<compile_context>
chip_gen: v6e
topology: v6e:2x2x1
jax: 0.10.0
libtpu: 0.0.40
codegen_flags: <defaults>
</compile_context>

<pallas_src>
import jax
import jax.numpy as jnp
from jax.experimental import pallas as pl
from jax.experimental.pallas import tpu as pltpu

NUM_CLASSES = 10
K_IN = 784          # 28 * 28 ; 784 = 49*16 -> sublane-exact for bf16, no pad
N_HEAD_PAD = 128    # classifier head padded to a lane-dense 128-wide slab
TM_MAX = 512        # row-tile cap (VMEM-safe on v7x's 64 MiB per core)


def _round_up(x, m):
    return ((x + m - 1) // m) * m


def _cdiv(a, b):
    return (a + b - 1) // b


def _leaky_relu(x, slope=0.2):
    # valid for slope in (0, 1); single VPU max instead of compare + select
    return jnp.maximum(x, slope * x)


def oracle_kernel(x_ref,
                  w1_ref, b1_ref,
                  w2_ref, b2_ref,
                  w3_ref, b3_ref,
                  w4_ref, b4_ref,
                  out_ref):
    # base: Linear(784->1024) -> LeakyReLU(0.2); x is already bf16, f32 accumulate
    h = jnp.dot(x_ref[...], w1_ref[...],
                preferred_element_type=jnp.float32) + b1_ref[...]
    h = _leaky_relu(h)
    # Linear(1024->512) -> LeakyReLU(0.2)
    h = jnp.dot(h.astype(jnp.bfloat16), w2_ref[...],
                preferred_element_type=jnp.float32) + b2_ref[...]
    h = _leaky_relu(h)
    # Linear(512->256) -> LeakyReLU(0.2)
    h = jnp.dot(h.astype(jnp.bfloat16), w3_ref[...],
                preferred_element_type=jnp.float32) + b3_ref[...]
    h = _leaky_relu(h)
    # classifier head: Linear(256->10), computed as a padded (TM, 128) slab
    scores = jnp.dot(h.astype(jnp.bfloat16), w4_ref[...],
                     preferred_element_type=jnp.float32) + b4_ref[...]
    # padded class columns must not contribute to the softmax -> mask to -inf
    col = jax.lax.broadcasted_iota(jnp.int32, scores.shape, 1)
    scores = jnp.where(col < NUM_CLASSES, scores, -jnp.inf)
    # numerically stable softmax along dim=1 (matches torch: softmax(s - max(s)))
    m = jnp.max(scores, axis=1, keepdims=True)
    e = jnp.exp(scores - m)                      # exp(-inf) == 0 for padded cols
    denom = jnp.sum(e, axis=1, keepdims=True)
    out_ref[...] = e * pl.reciprocal(denom, approx=True)


def prepare_params(params_f32):
    """One-time cast to bf16 + head padding into the kernel layout (off hot path)."""
    w1 = params_f32["w1"].astype(jnp.bfloat16)                 # (784, 1024), no K pad
    w2 = params_f32["w2"].astype(jnp.bfloat16)                 # (1024, 512)
    w3 = params_f32["w3"].astype(jnp.bfloat16)                 # (512, 256)
    w4 = jnp.zeros((256, N_HEAD_PAD), jnp.bfloat16).at[:, :NUM_CLASSES].set(
        params_f32["w4"].astype(jnp.bfloat16))                 # (256, 128)
    b1 = params_f32["b1"].astype(jnp.float32)
    b2 = params_f32["b2"].astype(jnp.float32)
    b3 = params_f32["b3"].astype(jnp.float32)
    b4 = jnp.zeros((1, N_HEAD_PAD), jnp.float32).at[:, :NUM_CLASSES].set(
        params_f32["b4"].astype(jnp.float32))
    return dict(w1=w1, b1=b1, w2=w2, b2=b2, w3=w3, b3=b3, w4=w4, b4=b4)


def _pick_tm(B):
    if B <= 128:
        return _round_up(B, 8)           # single tile; tiny batch is DMA-bound
    n_tiles = max(2, _cdiv(B, TM_MAX))   # >= 2 tiles so both v7x cores get work
    return min(TM_MAX, _round_up(_cdiv(B, n_tiles), 8))


def oracle_forward(x, kparams):
    """x: (B, 784) or (B, 1, 28, 28). kparams: prepare_params output. -> (B, 10)."""
    B = x.shape[0]
    # cast + flatten in the wrapper: bf16 halves x DMA; batch-only padding
    xb = x.reshape(B, K_IN).astype(jnp.bfloat16)

    TM = _pick_tm(B)
    Bp = _round_up(B, TM)
    if Bp != B:
        xb = jnp.pad(xb, ((0, Bp - B), (0, 0)))

    w1, b1 = kparams["w1"], kparams["b1"]
    w2, b2 = kparams["w2"], kparams["b2"]
    w3, b3 = kparams["w3"], kparams["b3"]
    w4, b4 = kparams["w4"], kparams["b4"]

    def build_call(single_buffer_weights):
        # constant block index => weight fetched once, resident across batch tiles
        def resident(a):
            if single_buffer_weights:
                return pl.BlockSpec(a.shape, lambda i: (0,) * a.ndim,
                                    pipeline_mode=pl.Buffered(1))
            return pl.BlockSpec(a.shape, lambda i: (0,) * a.ndim)

        return pl.pallas_call(
            oracle_kernel,
            out_shape=jax.ShapeDtypeStruct((Bp, N_HEAD_PAD), jnp.float32),
            grid_spec=pltpu.PrefetchScalarGridSpec(
                num_scalar_prefetch=0,
                grid=(Bp // TM,),
                in_specs=[pl.BlockSpec((TM, K_IN), lambda i: (i, 0)),
                          resident(w1), resident(b1),
                          resident(w2), resident(b2),
                          resident(w3), resident(b3),
                          resident(w4), resident(b4)],
                out_specs=pl.BlockSpec((TM, N_HEAD_PAD), lambda i: (i, 0)),
            ),
            compiler_params=pltpu.CompilerParams(
                dimension_semantics=("parallel",),
                vmem_limit_bytes=48 << 20,
            ),
        )

    try:
        # resident weights single-buffered (saves ~3 MiB of duplicated bf16 weights)
        out = build_call(single_buffer_weights=True)(xb, w1, b1, w2, b2, w3, b3, w4, b4)
    except Exception:
        # fallback if this jax build rejects pipeline_mode on top-level BlockSpecs
        out = build_call(single_buffer_weights=False)(xb, w1, b1, w2, b2, w3, b3, w4, b4)

    out = out[:B, :NUM_CLASSES]
    # torch does out.squeeze(); only matters when B == 1.
    return jnp.squeeze(out) if B == 1 else out


def init_params(key):
    """Deterministic parameter init (uniform, PyTorch-Linear-style bounds), f32."""
    dims = [(K_IN, 1024), (1024, 512), (512, 256), (256, NUM_CLASSES)]
    params = {}
    for i, (fan_in, fan_out) in enumerate(dims, start=1):
        key, kw, kb = jax.random.split(key, 3)
        bound = 1.0 / jnp.sqrt(fan_in)
        # stored as (in, out) so the kernel does x @ W + b
        params[f"w{i}"] = jax.random.uniform(
            kw, (fan_in, fan_out), jnp.float32, -bound, bound)
        params[f"b{i}"] = jax.random.uniform(
            kb, (1, fan_out), jnp.float32, -bound, bound)
    return params


if __name__ == "__main__":
    key = jax.random.PRNGKey(0)
    kx, kp = jax.random.split(key)
    B = 8
    # mnist-shaped input: (B, 1, 28, 28), flattened inside the wrapper
    x_img = jax.random.normal(kx, (B, 1, 28, 28), jnp.float32)
    params = init_params(kp)
    kparams = prepare_params(params)

    out = oracle_forward(x_img, kparams)
    out = jax.block_until_ready(out)

    # sanity checks: shape, softmax rows sum to ~1, and close to a pure-JAX
    # reference using the same bf16-rounded weights / input.
    assert out.shape == (B, NUM_CLASSES)
    assert jnp.allclose(jnp.sum(out, axis=1), 1.0, atol=1e-2)

    def ref(x):
        h = x.reshape(B, K_IN).astype(jnp.bfloat16).astype(jnp.float32)
        h = _leaky_relu(h @ kparams["w1"].astype(jnp.float32) + kparams["b1"])
        h = _leaky_relu(h @ kparams["w2"].astype(jnp.float32) + kparams["b2"])
        h = _leaky_relu(h @ kparams["w3"].astype(jnp.float32) + kparams["b3"])
        s = (h @ kparams["w4"].astype(jnp.float32) + kparams["b4"])[:, :NUM_CLASSES]
        return jax.nn.softmax(s - s.max(axis=1, keepdims=True), axis=1)

    r = jax.block_until_ready(ref(x_img))
    assert jnp.allclose(out, r, atol=3e-2)

    print("KERNEL_OK")
</pallas_src>

<mosaic_0001>
module attributes {stable_mosaic.version = 11 : i64} {
  func.func @oracle_kernel(%arg0: i32, %arg1: memref<8x784xbf16, #tpu.memory_space<vmem>>, %arg2: memref<784x1024xbf16, #tpu.memory_space<vmem>>, %arg3: memref<1x1024xf32, #tpu.memory_space<vmem>>, %arg4: memref<1024x512xbf16, #tpu.memory_space<vmem>>, %arg5: memref<1x512xf32, #tpu.memory_space<vmem>>, %arg6: memref<512x256xbf16, #tpu.memory_space<vmem>>, %arg7: memref<1x256xf32, #tpu.memory_space<vmem>>, %arg8: memref<256x128xbf16, #tpu.memory_space<vmem>>, %arg9: memref<1x128xf32, #tpu.memory_space<vmem>>, %arg10: memref<8x128xf32, #tpu.memory_space<vmem>>) attributes {dimension_semantics = [#tpu.dimension_semantics<parallel>], iteration_bounds = array<i64: 1>, scalar_prefetch = 0 : i64, scratch_operands = 0 : i64, tpu.core_type = #tpu.core_type<tc>, window_params = [{transform_indices = @transform_0, window_bounds = array<i64: 8, 784>}, {pipeline_mode = #tpu.pipeline_mode<synchronous>, transform_indices = @transform_1, window_bounds = array<i64: 784, 1024>}, {pipeline_mode = #tpu.pipeline_mode<synchronous>, transform_indices = @transform_2, window_bounds = array<i64: 1, 1024>}, {pipeline_mode = #tpu.pipeline_mode<synchronous>, transform_indices = @transform_3, window_bounds = array<i64: 1024, 512>}, {pipeline_mode = #tpu.pipeline_mode<synchronous>, transform_indices = @transform_4, window_bounds = array<i64: 1, 512>}, {pipeline_mode = #tpu.pipeline_mode<synchronous>, transform_indices = @transform_5, window_bounds = array<i64: 512, 256>}, {pipeline_mode = #tpu.pipeline_mode<synchronous>, transform_indices = @transform_6, window_bounds = array<i64: 1, 256>}, {pipeline_mode = #tpu.pipeline_mode<synchronous>, transform_indices = @transform_7, window_bounds = array<i64: 256, 128>}, {pipeline_mode = #tpu.pipeline_mode<synchronous>, transform_indices = @transform_8, window_bounds = array<i64: 1, 128>}, {transform_indices = @transform_9, window_bounds = array<i64: 8, 128>}]} {
    %c0 = arith.constant 0 : index
    %c0_0 = arith.constant 0 : index
    %0 = vector.load %arg1[%c0, %c0_0] : memref<8x784xbf16, #tpu.memory_space<vmem>>, vector<8x784xbf16>
    %c0_1 = arith.constant 0 : index
    %c0_2 = arith.constant 0 : index
    %1 = vector.load %arg2[%c0_1, %c0_2] : memref<784x1024xbf16, #tpu.memory_space<vmem>>, vector<784x1024xbf16>
    %cst = arith.constant dense<0.000000e+00> : vector<8x1024xf32>
    %2 = tpu.matmul %0, %1, %cst {dimension_numbers = #tpu.dot_dimension_numbers<[1], [0], [0], [1], [0, 0, 1, 1], [], []>} : vector<8x784xbf16>, vector<784x1024xbf16>, vector<8x1024xf32> -> vector<8x1024xf32>
    %c0_3 = arith.constant 0 : index
    %c0_4 = arith.constant 0 : index
    %3 = vector.load %arg3[%c0_3, %c0_4] : memref<1x1024xf32, #tpu.memory_space<vmem>>, vector<1x1024xf32>
    %4 = vector.broadcast %3 : vector<1x1024xf32> to vector<8x1024xf32>
    %5 = arith.addf %2, %4 : vector<8x1024xf32>
    %cst_5 = arith.constant 2.000000e-01 : f32
    %6 = vector.broadcast %cst_5 : f32 to vector<8x1024xf32>
    %7 = arith.mulf %6, %5 : vector<8x1024xf32>
    %8 = arith.maximumf %5, %7 : vector<8x1024xf32>
    %9 = arith.truncf %8 : vector<8x1024xf32> to vector<8x1024xbf16>
    %c0_6 = arith.constant 0 : index
    %c0_7 = arith.constant 0 : index
    %10 = vector.load %arg4[%c0_6, %c0_7] : memref<1024x512xbf16, #tpu.memory_space<vmem>>, vector<1024x512xbf16>
    %cst_8 = arith.constant dense<0.000000e+00> : vector<8x512xf32>
    %11 = tpu.matmul %9, %10, %cst_8 {dimension_numbers = #tpu.dot_dimension_numbers<[1], [0], [0], [1], [0, 0, 1, 1], [], []>} : vector<8x1024xbf16>, vector<1024x512xbf16>, vector<8x512xf32> -> vector<8x512xf32>
    %c0_9 = arith.constant 0 : index
    %c0_10 = arith.constant 0 : index
    %12 = vector.load %arg5[%c0_9, %c0_10] : memref<1x512xf32, #tpu.memory_space<vmem>>, vector<1x512xf32>
    %13 = vector.broadcast %12 : vector<1x512xf32> to vector<8x512xf32>
    %14 = arith.addf %11, %13 : vector<8x512xf32>
    %cst_11 = arith.constant 2.000000e-01 : f32
    %15 = vector.broadcast %cst_11 : f32 to vector<8x512xf32>
    %16 = arith.mulf %15, %14 : vector<8x512xf32>
    %17 = arith.maximumf %14, %16 : vector<8x512xf32>
    %18 = arith.truncf %17 : vector<8x512xf32> to vector<8x512xbf16>
    %c0_12 = arith.constant 0 : index
    %c0_13 = arith.constant 0 : index
    %19 = vector.load %arg6[%c0_12, %c0_13] : memref<512x256xbf16, #tpu.memory_space<vmem>>, vector<512x256xbf16>
    %cst_14 = arith.constant dense<0.000000e+00> : vector<8x256xf32>
    %20 = tpu.matmul %18, %19, %cst_14 {dimension_numbers = #tpu.dot_dimension_numbers<[1], [0], [0], [1], [0, 0, 1, 1], [], []>} : vector<8x512xbf16>, vector<512x256xbf16>, vector<8x256xf32> -> vector<8x256xf32>
    %c0_15 = arith.constant 0 : index
    %c0_16 = arith.constant 0 : index
    %21 = vector.load %arg7[%c0_15, %c0_16] : memref<1x256xf32, #tpu.memory_space<vmem>>, vector<1x256xf32>
    %22 = vector.broadcast %21 : vector<1x256xf32> to vector<8x256xf32>
    %23 = arith.addf %20, %22 : vector<8x256xf32>
    %cst_17 = arith.constant 2.000000e-01 : f32
    %24 = vector.broadcast %cst_17 : f32 to vector<8x256xf32>
    %25 = arith.mulf %24, %23 : vector<8x256xf32>
    %26 = arith.maximumf %23, %25 : vector<8x256xf32>
    %27 = arith.truncf %26 : vector<8x256xf32> to vector<8x256xbf16>
    %c0_18 = arith.constant 0 : index
    %c0_19 = arith.constant 0 : index
    %28 = vector.load %arg8[%c0_18, %c0_19] : memref<256x128xbf16, #tpu.memory_space<vmem>>, vector<256x128xbf16>
    %cst_20 = arith.constant dense<0.000000e+00> : vector<8x128xf32>
    %29 = tpu.matmul %27, %28, %cst_20 {dimension_numbers = #tpu.dot_dimension_numbers<[1], [0], [0], [1], [0, 0, 1, 1], [], []>} : vector<8x256xbf16>, vector<256x128xbf16>, vector<8x128xf32> -> vector<8x128xf32>
    %c0_21 = arith.constant 0 : index
    %c0_22 = arith.constant 0 : index
    %30 = vector.load %arg9[%c0_21, %c0_22] : memref<1x128xf32, #tpu.memory_space<vmem>>, vector<1x128xf32>
    %31 = vector.broadcast %30 : vector<1x128xf32> to vector<8x128xf32>
    %32 = arith.addf %29, %31 : vector<8x128xf32>
    %33 = tpu.iota {dimensions = array<i32: 1>} : vector<8x128xi32>
    %c10_i32 = arith.constant 10 : i32
    %34 = vector.broadcast %c10_i32 : i32 to vector<8x128xi32>
    %35 = arith.cmpi slt, %33, %34 : vector<8x128xi32>
    %cst_23 = arith.constant 0xFF800000 : f32
    %36 = vector.broadcast %cst_23 : f32 to vector<8x128xf32>
    %37 = arith.select %35, %32, %36 : vector<8x128xi1>, vector<8x128xf32>
    %cst_24 = arith.constant dense<0xFF800000> : vector<8xf32>
    %38 = vector.multi_reduction <maximumf>, %37, %cst_24 [1] : vector<8x128xf32> to vector<8xf32>
    %39 = vector.shape_cast %38 : vector<8xf32> to vector<8x1xf32>
    %40 = vector.broadcast %39 : vector<8x1xf32> to vector<8x128xf32>
    %41 = arith.subf %37, %40 : vector<8x128xf32>
    %42 = math.exp %41 : vector<8x128xf32>
    %cst_25 = arith.constant dense<0.000000e+00> : vector<8xf32>
    %43 = vector.multi_reduction <add>, %42, %cst_25 [1] : vector<8x128xf32> to vector<8xf32>
    %44 = vector.shape_cast %43 : vector<8xf32> to vector<8x1xf32>
    %45 = tpu.reciprocal %44 {approx = true} : vector<8x1xf32> -> vector<8x1xf32>
    %46 = vector.broadcast %45 : vector<8x1xf32> to vector<8x128xf32>
    %47 = arith.mulf %42, %46 : vector<8x128xf32>
    %c0_26 = arith.constant 0 : index
    %c0_27 = arith.constant 0 : index
    %48 = vector.load %arg10[%c0_26, %c0_27] : memref<8x128xf32, #tpu.memory_space<vmem>>, vector<8x128xf32>
    tpu.vector_store %arg10[%c0_26, %c0_27], %47 {strides = array<i32>} : memref<8x128xf32, #tpu.memory_space<vmem>>, vector<8x128xf32>,
    return
  }
  func.func @transform_0(%arg0: i32) -> (i32, i32) {
    %c0_i32 = arith.constant 0 : i32
    %c0_i32_0 = arith.constant 0 : i32
    return %arg0, %c0_i32 : i32, i32
  }
  func.func @transform_1(%arg0: i32) -> (i32, i32) {
    %c0_i32 = arith.constant 0 : i32
    %c0_i32_0 = arith.constant 0 : i32
    %c0_i32_1 = arith.constant 0 : i32
    return %c0_i32, %c0_i32_0 : i32, i32
  }
  func.func @transform_2(%arg0: i32) -> (i32, i32) {
    %c0_i32 = arith.constant 0 : i32
    %c0_i32_0 = arith.constant 0 : i32
    %c0_i32_1 = arith.constant 0 : i32
    return %c0_i32, %c0_i32_0 : i32, i32
  }
  func.func @transform_3(%arg0: i32) -> (i32, i32) {
    %c0_i32 = arith.constant 0 : i32
    %c0_i32_0 = arith.constant 0 : i32
    %c0_i32_1 = arith.constant 0 : i32
    return %c0_i32, %c0_i32_0 : i32, i32
  }
  func.func @transform_4(%arg0: i32) -> (i32, i32) {
    %c0_i32 = arith.constant 0 : i32
    %c0_i32_0 = arith.constant 0 : i32
    %c0_i32_1 = arith.constant 0 : i32
    return %c0_i32, %c0_i32_0 : i32, i32
  }
  func.func @transform_5(%arg0: i32) -> (i32, i32) {
    %c0_i32 = arith.constant 0 : i32
    %c0_i32_0 = arith.constant 0 : i32
    %c0_i32_1 = arith.constant 0 : i32
    return %c0_i32, %c0_i32_0 : i32, i32
  }
  func.func @transform_6(%arg0: i32) -> (i32, i32) {
    %c0_i32 = arith.constant 0 : i32
    %c0_i32_0 = arith.constant 0 : i32
    %c0_i32_1 = arith.constant 0 : i32
    return %c0_i32, %c0_i32_0 : i32, i32
  }
  func.func @transform_7(%arg0: i32) -> (i32, i32) {
    %c0_i32 = arith.constant 0 : i32
    %c0_i32_0 = arith.constant 0 : i32
    %c0_i32_1 = arith.constant 0 : i32
    return %c0_i32, %c0_i32_0 : i32, i32
  }
  func.func @transform_8(%arg0: i32) -> (i32, i32) {
    %c0_i32 = arith.constant 0 : i32
    %c0_i32_0 = arith.constant 0 : i32
    %c0_i32_1 = arith.constant 0 : i32
    return %c0_i32, %c0_i32_0 : i32, i32
  }
  func.func @transform_9(%arg0: i32) -> (i32, i32) {
    %c0_i32 = arith.constant 0 : i32
    %c0_i32_0 = arith.constant 0 : i32
    return %arg0, %c0_i32 : i32, i32
  }
}

module attributes {stable_mosaic.version = 11 : i64} {
  func.func @oracle_kernel(%arg0: i32, %arg1: memref<8x784xbf16, #tpu.memory_space<vmem>>, %arg2: memref<784x1024xbf16, #tpu.memory_space<vmem>>, %arg3: memref<1x1024xf32, #tpu.memory_space<vmem>>, %arg4: memref<1024x512xbf16, #tpu.memory_space<vmem>>, %arg5: memref<1x512xf32, #tpu.memory_space<vmem>>, %arg6: memref<512x256xbf16, #tpu.memory_space<vmem>>, %arg7: memref<1x256xf32, #tpu.memory_space<vmem>>, %arg8: memref<256x128xbf16, #tpu.memory_space<vmem>>, %arg9: memref<1x128xf32, #tpu.memory_space<vmem>>, %arg10: memref<8x128xf32, #tpu.memory_space<vmem>>) attributes {dimension_semantics = [#tpu.dimension_semantics<parallel>], iteration_bounds = array<i64: 1>, scalar_prefetch = 0 : i64, scratch_operands = 0 : i64, tpu.core_type = #tpu.core_type<tc>, window_params = [{transform_indices = @transform_0, window_bounds = array<i64: 8, 784>}, {pipeline_mode = #tpu.pipeline_mode<synchronous>, transform_indices = @transform_1, window_bounds = array<i64: 784, 1024>}, {pipeline_mode = #tpu.pipeline_mode<synchronous>, transform_indices = @transform_2, window_bounds = array<i64: 1, 1024>}, {pipeline_mode = #tpu.pipeline_mode<synchronous>, transform_indices = @transform_3, window_bounds = array<i64: 1024, 512>}, {pipeline_mode = #tpu.pipeline_mode<synchronous>, transform_indices = @transform_4, window_bounds = array<i64: 1, 512>}, {pipeline_mode = #tpu.pipeline_mode<synchronous>, transform_indices = @transform_5, window_bounds = array<i64: 512, 256>}, {pipeline_mode = #tpu.pipeline_mode<synchronous>, transform_indices = @transform_6, window_bounds = array<i64: 1, 256>}, {pipeline_mode = #tpu.pipeline_mode<synchronous>, transform_indices = @transform_7, window_bounds = array<i64: 256, 128>}, {pipeline_mode = #tpu.pipeline_mode<synchronous>, transform_indices = @transform_8, window_bounds = array<i64: 1, 128>}, {transform_indices = @transform_9, window_bounds = array<i64: 8, 128>}]} {
    %c0 = arith.constant 0 : index
    %c0_0 = arith.constant 0 : index
    %0 = vector.load %arg1[%c0, %c0_0] : memref<8x784xbf16, #tpu.memory_space<vmem>>, vector<8x784xbf16>
    %c0_1 = arith.constant 0 : index
    %c0_2 = arith.constant 0 : index
    %1 = vector.load %arg2[%c0_1, %c0_2] : memref<784x1024xbf16, #tpu.memory_space<vmem>>, vector<784x1024xbf16>
    %cst = arith.constant dense<0.000000e+00> : vector<8x1024xf32>
    %2 = tpu.matmul %0, %1, %cst {dimension_numbers = #tpu.dot_dimension_numbers<[1], [0], [0], [1], [0, 0, 1, 1], [], []>} : vector<8x784xbf16>, vector<784x1024xbf16>, vector<8x1024xf32> -> vector<8x1024xf32>
    %c0_3 = arith.constant 0 : index
    %c0_4 = arith.constant 0 : index
    %3 = vector.load %arg3[%c0_3, %c0_4] : memref<1x1024xf32, #tpu.memory_space<vmem>>, vector<1x1024xf32>
    %4 = vector.broadcast %3 : vector<1x1024xf32> to vector<8x1024xf32>
    %5 = arith.addf %2, %4 : vector<8x1024xf32>
    %cst_5 = arith.constant 2.000000e-01 : f32
    %6 = vector.broadcast %cst_5 : f32 to vector<8x1024xf32>
    %7 = arith.mulf %6, %5 : vector<8x1024xf32>
    %8 = arith.maximumf %5, %7 : vector<8x1024xf32>
    %9 = arith.truncf %8 : vector<8x1024xf32> to vector<8x1024xbf16>
    %c0_6 = arith.constant 0 : index
    %c0_7 = arith.constant 0 : index
    %10 = vector.load %arg4[%c0_6, %c0_7] : memref<1024x512xbf16, #tpu.memory_space<vmem>>, vector<1024x512xbf16>
    %cst_8 = arith.constant dense<0.000000e+00> : vector<8x512xf32>
    %11 = tpu.matmul %9, %10, %cst_8 {dimension_numbers = #tpu.dot_dimension_numbers<[1], [0], [0], [1], [0, 0, 1, 1], [], []>} : vector<8x1024xbf16>, vector<1024x512xbf16>, vector<8x512xf32> -> vector<8x512xf32>
    %c0_9 = arith.constant 0 : index
    %c0_10 = arith.constant 0 : index
    %12 = vector.load %arg5[%c0_9, %c0_10] : memref<1x512xf32, #tpu.memory_space<vmem>>, vector<1x512xf32>
    %13 = vector.broadcast %12 : vector<1x512xf32> to vector<8x512xf32>
    %14 = arith.addf %11, %13 : vector<8x512xf32>
    %cst_11 = arith.constant 2.000000e-01 : f32
    %15 = vector.broadcast %cst_11 : f32 to vector<8x512xf32>
    %16 = arith.mulf %15, %14 : vector<8x512xf32>
    %17 = arith.maximumf %14, %16 : vector<8x512xf32>
    %18 = arith.truncf %17 : vector<8x512xf32> to vector<8x512xbf16>
    %c0_12 = arith.constant 0 : index
    %c0_13 = arith.constant 0 : index
    %19 = vector.load %arg6[%c0_12, %c0_13] : memref<512x256xbf16, #tpu.memory_space<vmem>>, vector<512x256xbf16>
    %cst_14 = arith.constant dense<0.000000e+00> : vector<8x256xf32>
    %20 = tpu.matmul %18, %19, %cst_14 {dimension_numbers = #tpu.dot_dimension_numbers<[1], [0], [0], [1], [0, 0, 1, 1], [], []>} : vector<8x512xbf16>, vector<512x256xbf16>, vector<8x256xf32> -> vector<8x256xf32>
    %c0_15 = arith.constant 0 : index
    %c0_16 = arith.constant 0 : index
    %21 = vector.load %arg7[%c0_15, %c0_16] : memref<1x256xf32, #tpu.memory_space<vmem>>, vector<1x256xf32>
    %22 = vector.broadcast %21 : vector<1x256xf32> to vector<8x256xf32>
    %23 = arith.addf %20, %22 : vector<8x256xf32>
    %cst_17 = arith.constant 2.000000e-01 : f32
    %24 = vector.broadcast %cst_17 : f32 to vector<8x256xf32>
    %25 = arith.mulf %24, %23 : vector<8x256xf32>
    %26 = arith.maximumf %23, %25 : vector<8x256xf32>
    %27 = arith.truncf %26 : vector<8x256xf32> to vector<8x256xbf16>
    %c0_18 = arith.constant 0 : index
    %c0_19 = arith.constant 0 : index
    %28 = vector.load %arg8[%c0_18, %c0_19] : memref<256x128xbf16, #tpu.memory_space<vmem>>, vector<256x128xbf16>
    %cst_20 = arith.constant dense<0.000000e+00> : vector<8x128xf32>
    %29 = tpu.matmul %27, %28, %cst_20 {dimension_numbers = #tpu.dot_dimension_numbers<[1], [0], [0], [1], [0, 0, 1, 1], [], []>} : vector<8x256xbf16>, vector<256x128xbf16>, vector<8x128xf32> -> vector<8x128xf32>
    %c0_21 = arith.constant 0 : index
    %c0_22 = arith.constant 0 : index
    %30 = vector.load %arg9[%c0_21, %c0_22] : memref<1x128xf32, #tpu.memory_space<vmem>>, vector<1x128xf32>
    %31 = vector.broadcast %30 : vector<1x128xf32> to vector<8x128xf32>
    %32 = arith.addf %29, %31 : vector<8x128xf32>
    %33 = tpu.iota {dimensions = array<i32: 1>} : vector<8x128xi32>
    %c10_i32 = arith.constant 10 : i32
    %34 = vector.broadcast %c10_i32 : i32 to vector<8x128xi32>
    %35 = arith.cmpi slt, %33, %34 : vector<8x128xi32>
    %cst_23 = arith.constant 0xFF800000 : f32
    %36 = vector.broadcast %cst_23 : f32 to vector<8x128xf32>
    %37 = arith.select %35, %32, %36 : vector<8x128xi1>, vector<8x128xf32>
    %cst_24 = arith.constant dense<0xFF800000> : vector<8xf32>
    %38 = vector.multi_reduction <maximumf>, %37, %cst_24 [1] : vector<8x128xf32> to vector<8xf32>
    %39 = vector.shape_cast %38 : vector<8xf32> to vector<8x1xf32>
    %40 = vector.broadcast %39 : vector<8x1xf32> to vector<8x128xf32>
    %41 = arith.subf %37, %40 : vector<8x128xf32>
    %42 = math.exp %41 : vector<8x128xf32>
    %cst_25 = arith.constant dense<0.000000e+00> : vector<8xf32>
    %43 = vector.multi_reduction <add>, %42, %cst_25 [1] : vector<8x128xf32> to vector<8xf32>
    %44 = vector.shape_cast %43 : vector<8xf32> to vector<8x1xf32>
    %45 = tpu.reciprocal %44 {approx = true} : vector<8x1xf32> -> vector<8x1xf32>
    %46 = vector.broadcast %45 : vector<8x1xf32> to vector<8x128xf32>
    %47 = arith.mulf %42, %46 : vector<8x128xf32>
    %c0_26 = arith.constant 0 : index
    %c0_27 = arith.constant 0 : index
    %48 = vector.load %arg10[%c0_26, %c0_27] : memref<8x128xf32, #tpu.memory_space<vmem>>, vector<8x128xf32>
    tpu.vector_store %arg10[%c0_26, %c0_27], %47 {strides = array<i32>} : memref<8x128xf32, #tpu.memory_space<vmem>>, vector<8x128xf32>,
    return
  }
  func.func @transform_0(%arg0: i32) -> (i32, i32) {
    %c0_i32 = arith.constant 0 : i32
    %c0_i32_0 = arith.constant 0 : i32
    return %arg0, %c0_i32 : i32, i32
  }
  func.func @transform_1(%arg0: i32) -> (i32, i32) {
    %c0_i32 = arith.constant 0 : i32
    %c0_i32_0 = arith.constant 0 : i32
    %c0_i32_1 = arith.constant 0 : i32
    return %c0_i32, %c0_i32_0 : i32, i32
  }
  func.func @transform_2(%arg0: i32) -> (i32, i32) {
    %c0_i32 = arith.constant 0 : i32
    %c0_i32_0 = arith.constant 0 : i32
    %c0_i32_1 = arith.constant 0 : i32
    return %c0_i32, %c0_i32_0 : i32, i32
  }
  func.func @transform_3(%arg0: i32) -> (i32, i32) {
    %c0_i32 = arith.constant 0 : i32
    %c0_i32_0 = arith.constant 0 : i32
    %c0_i32_1 = arith.constant 0 : i32
    return %c0_i32, %c0_i32_0 : i32, i32
  }
  func.func @transform_4(%arg0: i32) -> (i32, i32) {
    %c0_i32 = arith.constant 0 : i32
    %c0_i32_0 = arith.constant 0 : i32
    %c0_i32_1 = arith.constant 0 : i32
    return %c0_i32, %c0_i32_0 : i32, i32
  }
  func.func @transform_5(%arg0: i32) -> (i32, i32) {
    %c0_i32 = arith.constant 0 : i32
    %c0_i32_0 = arith.constant 0 : i32
    %c0_i32_1 = arith.constant 0 : i32
    return %c0_i32, %c0_i32_0 : i32, i32
  }
  func.func @transform_6(%arg0: i32) -> (i32, i32) {
    %c0_i32 = arith.constant 0 : i32
    %c0_i32_0 = arith.constant 0 : i32
    %c0_i32_1 = arith.constant 0 : i32
    return %c0_i32, %c0_i32_0 : i32, i32
  }
  func.func @transform_7(%arg0: i32) -> (i32, i32) {
    %c0_i32 = arith.constant 0 : i32
    %c0_i32_0 = arith.constant 0 : i32
    %c0_i32_1 = arith.constant 0 : i32
    return %c0_i32, %c0_i32_0 : i32, i32
  }
  func.func @transform_8(%arg0: i32) -> (i32, i32) {
    %c0_i32 = arith.constant 0 : i32
    %c0_i32_0 = arith.constant 0 : i32
    %c0_i32_1 = arith.constant 0 : i32
    return %c0_i32, %c0_i32_0 : i32, i32
  }
  func.func @transform_9(%arg0: i32) -> (i32, i32) {
    %c0_i32 = arith.constant 0 : i32
    %c0_i32_0 = arith.constant 0 : i32
    return %arg0, %c0_i32 : i32, i32
  }
}

</mosaic_0001>

<bundles_post_ra>
// kernel: tpu_custom_call.1
= control target key start
LH: loop header
LB: loop body
LE: loop exit
PB: predicated region body
PF: predicated region fallthrough
CT: control target
= control target key end

     0   :  { %14 = vsyncpa [#allocation3], 0  ;;  %s7662_s0 = inlined_call_operand.hbm [shape: bf16[8,784], index: 0, kind: input, shape index: {}]   ;;  %s7663_s1 = inlined_call_operand.hbm [shape: bf16[784,1024], index: 1, kind: input, shape index: {}]   ;;  %s7664_s2 = inlined_call_operand.hbm [shape: f32[1,1024], index: 2, kind: input, shape index: {}]   ;;  %s7665_s3 = inlined_call_operand.hbm [shape: bf16[1024,512], index: 3, kind: input, shape index: {}]   ;;  %s7666_s4 = inlined_call_operand.hbm [shape: f32[1,512], index: 4, kind: input, shape index: {}]   ;;  %s7667_s5 = inlined_call_operand.hbm [shape: bf16[512,256], index: 5, kind: input, shape index: {}]   ;;  %s7668_s6 = inlined_call_operand.hbm [shape: f32[1,256], index: 6, kind: input, shape index: {}]   ;;  %s7669_s7 = inlined_call_operand.hbm [shape: bf16[256,128], index: 7, kind: input, shape index: {}]   ;;  %s7670_s8 = inlined_call_operand.hbm [shape: f32[1,128], index: 8, kind: input, shape index: {}]   ;;  %s7671_s9 = inlined_call_operand.hbm [shape: f32[8,128], index: 9, kind: output, shape index: {}]  }
   0x1   :  { %15 = vsyncpa [#allocation6], 0 }
   0x2   :  { %16 = vsyncpa [#allocation9], 0 }
   0x3   :  { %17 = vsyncpa [#allocation12], 0 }
   0x4   :  { %18 = vsyncpa [#allocation15], 0 }
   0x5   :  { %19 = vsyncpa [#allocation4], 0  ;;  %s7345_s30 = smov [#allocation5]  }
   0x6   :  { %s35_s10 = sshll.u32 %s7345_s30, 4  ;;  %s36_s10 = int_to_ptr.vmem [resolvable:$true] %s35_s10 }
   0x7   :  { %s7141_s11 = scalar_lea.vmem %s36_s10, 50176  ;;  %p7146_p1 = scmp.lt.s32.totalorder %s36_s10, %s36_s10 }
   0x8   :  { %p7142_p0 = scmp.ne.s32.totalorder %s36_s10, %s7141_s11  ;;  %p7147_p2 = scmp.lt.s32.totalorder %s7141_s11, %s7141_s11 }
   0xa   :  { %p7148_p3 = por %p7147_p2, %p7146_p1 }
   0xc   :  { %p7149_p4 = pnand %p7148_p3, %p7142_p0 }
   0xe   :  { %7152 = shalt.err (!%p7149_p4)
}
   0xf   :  { %s7346_s12 = smov 512   ;;  %s7347_s13 = smov 32  }
  0x10   :  { %41 = dma.hbm_to_vmem [thread:$0]  %s7663_s1, 50176, %s36_s10, [#allocation6], %s7346_s12, %s7346_s12, %s7347_s13  }
  0x11   :  { %s7348_s16 = smov [#allocation8]  }
  0x12   :  { %s57_s17 = sshll.u32 %s7348_s16, 4  ;;  %s58_s17 = int_to_ptr.vmem [resolvable:$true] %s57_s17 }
  0x13   :  { %s7161_s18 = scalar_lea.vmem %s58_s17, 32768  ;;  %p7166_p6 = scmp.lt.s32.totalorder %s58_s17, %s58_s17 }
  0x14   :  { %p7162_p5 = scmp.ne.s32.totalorder %s58_s17, %s7161_s18  ;;  %p7167_p7 = scmp.lt.s32.totalorder %s7161_s18, %s7161_s18 }
  0x16   :  { %p7168_p8 = por %p7167_p7, %p7166_p6 }
  0x18   :  { %p7169_p9 = pnand %p7168_p8, %p7162_p5 }
  0x1a   :  { %7172 = shalt.err (!%p7169_p9)
}
  0x1b   :  { %s7349_s19 = smov 256   ;;  %s7350_s20 = smov 16  }
  0x1c   :  { %63 = dma.hbm_to_vmem [thread:$0]  %s7665_s3, 32768, %s58_s17, [#allocation9], %s7349_s19, %s7349_s19, %s7350_s20  }
  0x1d   :  { %s7351_s23 = smov [#allocation11]  }
  0x1e   :  { %s79_s24 = sshll.u32 %s7351_s23, 4  ;;  %s80_s24 = int_to_ptr.vmem [resolvable:$true] %s79_s24 }
  0x1f   :  { %s7181_s1 = scalar_lea.vmem %s80_s24, 8192  ;;  %p7186_p11 = scmp.lt.s32.totalorder %s80_s24, %s80_s24 }
  0x20   :  { %p7182_p10 = scmp.ne.s32.totalorder %s80_s24, %s7181_s1  ;;  %p7187_p12 = scmp.lt.s32.totalorder %s7181_s1, %s7181_s1 }
  0x22   :  { %p7188_p13 = por %p7187_p12, %p7186_p11 }
  0x24   :  { %p7189_p0 = pnand %p7188_p13, %p7182_p10 }
  0x26   :  { %7192 = shalt.err (!%p7189_p0)
}
  0x27   :  { %s7352_s25 = smov 128   ;;  %s7353_s26 = smov 8  }
  0x28   :  { %85 = dma.hbm_to_vmem [thread:$0]  %s7667_s5, 8192, %s80_s24, [#allocation12], %s7352_s25, %s7352_s25, %s7353_s26  }
  0x29   :  { %s7354_s29 = smov [#allocation14]  }
  0x2a   :  { %s101_s30 = sshll.u32 %s7354_s29, 4  ;;  %s102_s30 = int_to_ptr.vmem [resolvable:$true] %s101_s30 }
  0x2b   :  { %s7201_s3 = scalar_lea.vmem %s102_s30, 2048  ;;  %p7206_p2 = scmp.lt.s32.totalorder %s102_s30, %s102_s30 }
  0x2c   :  { %p7202_p1 = scmp.ne.s32.totalorder %s102_s30, %s7201_s3  ;;  %p7207_p3 = scmp.lt.s32.totalorder %s7201_s3, %s7201_s3 }
  0x2e   :  { %p7208_p4 = por %p7207_p3, %p7206_p2 }
  0x30   :  { %p7209_p5 = pnand %p7208_p4, %p7202_p1 }
  0x32   :  { %7212 = shalt.err (!%p7209_p5)
}
  0x33   :  { %s7355_s10 = smov 64   ;;  %s7356_s11 = smov 4  }
  0x34   :  { %107 = dma.hbm_to_vmem [thread:$0]  %s7669_s7, 2048, %s102_s30, [#allocation15], %s7355_s10, %s7355_s10, %s7356_s11  }
  0x35   :  { %s7357_s14 = smov [#allocation2]   ;;  %s7358_s16 = smov [#allocation7]  }
  0x36   :  { %s26_s15 = sshll.u32 %s7357_s14, 4  ;;  %s48_s5 = sshll.u32 %s7358_s16, 4  ;;  %s27_s15 = int_to_ptr.vmem [resolvable:$true] %s26_s15  ;;  %s49_s5 = int_to_ptr.vmem [resolvable:$true] %s48_s5 }
  0x37   :  { %s7221_s17 = scalar_lea.vmem %s27_s15, 448  ;;  %p7226_p7 = scmp.lt.s32.totalorder %s27_s15, %s27_s15 }
  0x38   :  { %p7222_p6 = scmp.ne.s32.totalorder %s27_s15, %s7221_s17  ;;  %p7227_p8 = scmp.lt.s32.totalorder %s7221_s17, %s7221_s17 }
  0x3a   :  { %p7228_p9 = por %p7227_p8, %p7226_p7 }
  0x3c   :  { %p7229_p10 = pnand %p7228_p9, %p7222_p6 }
  0x3e   :  { %7232 = shalt.err (!%p7229_p10)
}
  0x3f   :  { %29 = dma.hbm_to_vmem [thread:$0]  %s7662_s0, 448, %s27_s15, [#allocation3]  }
  0x40   :  { %s7241_s20 = scalar_lea.vmem %s49_s5, 128  ;;  %p7246_p12 = scmp.lt.s32.totalorder %s49_s5, %s49_s5 }
  0x41   :  { %p7242_p11 = scmp.ne.s32.totalorder %s49_s5, %s7241_s20  ;;  %p7247_p13 = scmp.lt.s32.totalorder %s7241_s20, %s7241_s20 }
  0x43   :  { %p7248_p0 = por %p7247_p13, %p7246_p12 }
  0x45   :  { %p7249_p1 = pnand %p7248_p0, %p7242_p11 }
  0x47   :  { %7252 = shalt.err (!%p7249_p1)
}
  0x48   :  { %51 = dma.hbm_to_vmem [thread:$0]  %s7664_s2, 128, %s49_s5, [#allocation6]  }
  0x49   :  { %s7359_s22 = smov [#allocation10]   ;;  %s7360_s24 = smov [#allocation13]  }
  0x4a   :  { %s70_s23 = sshll.u32 %s7359_s22, 4  ;;  %s92_s1 = sshll.u32 %s7360_s24, 4  ;;  %s71_s23 = int_to_ptr.vmem [resolvable:$true] %s70_s23  ;;  %s93_s1 = int_to_ptr.vmem [resolvable:$true] %s92_s1 }
  0x4b   :  { %s7261_s25 = scalar_lea.vmem %s71_s23, 64  ;;  %p7266_p3 = scmp.lt.s32.totalorder %s71_s23, %s71_s23 }
  0x4c   :  { %p7262_p2 = scmp.ne.s32.totalorder %s71_s23, %s7261_s25  ;;  %p7267_p4 = scmp.lt.s32.totalorder %s7261_s25, %s7261_s25 }
  0x4e   :  { %p7268_p5 = por %p7267_p4, %p7266_p3 }
  0x50   :  { %p7269_p6 = pnand %p7268_p5, %p7262_p2 }
  0x52   :  { %7272 = shalt.err (!%p7269_p6)
}
  0x53   :  { %73 = dma.hbm_to_vmem [thread:$0]  %s7666_s4, 64, %s71_s23, [#allocation9]  }
  0x54   :  { %s7281_s27 = scalar_lea.vmem %s93_s1, 32  ;;  %p7286_p8 = scmp.lt.s32.totalorder %s93_s1, %s93_s1 }
  0x55   :  { %p7282_p7 = scmp.ne.s32.totalorder %s93_s1, %s7281_s27  ;;  %p7287_p9 = scmp.lt.s32.totalorder %s7281_s27, %s7281_s27 }
  0x57   :  { %p7288_p10 = por %p7287_p9, %p7286_p8 }
  0x59   :  { %p7289_p11 = pnand %p7288_p10, %p7282_p7 }
  0x5b   :  { %7292 = shalt.err (!%p7289_p11)
}
  0x5c   :  { %95 = dma.hbm_to_vmem [thread:$0]  %s7668_s6, 32, %s93_s1, [#allocation12]  }
  0x5d   :  { %s7361_s29 = smov [#allocation16]  }
  0x5e   :  { %s114_s30 = sshll.u32 %s7361_s29, 4  ;;  %s115_s30 = int_to_ptr.vmem [resolvable:$true] %s114_s30 }
  0x5f   :  { %s7301_s3 = scalar_lea.vmem %s115_s30, 16  ;;  %s7305_s10 = scalar_lea.vmem %s115_s30, 32 }
  0x60   :  { %p7302_p12 = scmp.ne.s32.totalorder %s115_s30, %s7301_s3  ;;  %p7306_p13 = scmp.lt.s32.totalorder %s115_s30, %s115_s30 }
  0x61   :  { %p7307_p0 = scmp.lt.s32.totalorder %s7305_s10, %s7301_s3 }
  0x63   :  { %p7308_p1 = por %p7307_p0, %p7306_p13 }
  0x65   :  { %p7309_p2 = pnand %p7308_p1, %p7302_p12 }
  0x67   :  { %7312 = shalt.err (!%p7309_p2)
}
  0x68   :  { %117 = dma.hbm_to_vmem [thread:$0]  %s7670_s8, 16, %s115_s30, [#allocation15]  }
  0x69   :  { %7333 = dma.done.wait [#allocation3], 448  }
  0x6a   :  { %7334 = vsyncadd [#allocation3], 4294966848 }
  0x6b   :  { %7335 = dma.done.wait [#allocation6], 50304  }
  0x6c   :  { %7336 = vsyncadd [#allocation6], 4294916992 }
  0x6d   :  { %7337 = dma.done.wait [#allocation9], 32832  }
  0x6e   :  { %7338 = vsyncadd [#allocation9], 4294934464 }
  0x6f   :  { %7339 = dma.done.wait [#allocation12], 8224  }
  0x70   :  { %7340 = vsyncadd [#allocation12], 4294959072 }
  0x71   :  { %7341 = dma.done.wait [#allocation15], 2064  }
  0x72   :  { %7342 = vsyncadd [#allocation15], 4294965232  ;;  %v206_v0 = vld [vmem:[#allocation5 + $0x1c0] sm:$0xff]  ;;  %v7443_v54 = vld [vmem:[#allocation2 + $0x8] sm:$0xff]  ;;  %vm2568_vm0 = vcmask 130048   ;;  %s7363_s6 = smov [#allocation17]  }
  0x73   :  { %v210_v1 = vld [vmem:[#allocation5 + $0x1e0] sm:$0xff]  ;;  %v7451_v59 = vcombine.high %v7443_v54, %v7443_v54  ;;  %s5829_s8 = sshll.u32 %s7363_s6, 4  ;;  %s5830_s8 = int_to_ptr.vmem [resolvable:$true] %s5829_s8 }
  0x74   :  { %v334_v2 = vld [vmem:[#allocation5 + $0x5c0] sm:$0xff]  ;;  %v5906_v3 = vcombine.high %v206_v0, %v210_v1  ;;  %v5905_v5 = vcombine.low %v206_v0, %v210_v1  ;;  %s7313_s12 = scalar_lea.vmem %s5830_s8, 128  ;;  %p7318_p4 = scmp.lt.s32.totalorder %s5830_s8, %s5830_s8 }
  0x75   :  { %v338_v4 = vld [vmem:[#allocation5 + $0x5e0] sm:$0xff]  ;;  %2645 = vmatprep.mubr.bf16.mxu1 %v7451_v59  ;;  %p7314_p3 = scmp.ne.s32.totalorder %s5830_s8, %s7313_s12  ;;  %p7319_p5 = scmp.lt.s32.totalorder %s7313_s12, %s7313_s12 }
  0x76   :  { %v198_v6 = vld [vmem:[#allocation5 + $0x180] sm:$0xff]  ;;  %v6034_v8 = vcombine.high %v334_v2, %v338_v4  ;;  %v6033_v9 = vcombine.low %v334_v2, %v338_v4  ;;  %2572 = vmatprep.subr.bf16.mxu0 %v5906_v3 }
  0x77   :  { %v202_v7 = vld [vmem:[#allocation5 + $0x1a0] sm:$0xff]  ;;  %2573 = vmatpush1.bf16.msra.mxu0 %v5905_v5  ;;  %p7320_p6 = por %p7319_p5, %p7318_p4 }
  0x78   :  { %v5898_v10 = vcombine.high %v198_v6, %v202_v7  ;;  %v326_v11 = vld [vmem:[#allocation5 + $0x580] sm:$0xff]  ;;  %2613 = vmatprep.subr.bf16.mxu1 %v6034_v8  ;;  %v5897_v18 = vcombine.low %v198_v6, %v202_v7 }
  0x79   :  { %v330_v12 = vld [vmem:[#allocation5 + $0x5a0] sm:$0xff]  ;;  %2614 = vmatpush1.bf16.msra.mxu1 %v6033_v9  ;;  %p7321_p7 = pnand %p7320_p6, %p7314_p3 }
  0x7a   :  { %v190_v13 = vld [vmem:[#allocation5 + $0x140] sm:$0xff]  ;;  %v6026_v14 = vcombine.high %v326_v11, %v330_v12  ;;  %2574 = vmatprep.subr.bf16.mxu0 %v5898_v10  ;;  %v6025_v19 = vcombine.low %v326_v11, %v330_v12 }
  0x7b   :  { %v194_v15 = vld [vmem:[#allocation5 + $0x160] sm:$0xff]  ;;  %2575 = vmatpush1.bf16.msra.mxu0 %v5897_v18 }
  0x7c   :  { %v318_v16 = vld [vmem:[#allocation5 + $0x540] sm:$0xff]  ;;  %v5890_v20 = vcombine.high %v190_v13, %v194_v15  ;;  %2615 = vmatprep.subr.bf16.mxu1 %v6026_v14  ;;  %v5889_v26 = vcombine.low %v190_v13, %v194_v15 }
  0x7d   :  { %v322_v17 = vld [vmem:[#allocation5 + $0x560] sm:$0xff]  ;;  %2616 = vmatpush1.bf16.msra.mxu1 %v6025_v19 }
  0x7e   :  { %v6018_v21 = vcombine.high %v318_v16, %v322_v17  ;;  %v182_v22 = vld [vmem:[#allocation5 + $0x100] sm:$0xff]  ;;  %2576 = vmatprep.subr.bf16.mxu0 %v5890_v20  ;;  %v6017_v27 = vcombine.low %v318_v16, %v322_v17 }
  0x7f   :  { %v186_v23 = vld [vmem:[#allocation5 + $0x120] sm:$0xff]  ;;  %2577 = vmatpush1.bf16.msra.mxu0 %v5889_v26 }
  0x80   :  { %v310_v24 = vld [vmem:[#allocation5 + $0x500] sm:$0xff]  ;;  %v5882_v28 = vcombine.high %v182_v22, %v186_v23  ;;  %2617 = vmatprep.subr.bf16.mxu1 %v6018_v21  ;;  %v5881_v34 = vcombine.low %v182_v22, %v186_v23 }
  0x81   :  { %v314_v25 = vld [vmem:[#allocation5 + $0x520] sm:$0xff]  ;;  %2618 = vmatpush1.bf16.msra.mxu1 %v6017_v27 }
  0x82   :  { %v6010_v29 = vcombine.high %v310_v24, %v314_v25  ;;  %v174_v30 = vld [vmem:[#allocation5 + $0xc0] sm:$0xff]  ;;  %2578 = vmatprep.subr.bf16.mxu0 %v5882_v28  ;;  %v6009_v35 = vcombine.low %v310_v24, %v314_v25 }
  0x83   :  { %v178_v31 = vld [vmem:[#allocation5 + $0xe0] sm:$0xff]  ;;  %2579 = vmatpush1.bf16.msra.mxu0 %v5881_v34 }
  0x84   :  { %v302_v32 = vld [vmem:[#allocation5 + $0x4c0] sm:$0xff]  ;;  %v5874_v36 = vcombine.high %v174_v30, %v178_v31  ;;  %2619 = vmatprep.subr.bf16.mxu1 %v6010_v29  ;;  %v5873_v42 = vcombine.low %v174_v30, %v178_v31 }
  0x85   :  { %v306_v33 = vld [vmem:[#allocation5 + $0x4e0] sm:$0xff]  ;;  %2620 = vmatpush1.bf16.msra.mxu1 %v6009_v35 }
  0x86   :  { %v6002_v37 = vcombine.high %v302_v32, %v306_v33  ;;  %v166_v38 = vld [vmem:[#allocation5 + $0x80] sm:$0xff]  ;;  %2580 = vmatprep.subr.bf16.mxu0 %v5874_v36  ;;  %v6001_v43 = vcombine.low %v302_v32, %v306_v33 }
  0x87   :  { %v170_v39 = vld [vmem:[#allocation5 + $0xa0] sm:$0xff]  ;;  %2581 = vmatpush1.bf16.msra.mxu0 %v5873_v42 }
  0x88   :  { %v294_v40 = vld [vmem:[#allocation5 + $0x480] sm:$0xff]  ;;  %v5866_v44 = vcombine.high %v166_v38, %v170_v39  ;;  %2621 = vmatprep.subr.bf16.mxu1 %v6002_v37  ;;  %v5865_v50 = vcombine.low %v166_v38, %v170_v39 }
  0x89   :  { %v298_v41 = vld [vmem:[#allocation5 + $0x4a0] sm:$0xff]  ;;  %2622 = vmatpush1.bf16.msra.mxu1 %v6001_v43 }
  0x8a   :  { %v5994_v45 = vcombine.high %v294_v40, %v298_v41  ;;  %v158_v46 = vld [vmem:[#allocation5 + $0x40] sm:$0xff]  ;;  %2582 = vmatprep.subr.bf16.mxu0 %v5866_v44  ;;  %v5993_v51 = vcombine.low %v294_v40, %v298_v41 }
  0x8b   :  { %v162_v47 = vld [vmem:[#allocation5 + $0x60] sm:$0xff]  ;;  %2583 = vmatpush1.bf16.msra.mxu0 %v5865_v50 }
  0x8c   :  { %v286_v48 = vld [vmem:[#allocation5 + $0x440] sm:$0xff]  ;;  %v5858_v52 = vcombine.high %v158_v46, %v162_v47  ;;  %2623 = vmatprep.subr.bf16.mxu1 %v5994_v45  ;;  %v5857_v62 = vcombine.low %v158_v46, %v162_v47 }
  0x8d   :  { %v290_v49 = vld [vmem:[#allocation5 + $0x460] sm:$0xff]  ;;  %2624 = vmatpush1.bf16.msra.mxu1 %v5993_v51 }
  0x8e   :  { %v7441_v53 = vld [vmem:[#allocation2] sm:$0xff]  ;;  %v5986_v55 = vcombine.high %v286_v48, %v290_v49  ;;  %2584 = vmatprep.subr.bf16.mxu0 %v5858_v52  ;;  %v5985_v63 = vcombine.low %v286_v48, %v290_v49 }
  0x8f   :  { %v150_v56 = vld [vmem:[#allocation5] sm:$0xff]  ;;  %v7447_v58 = vcombine.high %v7441_v53, %v7441_v53  ;;  %2585 = vmatpush1.bf16.msra.mxu0 %v5857_v62 }
  0x90   :  { %v154_v57 = vld [vmem:[#allocation5 + $0x20] sm:$0xff]  ;;  %2625 = vmatprep.subr.bf16.mxu1 %v5986_v55 }
  0x91   :  { %v278_v60 = vld [vmem:[#allocation5 + $0x400] sm:$0xff]  ;;  %2604 = vmatprep.mubr.bf16.mxu0 %v7447_v58  ;;  %v5850_v0 = vcombine.high %v150_v56, %v154_v57  ;;  %v5849_v6 = vcombine.low %v150_v56, %v154_v57  ;;  %2626 = vmatpush1.bf16.msra.mxu1 %v5985_v63 }
  0x92   :  { %v282_v61 = vld [vmem:[#allocation5 + $0x420] sm:$0xff] }
  0x93   :  { %v5978_v1 = vcombine.high %v278_v60, %v282_v61  ;;  %v270_v2 = vld [vmem:[#allocation5 + $0x3c0] sm:$0xff]  ;;  %2586 = vmatprep.subr.bf16.mxu0 %v5850_v0  ;;  %v5977_v7 = vcombine.low %v278_v60, %v282_v61 }
  0x94   :  { %v274_v3 = vld [vmem:[#allocation5 + $0x3e0] sm:$0xff]  ;;  %2587 = vmatpush1.bf16.msra.mxu0 %v5849_v6 }
  0x95   :  { %v398_v4 = vld [vmem:[#allocation5 + $0x7c0] sm:$0xff]  ;;  %v5970_v8 = vcombine.high %v270_v2, %v274_v3  ;;  %2627 = vmatprep.subr.bf16.mxu1 %v5978_v1  ;;  %v5969_v14 = vcombine.low %v270_v2, %v274_v3 }
  0x96   :  { %v402_v5 = vld [vmem:[#allocation5 + $0x7e0] sm:$0xff]  ;;  %2628 = vmatpush1.bf16.msra.mxu1 %v5977_v7 }
  0x97   :  { %v6098_v9 = vcombine.high %v398_v4, %v402_v5  ;;  %v262_v10 = vld [vmem:[#allocation5 + $0x380] sm:$0xff]  ;;  %2588 = vmatprep.subr.bf16.mxu0 %v5970_v8  ;;  %v6097_v15 = vcombine.low %v398_v4, %v402_v5 }
  0x98   :  { %v266_v11 = vld [vmem:[#allocation5 + $0x3a0] sm:$0xff]  ;;  %2589 = vmatpush2.bf16.msra.mxu0 %v5969_v14 }
  0x99   :  { %v390_v12 = vld [vmem:[#allocation5 + $0x780] sm:$0xff]  ;;  %v5962_v16 = vcombine.high %v262_v10, %v266_v11  ;;  %2629 = vmatprep.subr.bf16.mxu1 %v6098_v9  ;;  %v5961_v22 = vcombine.low %v262_v10, %v266_v11 }
  0x9a   :  { %v394_v13 = vld [vmem:[#allocation5 + $0x7a0] sm:$0xff]  ;;  %2630 = vmatpush2.bf16.msra.mxu1 %v6097_v15 }
  0x9b   :  { %v6090_v17 = vcombine.high %v390_v12, %v394_v13  ;;  %v254_v18 = vld [vmem:[#allocation5 + $0x340] sm:$0xff]  ;;  %2590 = vmatprep.subr.bf16.mxu0 %v5962_v16  ;;  %v6089_v23 = vcombine.low %v390_v12, %v394_v13  ;;  %v7457_v16 = vcombine.low %v7441_v53, %v7441_v53 }
  0x9c   :  { %v258_v19 = vld [vmem:[#allocation5 + $0x360] sm:$0xff]  ;;  %2591 = vmatpush2.bf16.msra.mxu0 %v5961_v22 }
  0x9d   :  { %v382_v20 = vld [vmem:[#allocation5 + $0x740] sm:$0xff]  ;;  %v5954_v24 = vcombine.high %v254_v18, %v258_v19  ;;  %2631 = vmatprep.subr.bf16.mxu1 %v6090_v17  ;;  %v5953_v30 = vcombine.low %v254_v18, %v258_v19  ;;  %v207_v17 = vld [vmem:[#allocation5 + $0x1c8] sm:$0xff]  ;;  %v7461_v19 = vcombine.low %v7443_v54, %v7443_v54 }
  0x9e   :  { %v386_v21 = vld [vmem:[#allocation5 + $0x760] sm:$0xff]  ;;  %2632 = vmatpush2.bf16.msra.mxu1 %v6089_v23  ;;  %v211_v18 = vld [vmem:[#allocation5 + $0x1e8] sm:$0xff] }
  0x9f   :  { %v6082_v25 = vcombine.high %v382_v20, %v386_v21  ;;  %v246_v26 = vld [vmem:[#allocation5 + $0x300] sm:$0xff]  ;;  %2592 = vmatprep.subr.bf16.mxu0 %v5954_v24  ;;  %v6081_v31 = vcombine.low %v382_v20, %v386_v21  ;;  %v7463_v21 = vld [vmem:[#allocation2 + $0x10] sm:$0xff]  ;;  %v5908_v24 = vcombine.high %v207_v17, %v211_v18 }
  0xa0   :  { %v250_v27 = vld [vmem:[#allocation5 + $0x320] sm:$0xff]  ;;  %2593 = vmatpush2.bf16.msra.mxu0 %v5953_v30  ;;  %v7468_v53 = vcombine.high %v7463_v21, %v7463_v21  ;;  %v7362_v30 = vmov 0  }
  0xa1   :  { %v374_v28 = vld [vmem:[#allocation5 + $0x700] sm:$0xff]  ;;  %v5946_v32 = vcombine.high %v246_v26, %v250_v27  ;;  %2633 = vmatprep.subr.bf16.mxu1 %v6082_v25  ;;  %v5945_v38 = vcombine.low %v246_v26, %v250_v27 }
  0xa2   :  { %v378_v29 = vld [vmem:[#allocation5 + $0x720] sm:$0xff]  ;;  %2634 = vmatpush2.bf16.msra.mxu1 %v6081_v31  ;;  %v6627_v31 = vld [vmem:[#allocation2 + $0x18] ss:$0 sps:$4 sm:$0xff]  }
  0xa3   :  { %v6074_v33 = vcombine.high %v374_v28, %v378_v29  ;;  %v238_v34 = vld [vmem:[#allocation5 + $0x2c0] sm:$0xff]  ;;  %2594 = vmatprep.subr.bf16.mxu0 %v5946_v32  ;;  %v6073_v39 = vcombine.low %v374_v28, %v378_v29  ;;  %v199_v28 = vld [vmem:[#allocation5 + $0x188] sm:$0xff] }
  0xa4   :  { %v242_v35 = vld [vmem:[#allocation5 + $0x2e0] sm:$0xff]  ;;  %2595 = vmatpush2.bf16.msra.mxu0 %v5945_v38  ;;  %v203_v29 = vld [vmem:[#allocation5 + $0x1a8] sm:$0xff] }
  0xa5   :  { %v366_v36 = vld [vmem:[#allocation5 + $0x6c0] sm:$0xff]  ;;  %v5938_v40 = vcombine.high %v238_v34, %v242_v35  ;;  %2635 = vmatprep.subr.bf16.mxu1 %v6074_v33  ;;  %v5937_v46 = vcombine.low %v238_v34, %v242_v35  ;;  %v5907_v35 = vcombine.low %v207_v17, %v211_v18  ;;  %v195_v38 = vld [vmem:[#allocation5 + $0x168] sm:$0xff] }
  0xa6   :  { %v370_v37 = vld [vmem:[#allocation5 + $0x6e0] sm:$0xff]  ;;  %2636 = vmatpush2.bf16.msra.mxu1 %v6073_v39  ;;  %v5900_v39 = vcombine.high %v199_v28, %v203_v29 }
  0xa7   :  { %v6066_v41 = vcombine.high %v366_v36, %v370_v37  ;;  %v230_v42 = vld [vmem:[#allocation5 + $0x280] sm:$0xff]  ;;  %2596 = vmatprep.subr.bf16.mxu0 %v5938_v40  ;;  %v6065_v47 = vcombine.low %v366_v36, %v370_v37  ;;  %v191_v37 = vld [vmem:[#allocation5 + $0x148] sm:$0xff] }
  0xa8   :  { %v234_v43 = vld [vmem:[#allocation5 + $0x2a0] sm:$0xff]  ;;  %2597 = vmatpush2.bf16.msra.mxu0 %v5937_v46  ;;  %v187_v46 = vld [vmem:[#allocation5 + $0x128] sm:$0xff] }
  0xa9   :  { %v358_v44 = vld [vmem:[#allocation5 + $0x680] sm:$0xff]  ;;  %v5930_v48 = vcombine.high %v230_v42, %v234_v43  ;;  %2637 = vmatprep.subr.bf16.mxu1 %v6066_v41  ;;  %v5929_v56 = vcombine.low %v230_v42, %v234_v43  ;;  %v5899_v43 = vcombine.low %v199_v28, %v203_v29 }
  0xaa   :  { %v362_v45 = vld [vmem:[#allocation5 + $0x6a0] sm:$0xff]  ;;  %2638 = vmatpush2.bf16.msra.mxu1 %v6065_v47 }
  0xab   :  { %v6058_v49 = vcombine.high %v358_v44, %v362_v45  ;;  %v222_v50 = vld [vmem:[#allocation5 + $0x240] sm:$0xff]  ;;  %2598 = vmatprep.subr.bf16.mxu0 %v5930_v48  ;;  %v6057_v57 = vcombine.low %v358_v44, %v362_v45  ;;  %v183_v45 = vld [vmem:[#allocation5 + $0x108] sm:$0xff] }
  0xac   :  { %v226_v51 = vld [vmem:[#allocation5 + $0x260] sm:$0xff]  ;;  %2599 = vmatpush2.bf16.msra.mxu0 %v5929_v56 }
  0xad   :  { %v350_v52 = vld [vmem:[#allocation5 + $0x640] sm:$0xff]  ;;  %v5922_v60 = vcombine.high %v222_v50, %v226_v51  ;;  %2639 = vmatprep.subr.bf16.mxu1 %v6058_v49  ;;  %v5921_v2 = vcombine.low %v222_v50, %v226_v51  ;;  %v5892_v49 = vcombine.high %v191_v37, %v195_v38 }
  0xae   :  { %v354_v55 = vld [vmem:[#allocation5 + $0x660] sm:$0xff]  ;;  %2640 = vmatpush2.bf16.msra.mxu1 %v6057_v57  ;;  %v5884_v57 = vcombine.high %v183_v45, %v187_v46 }
  0xaf   :  { %v6050_v61 = vcombine.high %v350_v52, %v354_v55  ;;  %v214_v62 = vld [vmem:[#allocation5 + $0x200] sm:$0xff]  ;;  %2600 = vmatprep.subr.bf16.mxu0 %v5922_v60  ;;  %v6049_v3 = vcombine.low %v350_v52, %v354_v55  ;;  %v5891_v55 = vcombine.low %v191_v37, %v195_v38  ;;  %v175_v60 = vld [vmem:[#allocation5 + $0xc8] sm:$0xff] }
  0xb0   :  { %v218_v63 = vld [vmem:[#allocation5 + $0x220] sm:$0xff]  ;;  %2601 = vmatpush2.bf16.msra.mxu0 %v5921_v2 }
  0xb1   :  { %v342_v0 = vld [vmem:[#allocation5 + $0x600] sm:$0xff]  ;;  %v5914_v4 = vcombine.high %v214_v62, %v218_v63  ;;  %2641 = vmatprep.subr.bf16.mxu1 %v6050_v61  ;;  %v5913_v10 = vcombine.low %v214_v62, %v218_v63  ;;  %v179_v61 = vld [vmem:[#allocation5 + $0xe8] sm:$0xff]  ;;  %v5883_v63 = vcombine.low %v183_v45, %v187_v46 }
  0xb2   :  { %v346_v1 = vld [vmem:[#allocation5 + $0x620] sm:$0xff]  ;;  %2642 = vmatpush2.bf16.msra.mxu1 %v6049_v3  ;;  %v5876_v3 = vcombine.high %v175_v60, %v179_v61 }
  0xb3   :  { %v6042_v5 = vcombine.high %v342_v0, %v346_v1  ;;  %v462_v6 = vld [vmem:[#allocation5 + $0x9c0] sm:$0xff]  ;;  %2602 = vmatprep.subr.bf16.mxu0 %v5914_v4  ;;  %v6041_v11 = vcombine.low %v342_v0, %v346_v1  ;;  %v167_v4 = vld [vmem:[#allocation5 + $0x88] sm:$0xff] }
  0xb4   :  { %v466_v7 = vld [vmem:[#allocation5 + $0x9e0] sm:$0xff]  ;;  %2603 = vmatpush2.bf16.msra.mxu0 %v5913_v10 }
  0xb5   :  { %v534_v8 = vld [vmem:[#allocation5 + $0xc00] sm:$0xff]  ;;  %v6162_v12 = vcombine.high %v462_v6, %v466_v7  ;;  %2643 = vmatprep.subr.bf16.mxu1 %v6042_v5  ;;  %v6161_v20 = vcombine.low %v462_v6, %v466_v7  ;;  %v171_v5 = vld [vmem:[#allocation5 + $0xa8] sm:$0xff]  ;;  %v5875_v7 = vcombine.low %v175_v60, %v179_v61 }
  0xb6   :  { %v538_v9 = vld [vmem:[#allocation5 + $0xc20] sm:$0xff]  ;;  %2644 = vmatpush2.bf16.msra.mxu1 %v6041_v11  ;;  %v5868_v11 = vcombine.high %v167_v4, %v171_v5  ;;  %v251_v60 = vld [vmem:[#allocation5 + $0x328] sm:$0xff] }
  0xb7   :  { %v6234_v13 = vcombine.high %v534_v8, %v538_v9  ;;  %v454_v14 = vld [vmem:[#allocation5 + $0x980] sm:$0xff]  ;;  %2654 = vmatprep.subr.bf16.mxu0 %v6162_v12  ;;  %v6233_v22 = vcombine.low %v534_v8, %v538_v9  ;;  %2605 = vmatmul.mubr.bf16.vlgmr.msra.gmra.mxu0 %v7457_v16  ;;  %v159_v12 = vld [vmem:[#allocation5 + $0x48] sm:$0xff] }
  0xb8   :  { %v458_v15 = vld [vmem:[#allocation5 + $0x9a0] sm:$0xff]  ;;  %2655 = vmatpush1.bf16.msra.mxu0 %v6161_v20  ;;  %2686 = vmatprep.mubr.bf16.mxu0 %v7468_v53 }
  0xb9   :  { %v6154_v23 = vcombine.high %v454_v14, %v458_v15  ;;  %2709 = vmatprep.subr.bf16.mxu1 %v6234_v13  ;;  %v446_v25 = vld [vmem:[#allocation5 + $0x940] sm:$0xff]  ;;  %2646 = vmatmul.mubr.bf16.vlgmr.msra.gmra.mxu1 %v7461_v19  ;;  %v6153_v54 = vcombine.low %v454_v14, %v458_v15  ;;  %v163_v13 = vld [vmem:[#allocation5 + $0x68] sm:$0xff]  ;;  %v5867_v15 = vcombine.low %v167_v4, %v171_v5 }
  0xba   :  { %v450_v26 = vld [vmem:[#allocation5 + $0x960] sm:$0xff]  ;;  %2710 = vmatpush1.bf16.msra.mxu1 %v6233_v22  ;;  %2727 = vmatprep.mubr.bf16.mxu1 %v7362_v30  ;;  %v5860_v22 = vcombine.high %v159_v12, %v163_v13  ;;  %v243_v4 = vld [vmem:[#allocation5 + $0x2e8] sm:$0xff] }
  0xbb   :  { %2656 = vmatprep.subr.bf16.mxu0 %v6154_v23  ;;  %v6146_v27 = vcombine.high %v446_v25, %v450_v26  ;;  %2736 = vmatprep.subr.bf16.mxu1 %v5908_v24  ;;  %v438_v32 = vld [vmem:[#allocation5 + $0x900] sm:$0xff]  ;;  %v6145_v34 = vcombine.low %v446_v25, %v450_v26  ;;  %v151_v23 = vld [vmem:[#allocation5 + $0x8] sm:$0xff]  ;;  %v5859_v26 = vcombine.low %v159_v12, %v163_v13 }
  0xbc   :  { %v442_v33 = vld [vmem:[#allocation5 + $0x920] sm:$0xff]  ;;  %2657 = vmatpush1.bf16.msra.mxu0 %v6153_v54  ;;  %v155_v24 = vld [vmem:[#allocation5 + $0x28] sm:$0xff] }
  0xbd   :  { %2658 = vmatprep.subr.bf16.mxu0 %v6146_v27  ;;  %v6138_v36 = vcombine.high %v438_v32, %v442_v33  ;;  %v430_v40 = vld [vmem:[#allocation5 + $0x8c0] sm:$0xff]  ;;  %v6137_v42 = vcombine.low %v438_v32, %v442_v33  ;;  %v5852_v29 = vcombine.high %v151_v23, %v155_v24  ;;  %v275_v32 = vld [vmem:[#allocation5 + $0x3e8] sm:$0xff] }
  0xbe   :  { %v434_v41 = vld [vmem:[#allocation5 + $0x8e0] sm:$0xff]  ;;  %v235_v12 = vld [vmem:[#allocation5 + $0x2a8] sm:$0xff] }
  0xbf   :  { %v6130_v44 = vcombine.high %v430_v40, %v434_v41  ;;  %v422_v47 = vld [vmem:[#allocation5 + $0x880] sm:$0xff]  ;;  %v6129_v50 = vcombine.low %v430_v40, %v434_v41  ;;  %v267_v40 = vld [vmem:[#allocation5 + $0x3a8] sm:$0xff] }
  0xc0   :  { %2659 = vmatpush1.bf16.msra.mxu0 %v6145_v34  ;;  %v426_v48 = vld [vmem:[#allocation5 + $0x8a0] sm:$0xff]  ;;  %v5851_v34 = vcombine.low %v151_v23, %v155_v24  ;;  %v227_v23 = vld [vmem:[#allocation5 + $0x268] sm:$0xff] }
  0xc1   :  { %6241 = vmatmul.mubr.msk.bf16.vlgmr.msra.gmra.mxu1 %vm2568_vm0, %v6627_v31  ;;  %2660 = vmatprep.subr.bf16.mxu0 %v6138_v36  ;;  %v414_v51 = vld [vmem:[#allocation5 + $0x840] sm:$0xff]  ;;  %v6122_v56 = vcombine.high %v422_v47, %v426_v48  ;;  %v6121_v62 = vcombine.low %v422_v47, %v426_v48  ;;  %v271_v31 = vld [vmem:[#allocation5 + $0x3c8] sm:$0xff] }
  0xc2   :  { %2737 = vmatpush1.bf16.msra.mxu1 %v5907_v35  ;;  %2768 = vmatprep.mubr.bf16.mxu1 %v7447_v58  ;;  %v418_v52 = vld [vmem:[#allocation5 + $0x860] sm:$0xff]  ;;  %v5972_v38 = vcombine.high %v271_v31, %v275_v32  ;;  %v255_v47 = vld [vmem:[#allocation5 + $0x348] sm:$0xff] }
  0xc3   :  { %2738 = vmatprep.subr.bf16.mxu1 %v5900_v39  ;;  %v6114_v0 = vcombine.high %v414_v51, %v418_v52  ;;  %v406_v1 = vld [vmem:[#allocation5 + $0x800] sm:$0xff]  ;;  %v6113_v6 = vcombine.low %v414_v51, %v418_v52  ;;  %v263_v39 = vld [vmem:[#allocation5 + $0x388] sm:$0xff] }
  0xc4   :  { %2661 = vmatpush1.bf16.msra.mxu0 %v6137_v42  ;;  %v410_v2 = vld [vmem:[#allocation5 + $0x820] sm:$0xff]  ;;  %v5971_v42 = vcombine.low %v271_v31, %v275_v32  ;;  %v5964_v46 = vcombine.high %v263_v39, %v267_v40  ;;  %v259_v48 = vld [vmem:[#allocation5 + $0x368] sm:$0xff] }
  0xc5   :  { %2662 = vmatprep.subr.bf16.mxu0 %v6130_v44  ;;  %v6106_v8 = vcombine.high %v406_v1, %v410_v2  ;;  %v526_v9 = vld [vmem:[#allocation5 + $0xbc0] sm:$0xff]  ;;  %v6105_v14 = vcombine.low %v406_v1, %v410_v2  ;;  %v215_v31 = vld [vmem:[#allocation5 + $0x208] sm:$0xff] }
  0xc6   :  { %2739 = vmatpush1.bf16.msra.mxu1 %v5899_v43  ;;  %v530_v10 = vld [vmem:[#allocation5 + $0xbe0] sm:$0xff]  ;;  %v219_v32 = vld [vmem:[#allocation5 + $0x228] sm:$0xff] }
  0xc7   :  { %2740 = vmatprep.subr.bf16.mxu1 %v5892_v49  ;;  %v6226_v17 = vcombine.high %v526_v9, %v530_v10  ;;  %v518_v18 = vld [vmem:[#allocation5 + $0xb80] sm:$0xff]  ;;  %v6225_v25 = vcombine.low %v526_v9, %v530_v10 }
  0xc8   :  { %2663 = vmatpush1.bf16.msra.mxu0 %v6129_v50  ;;  %v522_v20 = vld [vmem:[#allocation5 + $0xba0] sm:$0xff]  ;;  %v5963_v50 = vcombine.low %v263_v39, %v267_v40  ;;  %v463_v39 = vld [vmem:[#allocation5 + $0x9c8] sm:$0xff] }
  0xc9   :  { %2664 = vmatprep.subr.bf16.mxu0 %v6122_v56  ;;  %v6218_v54 = vcombine.high %v518_v18, %v522_v20  ;;  %v510_v27 = vld [vmem:[#allocation5 + $0xb40] sm:$0xff]  ;;  %v6217_v33 = vcombine.low %v518_v18, %v522_v20  ;;  %v5956_v56 = vcombine.high %v255_v47, %v259_v48  ;;  %v339_v18 = vld [vmem:[#allocation5 + $0x5e8] sm:$0xff] }
  0xca   :  { %2741 = vmatpush1.bf16.msra.mxu1 %v5891_v55  ;;  %v514_v28 = vld [vmem:[#allocation5 + $0xb60] sm:$0xff]  ;;  %v467_v40 = vld [vmem:[#allocation5 + $0x9e8] sm:$0xff] }
  0xcb   :  { %2742 = vmatprep.subr.bf16.mxu1 %v5884_v57  ;;  %v6210_v35 = vcombine.high %v510_v27, %v514_v28  ;;  %v502_v36 = vld [vmem:[#allocation5 + $0xb00] sm:$0xff]  ;;  %v6209_v41 = vcombine.low %v510_v27, %v514_v28  ;;  %v247_v57 = vld [vmem:[#allocation5 + $0x308] sm:$0xff] }
  0xcc   :  { %2665 = vmatpush1.bf16.msra.mxu0 %v6121_v62  ;;  %v506_v37 = vld [vmem:[#allocation5 + $0xb20] sm:$0xff]  ;;  %v5955_v62 = vcombine.low %v255_v47, %v259_v48  ;;  %v5948_v2 = vcombine.high %v247_v57, %v251_v60  ;;  %v331_v27 = vld [vmem:[#allocation5 + $0x5a8] sm:$0xff] }
  0xcd   :  { %2666 = vmatprep.subr.bf16.mxu0 %v6114_v0  ;;  %v6202_v43 = vcombine.high %v502_v36, %v506_v37  ;;  %v494_v44 = vld [vmem:[#allocation5 + $0xac0] sm:$0xff]  ;;  %v6201_v49 = vcombine.low %v502_v36, %v506_v37  ;;  %v319_v36 = vld [vmem:[#allocation5 + $0x548] sm:$0xff] }
  0xce   :  { %2743 = vmatpush1.bf16.msra.mxu1 %v5883_v63  ;;  %v498_v45 = vld [vmem:[#allocation5 + $0xae0] sm:$0xff]  ;;  %v323_v37 = vld [vmem:[#allocation5 + $0x568] sm:$0xff] }
  0xcf   :  { %2744 = vmatprep.subr.bf16.mxu1 %v5876_v3  ;;  %v6194_v51 = vcombine.high %v494_v44, %v498_v45  ;;  %v486_v52 = vld [vmem:[#allocation5 + $0xa80] sm:$0xff]  ;;  %v6193_v61 = vcombine.low %v494_v44, %v498_v45  ;;  %v239_v3 = vld [vmem:[#allocation5 + $0x2c8] sm:$0xff]  ;;  %v6164_v45 = vcombine.high %v463_v39, %v467_v40  ;;  %v6019_v48 = vcombine.low %v319_v36, %v323_v37 }
  0xd0   :  { %2667 = vmatpush1.bf16.msra.mxu0 %v6113_v6  ;;  %v490_v55 = vld [vmem:[#allocation5 + $0xaa0] sm:$0xff]  ;;  %v5947_v6 = vcombine.low %v247_v57, %v251_v60  ;;  %v5940_v10 = vcombine.high %v239_v3, %v243_v4  ;;  %v315_v44 = vld [vmem:[#allocation5 + $0x528] sm:$0xff] }
  0xd1   :  { %2668 = vmatprep.subr.bf16.mxu0 %v6106_v8  ;;  %v6186_v63 = vcombine.high %v486_v52, %v490_v55  ;;  %v478_v0 = vld [vmem:[#allocation5 + $0xa40] sm:$0xff]  ;;  %v6185_v5 = vcombine.low %v486_v52, %v490_v55  ;;  %v459_v47 = vld [vmem:[#allocation5 + $0x9a8] sm:$0xff] }
  0xd2   :  { %2745 = vmatpush1.bf16.msra.mxu1 %v5875_v7  ;;  %v482_v1 = vld [vmem:[#allocation5 + $0xa60] sm:$0xff]  ;;  %v307_v52 = vld [vmem:[#allocation5 + $0x4e8] sm:$0xff] }
  0xd3   :  { %2746 = vmatprep.subr.bf16.mxu1 %v5868_v11  ;;  %v6178_v7 = vcombine.high %v478_v0, %v482_v1  ;;  %v470_v8 = vld [vmem:[#allocation5 + $0xa00] sm:$0xff]  ;;  %v231_v11 = vld [vmem:[#allocation5 + $0x288] sm:$0xff]  ;;  %v6177_v13 = vcombine.low %v478_v0, %v482_v1 }
  0xd4   :  { %2669 = vmatpush1.bf16.msra.mxu0 %v6105_v14  ;;  %v474_v9 = vld [vmem:[#allocation5 + $0xa20] sm:$0xff]  ;;  %v5939_v14 = vcombine.low %v239_v3, %v243_v4  ;;  %v5932_v20 = vcombine.high %v231_v11, %v235_v12  ;;  %v451_v57 = vld [vmem:[#allocation5 + $0x968] sm:$0xff] }
  0xd5   :  { %2670 = vmatprep.subr.bf16.mxu0 %v6226_v17  ;;  %v335_v17 = vld [vmem:[#allocation5 + $0x5c8] sm:$0xff]  ;;  %v6169_v24 = vcombine.low %v470_v8, %v474_v9 }
  0xd6   :  { %2747 = vmatpush1.bf16.msra.mxu1 %v5867_v15  ;;  %v6170_v15 = vcombine.high %v470_v8, %v474_v9  ;;  %v299_v0 = vld [vmem:[#allocation5 + $0x4a8] sm:$0xff] }
  0xd7   :  { %2748 = vmatprep.subr.bf16.mxu1 %v5860_v22  ;;  %v223_v22 = vld [vmem:[#allocation5 + $0x248] sm:$0xff] }
  0xd8   :  { %2671 = vmatpush2.bf16.msra.mxu0 %v6225_v25  ;;  %v5931_v25 = vcombine.low %v231_v11, %v235_v12  ;;  %v5924_v28 = vcombine.high %v223_v22, %v227_v23  ;;  %v443_v3 = vld [vmem:[#allocation5 + $0x928] sm:$0xff] }
  0xd9   :  { %2672 = vmatprep.subr.bf16.mxu0 %v6218_v54  ;;  %v327_v54 = vld [vmem:[#allocation5 + $0x588] sm:$0xff] }
  0xda   :  { %2749 = vmatpush1.bf16.msra.mxu1 %v5859_v26  ;;  %v6036_v26 = vcombine.high %v335_v17, %v339_v18  ;;  %v435_v11 = vld [vmem:[#allocation5 + $0x8e8] sm:$0xff] }
  0xdb   :  { %2750 = vmatprep.subr.bf16.mxu1 %v5852_v29  ;;  %v7477_v29 = vcombine.low %v7463_v21, %v7463_v21  ;;  %v5915_v21 = vcombine.low %v215_v31, %v219_v32 }
  0xdc   :  { %2673 = vmatpush2.bf16.msra.mxu0 %v6217_v33  ;;  %v6035_v33 = vcombine.low %v335_v17, %v339_v18  ;;  %v427_v17 = vld [vmem:[#allocation5 + $0x8a8] sm:$0xff] }
  0xdd   :  { %2674 = vmatprep.subr.bf16.mxu0 %v6210_v35  ;;  %v6028_v35 = vcombine.high %v327_v54, %v331_v27  ;;  %v279_v18 = vld [vmem:[#allocation5 + $0x408] sm:$0xff] }
  0xde   :  { %2751 = vmatpush1.bf16.msra.mxu1 %v5851_v34  ;;  %v5923_v34 = vcombine.low %v223_v22, %v227_v23 }
  0xdf   :  { %2752 = vmatprep.subr.bf16.mxu1 %v5972_v38  ;;  %v5916_v38 = vcombine.high %v215_v31, %v219_v32 }
  0xe0   :  { %2675 = vmatpush2.bf16.msra.mxu0 %v6209_v41  ;;  %v6027_v41 = vcombine.low %v327_v54, %v331_v27  ;;  %v415_v27 = vld [vmem:[#allocation5 + $0x848] sm:$0xff] }
  0xe1   :  { %2676 = vmatprep.subr.bf16.mxu0 %v6202_v43  ;;  %v311_v43 = vld [vmem:[#allocation5 + $0x508] sm:$0xff] }
  0xe2   :  { %2753 = vmatpush2.bf16.msra.mxu1 %v5971_v42  ;;  %v6020_v42 = vcombine.high %v319_v36, %v323_v37  ;;  %v6011_v60 = vcombine.low %v311_v43, %v315_v44  ;;  %v411_v36 = vld [vmem:[#allocation5 + $0x828] sm:$0xff] }
  0xe3   :  { %2754 = vmatprep.subr.bf16.mxu1 %v5964_v46  ;;  %v455_v46 = vld [vmem:[#allocation5 + $0x988] sm:$0xff] }
  0xe4   :  { %2677 = vmatpush2.bf16.msra.mxu0 %v6201_v49  ;;  %v6163_v49 = vcombine.low %v463_v39, %v467_v40  ;;  %v6156_v55 = vcombine.high %v455_v46, %v459_v47  ;;  %v391_v37 = vld [vmem:[#allocation5 + $0x788] sm:$0xff] }
  0xe5   :  { %2678 = vmatprep.subr.bf16.mxu0 %v6194_v51  ;;  %v303_v51 = vld [vmem:[#allocation5 + $0x4c8] sm:$0xff] }
  0xe6   :  { %2755 = vmatpush2.bf16.msra.mxu1 %v5963_v50  ;;  %v6012_v50 = vcombine.high %v311_v43, %v315_v44  ;;  %v6003_v4 = vcombine.low %v303_v51, %v307_v52  ;;  %v531_v43 = vld [vmem:[#allocation5 + $0xbe8] sm:$0xff] }
  0xe7   :  { %2756 = vmatprep.subr.bf16.mxu1 %v5956_v56  ;;  %v447_v56 = vld [vmem:[#allocation5 + $0x948] sm:$0xff] }
  0xe8   :  { %2679 = vmatpush2.bf16.msra.mxu0 %v6193_v61  ;;  %v6155_v61 = vcombine.low %v455_v46, %v459_v47  ;;  %v6148_v1 = vcombine.high %v447_v56, %v451_v57  ;;  %v383_v44 = vld [vmem:[#allocation5 + $0x748] sm:$0xff] }
  0xe9   :  { %2680 = vmatprep.subr.bf16.mxu0 %v6186_v63  ;;  %v295_v63 = vld [vmem:[#allocation5 + $0x488] sm:$0xff] }
  0xea   :  { %2757 = vmatpush2.bf16.msra.mxu1 %v5955_v62  ;;  %v6004_v62 = vcombine.high %v303_v51, %v307_v52  ;;  %v5996_v8 = vcombine.high %v295_v63, %v299_v0  ;;  %v5995_v12 = vcombine.low %v295_v63, %v299_v0  ;;  %v523_v51 = vld [vmem:[#allocation5 + $0xba8] sm:$0xff] }
  0xeb   :  { %2758 = vmatprep.subr.bf16.mxu1 %v5948_v2  ;;  %v439_v2 = vld [vmem:[#allocation5 + $0x908] sm:$0xff] }
  0xec   :  { %2681 = vmatpush2.bf16.msra.mxu0 %v6185_v5  ;;  %v287_v5 = vld [vmem:[#allocation5 + $0x448] sm:$0xff]  ;;  %v6140_v9 = vcombine.high %v439_v2, %v443_v3 }
  0xed   :  { %2682 = vmatprep.subr.bf16.mxu0 %v6178_v7  ;;  %v6147_v7 = vcombine.low %v447_v56, %v451_v57  ;;  %v375_v52 = vld [vmem:[#allocation5 + $0x708] sm:$0xff] }
  0xee   :  { %2759 = vmatpush2.bf16.msra.mxu1 %v5947_v6  ;;  %v291_v6 = vld [vmem:[#allocation5 + $0x468] sm:$0xff] }
  0xef   :  { %2760 = vmatprep.subr.bf16.mxu1 %v5940_v10  ;;  %v431_v10 = vld [vmem:[#allocation5 + $0x8c8] sm:$0xff]  ;;  %v5987_v23 = vcombine.low %v287_v5, %v291_v6 }
  0xf0   :  { %2683 = vmatpush2.bf16.msra.mxu0 %v6177_v13  ;;  %v6139_v13 = vcombine.low %v439_v2, %v443_v3  ;;  %v6132_v22 = vcombine.high %v431_v10, %v435_v11  ;;  %v515_v63 = vld [vmem:[#allocation5 + $0xb68] sm:$0xff] }
  0xf1   :  { %2684 = vmatprep.subr.bf16.mxu0 %v6170_v15  ;;  %v423_v15 = vld [vmem:[#allocation5 + $0x888] sm:$0xff] }
  0xf2   :  { %2761 = vmatpush2.bf16.msra.mxu1 %v5939_v14  ;;  %v5988_v14 = vcombine.high %v287_v5, %v291_v6  ;;  %v6124_v31 = vcombine.high %v423_v15, %v427_v17  ;;  %v367_v0 = vld [vmem:[#allocation5 + $0x6c8] sm:$0xff] }
  0xf3   :  { %2762 = vmatprep.subr.bf16.mxu1 %v5932_v20  ;;  %v283_v20 = vld [vmem:[#allocation5 + $0x428] sm:$0xff] }
  0xf4   :  { %2685 = vmatpush2.bf16.msra.mxu0 %v6169_v24  ;;  %v399_v24 = vld [vmem:[#allocation5 + $0x7c8] sm:$0xff]  ;;  %v5980_v54 = vcombine.high %v279_v18, %v283_v20  ;;  %v5979_v32 = vcombine.low %v279_v18, %v283_v20 }
  0xf5   :  { %2777 = vmatprep.subr.bf16.mxu0 %v6036_v26  ;;  %v6131_v26 = vcombine.low %v431_v10, %v435_v11  ;;  %v503_v6 = vld [vmem:[#allocation5 + $0xb08] sm:$0xff] }
  0xf6   :  { %2763 = vmatpush2.bf16.msra.mxu1 %v5931_v25  ;;  %v403_v25 = vld [vmem:[#allocation5 + $0x7e8] sm:$0xff] }
  0xf7   :  { %2764 = vmatprep.subr.bf16.mxu1 %v5924_v28  ;;  %2687 = vmatmul.mubr.bf16.vlgmr.msra.gmra.mxu0 %v7477_v29  ;;  %v419_v28 = vld [vmem:[#allocation5 + $0x868] sm:$0xff]  ;;  %v6099_v40 = vcombine.low %v399_v24, %v403_v25 }
  0xf8   :  { %2778 = vmatpush1.bf16.msra.mxu0 %v6035_v33  ;;  %2809 = vmatprep.mubr.bf16.mxu0 %v7451_v59  ;;  %v6123_v33 = vcombine.low %v423_v15, %v427_v17  ;;  %v6116_v39 = vcombine.high %v415_v27, %v419_v28  ;;  %v499_v15 = vld [vmem:[#allocation5 + $0xae8] sm:$0xff] }
  0xf9   :  { %2779 = vmatprep.subr.bf16.mxu0 %v6028_v35  ;;  %v407_v35 = vld [vmem:[#allocation5 + $0x808] sm:$0xff] }
  0xfa   :  { %2765 = vmatpush2.bf16.msra.mxu1 %v5923_v34  ;;  %v6100_v34 = vcombine.high %v399_v24, %v403_v25  ;;  %v6108_v46 = vcombine.high %v407_v35, %v411_v36  ;;  %v351_v17 = vld [vmem:[#allocation5 + $0x648] sm:$0xff] }
  0xfb   :  { %2766 = vmatprep.subr.bf16.mxu1 %v5916_v38  ;;  %v395_v38 = vld [vmem:[#allocation5 + $0x7a8] sm:$0xff] }
  0xfc   :  { %2780 = vmatpush1.bf16.msra.mxu0 %v6027_v41  ;;  %v6115_v41 = vcombine.low %v415_v27, %v419_v28  ;;  %v6091_v47 = vcombine.low %v391_v37, %v395_v38  ;;  %v355_v18 = vld [vmem:[#allocation5 + $0x668] sm:$0xff] }
  0xfd   :  { %2781 = vmatprep.subr.bf16.mxu0 %v6020_v42  ;;  %v527_v42 = vld [vmem:[#allocation5 + $0xbc8] sm:$0xff]  ;;  %v6052_v24 = vcombine.high %v351_v17, %v355_v18 }
  0xfe   :  { %2767 = vmatpush2.bf16.msra.mxu1 %v5915_v21  ;;  %v6092_v21 = vcombine.high %v391_v37, %v395_v38  ;;  %v6228_v56 = vcombine.high %v527_v42, %v531_v43  ;;  %v487_v25 = vld [vmem:[#allocation5 + $0xa88] sm:$0xff]  ;;  %v212_v37 = vld [vmem:[#allocation5 + $0x1f0] sm:$0xff] }
  0xff   :  { %2818 = vmatprep.subr.bf16.mxu1 %v6164_v45  ;;  %v387_v45 = vld [vmem:[#allocation5 + $0x768] sm:$0xff] }
 0x100   :  { %2782 = vmatpush1.bf16.msra.mxu0 %v6019_v48  ;;  %v6107_v48 = vcombine.low %v407_v35, %v411_v36  ;;  %v6083_v57 = vcombine.low %v383_v44, %v387_v45  ;;  %v347_v27 = vld [vmem:[#allocation5 + $0x628] sm:$0xff]  ;;  %v208_v36 = vld [vmem:[#allocation5 + $0x1d0] sm:$0xff] }
 0x101   :  { %2769 = vmatmul.mubr.bf16.vlgmr.msra.gmra.mxu1 %v7457_v16  ;;  %2783 = vmatprep.subr.bf16.mxu0 %v6012_v50  ;;  %v519_v50 = vld [vmem:[#allocation5 + $0xb88] sm:$0xff] }
 0x102   :  { %2819 = vmatpush1.bf16.msra.mxu1 %v6163_v49  ;;  %2850 = vmatprep.mubr.bf16.mxu1 %v7468_v53  ;;  %v6084_v49 = vcombine.high %v383_v44, %v387_v45  ;;  %v6220_v2 = vcombine.high %v519_v50, %v523_v51  ;;  %v483_v35 = vld [vmem:[#allocation5 + $0xa68] sm:$0xff]  ;;  %v204_v44 = vld [vmem:[#allocation5 + $0x1b0] sm:$0xff] }
 0x103   :  { %2820 = vmatprep.subr.bf16.mxu1 %v6156_v55  ;;  %v379_v55 = vld [vmem:[#allocation5 + $0x728] sm:$0xff] }
 0x104   :  { %2784 = vmatpush1.bf16.msra.mxu0 %v6011_v60  ;;  %v6227_v60 = vcombine.low %v527_v42, %v531_v43  ;;  %v6075_v3 = vcombine.low %v375_v52, %v379_v55  ;;  %v475_v42 = vld [vmem:[#allocation5 + $0xa28] sm:$0xff]  ;;  %v200_v43 = vld [vmem:[#allocation5 + $0x190] sm:$0xff] }
 0x105   :  { %2785 = vmatprep.subr.bf16.mxu0 %v6004_v62  ;;  %v511_v62 = vld [vmem:[#allocation5 + $0xb48] sm:$0xff] }
 0x106   :  { %2821 = vmatpush1.bf16.msra.mxu1 %v6155_v61  ;;  %v6076_v61 = vcombine.high %v375_v52, %v379_v55  ;;  %v6212_v10 = vcombine.high %v511_v62, %v515_v63  ;;  %v539_v52 = vld [vmem:[#allocation5 + $0xc28] sm:$0xff] }
 0x107   :  { %2822 = vmatprep.subr.bf16.mxu1 %v6148_v1  ;;  %v371_v1 = vld [vmem:[#allocation5 + $0x6e8] sm:$0xff] }
 0x108   :  { %2786 = vmatpush1.bf16.msra.mxu0 %v6003_v4  ;;  %v6219_v4 = vcombine.low %v519_v50, %v523_v51  ;;  %v6068_v5 = vcombine.high %v367_v0, %v371_v1  ;;  %v6067_v11 = vcombine.low %v367_v0, %v371_v1  ;;  %v5902_v50 = vcombine.high %v200_v43, %v204_v44  ;;  %v535_v51 = vld [vmem:[#allocation5 + $0xc08] sm:$0xff]  ;;  %v340_v0 = vld [vmem:[#allocation5 + $0x5f0] sm:$0xff] }
 0x109   :  { %2787 = vmatprep.subr.bf16.mxu0 %v5996_v8  ;;  %v359_v8 = vld [vmem:[#allocation5 + $0x688] sm:$0xff]  ;;  %v6236_v1 = vcombine.high %v535_v51, %v539_v52 }
 0x10a   :  { %2823 = vmatpush1.bf16.msra.mxu1 %v6147_v7  ;;  %v507_v7 = vld [vmem:[#allocation5 + $0xb28] sm:$0xff] }
 0x10b   :  { %2824 = vmatprep.subr.bf16.mxu1 %v6140_v9  ;;  %v363_v9 = vld [vmem:[#allocation5 + $0x6a8] sm:$0xff]  ;;  %v6204_v20 = vcombine.high %v503_v6, %v507_v7 }
 0x10c   :  { %2788 = vmatpush1.bf16.msra.mxu0 %v5995_v12  ;;  %v6211_v12 = vcombine.low %v511_v62, %v515_v63  ;;  %v336_v63 = vld [vmem:[#allocation5 + $0x5d0] sm:$0xff] }
 0x10d   :  { %2789 = vmatprep.subr.bf16.mxu0 %v5988_v14  ;;  %v495_v14 = vld [vmem:[#allocation5 + $0xac8] sm:$0xff] }
 0x10e   :  { %2825 = vmatpush1.bf16.msra.mxu1 %v6139_v13  ;;  %v6060_v13 = vcombine.high %v359_v8, %v363_v9  ;;  %v6196_v28 = vcombine.high %v495_v14, %v499_v15 }
 0x10f   :  { %2826 = vmatprep.subr.bf16.mxu1 %v6132_v22  ;;  %v6059_v22 = vcombine.low %v359_v8, %v363_v9 }
 0x110   :  { %2790 = vmatpush1.bf16.msra.mxu0 %v5987_v23  ;;  %v6203_v23 = vcombine.low %v503_v6, %v507_v7  ;;  %v180_v6 = vld [vmem:[#allocation5 + $0xf0] sm:$0xff]  ;;  %v6038_v7 = vcombine.high %v336_v63, %v340_v0 }
 0x111   :  { %2791 = vmatprep.subr.bf16.mxu0 %v5980_v54  ;;  %v343_v54 = vld [vmem:[#allocation5 + $0x608] sm:$0xff] }
 0x112   :  { %2827 = vmatpush1.bf16.msra.mxu1 %v6131_v26  ;;  %v491_v26 = vld [vmem:[#allocation5 + $0xaa8] sm:$0xff] }
 0x113   :  { %2828 = vmatprep.subr.bf16.mxu1 %v6124_v31  ;;  %v6051_v31 = vcombine.low %v351_v17, %v355_v18  ;;  %v6188_v38 = vcombine.high %v487_v25, %v491_v26  ;;  %v320_v18 = vld [vmem:[#allocation5 + $0x550] sm:$0xff] }
 0x114   :  { %2792 = vmatpush1.bf16.msra.mxu0 %v5979_v32  ;;  %v6195_v32 = vcombine.low %v495_v14, %v499_v15  ;;  %v6037_v15 = vcombine.low %v336_v63, %v340_v0 }
 0x115   :  { %2793 = vmatprep.subr.bf16.mxu0 %v6100_v34  ;;  %v479_v34 = vld [vmem:[#allocation5 + $0xa48] sm:$0xff] }
 0x116   :  { %2829 = vmatpush1.bf16.msra.mxu1 %v6123_v33  ;;  %v6044_v33 = vcombine.high %v343_v54, %v347_v27  ;;  %v6180_v45 = vcombine.high %v479_v34, %v483_v35 }
 0x117   :  { %2830 = vmatprep.subr.bf16.mxu1 %v6116_v39  ;;  %v6043_v39 = vcombine.low %v343_v54, %v347_v27 }
 0x118   :  { %2794 = vmatpush2.bf16.msra.mxu0 %v6099_v40  ;;  %v6187_v40 = vcombine.low %v487_v25, %v491_v26  ;;  %v7487_v25 = vld [vmem:[#allocation2 + $0x18] ss:$0 sps:$4 sm:$0xff]  }
 0x119   :  { %2795 = vmatprep.subr.bf16.mxu0 %v6092_v21  ;;  %v471_v21 = vld [vmem:[#allocation5 + $0xa08] sm:$0xff] }
 0x11a   :  { %2831 = vmatpush1.bf16.msra.mxu1 %v6115_v41  ;;  %v5910_v41 = vcombine.high %v208_v36, %v212_v37  ;;  %v6172_v55 = vcombine.high %v471_v21, %v475_v42 }
 0x11b   :  { %2832 = vmatprep.subr.bf16.mxu1 %v6108_v46  ;;  %v5909_v46 = vcombine.low %v208_v36, %v212_v37 }
 0x11c   :  { %2796 = vmatpush2.bf16.msra.mxu0 %v6091_v47  ;;  %v192_v47 = vld [vmem:[#allocation5 + $0x150] sm:$0xff] }
 0x11d   :  { %2797 = vmatprep.subr.bf16.mxu0 %v6084_v49  ;;  %v6179_v49 = vcombine.low %v479_v34, %v483_v35 }
 0x11e   :  { %2833 = vmatpush1.bf16.msra.mxu1 %v6107_v48  ;;  %v196_v48 = vld [vmem:[#allocation5 + $0x170] sm:$0xff] }
 0x11f   :  { %2834 = vmatprep.subr.bf16.mxu1 %v6228_v56  ;;  %v5901_v56 = vcombine.low %v200_v43, %v204_v44  ;;  %v5894_v62 = vcombine.high %v192_v47, %v196_v48 }
 0x120   :  { %2798 = vmatpush2.bf16.msra.mxu0 %v6083_v57  ;;  %v184_v57 = vld [vmem:[#allocation5 + $0x110] sm:$0xff] }
 0x121   :  { %2799 = vmatprep.subr.bf16.mxu0 %v6076_v61  ;;  %v6171_v61 = vcombine.low %v471_v21, %v475_v42 }
 0x122   :  { %2835 = vmatpush2.bf16.msra.mxu1 %v6227_v60  ;;  %v188_v60 = vld [vmem:[#allocation5 + $0x130] sm:$0xff] }
 0x123   :  { %2836 = vmatprep.subr.bf16.mxu1 %v6220_v2  ;;  %v5893_v2 = vcombine.low %v192_v47, %v196_v48  ;;  %v5885_v8 = vcombine.low %v184_v57, %v188_v60  ;;  %v264_v47 = vld [vmem:[#allocation5 + $0x390] sm:$0xff] }
 0x124   :  { %2800 = vmatpush2.bf16.msra.mxu0 %v6075_v3  ;;  %v6235_v3 = vcombine.low %v535_v51, %v539_v52  ;;  %v268_v48 = vld [vmem:[#allocation5 + $0x3b0] sm:$0xff] }
 0x125   :  { %2801 = vmatprep.subr.bf16.mxu0 %v6068_v5  ;;  %v176_v5 = vld [vmem:[#allocation5 + $0xd0] sm:$0xff]  ;;  %v5966_v52 = vcombine.high %v264_v47, %v268_v48 }
 0x126   :  { %2837 = vmatpush2.bf16.msra.mxu1 %v6219_v4  ;;  %v5886_v4 = vcombine.high %v184_v57, %v188_v60  ;;  %v5878_v9 = vcombine.high %v176_v5, %v180_v6  ;;  %v5877_v14 = vcombine.low %v176_v5, %v180_v6  ;;  %v256_v57 = vld [vmem:[#allocation5 + $0x350] sm:$0xff] }
 0x127   :  { %2838 = vmatprep.subr.bf16.mxu1 %v6212_v10  ;;  %v328_v10 = vld [vmem:[#allocation5 + $0x590] sm:$0xff] }
 0x128   :  { %2802 = vmatpush2.bf16.msra.mxu0 %v6067_v11  ;;  %v332_v11 = vld [vmem:[#allocation5 + $0x5b0] sm:$0xff] }
 0x129   :  { %2803 = vmatprep.subr.bf16.mxu0 %v6060_v13  ;;  %v172_v13 = vld [vmem:[#allocation5 + $0xb0] sm:$0xff]  ;;  %v6029_v54 = vcombine.low %v328_v10, %v332_v11 }
 0x12a   :  { %2839 = vmatpush2.bf16.msra.mxu1 %v6211_v12  ;;  %v168_v12 = vld [vmem:[#allocation5 + $0x90] sm:$0xff] }
 0x12b   :  { %2840 = vmatprep.subr.bf16.mxu1 %v6204_v20  ;;  %v5870_v17 = vcombine.high %v168_v12, %v172_v13  ;;  %v324_v20 = vld [vmem:[#allocation5 + $0x570] sm:$0xff]  ;;  %v5869_v26 = vcombine.low %v168_v12, %v172_v13 }
 0x12c   :  { %2804 = vmatpush2.bf16.msra.mxu0 %v6059_v22  ;;  %v160_v22 = vld [vmem:[#allocation5 + $0x50] sm:$0xff]  ;;  %v6022_v34 = vcombine.high %v320_v18, %v324_v20  ;;  %v6021_v36 = vcombine.low %v320_v18, %v324_v20 }
 0x12d   :  { %2805 = vmatprep.subr.bf16.mxu0 %v6052_v24  ;;  %v6030_v24 = vcombine.high %v328_v10, %v332_v11  ;;  %v260_v60 = vld [vmem:[#allocation5 + $0x370] sm:$0xff] }
 0x12e   :  { %2841 = vmatpush2.bf16.msra.mxu1 %v6203_v23  ;;  %v164_v23 = vld [vmem:[#allocation5 + $0x70] sm:$0xff]  ;;  %v5958_v0 = vcombine.high %v256_v57, %v260_v60  ;;  %v5957_v6 = vcombine.low %v256_v57, %v260_v60  ;;  %v7498_v57 = vld [vmem:[#allocation7] sm:$0xff] }
 0x12f   :  { %2842 = vmatprep.subr.bf16.mxu1 %v6196_v28  ;;  %v5862_v27 = vcombine.high %v160_v22, %v164_v23  ;;  %v312_v28 = vld [vmem:[#allocation5 + $0x510] sm:$0xff]  ;;  %v5861_v35 = vcombine.low %v160_v22, %v164_v23 }
 0x130   :  { %2806 = vmatpush2.bf16.msra.mxu0 %v6051_v31  ;;  %v316_v31 = vld [vmem:[#allocation5 + $0x530] sm:$0xff] }
 0x131   :  { %2807 = vmatprep.subr.bf16.mxu0 %v6044_v33  ;;  %v156_v33 = vld [vmem:[#allocation5 + $0x30] sm:$0xff]  ;;  %v6014_v21 = vcombine.high %v312_v28, %v316_v31  ;;  %v6013_v43 = vcombine.low %v312_v28, %v316_v31 }
 0x132   :  { %2843 = vmatpush2.bf16.msra.mxu1 %v6195_v32  ;;  %v152_v32 = vld [vmem:[#allocation5 + $0x10] sm:$0xff] }
 0x133   :  { %2844 = vmatprep.subr.bf16.mxu1 %v6188_v38  ;;  %v5854_v37 = vcombine.high %v152_v32, %v156_v33  ;;  %v304_v38 = vld [vmem:[#allocation5 + $0x4d0] sm:$0xff]  ;;  %v5853_v42 = vcombine.low %v152_v32, %v156_v33 }
 0x134   :  { %2808 = vmatpush2.bf16.msra.mxu0 %v6043_v39  ;;  %v308_v39 = vld [vmem:[#allocation5 + $0x4f0] sm:$0xff] }
 0x135   :  { %2900 = vmatprep.subr.bf16.mxu0 %v5910_v41  ;;  %v276_v41 = vld [vmem:[#allocation5 + $0x3f0] sm:$0xff]  ;;  %v6005_v51 = vcombine.low %v304_v38, %v308_v39 }
 0x136   :  { %2845 = vmatpush2.bf16.msra.mxu1 %v6187_v40  ;;  %v272_v40 = vld [vmem:[#allocation5 + $0x3d0] sm:$0xff] }
 0x137   :  { %2846 = vmatprep.subr.bf16.mxu1 %v6180_v45  ;;  %2810 = vmatmul.mubr.bf16.vlgmr.msra.gmra.mxu0 %v7461_v19  ;;  %v5974_v44 = vcombine.high %v272_v40, %v276_v41  ;;  %v296_v45 = vld [vmem:[#allocation5 + $0x490] sm:$0xff] }
 0x138   :  { %2901 = vmatpush1.bf16.msra.mxu0 %v5909_v46  ;;  %2932 = vmatprep.mubr.bf16.mxu0 %v7447_v58  ;;  %v300_v46 = vld [vmem:[#allocation5 + $0x4b0] sm:$0xff] }
 0x139   :  { %2902 = vmatprep.subr.bf16.mxu0 %v5902_v50  ;;  %v5973_v50 = vcombine.low %v272_v40, %v276_v41  ;;  %v5997_v63 = vcombine.low %v296_v45, %v300_v46  ;;  %v404_v10 = vld [vmem:[#allocation5 + $0x7f0] sm:$0xff] }
 0x13a   :  { %2847 = vmatpush2.bf16.msra.mxu1 %v6179_v49  ;;  %v6006_v49 = vcombine.high %v304_v38, %v308_v39  ;;  %v240_v11 = vld [vmem:[#allocation5 + $0x2d0] sm:$0xff] }
 0x13b   :  { %2848 = vmatprep.subr.bf16.mxu1 %v6172_v55  ;;  %v288_v55 = vld [vmem:[#allocation5 + $0x450] sm:$0xff] }
 0x13c   :  { %2903 = vmatpush1.bf16.msra.mxu0 %v5901_v56  ;;  %v292_v56 = vld [vmem:[#allocation5 + $0x470] sm:$0xff] }
 0x13d   :  { %2904 = vmatprep.subr.bf16.mxu0 %v5894_v62  ;;  %v5965_v62 = vcombine.low %v264_v47, %v268_v48  ;;  %v5990_v5 = vcombine.high %v288_v55, %v292_v56  ;;  %v244_v12 = vld [vmem:[#allocation5 + $0x2f0] sm:$0xff] }
 0x13e   :  { %2849 = vmatpush2.bf16.msra.mxu1 %v6171_v61  ;;  %v5998_v61 = vcombine.high %v296_v45, %v300_v46  ;;  %v232_v18 = vld [vmem:[#allocation5 + $0x290] sm:$0xff] }
 0x13f   :  { %2873 = vmatprep.subr.bf16.mxu1 %v6236_v1  ;;  %v280_v1 = vld [vmem:[#allocation5 + $0x410] sm:$0xff] }
 0x140   :  { %2905 = vmatpush1.bf16.msra.mxu0 %v5893_v2  ;;  %v284_v2 = vld [vmem:[#allocation5 + $0x430] sm:$0xff] }
 0x141   :  { %2851 = vmatmul.mubr.bf16.vlgmr.msra.gmra.mxu1 %v7477_v29  ;;  %2906 = vmatprep.subr.bf16.mxu0 %v5886_v4  ;;  %v252_v4 = vld [vmem:[#allocation5 + $0x330] sm:$0xff]  ;;  %v5982_v13 = vcombine.high %v280_v1, %v284_v2 }
 0x142   :  { %2874 = vmatpush1.bf16.msra.mxu1 %v6235_v3  ;;  %2891 = vmatprep.mubr.bf16.mxu1 %v7362_v30  ;;  %v248_v3 = vld [vmem:[#allocation5 + $0x310] sm:$0xff] }
 0x143   :  { %2941 = vmatprep.subr.bf16.mxu1 %v6038_v7  ;;  %v5989_v7 = vcombine.low %v288_v55, %v292_v56  ;;  %v236_v20 = vld [vmem:[#allocation5 + $0x2b0] sm:$0xff] }
 0x144   :  { %2907 = vmatpush1.bf16.msra.mxu0 %v5885_v8  ;;  %v5950_v8 = vcombine.high %v248_v3, %v252_v4  ;;  %v392_v23 = vld [vmem:[#allocation5 + $0x790] sm:$0xff] }
 0x145   :  { %2908 = vmatprep.subr.bf16.mxu0 %v5878_v9  ;;  %v400_v9 = vld [vmem:[#allocation5 + $0x7d0] sm:$0xff] }
 0x146   :  { %v6102_v22 = vcombine.high %v400_v9, %v404_v10  ;;  %v224_v31 = vld [vmem:[#allocation5 + $0x250] sm:$0xff] }
 0x147   :  { %v228_v32 = vld [vmem:[#allocation5 + $0x270] sm:$0xff] }
 0x148   :  { %2909 = vmatpush1.bf16.msra.mxu0 %v5877_v14  ;;  %v5949_v14 = vcombine.low %v248_v3, %v252_v4  ;;  %v384_v33 = vld [vmem:[#allocation5 + $0x750] sm:$0xff]  ;;  %v5926_v38 = vcombine.high %v224_v31, %v228_v32 }
 0x149   :  { %6242 = vmatmul.mubr.msk.bf16.vlgmr.msra.gmra.mxu1 %vm2568_vm0, %v7487_v25  ;;  %2910 = vmatprep.subr.bf16.mxu0 %v5870_v17  ;;  %v5942_v17 = vcombine.high %v240_v11, %v244_v12  ;;  %v216_v40 = vld [vmem:[#allocation5 + $0x210] sm:$0xff] }
 0x14a   :  { %2942 = vmatpush1.bf16.msra.mxu1 %v6037_v15  ;;  %2973 = vmatprep.mubr.bf16.mxu1 %v7451_v59  ;;  %v5981_v15 = vcombine.low %v280_v1, %v284_v2  ;;  %v220_v41 = vld [vmem:[#allocation5 + $0x230] sm:$0xff] }
 0x14b   :  { %2943 = vmatprep.subr.bf16.mxu1 %v6030_v24  ;;  %v396_v24 = vld [vmem:[#allocation5 + $0x7b0] sm:$0xff]  ;;  %v5918_v46 = vcombine.high %v216_v40, %v220_v41 }
 0x14c   :  { %2911 = vmatpush1.bf16.msra.mxu0 %v5869_v26  ;;  %v5941_v26 = vcombine.low %v240_v11, %v244_v12  ;;  %v6094_v28 = vcombine.high %v392_v23, %v396_v24  ;;  %v464_v48 = vld [vmem:[#allocation5 + $0x9d0] sm:$0xff] }
 0x14d   :  { %2912 = vmatprep.subr.bf16.mxu0 %v5862_v27  ;;  %v5934_v27 = vcombine.high %v232_v18, %v236_v20  ;;  %v360_v1 = vld [vmem:[#allocation5 + $0x690] sm:$0xff] }
 0x14e   :  { %2944 = vmatpush1.bf16.msra.mxu1 %v6029_v54  ;;  %v6101_v54 = vcombine.low %v400_v9, %v404_v10  ;;  %v364_v2 = vld [vmem:[#allocation5 + $0x6b0] sm:$0xff] }
 0x14f   :  { %2945 = vmatprep.subr.bf16.mxu1 %v6022_v34  ;;  %v388_v34 = vld [vmem:[#allocation5 + $0x770] sm:$0xff] }
 0x150   :  { %2913 = vmatpush1.bf16.msra.mxu0 %v5861_v35  ;;  %v5933_v35 = vcombine.low %v232_v18, %v236_v20  ;;  %v6086_v39 = vcombine.high %v384_v33, %v388_v34  ;;  %v6085_v45 = vcombine.low %v384_v33, %v388_v34  ;;  %v448_v9 = vld [vmem:[#allocation5 + $0x950] sm:$0xff]  ;;  %v6061_v20 = vcombine.low %v360_v1, %v364_v2 }
 0x151   :  { %2914 = vmatprep.subr.bf16.mxu0 %v5854_v37  ;;  %v6093_v37 = vcombine.low %v392_v23, %v396_v24  ;;  %v452_v10 = vld [vmem:[#allocation5 + $0x970] sm:$0xff] }
 0x152   :  { %2946 = vmatpush1.bf16.msra.mxu1 %v6021_v36  ;;  %v544_v36 = vlaneseq  ;;  %v352_v12 = vld [vmem:[#allocation5 + $0x650] sm:$0xff] }
 0x153   :  { %2947 = vmatprep.subr.bf16.mxu1 %v6014_v21  ;;  %v376_v21 = vld [vmem:[#allocation5 + $0x710] sm:$0xff] }
 0x154   :  { %2915 = vmatpush1.bf16.msra.mxu0 %v5853_v42  ;;  %v380_v42 = vld [vmem:[#allocation5 + $0x730] sm:$0xff] }
 0x155   :  { %2916 = vmatprep.subr.bf16.mxu0 %v5974_v44  ;;  %v7493_v44 = vshrl.u32 %v544_v36, 7  ;;  %v6078_v47 = vcombine.high %v376_v21, %v380_v42  ;;  %v6077_v56 = vcombine.low %v376_v21, %v380_v42  ;;  %v432_v42 = vld [vmem:[#allocation5 + $0x8d0] sm:$0xff] }
 0x156   :  { %2948 = vmatpush1.bf16.msra.mxu1 %v6013_v43  ;;  %v5925_v43 = vcombine.low %v224_v31, %v228_v32  ;;  %v344_v31 = vld [vmem:[#allocation5 + $0x610] sm:$0xff] }
 0x157   :  { %2949 = vmatprep.subr.bf16.mxu1 %v6006_v49  ;;  %v468_v49 = vld [vmem:[#allocation5 + $0x9f0] sm:$0xff]  ;;  %v7496_v55 = vsub.s32 0, %v7493_v44 }
 0x158   :  { %2917 = vmatpush2.bf16.msra.mxu0 %v5973_v50  ;;  %v368_v50 = vld [vmem:[#allocation5 + $0x6d0] sm:$0xff]  ;;  %v6166_v60 = vcombine.high %v464_v48, %v468_v49  ;;  %v6165_v4 = vcombine.low %v464_v48, %v468_v49 }
 0x159   :  { %2918 = vmatprep.subr.bf16.mxu0 %v5966_v52  ;;  %v5917_v52 = vcombine.low %v216_v40, %v220_v41  ;;  %v547_v3 = vrot.slane %v7498_v57, %v7496_v55  ;;  %v348_v32 = vld [vmem:[#allocation5 + $0x630] sm:$0xff] }
 0x15a   :  { %2950 = vmatpush1.bf16.msra.mxu1 %v6005_v51  ;;  %v372_v51 = vld [vmem:[#allocation5 + $0x6f0] sm:$0xff]  ;;  %v6046_v21 = vcombine.high %v344_v31, %v348_v32  ;;  %v6045_v49 = vcombine.low %v344_v31, %v348_v32 }
 0x15b   :  { %2951 = vmatprep.subr.bf16.mxu1 %v5998_v61  ;;  %v6070_v61 = vcombine.high %v368_v50, %v372_v51  ;;  %v520_v32 = vld [vmem:[#allocation5 + $0xb90] sm:$0xff] }
 0x15c   :  { %2919 = vmatpush2.bf16.msra.mxu0 %v5965_v62  ;;  %v7501_v62 = vsub.s32 1, %v7493_v44 }
 0x15d   :  { %2920 = vmatprep.subr.bf16.mxu0 %v5958_v0  ;;  %v460_v0 = vld [vmem:[#allocation5 + $0x9b0] sm:$0xff] }
 0x15e   :  { %2952 = vmatpush1.bf16.msra.mxu1 %v5997_v63  ;;  %v456_v63 = vld [vmem:[#allocation5 + $0x990] sm:$0xff] }
 0x15f   :  { %2953 = vmatprep.subr.bf16.mxu1 %v5990_v5  ;;  %v6069_v5 = vcombine.low %v368_v50, %v372_v51 }
 0x160   :  { %2921 = vmatpush2.bf16.msra.mxu0 %v5957_v6  ;;  %v6158_v6 = vcombine.high %v456_v63, %v460_v0 }
 0x161   :  { %2922 = vmatprep.subr.bf16.mxu0 %v5950_v8  ;;  %v6062_v8 = vcombine.high %v360_v1, %v364_v2 }
 0x162   :  { %2954 = vmatpush1.bf16.msra.mxu1 %v5989_v7  ;;  %v551_v7 = vrot.slane %v7498_v57, %v7501_v62 }
 0x163   :  { %2955 = vmatprep.subr.bf16.mxu1 %v5982_v13  ;;  %v356_v13 = vld [vmem:[#allocation5 + $0x670] sm:$0xff] }
 0x164   :  { %2923 = vmatpush2.bf16.msra.mxu0 %v5949_v14 }
 0x165   :  { %2924 = vmatprep.subr.bf16.mxu0 %v5942_v17  ;;  %v6157_v17 = vcombine.low %v456_v63, %v460_v0  ;;  %v213_v63 = vld [vmem:[#allocation5 + $0x1f8] sm:$0xff] }
 0x166   :  { %2956 = vmatpush1.bf16.msra.mxu1 %v5981_v15 }
 0x167   :  { %2957 = vmatprep.subr.bf16.mxu1 %v6102_v22  ;;  %v6150_v22 = vcombine.high %v448_v9, %v452_v10 }
 0x168   :  { %2925 = vmatpush2.bf16.msra.mxu0 %v5941_v26 }
 0x169   :  { %2926 = vmatprep.subr.bf16.mxu0 %v5934_v27  ;;  %v440_v27 = vld [vmem:[#allocation5 + $0x910] sm:$0xff] }
 0x16a   :  { %2958 = vmatpush2.bf16.msra.mxu1 %v6101_v54  ;;  %v6054_v54 = vcombine.high %v352_v12, %v356_v13 }
 0x16b   :  { %2959 = vmatprep.subr.bf16.mxu1 %v6094_v28  ;;  %v444_v28 = vld [vmem:[#allocation5 + $0x930] sm:$0xff] }
 0x16c   :  { %2927 = vmatpush2.bf16.msra.mxu0 %v5933_v35  ;;  %v6141_v48 = vcombine.low %v440_v27, %v444_v28 }
 0x16d   :  { %2928 = vmatprep.subr.bf16.mxu0 %v5926_v38  ;;  %v6053_v38 = vcombine.low %v352_v12, %v356_v13  ;;  %v201_v12 = vld [vmem:[#allocation5 + $0x198] sm:$0xff] }
 0x16e   :  { %2960 = vmatpush2.bf16.msra.mxu1 %v6093_v37  ;;  %v6149_v37 = vcombine.low %v448_v9, %v452_v10  ;;  %v408_v10 = vld [vmem:[#allocation5 + $0x810] sm:$0xff]  ;;  %v205_v13 = vld [vmem:[#allocation5 + $0x1b8] sm:$0xff] }
 0x16f   :  { %2961 = vmatprep.subr.bf16.mxu1 %v6086_v39  ;;  %v6142_v39 = vcombine.high %v440_v27, %v444_v28  ;;  %v5903_v27 = vcombine.low %v201_v12, %v205_v13 }
 0x170   :  { %2929 = vmatpush2.bf16.msra.mxu0 %v5925_v43  ;;  %v436_v43 = vld [vmem:[#allocation5 + $0x8f0] sm:$0xff] }
 0x171   :  { %2930 = vmatprep.subr.bf16.mxu0 %v5918_v46  ;;  %v540_v46 = vld [vmem:[#allocation5 + $0xc30] sm:$0xff]  ;;  %v6134_v50 = vcombine.high %v432_v42, %v436_v43  ;;  %v6133_v1 = vcombine.low %v432_v42, %v436_v43  ;;  %v177_v42 = vld [vmem:[#allocation5 + $0xd8] sm:$0xff] }
 0x172   :  { %2962 = vmatpush2.bf16.msra.mxu1 %v6085_v45  ;;  %v536_v45 = vld [vmem:[#allocation5 + $0xc10] sm:$0xff]  ;;  %v181_v43 = vld [vmem:[#allocation5 + $0xf8] sm:$0xff] }
 0x173   :  { %2963 = vmatprep.subr.bf16.mxu1 %v6078_v47  ;;  %v6237_v2 = vcombine.low %v536_v45, %v540_v46 }
 0x174   :  { %2931 = vmatpush2.bf16.msra.mxu0 %v5917_v52  ;;  %v6238_v52 = vcombine.high %v536_v45, %v540_v46 }
 0x175   :  { %2982 = vmatprep.subr.bf16.mxu0 %v6166_v60  ;;  %v428_v60 = vld [vmem:[#allocation5 + $0x8b0] sm:$0xff] }
 0x176   :  { %2964 = vmatpush2.bf16.msra.mxu1 %v6077_v56  ;;  %v424_v56 = vld [vmem:[#allocation5 + $0x890] sm:$0xff] }
 0x177   :  { %2965 = vmatprep.subr.bf16.mxu1 %v6070_v61  ;;  %v2606_v11 = vpop.f32.mrf.mxu0  ;;  %2933 = vmatmul.mubr.bf16.vlgmr.msra.gmra.mxu0 %v7457_v16  ;;  %v209_v61 = vld [vmem:[#allocation5 + $0x1d8] sm:$0xff] }
 0x178   :  { %v2607_v14 = vadd.f32 %v2606_v11, %v547_v3  ;;  %2983 = vmatpush1.bf16.msra.mxu0 %v6165_v4  ;;  %3014 = vmatprep.mubr.bf16.mxu0 %v7468_v53  ;;  %v6126_v3 = vcombine.high %v424_v56, %v428_v60  ;;  %v412_v11 = vld [vmem:[#allocation5 + $0x830] sm:$0xff] }
 0x179   :  { %v2647_v15 = vpop.f32.mrf.mxu1  ;;  %v2608_v18 = vpop.f32.mrf.mxu0  ;;  %2984 = vmatprep.subr.bf16.mxu0 %v6158_v6  ;;  %v416_v6 = vld [vmem:[#allocation5 + $0x850] sm:$0xff] }
 0x17a   :  { %2966 = vmatpush2.bf16.msra.mxu1 %v6069_v5  ;;  %v7509_v23 = vadd.f32 %v2647_v15, %v2607_v14  ;;  %v2609_v24 = vadd.f32 %v2608_v18, %v551_v7  ;;  %v5912_v5 = vcombine.high %v209_v61, %v213_v63  ;;  %v420_v7 = vld [vmem:[#allocation5 + $0x870] sm:$0xff]  ;;  %v5911_v15 = vcombine.low %v209_v61, %v213_v63 }
 0x17b   :  { %v2649_v26 = vpop.f32.mrf.mxu1  ;;  %2967 = vmatprep.subr.bf16.mxu1 %v6062_v8  ;;  %v2610_v33 = vpop.f32.mrf.mxu0  ;;  %v6125_v8 = vcombine.low %v424_v56, %v428_v60  ;;  %v6118_v9 = vcombine.high %v416_v6, %v420_v7  ;;  %v6117_v14 = vcombine.low %v416_v6, %v420_v7  ;;  %v5904_v18 = vcombine.high %v201_v12, %v205_v13  ;;  %v173_v56 = vld [vmem:[#allocation5 + $0xb8] sm:$0xff] }
 0x17c   :  { %v7511_v34 = vadd.f32 %v2649_v26, %v2609_v24  ;;  %2985 = vmatpush1.bf16.msra.mxu0 %v6157_v17  ;;  %v6110_v17 = vcombine.high %v408_v10, %v412_v11  ;;  %v193_v24 = vld [vmem:[#allocation5 + $0x158] sm:$0xff]  ;;  %v524_v33 = vld [vmem:[#allocation5 + $0xbb0] sm:$0xff]  ;;  %v5879_v61 = vcombine.low %v177_v42, %v181_v43 }
 0x17d   :  { %v2651_v35 = vpop.f32.mrf.mxu1  ;;  %2986 = vmatprep.subr.bf16.mxu0 %v6150_v22  ;;  %v2611_v40 = vpop.f32.mrf.mxu0  ;;  %v532_v22 = vld [vmem:[#allocation5 + $0xbf0] sm:$0xff]  ;;  %v197_v26 = vld [vmem:[#allocation5 + $0x178] sm:$0xff]  ;;  %v6221_v45 = vcombine.low %v520_v32, %v524_v33 }
 0x17e   :  { %2968 = vmatpush2.bf16.msra.mxu1 %v6061_v20  ;;  %v528_v20 = vld [vmem:[#allocation5 + $0xbd0] sm:$0xff]  ;;  %v5896_v31 = vcombine.high %v193_v24, %v197_v26  ;;  %v185_v35 = vld [vmem:[#allocation5 + $0x118] sm:$0xff] }
 0x17f   :  { %v2652_v41 = vpop.f32.mrf.mxu1  ;;  %2969 = vmatprep.subr.bf16.mxu1 %v6054_v54  ;;  %v6109_v54 = vcombine.low %v408_v10, %v412_v11  ;;  %v6230_v28 = vcombine.high %v528_v20, %v532_v22  ;;  %v492_v10 = vld [vmem:[#allocation5 + $0xab0] sm:$0xff]  ;;  %v153_v11 = vld [vmem:[#allocation5 + $0x18] sm:$0xff] }
 0x180   :  { %2987 = vmatpush1.bf16.msra.mxu0 %v6149_v37  ;;  %v189_v37 = vld [vmem:[#allocation5 + $0x138] sm:$0xff]  ;;  %v512_v41 = vld [vmem:[#allocation5 + $0xb50] sm:$0xff] }
 0x181   :  { %v7513_v47 = vpop.f32.mrf.mxu1  ;;  %2988 = vmatprep.subr.bf16.mxu0 %v6142_v39  ;;  %v5895_v39 = vcombine.low %v193_v24, %v197_v26  ;;  %v5888_v40 = vcombine.high %v185_v35, %v189_v37  ;;  %v5887_v46 = vcombine.low %v185_v35, %v189_v37  ;;  %v157_v12 = vld [vmem:[#allocation5 + $0x38] sm:$0xff] }
 0x182   :  { %2970 = vmatpush2.bf16.msra.mxu1 %v6053_v38  ;;  %v6229_v38 = vcombine.low %v528_v20, %v532_v22  ;;  %v484_v20 = vld [vmem:[#allocation5 + $0xa70] sm:$0xff]  ;;  %v273_v22 = vld [vmem:[#allocation5 + $0x3d8] sm:$0xff] }
 0x183   :  { %v7515_v51 = vpop.f32.mrf.mxu1  ;;  %2971 = vmatprep.subr.bf16.mxu1 %v6046_v21  ;;  %v516_v21 = vld [vmem:[#allocation5 + $0xb70] sm:$0xff]  ;;  %v277_v24 = vld [vmem:[#allocation5 + $0x3f8] sm:$0xff] }
 0x184   :  { %2989 = vmatpush1.bf16.msra.mxu0 %v6141_v48  ;;  %v5880_v48 = vcombine.high %v177_v42, %v181_v43  ;;  %v6213_v60 = vcombine.low %v512_v41, %v516_v21  ;;  %v269_v35 = vld [vmem:[#allocation5 + $0x3b8] sm:$0xff] }
 0x185   :  { %v2733_v0 = vpop.f32.mrf.mxu1  ;;  %2990 = vmatprep.subr.bf16.mxu0 %v6134_v50  ;;  %v508_v50 = vld [vmem:[#allocation5 + $0xb30] sm:$0xff]  ;;  %v261_v42 = vld [vmem:[#allocation5 + $0x378] sm:$0xff] }
 0x186   :  { %2972 = vmatpush2.bf16.msra.mxu1 %v6045_v49  ;;  %v504_v49 = vld [vmem:[#allocation5 + $0xb10] sm:$0xff] }
 0x187   :  { %v2734_v4 = vpop.f32.mrf.mxu1  ;;  %3037 = vmatprep.subr.bf16.mxu1 %v6238_v52  ;;  %v169_v52 = vld [vmem:[#allocation5 + $0x98] sm:$0xff]  ;;  %v6206_v63 = vcombine.high %v504_v49, %v508_v50 }
 0x188   :  { %2991 = vmatpush1.bf16.msra.mxu0 %v6133_v1  ;;  %v5872_v0 = vcombine.high %v169_v52, %v173_v56  ;;  %v496_v1 = vld [vmem:[#allocation5 + $0xad0] sm:$0xff]  ;;  %v165_v4 = vld [vmem:[#allocation5 + $0x78] sm:$0xff]  ;;  %v5871_v6 = vcombine.low %v169_v52, %v173_v56 }
 0x189   :  { %2974 = vmatmul.mubr.bf16.vlgmr.msra.gmra.mxu1 %v7461_v19  ;;  %2992 = vmatprep.subr.bf16.mxu0 %v6126_v3  ;;  %v161_v3 = vld [vmem:[#allocation5 + $0x58] sm:$0xff] }
 0x18a   :  { %3038 = vmatpush1.bf16.msra.mxu1 %v6237_v2  ;;  %3055 = vmatprep.mubr.bf16.mxu1 %v7362_v30  ;;  %v500_v2 = vld [vmem:[#allocation5 + $0xaf0] sm:$0xff]  ;;  %v253_v52 = vld [vmem:[#allocation5 + $0x338] sm:$0xff] }
 0x18b   :  { %3064 = vmatprep.subr.bf16.mxu1 %v5912_v5  ;;  %v6205_v5 = vcombine.low %v504_v49, %v508_v50  ;;  %v6198_v7 = vcombine.high %v496_v1, %v500_v2  ;;  %v6197_v13 = vcombine.low %v496_v1, %v500_v2  ;;  %v333_v49 = vld [vmem:[#allocation5 + $0x5b8] sm:$0xff] }
 0x18c   :  { %2993 = vmatpush1.bf16.msra.mxu0 %v6125_v8  ;;  %v5864_v8 = vcombine.high %v161_v3, %v165_v4  ;;  %v249_v50 = vld [vmem:[#allocation5 + $0x318] sm:$0xff] }
 0x18d   :  { %2994 = vmatprep.subr.bf16.mxu0 %v6118_v9  ;;  %v488_v9 = vld [vmem:[#allocation5 + $0xa90] sm:$0xff]  ;;  %v325_v1 = vld [vmem:[#allocation5 + $0x578] sm:$0xff] }
 0x18e   :  { %v6189_v26 = vcombine.low %v488_v9, %v492_v10 }
 0x190   :  { %2995 = vmatpush1.bf16.msra.mxu0 %v6117_v14  ;;  %v5863_v14 = vcombine.low %v161_v3, %v165_v4  ;;  %v241_v3 = vld [vmem:[#allocation5 + $0x2d8] sm:$0xff] }
 0x191   :  { %6243 = vmatmul.mubr.msk.bf16.vlgmr.msra.gmra.mxu1 %vm2568_vm0, %v7487_v25  ;;  %2996 = vmatprep.subr.bf16.mxu0 %v6110_v17  ;;  %v6222_v25 = vcombine.high %v520_v32, %v524_v33  ;;  %v5856_v17 = vcombine.high %v153_v11, %v157_v12  ;;  %v476_v32 = vld [vmem:[#allocation5 + $0xa30] sm:$0xff]  ;;  %v265_v33 = vld [vmem:[#allocation5 + $0x398] sm:$0xff] }
 0x192   :  { %3065 = vmatpush1.bf16.msra.mxu1 %v5911_v15  ;;  %3096 = vmatprep.mubr.bf16.mxu1 %v7447_v58  ;;  %v6214_v58 = vcombine.high %v512_v41, %v516_v21  ;;  %v6190_v15 = vcombine.high %v488_v9, %v492_v10  ;;  %v341_v41 = vld [vmem:[#allocation5 + $0x5f8] sm:$0xff] }
 0x193   :  { %3066 = vmatprep.subr.bf16.mxu1 %v5904_v18  ;;  %v480_v18 = vld [vmem:[#allocation5 + $0xa50] sm:$0xff]  ;;  %v257_v21 = vld [vmem:[#allocation5 + $0x358] sm:$0xff] }
 0x194   :  { %2997 = vmatpush1.bf16.msra.mxu0 %v6109_v54  ;;  %v5855_v54 = vcombine.low %v153_v11, %v157_v12  ;;  %v6181_v37 = vcombine.low %v480_v18, %v484_v20  ;;  %v245_v4 = vld [vmem:[#allocation5 + $0x2f8] sm:$0xff] }
 0x195   :  { %2998 = vmatprep.subr.bf16.mxu0 %v6230_v28  ;;  %v5976_v28 = vcombine.high %v273_v22, %v277_v24  ;;  %v5944_v12 = vcombine.high %v241_v3, %v245_v4 }
 0x196   :  { %3067 = vmatpush1.bf16.msra.mxu1 %v5903_v27  ;;  %v6182_v27 = vcombine.high %v480_v18, %v484_v20  ;;  %v5943_v20 = vcombine.low %v241_v3, %v245_v4 }
 0x197   :  { %3068 = vmatprep.subr.bf16.mxu1 %v5896_v31  ;;  %v472_v31 = vld [vmem:[#allocation5 + $0xa10] sm:$0xff] }
 0x198   :  { %2999 = vmatpush2.bf16.msra.mxu0 %v6229_v38  ;;  %v5975_v38 = vcombine.low %v273_v22, %v277_v24  ;;  %v6173_v43 = vcombine.low %v472_v31, %v476_v32 }
 0x199   :  { %3000 = vmatprep.subr.bf16.mxu0 %v6222_v25  ;;  %v5968_v25 = vcombine.high %v265_v33, %v269_v35 }
 0x19a   :  { %3069 = vmatpush1.bf16.msra.mxu1 %v5895_v39  ;;  %v6174_v39 = vcombine.high %v472_v31, %v476_v32 }
 0x19b   :  { %3070 = vmatprep.subr.bf16.mxu1 %v5888_v40  ;;  %v337_v40 = vld [vmem:[#allocation5 + $0x5d8] sm:$0xff] }
 0x19c   :  { %3001 = vmatpush2.bf16.msra.mxu0 %v6221_v45  ;;  %v5967_v45 = vcombine.low %v265_v33, %v269_v35  ;;  %v6039_v56 = vcombine.low %v337_v40, %v341_v41 }
 0x19d   :  { %3002 = vmatprep.subr.bf16.mxu0 %v6214_v58  ;;  %v5960_v58 = vcombine.high %v257_v21, %v261_v42 }
 0x19e   :  { %3071 = vmatpush1.bf16.msra.mxu1 %v5887_v46  ;;  %v6040_v46 = vcombine.high %v337_v40, %v341_v41 }
 0x19f   :  { %3072 = vmatprep.subr.bf16.mxu1 %v5880_v48  ;;  %v329_v48 = vld [vmem:[#allocation5 + $0x598] sm:$0xff] }
 0x1a0   :  { %3003 = vmatpush2.bf16.msra.mxu0 %v6213_v60  ;;  %v5959_v60 = vcombine.low %v257_v21, %v261_v42 }
 0x1a1   :  { %3004 = vmatprep.subr.bf16.mxu0 %v6206_v63  ;;  %v5952_v63 = vcombine.high %v249_v50, %v253_v52 }
 0x1a2   :  { %3073 = vmatpush1.bf16.msra.mxu1 %v5879_v61  ;;  %v6032_v61 = vcombine.high %v329_v48, %v333_v49 }
 0x1a3   :  { %3074 = vmatprep.subr.bf16.mxu1 %v5872_v0  ;;  %v321_v0 = vld [vmem:[#allocation5 + $0x558] sm:$0xff] }
 0x1a4   :  { %3005 = vmatpush2.bf16.msra.mxu0 %v6205_v5  ;;  %v6024_v9 = vcombine.high %v321_v0, %v325_v1 }
 0x1a5   :  { %3006 = vmatprep.subr.bf16.mxu0 %v6198_v7  ;;  %v5951_v7 = vcombine.low %v249_v50, %v253_v52 }
 0x1a6   :  { %3075 = vmatpush1.bf16.msra.mxu1 %v5871_v6  ;;  %v6031_v6 = vcombine.low %v329_v48, %v333_v49  ;;  %v465_v48 = vld [vmem:[#allocation5 + $0x9d8] sm:$0xff] }
 0x1a7   :  { %3076 = vmatprep.subr.bf16.mxu1 %v5864_v8  ;;  %v469_v49 = vld [vmem:[#allocation5 + $0x9f8] sm:$0xff] }
 0x1a8   :  { %3007 = vmatpush2.bf16.msra.mxu0 %v6197_v13  ;;  %v313_v13 = vld [vmem:[#allocation5 + $0x518] sm:$0xff]  ;;  %v6167_v3 = vcombine.low %v465_v48, %v469_v49 }
 0x1a9   :  { %3008 = vmatprep.subr.bf16.mxu0 %v6190_v15  ;;  %v233_v15 = vld [vmem:[#allocation5 + $0x298] sm:$0xff] }
 0x1aa   :  { %3077 = vmatpush1.bf16.msra.mxu1 %v5863_v14  ;;  %v317_v14 = vld [vmem:[#allocation5 + $0x538] sm:$0xff] }
 0x1ab   :  { %3078 = vmatprep.subr.bf16.mxu1 %v5856_v17  ;;  %v6016_v22 = vcombine.high %v313_v13, %v317_v14  ;;  %v6015_v31 = vcombine.low %v313_v13, %v317_v14 }
 0x1ac   :  { %3009 = vmatpush2.bf16.msra.mxu0 %v6189_v26  ;;  %v305_v26 = vld [vmem:[#allocation5 + $0x4d8] sm:$0xff] }
 0x1ad   :  { %3010 = vmatprep.subr.bf16.mxu0 %v6182_v27  ;;  %v229_v27 = vld [vmem:[#allocation5 + $0x278] sm:$0xff] }
 0x1ae   :  { %3079 = vmatpush1.bf16.msra.mxu1 %v5855_v54  ;;  %v225_v54 = vld [vmem:[#allocation5 + $0x258] sm:$0xff] }
 0x1af   :  { %3080 = vmatprep.subr.bf16.mxu1 %v5976_v28  ;;  %v5928_v35 = vcombine.high %v225_v54, %v229_v27  ;;  %v5927_v21 = vcombine.low %v225_v54, %v229_v27  ;;  %v437_v54 = vld [vmem:[#allocation5 + $0x8f8] sm:$0xff] }
 0x1b0   :  { %3011 = vmatpush2.bf16.msra.mxu0 %v6181_v37  ;;  %v297_v37 = vld [vmem:[#allocation5 + $0x498] sm:$0xff] }
 0x1b1   :  { %3012 = vmatprep.subr.bf16.mxu0 %v6174_v39  ;;  %v217_v39 = vld [vmem:[#allocation5 + $0x218] sm:$0xff] }
 0x1b2   :  { %3081 = vmatpush2.bf16.msra.mxu1 %v5975_v38  ;;  %v301_v38 = vld [vmem:[#allocation5 + $0x4b8] sm:$0xff] }
 0x1b3   :  { %3082 = vmatprep.subr.bf16.mxu1 %v5968_v25  ;;  %v221_v25 = vld [vmem:[#allocation5 + $0x238] sm:$0xff]  ;;  %v6000_v42 = vcombine.high %v297_v37, %v301_v38  ;;  %v5999_v50 = vcombine.low %v297_v37, %v301_v38 }
 0x1b4   :  { %3013 = vmatpush2.bf16.msra.mxu0 %v6173_v43  ;;  %v5919_v52 = vcombine.low %v217_v39, %v221_v25  ;;  %v425_v37 = vld [vmem:[#allocation5 + $0x898] sm:$0xff] }
 0x1b5   :  { %3105 = vmatprep.subr.bf16.mxu0 %v6040_v46  ;;  %v289_v46 = vld [vmem:[#allocation5 + $0x458] sm:$0xff] }
 0x1b6   :  { %3083 = vmatpush2.bf16.msra.mxu1 %v5967_v45  ;;  %v5920_v45 = vcombine.high %v217_v39, %v221_v25  ;;  %v429_v38 = vld [vmem:[#allocation5 + $0x8b8] sm:$0xff] }
 0x1b7   :  { %3084 = vmatprep.subr.bf16.mxu1 %v5960_v58  ;;  %v2688_v2 = vpop.f32.mrf.mxu0  ;;  %3015 = vmatmul.mubr.bf16.vlgmr.msra.gmra.mxu0 %v7477_v29  ;;  %v293_v58 = vld [vmem:[#allocation5 + $0x478] sm:$0xff] }
 0x1b8   :  { %v2689_v5 = vadd.f32 %v2688_v2, %v7509_v23  ;;  %3106 = vmatpush1.bf16.msra.mxu0 %v6039_v56  ;;  %3137 = vmatprep.mubr.bf16.mxu0 %v7451_v59  ;;  %v237_v23 = vld [vmem:[#allocation5 + $0x2b8] sm:$0xff]  ;;  %v6023_v59 = vcombine.low %v321_v0, %v325_v1  ;;  %v5992_v56 = vcombine.high %v289_v46, %v293_v58 }
 0x1b9   :  { %v2690_v8 = vpop.f32.mrf.mxu0  ;;  %3107 = vmatprep.subr.bf16.mxu0 %v6032_v61  ;;  %v5936_v24 = vcombine.high %v233_v15, %v237_v23  ;;  %v281_v61 = vld [vmem:[#allocation5 + $0x418] sm:$0xff]  ;;  %v5991_v2 = vcombine.low %v289_v46, %v293_v58  ;;  %v6127_v58 = vcombine.low %v425_v37, %v429_v38 }
 0x1ba   :  { %3085 = vmatpush2.bf16.msra.mxu1 %v5959_v60  ;;  %v7526_v10 = vadd.f32 %v7513_v47, %v2689_v5  ;;  %v2691_v11 = vadd.f32 %v2690_v8, %v7511_v34  ;;  %v309_v34 = vld [vmem:[#allocation5 + $0x4f8] sm:$0xff]  ;;  %v6168_v60 = vcombine.high %v465_v48, %v469_v49 }
 0x1bb   :  { %3086 = vmatprep.subr.bf16.mxu1 %v5952_v63  ;;  %v2692_v17 = vpop.f32.mrf.mxu0  ;;  %v6008_v32 = vcombine.high %v305_v26, %v309_v34  ;;  %v6007_v41 = vcombine.low %v305_v26, %v309_v34  ;;  %v285_v63 = vld [vmem:[#allocation5 + $0x438] sm:$0xff] }
 0x1bc   :  { %v7530_v18 = vadd.f32 %v7515_v51, %v2691_v11  ;;  %3108 = vmatpush1.bf16.msra.mxu0 %v6031_v6  ;;  %v5935_v51 = vcombine.low %v233_v15, %v237_v23  ;;  %v457_v0 = vld [vmem:[#allocation5 + $0x998] sm:$0xff]  ;;  %v5984_v4 = vcombine.high %v281_v61, %v285_v63  ;;  %v5983_v11 = vcombine.low %v281_v61, %v285_v63 }
 0x1bd   :  { %3109 = vmatprep.subr.bf16.mxu0 %v6024_v9  ;;  %v2693_v47 = vpop.f32.mrf.mxu0  ;;  %v461_v1 = vld [vmem:[#allocation5 + $0x9b8] sm:$0xff] }
 0x1be   :  { %3087 = vmatpush2.bf16.msra.mxu1 %v5951_v7  ;;  %v6160_v5 = vcombine.high %v457_v0, %v461_v1  ;;  %v401_v6 = vld [vmem:[#allocation5 + $0x7d8] sm:$0xff] }
 0x1bf   :  { %3088 = vmatprep.subr.bf16.mxu1 %v5944_v12  ;;  %v405_v7 = vld [vmem:[#allocation5 + $0x7f8] sm:$0xff]  ;;  %v6159_v12 = vcombine.low %v457_v0, %v461_v1 }
 0x1c0   :  { %3110 = vmatpush1.bf16.msra.mxu0 %v6023_v59  ;;  %v449_v8 = vld [vmem:[#allocation5 + $0x958] sm:$0xff]  ;;  %v6104_v13 = vcombine.high %v401_v6, %v405_v7 }
 0x1c1   :  { %v7532_v28 = vpop.f32.mrf.mxu1  ;;  %3111 = vmatprep.subr.bf16.mxu0 %v6016_v22  ;;  %v453_v9 = vld [vmem:[#allocation5 + $0x978] sm:$0xff] }
 0x1c2   :  { %3089 = vmatpush2.bf16.msra.mxu1 %v5943_v20  ;;  %v6152_v14 = vcombine.high %v449_v8, %v453_v9  ;;  %v393_v15 = vld [vmem:[#allocation5 + $0x798] sm:$0xff]  ;;  %v6103_v20 = vcombine.low %v401_v6, %v405_v7  ;;  %v6151_v22 = vcombine.low %v449_v8, %v453_v9 }
 0x1c3   :  { %v7534_v33 = vpop.f32.mrf.mxu1  ;;  %3090 = vmatprep.subr.bf16.mxu1 %v5936_v24  ;;  %v397_v23 = vld [vmem:[#allocation5 + $0x7b8] sm:$0xff] }
 0x1c4   :  { %3112 = vmatpush1.bf16.msra.mxu0 %v6015_v31  ;;  %v441_v17 = vld [vmem:[#allocation5 + $0x918] sm:$0xff]  ;;  %v6095_v27 = vcombine.low %v393_v15, %v397_v23 }
 0x1c5   :  { %v2774_v40 = vpop.f32.mrf.mxu1  ;;  %3113 = vmatprep.subr.bf16.mxu0 %v6008_v32  ;;  %v445_v59 = vld [vmem:[#allocation5 + $0x938] sm:$0xff] }
 0x1c6   :  { %3091 = vmatpush2.bf16.msra.mxu1 %v5935_v51  ;;  %v6144_v47 = vcombine.high %v441_v17, %v445_v59  ;;  %v385_v24 = vld [vmem:[#allocation5 + $0x758] sm:$0xff]  ;;  %v6143_v31 = vcombine.low %v441_v17, %v445_v59  ;;  %v3229_v59 = vmul.f32 0.2, %v7530_v18 }
 0x1c7   :  { %v2775_v43 = vpop.f32.mrf.mxu1  ;;  %3092 = vmatprep.subr.bf16.mxu1 %v5928_v35  ;;  %v389_v26 = vld [vmem:[#allocation5 + $0x778] sm:$0xff] }
 0x1c8   :  { %3114 = vmatpush1.bf16.msra.mxu0 %v6007_v41  ;;  %v433_v34 = vld [vmem:[#allocation5 + $0x8d8] sm:$0xff]  ;;  %v6087_v39 = vcombine.low %v385_v24, %v389_v26  ;;  %v6128_v41 = vcombine.high %v425_v37, %v429_v38 }
 0x1c9   :  { %3115 = vmatprep.subr.bf16.mxu0 %v6000_v42  ;;  %v6136_v51 = vcombine.high %v433_v34, %v437_v54  ;;  %v377_v32 = vld [vmem:[#allocation5 + $0x718] sm:$0xff]  ;;  %v6135_v25 = vcombine.low %v433_v34, %v437_v54 }
 0x1ca   :  { %3093 = vmatpush2.bf16.msra.mxu1 %v5927_v21  ;;  %v381_v35 = vld [vmem:[#allocation5 + $0x738] sm:$0xff] }
 0x1cb   :  { %3094 = vmatprep.subr.bf16.mxu1 %v5920_v45  ;;  %v6080_v40 = vcombine.high %v377_v32, %v381_v35  ;;  %v369_v21 = vld [vmem:[#allocation5 + $0x6d8] sm:$0xff]  ;;  %v6079_v46 = vcombine.low %v377_v32, %v381_v35 }
 0x1cc   :  { %3116 = vmatpush1.bf16.msra.mxu0 %v5999_v50  ;;  %v373_v42 = vld [vmem:[#allocation5 + $0x6f8] sm:$0xff] }
 0x1cd   :  { %3117 = vmatprep.subr.bf16.mxu0 %v5992_v56  ;;  %v417_v43 = vld [vmem:[#allocation5 + $0x858] sm:$0xff]  ;;  %v6072_v48 = vcombine.high %v369_v21, %v373_v42  ;;  %v6071_v61 = vcombine.low %v369_v21, %v373_v42 }
 0x1ce   :  { %3095 = vmatpush2.bf16.msra.mxu1 %v5919_v52  ;;  %v421_v45 = vld [vmem:[#allocation5 + $0x878] sm:$0xff] }
 0x1cf   :  { %3146 = vmatprep.subr.bf16.mxu1 %v6168_v60  ;;  %v6120_v49 = vcombine.high %v417_v43, %v421_v45  ;;  %v361_v50 = vld [vmem:[#allocation5 + $0x698] sm:$0xff]  ;;  %v6119_v63 = vcombine.low %v417_v43, %v421_v45 }
 0x1d0   :  { %3118 = vmatpush1.bf16.msra.mxu0 %v5991_v2  ;;  %v365_v52 = vld [vmem:[#allocation5 + $0x6b8] sm:$0xff] }
 0x1d1   :  { %3097 = vmatmul.mubr.bf16.vlgmr.msra.gmra.mxu1 %v7457_v16  ;;  %3119 = vmatprep.subr.bf16.mxu0 %v5984_v4  ;;  %v6096_v16 = vcombine.high %v393_v15, %v397_v23  ;;  %v409_v56 = vld [vmem:[#allocation5 + $0x818] sm:$0xff]  ;;  %v6064_v0 = vcombine.high %v361_v50, %v365_v52  ;;  %v6063_v6 = vcombine.low %v361_v50, %v365_v52 }
 0x1d2   :  { %3147 = vmatpush1.bf16.msra.mxu1 %v6167_v3  ;;  %3178 = vmatprep.mubr.bf16.mxu1 %v7468_v53  ;;  %v6088_v53 = vcombine.high %v385_v24, %v389_v26  ;;  %v413_v60 = vld [vmem:[#allocation5 + $0x838] sm:$0xff] }
 0x1d3   :  { %3148 = vmatprep.subr.bf16.mxu1 %v6160_v5  ;;  %v6112_v1 = vcombine.high %v409_v56, %v413_v60  ;;  %v353_v2 = vld [vmem:[#allocation5 + $0x658] sm:$0xff]  ;;  %v6111_v7 = vcombine.low %v409_v56, %v413_v60 }
 0x1d4   :  { %3120 = vmatpush1.bf16.msra.mxu0 %v5983_v11  ;;  %v357_v3 = vld [vmem:[#allocation5 + $0x678] sm:$0xff] }
 0x1d5   :  { %3121 = vmatprep.subr.bf16.mxu0 %v6104_v13  ;;  %v529_v4 = vld [vmem:[#allocation5 + $0xbd8] sm:$0xff]  ;;  %v6056_v8 = vcombine.high %v353_v2, %v357_v3  ;;  %v6055_v15 = vcombine.low %v353_v2, %v357_v3 }
 0x1d6   :  { %3149 = vmatpush1.bf16.msra.mxu1 %v6159_v12  ;;  %v533_v5 = vld [vmem:[#allocation5 + $0xbf8] sm:$0xff] }
 0x1d7   :  { %3150 = vmatprep.subr.bf16.mxu1 %v6152_v14  ;;  %v6232_v9 = vcombine.high %v529_v4, %v533_v5  ;;  %v345_v11 = vld [vmem:[#allocation5 + $0x618] sm:$0xff]  ;;  %v6231_v23 = vcombine.low %v529_v4, %v533_v5 }
 0x1d8   :  { %3122 = vmatpush2.bf16.msra.mxu0 %v6103_v20  ;;  %v349_v12 = vld [vmem:[#allocation5 + $0x638] sm:$0xff]  ;;  %v554_v20 = vsub.s32 2, %v7493_v44 }
 0x1d9   :  { %3123 = vmatprep.subr.bf16.mxu0 %v6096_v16  ;;  %v521_v13 = vld [vmem:[#allocation5 + $0xb98] sm:$0xff]  ;;  %v6048_v17 = vcombine.high %v345_v11, %v349_v12  ;;  %v6047_v24 = vcombine.low %v345_v11, %v349_v12 }
 0x1da   :  { %3151 = vmatpush1.bf16.msra.mxu1 %v6151_v22  ;;  %v525_v14 = vld [vmem:[#allocation5 + $0xbb8] sm:$0xff]  ;;  %v555_v54 = vrot.slane %v7498_v57, %v554_v20 }
 0x1db   :  { %3152 = vmatprep.subr.bf16.mxu1 %v6144_v47  ;;  %v6224_v22 = vcombine.high %v521_v13, %v525_v14  ;;  %v513_v16 = vld [vmem:[#allocation5 + $0xb58] sm:$0xff]  ;;  %v6223_v26 = vcombine.low %v521_v13, %v525_v14 }
 0x1dc   :  { %3124 = vmatpush2.bf16.msra.mxu0 %v6095_v27  ;;  %v517_v47 = vld [vmem:[#allocation5 + $0xb78] sm:$0xff]  ;;  %v2771_v38 = vadd.f32 %v7532_v28, %v555_v54 }
 0x1dd   :  { %3125 = vmatprep.subr.bf16.mxu0 %v6088_v53  ;;  %v6632_v34 = vld [vmem:[#allocation8 + $0xe4] ss:$16 sps:$4 sm:$0xff]   ;;  %v6216_v27 = vcombine.high %v513_v16, %v517_v47  ;;  %v6630_v32 = vld [vmem:[#allocation8 + $0xe0] ss:$16 sps:$4 sm:$0xff]   ;;  %v6215_v35 = vcombine.low %v513_v16, %v517_v47 }
 0x1de   :  { %3153 = vmatpush1.bf16.msra.mxu1 %v6143_v31  ;;  %v3237_v31 = vmax.f32 %v7530_v18, %v3229_v59  ;;  %v505_v53 = vld [vmem:[#allocation5 + $0xb18] sm:$0xff] }
 0x1df   :  { %3154 = vmatprep.subr.bf16.mxu1 %v6136_v51  ;;  %v509_v51 = vld [vmem:[#allocation5 + $0xb38] sm:$0xff] }
 0x1e0   :  { %3126 = vmatpush2.bf16.msra.mxu0 %v6087_v39  ;;  %v6635_v37 = vld [vmem:[#allocation8 + $0xc4] ss:$16 sps:$4 sm:$0xff]   ;;  %v6208_v39 = vcombine.high %v505_v53, %v509_v51  ;;  %v6633_v42 = vld [vmem:[#allocation8 + $0xc0] ss:$16 sps:$4 sm:$0xff]   ;;  %v6207_v43 = vcombine.low %v505_v53, %v509_v51 }
 0x1e1   :  { %3127 = vmatprep.subr.bf16.mxu0 %v6080_v40  ;;  %v501_v21 = vld [vmem:[#allocation5 + $0xaf8] sm:$0xff] }
 0x1e2   :  { %3155 = vmatpush1.bf16.msra.mxu1 %v6135_v25  ;;  %v7545_v25 = vpack.c.bf16 %v3237_v31, %v3237_v31  ;;  %v6636_v50 = vld [vmem:[#allocation8 + $0xa0] ss:$16 sps:$4 sm:$0xff]   ;;  %v6641_v56 = vld [vmem:[#allocation8 + $0x84] ss:$16 sps:$4 sm:$0xff]  }
 0x1e3   :  { %3156 = vmatprep.subr.bf16.mxu1 %v6128_v41  ;;  %v497_v41 = vld [vmem:[#allocation5 + $0xad8] sm:$0xff] }
 0x1e4   :  { %3128 = vmatpush2.bf16.msra.mxu0 %v6079_v46  ;;  %v6638_v46 = vld [vmem:[#allocation8 + $0xa4] ss:$16 sps:$4 sm:$0xff]   ;;  %v6200_v28 = vcombine.high %v497_v41, %v501_v21  ;;  %v6199_v52 = vcombine.low %v497_v41, %v501_v21  ;;  %v6639_v2 = vld [vmem:[#allocation8 + $0x80] ss:$16 sps:$4 sm:$0xff]  }
 0x1e5   :  { %3129 = vmatprep.subr.bf16.mxu0 %v6072_v48  ;;  %v493_v48 = vld [vmem:[#allocation5 + $0xab8] sm:$0xff] }
 0x1e6   :  { %3157 = vmatpush1.bf16.msra.mxu1 %v6127_v58  ;;  %v489_v58 = vld [vmem:[#allocation5 + $0xa98] sm:$0xff] }
 0x1e7   :  { %3158 = vmatprep.subr.bf16.mxu1 %v6120_v49  ;;  %v6191_v5 = vcombine.low %v489_v58, %v493_v48  ;;  %v477_v11 = vld [vmem:[#allocation5 + $0xa38] sm:$0xff] }
 0x1e8   :  { %3130 = vmatpush2.bf16.msra.mxu0 %v6071_v61  ;;  %v6192_v61 = vcombine.high %v489_v58, %v493_v48  ;;  %v6642_v13 = vld [vmem:[#allocation8 + $0x60] ss:$16 sps:$4 sm:$0xff]   ;;  %v6659_v21 = vld [vmem:[#allocation8 + $0x1e4] ss:$16 sps:$4 sm:$0xff]  }
 0x1e9   :  { %3131 = vmatprep.subr.bf16.mxu0 %v6064_v0  ;;  %v485_v0 = vld [vmem:[#allocation5 + $0xa78] sm:$0xff] }
 0x1ea   :  { %3159 = vmatpush1.bf16.msra.mxu1 %v6119_v63  ;;  %v481_v63 = vld [vmem:[#allocation5 + $0xa58] sm:$0xff] }
 0x1eb   :  { %3160 = vmatprep.subr.bf16.mxu1 %v6112_v1  ;;  %v541_v16 = vld [vmem:[#allocation5 + $0xc38] sm:$0xff] }
 0x1ec   :  { %3132 = vmatpush2.bf16.msra.mxu0 %v6063_v6  ;;  %v6644_v6 = vld [vmem:[#allocation8 + $0x64] ss:$16 sps:$4 sm:$0xff]   ;;  %v6651_v41 = vld [vmem:[#allocation8] ss:$16 sps:$4 sm:$0xff]  }
 0x1ed   :  { %3133 = vmatprep.subr.bf16.mxu0 %v6056_v8  ;;  %v6184_v8 = vcombine.high %v481_v63, %v485_v0  ;;  %v7131_v58 = vld [vmem:[#allocation2 + $0x18] ss:$0 sps:$4 sm:$0xff]  }
 0x1ee   :  { %3161 = vmatpush1.bf16.msra.mxu1 %v6111_v7  ;;  %v6671_v48 = vld [vmem:[#allocation8 + $0x1a4] ss:$16 sps:$4 sm:$0xff]  }
 0x1ef   :  { %3162 = vmatprep.subr.bf16.mxu1 %v6232_v9  ;;  %v473_v9 = vld [vmem:[#allocation5 + $0xa18] sm:$0xff] }
 0x1f0   :  { %3134 = vmatpush2.bf16.msra.mxu0 %v6055_v15  ;;  %v6183_v15 = vcombine.low %v481_v63, %v485_v0  ;;  %v6175_v54 = vcombine.low %v473_v9, %v477_v11  ;;  %v6672_v63 = vld [vmem:[#allocation8 + $0x280] ss:$16 sps:$4 sm:$0xff]   ;;  %v6683_v0 = vld [vmem:[#allocation8 + $0x164] ss:$16 sps:$4 sm:$0xff]  }
 0x1f1   :  { %3135 = vmatprep.subr.bf16.mxu0 %v6048_v17  ;;  %v6176_v17 = vcombine.high %v473_v9, %v477_v11  ;;  %v6692_v9 = vld [vmem:[#allocation8 + $0x224] ss:$16 sps:$4 sm:$0xff]   ;;  %v6693_v11 = vld [vmem:[#allocation8 + $0x120] ss:$16 sps:$4 sm:$0xff]  }
 0x1f2   :  { %3163 = vmatpush2.bf16.msra.mxu1 %v6231_v23  ;;  %v6647_v23 = vld [vmem:[#allocation8 + $0x44] ss:$16 sps:$4 sm:$0xff]  }
 0x1f3   :  { %3164 = vmatprep.subr.bf16.mxu1 %v6224_v22  ;;  %v537_v22 = vld [vmem:[#allocation5 + $0xc18] sm:$0xff] }
 0x1f4   :  { %3136 = vmatpush2.bf16.msra.mxu0 %v6047_v24  ;;  %v6645_v24 = vld [vmem:[#allocation8 + $0x40] ss:$16 sps:$4 sm:$0xff]   ;;  %v6240_v31 = vcombine.high %v537_v22, %v541_v16 }
 0x1f5   :  { %4810 = vmatprep.subr.bf16.mxu0 %v6632_v34 }
 0x1f6   :  { %3165 = vmatpush2.bf16.msra.mxu1 %v6223_v26 }
 0x1f7   :  { %3166 = vmatprep.subr.bf16.mxu1 %v6216_v27  ;;  %v2811_v40 = vpop.f32.mrf.mxu0  ;;  %3138 = vmatmul.mubr.bf16.vlgmr.msra.gmra.mxu0 %v7461_v19  ;;  %v558_v19 = vsub.s32 3, %v7493_v44 }
 0x1f8   :  { %v2812_v18 = vadd.f32 %v2811_v40, %v2771_v38  ;;  %4811 = vmatpush1.bf16.msra.mxu0 %v6630_v32  ;;  %4842 = vmatprep.mubr.bf16.mxu0 %v7545_v25  ;;  %v6648_v32 = vld [vmem:[#allocation8 + $0x20] ss:$16 sps:$4 sm:$0xff]   ;;  %v6653_v38 = vld [vmem:[#allocation8 + $0x4] ss:$16 sps:$4 sm:$0xff]  }
 0x1f9   :  { %v2813_v45 = vpop.f32.mrf.mxu0  ;;  %4812 = vmatprep.subr.bf16.mxu0 %v6635_v37  ;;  %v559_v3 = vrot.slane %v7498_v57, %v558_v19 }
 0x1fa   :  { %3167 = vmatpush2.bf16.msra.mxu1 %v6215_v35  ;;  %v6239_v35 = vcombine.low %v537_v22, %v541_v16  ;;  %v6704_v22 = vld [vmem:[#allocation8 + $0x3e4] ss:$16 sps:$4 sm:$0xff]   ;;  %v6717_v16 = vld [vmem:[#allocation8 + $0x4e0] ss:$16 sps:$4 sm:$0xff]  }
 0x1fb   :  { %3168 = vmatprep.subr.bf16.mxu1 %v6208_v39  ;;  %v2815_v49 = vpop.f32.mrf.mxu0  ;;  %v2773_v14 = vadd.f32 %v7534_v33, %v559_v3  ;;  %v6650_v33 = vld [vmem:[#allocation8 + $0x24] ss:$16 sps:$4 sm:$0xff]   ;;  %v6678_v3 = vld [vmem:[#allocation8 + $0x260] ss:$16 sps:$4 sm:$0xff]  }
 0x1fc   :  { %4813 = vmatpush1.bf16.msra.mxu0 %v6633_v42  ;;  %v6656_v39 = vld [vmem:[#allocation8 + $0x2e4] ss:$16 sps:$4 sm:$0xff]   ;;  %v6657_v42 = vld [vmem:[#allocation8 + $0x1e0] ss:$16 sps:$4 sm:$0xff]  }
 0x1fd   :  { %4814 = vmatprep.subr.bf16.mxu0 %v6638_v46  ;;  %v2816_v60 = vpop.f32.mrf.mxu0  ;;  %v2814_v59 = vadd.f32 %v2813_v45, %v2773_v14  ;;  %v6662_v45 = vld [vmem:[#allocation8 + $0x2c4] ss:$16 sps:$4 sm:$0xff]  }
 0x1fe   :  { %3169 = vmatpush2.bf16.msra.mxu1 %v6207_v43  ;;  %v6654_v43 = vld [vmem:[#allocation8 + $0x2e0] ss:$16 sps:$4 sm:$0xff]   ;;  %v6665_v46 = vld [vmem:[#allocation8 + $0x1c4] ss:$16 sps:$4 sm:$0xff]  }
 0x1ff   :  { %3170 = vmatprep.subr.bf16.mxu1 %v6200_v28  ;;  %v6668_v49 = vld [vmem:[#allocation8 + $0x2a4] ss:$16 sps:$4 sm:$0xff]  }
 0x200   :  { %4815 = vmatpush1.bf16.msra.mxu0 %v6636_v50  ;;  %v6669_v50 = vld [vmem:[#allocation8 + $0x1a0] ss:$16 sps:$4 sm:$0xff]   ;;  %v6674_v60 = vld [vmem:[#allocation8 + $0x284] ss:$16 sps:$4 sm:$0xff]  }
 0x201   :  { %v2852_v1 = vpop.f32.mrf.mxu1  ;;  %4816 = vmatprep.subr.bf16.mxu0 %v6641_v56  ;;  %v6677_v56 = vld [vmem:[#allocation8 + $0x184] ss:$16 sps:$4 sm:$0xff]  }
 0x202   :  { %3171 = vmatpush2.bf16.msra.mxu1 %v6199_v52  ;;  %v2853_v4 = vadd.f32 %v2852_v1, %v2812_v18  ;;  %v6666_v52 = vld [vmem:[#allocation8 + $0x2a0] ss:$16 sps:$4 sm:$0xff]   ;;  %v6680_v1 = vld [vmem:[#allocation8 + $0x264] ss:$16 sps:$4 sm:$0xff]  }
 0x203   :  { %v2854_v7 = vpop.f32.mrf.mxu1  ;;  %3172 = vmatprep.subr.bf16.mxu1 %v6192_v61  ;;  %v6675_v61 = vld [vmem:[#allocation8 + $0x180] ss:$16 sps:$4 sm:$0xff]   ;;  %v6701_v14 = vld [vmem:[#allocation8 + $0x104] ss:$16 sps:$4 sm:$0xff]  }
 0x204   :  { %4817 = vmatpush1.bf16.msra.mxu0 %v6639_v2  ;;  %v2855_v26 = vadd.f32 %v2854_v7, %v2814_v59  ;;  %v6681_v2 = vld [vmem:[#allocation8 + $0x160] ss:$16 sps:$4 sm:$0xff]   ;;  %v6719_v59 = vld [vmem:[#allocation8 + $0x4e4] ss:$16 sps:$4 sm:$0xff]  }
 0x205   :  { %v2856_v12 = vpop.f32.mrf.mxu1  ;;  %4818 = vmatprep.subr.bf16.mxu0 %v6644_v6  ;;  %v6687_v6 = vld [vmem:[#allocation8 + $0x140] ss:$16 sps:$4 sm:$0xff]  }
 0x206   :  { %3173 = vmatpush2.bf16.msra.mxu1 %v6191_v5  ;;  %v6686_v5 = vld [vmem:[#allocation8 + $0x244] ss:$16 sps:$4 sm:$0xff]   ;;  %v6684_v7 = vld [vmem:[#allocation8 + $0x240] ss:$16 sps:$4 sm:$0xff]   ;;  %v3228_v12 = vmul.f32 0.2, %v7526_v10 }
 0x207   :  { %v2857_v57 = vpop.f32.mrf.mxu1  ;;  %3174 = vmatprep.subr.bf16.mxu1 %v6184_v8  ;;  %v6695_v8 = vld [vmem:[#allocation8 + $0x124] ss:$16 sps:$4 sm:$0xff]  }
 0x208   :  { %4819 = vmatpush1.bf16.msra.mxu0 %v6642_v13  ;;  %v6690_v13 = vld [vmem:[#allocation8 + $0x220] ss:$16 sps:$4 sm:$0xff]   ;;  %v3236_v57 = vmax.f32 %v7526_v10, %v3228_v12 }
 0x209   :  { %v2893_v47 = vpop.f32.mrf.mxu1  ;;  %4820 = vmatprep.subr.bf16.mxu0 %v6647_v23  ;;  %v6699_v23 = vld [vmem:[#allocation8 + $0x100] ss:$16 sps:$4 sm:$0xff]  }
 0x20a   :  { %3175 = vmatpush2.bf16.msra.mxu1 %v6183_v15  ;;  %v7554_v34 = vadd.f32 %v2893_v47, %v2853_v4  ;;  %v6689_v4 = vld [vmem:[#allocation8 + $0x144] ss:$16 sps:$4 sm:$0xff]   ;;  %v7564_v47 = vpack.c.bf16 %v3236_v57, %v3236_v57  ;;  %v6723_v10 = vld [vmem:[#allocation8 + $0x4c0] ss:$16 sps:$4 sm:$0xff]  }
 0x20b   :  { %v2895_v27 = vpop.f32.mrf.mxu1  ;;  %3176 = vmatprep.subr.bf16.mxu1 %v6176_v17  ;;  %v6698_v15 = vld [vmem:[#allocation8 + $0x204] ss:$16 sps:$4 sm:$0xff]   ;;  %v6696_v17 = vld [vmem:[#allocation8 + $0x200] ss:$16 sps:$4 sm:$0xff]  }
 0x20c   :  { %v2896_v53 = vadd.f32 %v2895_v27, %v2855_v26  ;;  %4821 = vmatpush1.bf16.msra.mxu0 %v6645_v24  ;;  %v6702_v24 = vld [vmem:[#allocation8 + $0x3e0] ss:$16 sps:$4 sm:$0xff]   ;;  %v6725_v26 = vld [vmem:[#allocation8 + $0x4c4] ss:$16 sps:$4 sm:$0xff]  }
 0x20d   :  { %v2897_v51 = vpop.f32.mrf.mxu1  ;;  %4822 = vmatprep.subr.bf16.mxu0 %v6650_v33  ;;  %v6705_v27 = vld [vmem:[#allocation8 + $0x3c0] ss:$16 sps:$4 sm:$0xff]   ;;  %v6803_v57 = vld [vmem:[#allocation8 + $0x6c4] ss:$16 sps:$4 sm:$0xff]  }
 0x20e   :  { %3177 = vmatpush2.bf16.msra.mxu1 %v6175_v54  ;;  %v3231_v40 = vmul.f32 0.2, %v2896_v53  ;;  %v6707_v54 = vld [vmem:[#allocation8 + $0x3c4] ss:$16 sps:$4 sm:$0xff]   ;;  %v6750_v12 = vld [vmem:[#allocation8 + $0x5e0] ss:$16 sps:$4 sm:$0xff]  }
 0x20f   :  { %v2898_v37 = vpop.f32.mrf.mxu1  ;;  %3201 = vmatprep.subr.bf16.mxu1 %v6240_v31  ;;  %v6710_v51 = vld [vmem:[#allocation8 + $0x3a4] ss:$16 sps:$4 sm:$0xff]  }
 0x210   :  { %4823 = vmatpush1.bf16.msra.mxu0 %v6648_v32  ;;  %v3239_v18 = vmax.f32 %v2896_v53, %v3231_v40  ;;  %v6731_v53 = vld [vmem:[#allocation8 + $0x4a4] ss:$16 sps:$4 sm:$0xff]   ;;  %v6708_v37 = vld [vmem:[#allocation8 + $0x3a0] ss:$16 sps:$4 sm:$0xff]  }
 0x211   :  { %3179 = vmatmul.mubr.bf16.vlgmr.msra.gmra.mxu1 %v7477_v29  ;;  %4824 = vmatprep.subr.bf16.mxu0 %v6653_v38  ;;  %v6663_v29 = vld [vmem:[#allocation8 + $0x1c0] ss:$16 sps:$4 sm:$0xff]   ;;  %v6737_v38 = vld [vmem:[#allocation8 + $0x484] ss:$16 sps:$4 sm:$0xff]  }
 0x212   :  { %3202 = vmatpush1.bf16.msra.mxu1 %v6239_v35  ;;  %3219 = vmatprep.mubr.bf16.mxu1 %v7362_v30  ;;  %v7558_v28 = vpack.c.bf16 %v3239_v18, %v3239_v18  ;;  %v6660_v30 = vld [vmem:[#allocation8 + $0x2c0] ss:$16 sps:$4 sm:$0xff]   ;;  %v6713_v40 = vld [vmem:[#allocation8 + $0x384] ss:$16 sps:$4 sm:$0xff]  }
 0x213   :  { %4851 = vmatprep.subr.bf16.mxu1 %v6656_v39  ;;  %v6729_v35 = vld [vmem:[#allocation8 + $0x4a0] ss:$16 sps:$4 sm:$0xff]   ;;  %v6740_v18 = vld [vmem:[#allocation8 + $0x464] ss:$16 sps:$4 sm:$0xff]  }
 0x214   :  { %4825 = vmatpush1.bf16.msra.mxu0 %v6651_v41  ;;  %v6735_v41 = vld [vmem:[#allocation8 + $0x480] ss:$16 sps:$4 sm:$0xff]  }
 0x215   :  { %4826 = vmatprep.subr.bf16.mxu0 %v6659_v21  ;;  %v6711_v21 = vld [vmem:[#allocation8 + $0x380] ss:$16 sps:$4 sm:$0xff]  }
 0x218   :  { %4827 = vmatpush2.bf16.msra.mxu0 %v6657_v42  ;;  %v6716_v42 = vld [vmem:[#allocation8 + $0x364] ss:$16 sps:$4 sm:$0xff]  }
 0x219   :  { %6244 = vmatmul.mubr.msk.bf16.vlgmr.msra.gmra.mxu1 %vm2568_vm0, %v7131_v58  ;;  %4828 = vmatprep.subr.bf16.mxu0 %v6665_v46  ;;  %v6743_v46 = vld [vmem:[#allocation8 + $0x444] ss:$16 sps:$4 sm:$0xff]  }
 0x21a   :  { %4852 = vmatpush1.bf16.msra.mxu1 %v6654_v43  ;;  %4883 = vmatprep.mubr.bf16.mxu1 %v7558_v28  ;;  %v6738_v43 = vld [vmem:[#allocation8 + $0x460] ss:$16 sps:$4 sm:$0xff]   ;;  %v6722_v58 = vld [vmem:[#allocation8 + $0x344] ss:$16 sps:$4 sm:$0xff]  }
 0x21b   :  { %4853 = vmatprep.subr.bf16.mxu1 %v6662_v45  ;;  %v6714_v45 = vld [vmem:[#allocation8 + $0x360] ss:$16 sps:$4 sm:$0xff]  }
 0x21c   :  { %4829 = vmatpush2.bf16.msra.mxu0 %v6663_v29 }
 0x21d   :  { %4830 = vmatprep.subr.bf16.mxu0 %v6671_v48  ;;  %v6720_v48 = vld [vmem:[#allocation8 + $0x340] ss:$16 sps:$4 sm:$0xff]  }
 0x21e   :  { %4854 = vmatpush1.bf16.msra.mxu1 %v6660_v30  ;;  %v6741_v30 = vld [vmem:[#allocation8 + $0x440] ss:$16 sps:$4 sm:$0xff]  }
 0x21f   :  { %4855 = vmatprep.subr.bf16.mxu1 %v6668_v49  ;;  %v6746_v49 = vld [vmem:[#allocation8 + $0x424] ss:$16 sps:$4 sm:$0xff]  }
 0x220   :  { %4831 = vmatpush2.bf16.msra.mxu0 %v6669_v50 }
 0x221   :  { %4832 = vmatprep.subr.bf16.mxu0 %v6677_v56 }
 0x222   :  { %4856 = vmatpush1.bf16.msra.mxu1 %v6666_v52  ;;  %v6728_v52 = vld [vmem:[#allocation8 + $0x324] ss:$16 sps:$4 sm:$0xff]  }
 0x223   :  { %4857 = vmatprep.subr.bf16.mxu1 %v6674_v60  ;;  %v6744_v60 = vld [vmem:[#allocation8 + $0x420] ss:$16 sps:$4 sm:$0xff]  }
 0x224   :  { %4833 = vmatpush2.bf16.msra.mxu0 %v6675_v61  ;;  %v6726_v61 = vld [vmem:[#allocation8 + $0x320] ss:$16 sps:$4 sm:$0xff]  }
 0x225   :  { %4834 = vmatprep.subr.bf16.mxu0 %v6683_v0  ;;  %v3230_v0 = vmul.f32 0.2, %v7554_v34 }
 0x226   :  { %4858 = vmatpush1.bf16.msra.mxu1 %v6672_v63  ;;  %v6749_v63 = vld [vmem:[#allocation8 + $0x404] ss:$16 sps:$4 sm:$0xff]  }
 0x227   :  { %4859 = vmatprep.subr.bf16.mxu1 %v6680_v1 }
 0x228   :  { %4835 = vmatpush2.bf16.msra.mxu0 %v6681_v2  ;;  %v6734_v2 = vld [vmem:[#allocation8 + $0x304] ss:$16 sps:$4 sm:$0xff]  }
 0x229   :  { %4836 = vmatprep.subr.bf16.mxu0 %v6689_v4  ;;  %v6747_v4 = vld [vmem:[#allocation8 + $0x400] ss:$16 sps:$4 sm:$0xff]  }
 0x22a   :  { %4860 = vmatpush1.bf16.msra.mxu1 %v6678_v3 }
 0x22b   :  { %4861 = vmatprep.subr.bf16.mxu1 %v6686_v5  ;;  %v6732_v5 = vld [vmem:[#allocation8 + $0x300] ss:$16 sps:$4 sm:$0xff]  }
 0x22c   :  { %4837 = vmatpush2.bf16.msra.mxu0 %v6687_v6  ;;  %v6752_v6 = vld [vmem:[#allocation8 + $0x5e4] ss:$16 sps:$4 sm:$0xff]  }
 0x22d   :  { %4838 = vmatprep.subr.bf16.mxu0 %v6695_v8 }
 0x22e   :  { %4862 = vmatpush1.bf16.msra.mxu1 %v6684_v7  ;;  %v3238_v7 = vmax.f32 %v7554_v34, %v3230_v0  ;;  %v6753_v34 = vld [vmem:[#allocation8 + $0x5c0] ss:$16 sps:$4 sm:$0xff]  }
 0x22f   :  { %4863 = vmatprep.subr.bf16.mxu1 %v6692_v9  ;;  %v6797_v9 = vld [vmem:[#allocation8 + $0x6e4] ss:$16 sps:$4 sm:$0xff]  }
 0x230   :  { %4839 = vmatpush2.bf16.msra.mxu0 %v6693_v11 }
 0x231   :  { %4840 = vmatprep.subr.bf16.mxu0 %v6701_v14  ;;  %v6795_v14 = vld [vmem:[#allocation8 + $0x6e0] ss:$16 sps:$4 sm:$0xff]  }
 0x232   :  { %4864 = vmatpush1.bf16.msra.mxu1 %v6690_v13  ;;  %v6755_v13 = vld [vmem:[#allocation8 + $0x5c4] ss:$16 sps:$4 sm:$0xff]  }
 0x233   :  { %4865 = vmatprep.subr.bf16.mxu1 %v6698_v15  ;;  %v7581_v15 = vpack.c.bf16 %v3238_v7, %v3238_v7 }
 0x234   :  { %4841 = vmatpush2.bf16.msra.mxu0 %v6699_v23 }
 0x235   :  { %4892 = vmatprep.subr.bf16.mxu0 %v6719_v59  ;;  %v6801_v59 = vld [vmem:[#allocation8 + $0x6c0] ss:$16 sps:$4 sm:$0xff]  }
 0x236   :  { %4866 = vmatpush1.bf16.msra.mxu1 %v6696_v17  ;;  %v6758_v17 = vld [vmem:[#allocation8 + $0x5a4] ss:$16 sps:$4 sm:$0xff]  }
 0x237   :  { %4867 = vmatprep.subr.bf16.mxu1 %v6704_v22  ;;  %4843 = vmatmul.mubr.bf16.vlgmr.msra.gmra.mxu0 %v7564_v47  ;;  %v7567_v33 = vpop.f32.mrf.mxu0  ;;  %v6809_v22 = vld [vmem:[#allocation8 + $0x6a4] ss:$16 sps:$4 sm:$0xff]  }
 0x238   :  { %4893 = vmatpush1.bf16.msra.mxu0 %v6717_v16  ;;  %v6756_v16 = vld [vmem:[#allocation8 + $0x5a0] ss:$16 sps:$4 sm:$0xff]  }
 0x239   :  { %v7569_v31 = vpop.f32.mrf.mxu0  ;;  %4894 = vmatprep.subr.bf16.mxu0 %v6725_v26  ;;  %v6807_v26 = vld [vmem:[#allocation8 + $0x6a0] ss:$16 sps:$4 sm:$0xff]  }
 0x23a   :  { %4868 = vmatpush2.bf16.msra.mxu1 %v6702_v24  ;;  %v6761_v24 = vld [vmem:[#allocation8 + $0x584] ss:$16 sps:$4 sm:$0xff]  }
 0x23b   :  { %4869 = vmatprep.subr.bf16.mxu1 %v6707_v54  ;;  %v2938_v32 = vpop.f32.mrf.mxu0  ;;  %v6815_v54 = vld [vmem:[#allocation8 + $0x684] ss:$16 sps:$4 sm:$0xff]  }
 0x23c   :  { %4895 = vmatpush1.bf16.msra.mxu0 %v6723_v10  ;;  %v6759_v10 = vld [vmem:[#allocation8 + $0x580] ss:$16 sps:$4 sm:$0xff]  }
 0x23d   :  { %4896 = vmatprep.subr.bf16.mxu0 %v6731_v53  ;;  %v2939_v39 = vpop.f32.mrf.mxu0  ;;  %v6813_v53 = vld [vmem:[#allocation8 + $0x680] ss:$16 sps:$4 sm:$0xff]  }
 0x23e   :  { %4870 = vmatpush2.bf16.msra.mxu1 %v6705_v27  ;;  %v6764_v27 = vld [vmem:[#allocation8 + $0x564] ss:$16 sps:$4 sm:$0xff]   ;;  %v6762_v32 = vld [vmem:[#allocation8 + $0x560] ss:$16 sps:$4 sm:$0xff]  }
 0x23f   :  { %4871 = vmatprep.subr.bf16.mxu1 %v6710_v51  ;;  %v6821_v51 = vld [vmem:[#allocation8 + $0x664] ss:$16 sps:$4 sm:$0xff]   ;;  %v6765_v39 = vld [vmem:[#allocation8 + $0x540] ss:$16 sps:$4 sm:$0xff]  }
 0x240   :  { %4897 = vmatpush1.bf16.msra.mxu0 %v6729_v35  ;;  %v6767_v35 = vld [vmem:[#allocation8 + $0x544] ss:$16 sps:$4 sm:$0xff]  }
 0x241   :  { %4898 = vmatprep.subr.bf16.mxu0 %v6737_v38  ;;  %v6827_v38 = vld [vmem:[#allocation8 + $0x644] ss:$16 sps:$4 sm:$0xff]  }
 0x242   :  { %4872 = vmatpush2.bf16.msra.mxu1 %v6708_v37  ;;  %v6819_v37 = vld [vmem:[#allocation8 + $0x660] ss:$16 sps:$4 sm:$0xff]  }
 0x243   :  { %4873 = vmatprep.subr.bf16.mxu1 %v6713_v40  ;;  %v6770_v40 = vld [vmem:[#allocation8 + $0x524] ss:$16 sps:$4 sm:$0xff]  }
 0x244   :  { %4899 = vmatpush1.bf16.msra.mxu0 %v6735_v41  ;;  %v6825_v41 = vld [vmem:[#allocation8 + $0x640] ss:$16 sps:$4 sm:$0xff]  }
 0x245   :  { %4900 = vmatprep.subr.bf16.mxu0 %v6740_v18  ;;  %v6833_v18 = vld [vmem:[#allocation8 + $0x624] ss:$16 sps:$4 sm:$0xff]  }
 0x246   :  { %4874 = vmatpush2.bf16.msra.mxu1 %v6711_v21  ;;  %v562_v21 = vsub.s32 4, %v7493_v44 }
 0x247   :  { %4875 = vmatprep.subr.bf16.mxu1 %v6716_v42  ;;  %v566_v42 = vsub.s32 5, %v7493_v44 }
 0x248   :  { %4901 = vmatpush1.bf16.msra.mxu0 %v6738_v43  ;;  %v6768_v43 = vld [vmem:[#allocation8 + $0x520] ss:$16 sps:$4 sm:$0xff]  }
 0x249   :  { %v7571_v29 = vpop.f32.mrf.mxu1  ;;  %4902 = vmatprep.subr.bf16.mxu0 %v6743_v46  ;;  %v6831_v46 = vld [vmem:[#allocation8 + $0x620] ss:$16 sps:$4 sm:$0xff]  }
 0x24a   :  { %4876 = vmatpush2.bf16.msra.mxu1 %v6714_v45  ;;  %v6773_v45 = vld [vmem:[#allocation8 + $0x504] ss:$16 sps:$4 sm:$0xff]  }
 0x24b   :  { %v7573_v50 = vpop.f32.mrf.mxu1  ;;  %4877 = vmatprep.subr.bf16.mxu1 %v6722_v58  ;;  %v7586_v58 = vld [vmem:[#allocation7] sm:$0xff] }
 0x24c   :  { %4903 = vmatpush1.bf16.msra.mxu0 %v6741_v30  ;;  %v563_v30 = vrot.slane %v7586_v58, %v562_v21  ;;  %v6885_v21 = vld [vmem:[#allocation8 + $0x700] ss:$16 sps:$4 sm:$0xff]  }
 0x24d   :  { %v2979_v56 = vpop.f32.mrf.mxu1  ;;  %4904 = vmatprep.subr.bf16.mxu0 %v6746_v49  ;;  %v567_v49 = vrot.slane %v7586_v58, %v566_v42  ;;  %v6786_v42 = vld [vmem:[#allocation8 + $0x68] ss:$16 sps:$4 sm:$0xff]  }
 0x24e   :  { %4878 = vmatpush2.bf16.msra.mxu1 %v6720_v48  ;;  %v6839_v48 = vld [vmem:[#allocation8 + $0x604] ss:$16 sps:$4 sm:$0xff]   ;;  %v6776_v56 = vld [vmem:[#allocation8 + $0xec] ss:$16 sps:$4 sm:$0xff]  }
 0x24f   :  { %v2980_v1 = vpop.f32.mrf.mxu1  ;;  %4879 = vmatprep.subr.bf16.mxu1 %v6728_v52  ;;  %v6771_v52 = vld [vmem:[#allocation8 + $0x500] ss:$16 sps:$4 sm:$0xff]   ;;  %v2937_v0 = vadd.f32 %v7569_v31, %v567_v49  ;;  %v6857_v31 = vld [vmem:[#allocation8 + $0x7a4] ss:$16 sps:$4 sm:$0xff]   ;;  %v6794_v49 = vld [vmem:[#allocation8 + $0x2c] ss:$16 sps:$4 sm:$0xff]  }
 0x250   :  { %4905 = vmatpush1.bf16.msra.mxu0 %v6744_v60  ;;  %v6837_v60 = vld [vmem:[#allocation8 + $0x600] ss:$16 sps:$4 sm:$0xff]  }
 0x251   :  { %v7576_v3 = vpop.f32.mrf.mxu1  ;;  %4906 = vmatprep.subr.bf16.mxu0 %v6749_v63  ;;  %v6845_v63 = vld [vmem:[#allocation8 + $0x7e4] ss:$16 sps:$4 sm:$0xff]   ;;  %v6843_v1 = vld [vmem:[#allocation8 + $0x7e0] ss:$16 sps:$4 sm:$0xff]  }
 0x252   :  { %4880 = vmatpush2.bf16.msra.mxu1 %v6726_v61  ;;  %v2935_v61 = vadd.f32 %v7567_v33, %v563_v30 }
 0x253   :  { %v7579_v8 = vpop.f32.mrf.mxu1  ;;  %4881 = vmatprep.subr.bf16.mxu1 %v6734_v2 }
 0x254   :  { %4907 = vmatpush1.bf16.msra.mxu0 %v6747_v4  ;;  %v2976_v2 = vadd.f32 %v7571_v29, %v2935_v61  ;;  %v6851_v4 = vld [vmem:[#allocation8 + $0x7c4] ss:$16 sps:$4 sm:$0xff]   ;;  %v6855_v29 = vld [vmem:[#allocation8 + $0x7a0] ss:$16 sps:$4 sm:$0xff]   ;;  %v6806_v61 = vld [vmem:[#allocation8 + $0x1ec] ss:$16 sps:$4 sm:$0xff]  }
 0x255   :  { %v3061_v11 = vpop.f32.mrf.mxu1  ;;  %4908 = vmatprep.subr.bf16.mxu0 %v6752_v6  ;;  %v2978_v6 = vadd.f32 %v7573_v50, %v2937_v0  ;;  %v6812_v0 = vld [vmem:[#allocation8 + $0x1cc] ss:$16 sps:$4 sm:$0xff]  }
 0x256   :  { %4882 = vmatpush2.bf16.msra.mxu1 %v6732_v5  ;;  %v6849_v11 = vld [vmem:[#allocation8 + $0x7c0] ss:$16 sps:$4 sm:$0xff]  }
 0x257   :  { %v3062_v23 = vpop.f32.mrf.mxu1  ;;  %4933 = vmatprep.subr.bf16.mxu1 %v6797_v9 }
 0x258   :  { %4909 = vmatpush2.bf16.msra.mxu0 %v6750_v12 }
 0x259   :  { %4884 = vmatmul.mubr.bf16.vlgmr.msra.gmra.mxu1 %v7581_v15  ;;  %4910 = vmatprep.subr.bf16.mxu0 %v6755_v13 }
 0x25a   :  { %4934 = vmatpush1.bf16.msra.mxu1 %v6795_v14 }
 0x25b   :  { %4935 = vmatprep.subr.bf16.mxu1 %v6803_v57 }
 0x25c   :  { %4911 = vmatpush2.bf16.msra.mxu0 %v6753_v34 }
 0x25d   :  { %4912 = vmatprep.subr.bf16.mxu0 %v6758_v17  ;;  %v6863_v17 = vld [vmem:[#allocation8 + $0x784] ss:$16 sps:$4 sm:$0xff]  }
 0x25e   :  { %4936 = vmatpush1.bf16.msra.mxu1 %v6801_v59 }
 0x25f   :  { %4937 = vmatprep.subr.bf16.mxu1 %v6809_v22  ;;  %v6861_v22 = vld [vmem:[#allocation8 + $0x780] ss:$16 sps:$4 sm:$0xff]  }
 0x260   :  { %4913 = vmatpush2.bf16.msra.mxu0 %v6756_v16 }
 0x261   :  { %4914 = vmatprep.subr.bf16.mxu0 %v6761_v24 }
 0x262   :  { %4938 = vmatpush1.bf16.msra.mxu1 %v6807_v26  ;;  %v6779_v26 = vld [vmem:[#allocation8 + $0xcc] ss:$16 sps:$4 sm:$0xff]  }
 0x263   :  { %4939 = vmatprep.subr.bf16.mxu1 %v6815_v54  ;;  %v6869_v54 = vld [vmem:[#allocation8 + $0x764] ss:$16 sps:$4 sm:$0xff]  }
 0x264   :  { %4915 = vmatpush2.bf16.msra.mxu0 %v6759_v10  ;;  %v6777_v10 = vld [vmem:[#allocation8 + $0xc8] ss:$16 sps:$4 sm:$0xff]  }
 0x265   :  { %4916 = vmatprep.subr.bf16.mxu0 %v6764_v27  ;;  %v6875_v27 = vld [vmem:[#allocation8 + $0x744] ss:$16 sps:$4 sm:$0xff]  }
 0x266   :  { %4940 = vmatpush1.bf16.msra.mxu1 %v6813_v53  ;;  %v6782_v53 = vld [vmem:[#allocation8 + $0xac] ss:$16 sps:$4 sm:$0xff]  }
 0x267   :  { %4941 = vmatprep.subr.bf16.mxu1 %v6821_v51  ;;  %v6873_v51 = vld [vmem:[#allocation8 + $0x740] ss:$16 sps:$4 sm:$0xff]  }
 0x268   :  { %4917 = vmatpush2.bf16.msra.mxu0 %v6762_v32  ;;  %v6780_v32 = vld [vmem:[#allocation8 + $0xa8] ss:$16 sps:$4 sm:$0xff]  }
 0x269   :  { %4918 = vmatprep.subr.bf16.mxu0 %v6767_v35  ;;  %v6881_v35 = vld [vmem:[#allocation8 + $0x724] ss:$16 sps:$4 sm:$0xff]  }
 0x26a   :  { %4942 = vmatpush1.bf16.msra.mxu1 %v6819_v37  ;;  %v6785_v37 = vld [vmem:[#allocation8 + $0x8c] ss:$16 sps:$4 sm:$0xff]  }
 0x26b   :  { %4943 = vmatprep.subr.bf16.mxu1 %v6827_v38  ;;  %v6879_v38 = vld [vmem:[#allocation8 + $0x720] ss:$16 sps:$4 sm:$0xff]  }
 0x26c   :  { %4919 = vmatpush2.bf16.msra.mxu0 %v6765_v39  ;;  %v6783_v39 = vld [vmem:[#allocation8 + $0x88] ss:$16 sps:$4 sm:$0xff]  }
 0x26d   :  { %4920 = vmatprep.subr.bf16.mxu0 %v6770_v40  ;;  %v6887_v40 = vld [vmem:[#allocation8 + $0x704] ss:$16 sps:$4 sm:$0xff]  }
 0x26e   :  { %4944 = vmatpush1.bf16.msra.mxu1 %v6825_v41 }
 0x26f   :  { %4945 = vmatprep.subr.bf16.mxu1 %v6833_v18 }
 0x270   :  { %4921 = vmatpush2.bf16.msra.mxu0 %v6768_v43  ;;  %v6893_v43 = vld [vmem:[#allocation8 + $0x2ec] ss:$16 sps:$4 sm:$0xff]  }
 0x271   :  { %4922 = vmatprep.subr.bf16.mxu0 %v6773_v45  ;;  %v6791_v45 = vld [vmem:[#allocation8 + $0x4c] ss:$16 sps:$4 sm:$0xff]  }
 0x272   :  { %4946 = vmatpush1.bf16.msra.mxu1 %v6831_v46 }
 0x273   :  { %4947 = vmatprep.subr.bf16.mxu1 %v6839_v48  ;;  %v6789_v48 = vld [vmem:[#allocation8 + $0x48] ss:$16 sps:$4 sm:$0xff]  }
 0x274   :  { %4923 = vmatpush2.bf16.msra.mxu0 %v6771_v52  ;;  %v6792_v52 = vld [vmem:[#allocation8 + $0x28] ss:$16 sps:$4 sm:$0xff]  }
 0x275   :  { %4974 = vmatprep.subr.bf16.mxu0 %v6776_v56  ;;  %v6800_v56 = vld [vmem:[#allocation8 + $0xc] ss:$16 sps:$4 sm:$0xff]  }
 0x276   :  { %4948 = vmatpush1.bf16.msra.mxu1 %v6837_v60  ;;  %v6798_v60 = vld [vmem:[#allocation8 + $0x8] ss:$16 sps:$4 sm:$0xff]  }
 0x277   :  { %4949 = vmatprep.subr.bf16.mxu1 %v6845_v63  ;;  %v3016_v5 = vpop.f32.mrf.mxu0  ;;  %v6804_v63 = vld [vmem:[#allocation8 + $0x1e8] ss:$16 sps:$4 sm:$0xff]  }
 0x278   :  { %v3017_v7 = vadd.f32 %v3016_v5, %v2976_v2  ;;  %v6818_v2 = vld [vmem:[#allocation8 + $0x1ac] ss:$16 sps:$4 sm:$0xff]  }
 0x279   :  { %v3018_v9 = vpop.f32.mrf.mxu0  ;;  %v6824_v5 = vld [vmem:[#allocation8 + $0x18c] ss:$16 sps:$4 sm:$0xff]  }
 0x27a   :  { %4950 = vmatpush2.bf16.msra.mxu1 %v6843_v1  ;;  %v3058_v33 = vadd.f32 %v7576_v3, %v3017_v7  ;;  %v3019_v12 = vadd.f32 %v3018_v9, %v2978_v6  ;;  %v6774_v3 = vld [vmem:[#allocation8 + $0xe8] ss:$16 sps:$4 sm:$0xff]   ;;  %v6830_v7 = vld [vmem:[#allocation8 + $0x16c] ss:$16 sps:$4 sm:$0xff]  }
 0x27b   :  { %4951 = vmatprep.subr.bf16.mxu1 %v6851_v4  ;;  %v3020_v13 = vpop.f32.mrf.mxu0  ;;  %v6810_v1 = vld [vmem:[#allocation8 + $0x1c8] ss:$16 sps:$4 sm:$0xff]  }
 0x27c   :  { %v3232_v14 = vmul.f32 0.2, %v3058_v33  ;;  %v3060_v23 = vadd.f32 %v7579_v8, %v3019_v12  ;;  %v6867_v8 = vld [vmem:[#allocation8 + $0x760] ss:$16 sps:$4 sm:$0xff]   ;;  %v6816_v4 = vld [vmem:[#allocation8 + $0x1a8] ss:$16 sps:$4 sm:$0xff]  }
 0x27d   :  { %v3021_v57 = vpop.f32.mrf.mxu0  ;;  %v6822_v6 = vld [vmem:[#allocation8 + $0x188] ss:$16 sps:$4 sm:$0xff]  }
 0x27e   :  { %4952 = vmatpush2.bf16.msra.mxu1 %v6849_v11  ;;  %v3233_v34 = vmul.f32 0.2, %v3060_v23  ;;  %v3240_v50 = vmax.f32 %v3058_v33, %v3232_v14  ;;  %v6828_v9 = vld [vmem:[#allocation8 + $0x168] ss:$16 sps:$4 sm:$0xff]   ;;  %v6836_v11 = vld [vmem:[#allocation8 + $0x14c] ss:$16 sps:$4 sm:$0xff]  }
 0x27f   :  { %4953 = vmatprep.subr.bf16.mxu1 %v6857_v31  ;;  %v6834_v33 = vld [vmem:[#allocation8 + $0x148] ss:$16 sps:$4 sm:$0xff]   ;;  %v6842_v31 = vld [vmem:[#allocation8 + $0x12c] ss:$16 sps:$4 sm:$0xff]  }
 0x280   :  { %v3241_v59 = vmax.f32 %v3060_v23, %v3233_v34  ;;  %v7598_v24 = vpack.c.bf16 %v3240_v50, %v3240_v50  ;;  %v6840_v14 = vld [vmem:[#allocation8 + $0x128] ss:$16 sps:$4 sm:$0xff]   ;;  %v6848_v23 = vld [vmem:[#allocation8 + $0x10c] ss:$16 sps:$4 sm:$0xff]  }
 0x281   :  { %v6846_v34 = vld [vmem:[#allocation8 + $0x108] ss:$16 sps:$4 sm:$0xff]  }
 0x282   :  { %4954 = vmatpush2.bf16.msra.mxu1 %v6855_v29  ;;  %v7596_v16 = vpack.c.bf16 %v3241_v59, %v3241_v59  ;;  %v6852_v50 = vld [vmem:[#allocation8 + $0x4e8] ss:$16 sps:$4 sm:$0xff]   ;;  %v6860_v59 = vld [vmem:[#allocation8 + $0x4cc] ss:$16 sps:$4 sm:$0xff]  }
 0x283   :  { %4955 = vmatprep.subr.bf16.mxu1 %v6863_v17  ;;  %v6854_v17 = vld [vmem:[#allocation8 + $0x4ec] ss:$16 sps:$4 sm:$0xff]  }
 0x284   :  { %4924 = vmatprep.mubr.bf16.mxu0 %v7596_v16 }
 0x285   :  { %4925 = vmatmul.mubr.bf16.vlgmr.msra.gmra.mxu0 %v7598_v24 }
 0x286   :  { %4956 = vmatpush2.bf16.msra.mxu1 %v6861_v22  ;;  %4975 = vmatpush1.bf16.msra.mxu0 %v6774_v3  ;;  %v6858_v22 = vld [vmem:[#allocation8 + $0x4c8] ss:$16 sps:$4 sm:$0xff]   ;;  %v6866_v3 = vld [vmem:[#allocation8 + $0x4ac] ss:$16 sps:$4 sm:$0xff]  }
 0x287   :  { %5006 = vmatprep.mubr.bf16.mxu0 %v7545_v25  ;;  %4976 = vmatprep.subr.bf16.mxu0 %v6779_v26  ;;  %v6788_v25 = vld [vmem:[#allocation8 + $0x6c] ss:$16 sps:$4 sm:$0xff]   ;;  %v6864_v26 = vld [vmem:[#allocation8 + $0x4a8] ss:$16 sps:$4 sm:$0xff]  }
 0x288   :  { %4957 = vmatprep.subr.bf16.mxu1 %v6869_v54  ;;  %v570_v54 = vsub.s32 6, %v7493_v44 }
 0x28a   :  { %4958 = vmatpush2.bf16.msra.mxu1 %v6867_v8  ;;  %4977 = vmatpush1.bf16.msra.mxu0 %v6777_v10  ;;  %v6872_v8 = vld [vmem:[#allocation8 + $0x48c] ss:$16 sps:$4 sm:$0xff]   ;;  %v574_v10 = vsub.s32 7, %v7493_v44 }
 0x28b   :  { %4959 = vmatprep.subr.bf16.mxu1 %v6875_v27  ;;  %4978 = vmatprep.subr.bf16.mxu0 %v6782_v53  ;;  %v6870_v27 = vld [vmem:[#allocation8 + $0x488] ss:$16 sps:$4 sm:$0xff]   ;;  %v571_v53 = vrot.slane %v7586_v58, %v570_v54  ;;  %v6932_v54 = vld [vmem:[#allocation8 + $0x54c] ss:$16 sps:$4 sm:$0xff]  }
 0x28c   :  { %v7114_v44 = vld [vmem:[#allocation14 + $0x68] sm:$0xff]  }
 0x28e   :  { %4960 = vmatpush2.bf16.msra.mxu1 %v6873_v51  ;;  %4979 = vmatpush1.bf16.msra.mxu0 %v6780_v32 }
 0x28f   :  { %4961 = vmatprep.subr.bf16.mxu1 %v6881_v35  ;;  %4980 = vmatprep.subr.bf16.mxu0 %v6785_v37  ;;  %v6876_v35 = vld [vmem:[#allocation8 + $0x468] ss:$16 sps:$4 sm:$0xff]  }
 0x291   :  { %v7603_v41 = vpop.f32.mrf.mxu1 }
 0x292   :  { %4962 = vmatpush2.bf16.msra.mxu1 %v6879_v38  ;;  %4981 = vmatpush1.bf16.msra.mxu0 %v6783_v39  ;;  %v3099_v37 = vadd.f32 %v7603_v41, %v571_v53  ;;  %v6884_v38 = vld [vmem:[#allocation8 + $0x44c] ss:$16 sps:$4 sm:$0xff]  }
 0x293   :  { %v7605_v18 = vpop.f32.mrf.mxu1  ;;  %4963 = vmatprep.subr.bf16.mxu1 %v6887_v40  ;;  %4982 = vmatprep.subr.bf16.mxu0 %v6788_v25 }
 0x295   :  { %v3102_v46 = vpop.f32.mrf.mxu1 }
 0x296   :  { %4964 = vmatpush2.bf16.msra.mxu1 %v6885_v21  ;;  %4983 = vmatpush1.bf16.msra.mxu0 %v6786_v42  ;;  %v6882_v42 = vld [vmem:[#allocation8 + $0x448] ss:$16 sps:$4 sm:$0xff]   ;;  %v6890_v46 = vld [vmem:[#allocation8 + $0x42c] ss:$16 sps:$4 sm:$0xff]  }
 0x297   :  { %v3103_v30 = vpop.f32.mrf.mxu1  ;;  %5015 = vmatprep.subr.bf16.mxu1 %v6893_v43  ;;  %4984 = vmatprep.subr.bf16.mxu0 %v6791_v45 }
 0x29a   :  { %4985 = vmatpush1.bf16.msra.mxu0 %v6789_v48 }
 0x29b   :  { %4986 = vmatprep.subr.bf16.mxu0 %v6794_v49 }
 0x29e   :  { %4987 = vmatpush1.bf16.msra.mxu0 %v6792_v52  ;;  %v6888_v52 = vld [vmem:[#allocation8 + $0x428] ss:$16 sps:$4 sm:$0xff]  }
 0x29f   :  { %4988 = vmatprep.subr.bf16.mxu0 %v6800_v56 }
 0x2a2   :  { %4989 = vmatpush1.bf16.msra.mxu0 %v6798_v60  ;;  %v6896_v60 = vld [vmem:[#allocation8 + $0x40c] ss:$16 sps:$4 sm:$0xff]  }
 0x2a3   :  { %4990 = vmatprep.subr.bf16.mxu0 %v6806_v61 }
 0x2a6   :  { %4991 = vmatpush2.bf16.msra.mxu0 %v6804_v63 }
 0x2a7   :  { %4992 = vmatprep.subr.bf16.mxu0 %v6812_v0 }
 0x2aa   :  { %4993 = vmatpush2.bf16.msra.mxu0 %v6810_v1  ;;  %v6894_v1 = vld [vmem:[#allocation8 + $0x408] ss:$16 sps:$4 sm:$0xff]  }
 0x2ab   :  { %4994 = vmatprep.subr.bf16.mxu0 %v6818_v2 }
 0x2ae   :  { %4995 = vmatpush2.bf16.msra.mxu0 %v6816_v4  ;;  %v6902_v4 = vld [vmem:[#allocation8 + $0x5ec] ss:$16 sps:$4 sm:$0xff]  }
 0x2af   :  { %4996 = vmatprep.subr.bf16.mxu0 %v6824_v5 }
 0x2b2   :  { %4997 = vmatpush2.bf16.msra.mxu0 %v6822_v6  ;;  %v6891_v6 = vld [vmem:[#allocation8 + $0x2e8] ss:$16 sps:$4 sm:$0xff]  }
 0x2b3   :  { %4998 = vmatprep.subr.bf16.mxu0 %v6830_v7 }
 0x2b6   :  { %4999 = vmatpush2.bf16.msra.mxu0 %v6828_v9  ;;  %v6899_v9 = vld [vmem:[#allocation8 + $0x2cc] ss:$16 sps:$4 sm:$0xff]  }
 0x2b7   :  { %v3139_v12 = vpop.f32.mrf.mxu0  ;;  %5000 = vmatprep.subr.bf16.mxu0 %v6836_v11  ;;  %v6900_v11 = vld [vmem:[#allocation8 + $0x5e8] ss:$16 sps:$4 sm:$0xff]  }
 0x2b8   :  { %v3140_v25 = vadd.f32 %v3139_v12, %v3099_v37  ;;  %v6897_v12 = vld [vmem:[#allocation8 + $0x2c8] ss:$16 sps:$4 sm:$0xff]  }
 0x2b9   :  { %v3141_v13 = vpop.f32.mrf.mxu0 }
 0x2ba   :  { %5001 = vmatpush2.bf16.msra.mxu0 %v6834_v33  ;;  %v6908_v33 = vld [vmem:[#allocation8 + $0x5cc] ss:$16 sps:$4 sm:$0xff]  }
 0x2bb   :  { %5002 = vmatprep.subr.bf16.mxu0 %v6842_v31  ;;  %v3143_v57 = vpop.f32.mrf.mxu0  ;;  %v6905_v31 = vld [vmem:[#allocation8 + $0x2ac] ss:$16 sps:$4 sm:$0xff]  }
 0x2bc   :  { %v6911_v57 = vld [vmem:[#allocation8 + $0x28c] ss:$16 sps:$4 sm:$0xff]  }
 0x2bd   :  { %v3144_v29 = vpop.f32.mrf.mxu0 }
 0x2be   :  { %5003 = vmatpush2.bf16.msra.mxu0 %v6840_v14  ;;  %v6914_v14 = vld [vmem:[#allocation8 + $0x5ac] ss:$16 sps:$4 sm:$0xff]   ;;  %v6912_v29 = vld [vmem:[#allocation8 + $0x5a8] ss:$16 sps:$4 sm:$0xff]  }
 0x2bf   :  { %5004 = vmatprep.subr.bf16.mxu0 %v6848_v23  ;;  %v6903_v23 = vld [vmem:[#allocation8 + $0x2a8] ss:$16 sps:$4 sm:$0xff]  }
 0x2c2   :  { %5005 = vmatpush2.bf16.msra.mxu0 %v6846_v34  ;;  %v6920_v34 = vld [vmem:[#allocation8 + $0x58c] ss:$16 sps:$4 sm:$0xff]  }
 0x2c3   :  { %5056 = vmatprep.subr.bf16.mxu0 %v6854_v17  ;;  %v6909_v17 = vld [vmem:[#allocation8 + $0x288] ss:$16 sps:$4 sm:$0xff]  }
 0x2c5   :  { %5007 = vmatmul.mubr.bf16.vlgmr.msra.gmra.mxu0 %v7564_v47  ;;  %v6878_v47 = vld [vmem:[#allocation8 + $0x46c] ss:$16 sps:$4 sm:$0xff]  }
 0x2c6   :  { %5057 = vmatpush1.bf16.msra.mxu0 %v6852_v50  ;;  %5088 = vmatprep.mubr.bf16.mxu0 %v7596_v16  ;;  %v575_v16 = vrot.slane %v7586_v58, %v574_v10  ;;  %v6918_v50 = vld [vmem:[#allocation8 + $0x588] ss:$16 sps:$4 sm:$0xff]   ;;  %v6929_v10 = vld [vmem:[#allocation8 + $0x22c] ss:$16 sps:$4 sm:$0xff]  }
 0x2c7   :  { %5058 = vmatprep.subr.bf16.mxu0 %v6860_v59  ;;  %v6926_v59 = vld [vmem:[#allocation8 + $0x56c] ss:$16 sps:$4 sm:$0xff]  }
 0x2c8   :  { %v3101_v40 = vadd.f32 %v7605_v18, %v575_v16 }
 0x2ca   :  { %5059 = vmatpush1.bf16.msra.mxu0 %v6858_v22  ;;  %v3142_v43 = vadd.f32 %v3141_v13, %v3101_v40  ;;  %v6906_v13 = vld [vmem:[#allocation8 + $0x5c8] ss:$16 sps:$4 sm:$0xff]  }
 0x2cb   :  { %5060 = vmatprep.subr.bf16.mxu0 %v6866_v3  ;;  %v6915_v22 = vld [vmem:[#allocation8 + $0x268] ss:$16 sps:$4 sm:$0xff]   ;;  %v6923_v3 = vld [vmem:[#allocation8 + $0x24c] ss:$16 sps:$4 sm:$0xff]  }
 0x2ce   :  { %5061 = vmatpush1.bf16.msra.mxu0 %v6864_v26  ;;  %v6924_v26 = vld [vmem:[#allocation8 + $0x568] ss:$16 sps:$4 sm:$0xff]  }
 0x2cf   :  { %5062 = vmatprep.subr.bf16.mxu0 %v6872_v8  ;;  %v6921_v8 = vld [vmem:[#allocation8 + $0x248] ss:$16 sps:$4 sm:$0xff]  }
 0x2d1   :  { %v3180_v51 = vpop.f32.mrf.mxu1 }
 0x2d2   :  { %5063 = vmatpush1.bf16.msra.mxu0 %v6870_v27  ;;  %v3181_v45 = vadd.f32 %v3180_v51, %v3140_v25  ;;  %v6930_v27 = vld [vmem:[#allocation8 + $0x548] ss:$16 sps:$4 sm:$0xff]   ;;  %v6941_v25 = vld [vmem:[#allocation8 + $0x3ec] ss:$16 sps:$4 sm:$0xff]  }
 0x2d3   :  { %v3182_v32 = vpop.f32.mrf.mxu1  ;;  %5064 = vmatprep.subr.bf16.mxu0 %v6878_v47  ;;  %v6938_v47 = vld [vmem:[#allocation8 + $0x52c] ss:$16 sps:$4 sm:$0xff]   ;;  %v6927_v51 = vld [vmem:[#allocation8 + $0x228] ss:$16 sps:$4 sm:$0xff]  }
 0x2d4   :  { %v3183_v58 = vadd.f32 %v3182_v32, %v3142_v43  ;;  %v6935_v32 = vld [vmem:[#allocation8 + $0x20c] ss:$16 sps:$4 sm:$0xff]   ;;  %v6939_v43 = vld [vmem:[#allocation8 + $0x3e8] ss:$16 sps:$4 sm:$0xff]  }
 0x2d5   :  { %v3184_v39 = vpop.f32.mrf.mxu1 }
 0x2d6   :  { %5065 = vmatpush1.bf16.msra.mxu0 %v6876_v35  ;;  %v6936_v35 = vld [vmem:[#allocation8 + $0x528] ss:$16 sps:$4 sm:$0xff]  }
 0x2d7   :  { %v3185_v21 = vpop.f32.mrf.mxu1  ;;  %5066 = vmatprep.subr.bf16.mxu0 %v6884_v38  ;;  %v6944_v38 = vld [vmem:[#allocation8 + $0x50c] ss:$16 sps:$4 sm:$0xff]   ;;  %v6933_v39 = vld [vmem:[#allocation8 + $0x208] ss:$16 sps:$4 sm:$0xff]  }
 0x2d8   :  { %v6942_v21 = vld [vmem:[#allocation8 + $0x508] ss:$16 sps:$4 sm:$0xff]  }
 0x2d9   :  { %v3221_v30 = vpop.f32.mrf.mxu1 }
 0x2da   :  { %v3222_v48 = vadd.f32 %v3221_v30, %v3181_v45  ;;  %5067 = vmatpush1.bf16.msra.mxu0 %v6882_v42  ;;  %v7016_v42 = vld [vmem:[#allocation11 + $0x74] ss:$8 sps:$4 sm:$0xff]   ;;  %v6947_v45 = vld [vmem:[#allocation8 + $0x3cc] ss:$16 sps:$4 sm:$0xff]   ;;  %v7019_v30 = vld [vmem:[#allocation11 + $0x64] ss:$8 sps:$4 sm:$0xff]  }
 0x2db   :  { %v3223_v49 = vpop.f32.mrf.mxu1  ;;  %5068 = vmatprep.subr.bf16.mxu0 %v6890_v46  ;;  %v7014_v46 = vld [vmem:[#allocation11 + $0x70] ss:$8 sps:$4 sm:$0xff]  }
 0x2dc   :  { %v3234_v41 = vmul.f32 0.2, %v3222_v48  ;;  %v3224_v56 = vadd.f32 %v3223_v49, %v3183_v58  ;;  %v6945_v58 = vld [vmem:[#allocation8 + $0x3c8] ss:$16 sps:$4 sm:$0xff]   ;;  %v7017_v49 = vld [vmem:[#allocation11 + $0x60] ss:$8 sps:$4 sm:$0xff]  }
 0x2dd   :  { %v3225_v61 = vpop.f32.mrf.mxu1 }
 0x2de   :  { %v3235_v18 = vmul.f32 0.2, %v3224_v56  ;;  %v3242_v63 = vmax.f32 %v3222_v48, %v3234_v41  ;;  %5069 = vmatpush1.bf16.msra.mxu0 %v6888_v52  ;;  %v6950_v48 = vld [vmem:[#allocation8 + $0x3ac] ss:$16 sps:$4 sm:$0xff]   ;;  %v7022_v52 = vld [vmem:[#allocation11 + $0x54] ss:$8 sps:$4 sm:$0xff]  }
 0x2df   :  { %v3226_v0 = vpop.f32.mrf.mxu1  ;;  %5070 = vmatprep.subr.bf16.mxu0 %v6896_v60  ;;  %v6948_v41 = vld [vmem:[#allocation8 + $0x3a8] ss:$16 sps:$4 sm:$0xff]   ;;  %v7020_v60 = vld [vmem:[#allocation11 + $0x50] ss:$8 sps:$4 sm:$0xff]  }
 0x2e0   :  { %v3243_v2 = vmax.f32 %v3224_v56, %v3235_v18  ;;  %v7617_v7 = vpack.c.bf16 %v3242_v63, %v3242_v63  ;;  %v6953_v56 = vld [vmem:[#allocation8 + $0x38c] ss:$16 sps:$4 sm:$0xff]   ;;  %v7025_v61 = vld [vmem:[#allocation11 + $0x44] ss:$8 sps:$4 sm:$0xff]   ;;  %v7028_v0 = vld [vmem:[#allocation11 + $0x34] ss:$8 sps:$4 sm:$0xff]  }
 0x2e1   :  { %v6951_v18 = vld [vmem:[#allocation8 + $0x388] ss:$16 sps:$4 sm:$0xff]   ;;  %v6956_v63 = vld [vmem:[#allocation8 + $0x36c] ss:$16 sps:$4 sm:$0xff]  }
 0x2e2   :  { %v7615_v5 = vpack.c.bf16 %v3243_v2, %v3243_v2  ;;  %5071 = vmatpush1.bf16.msra.mxu0 %v6894_v1  ;;  %v7627_v1 = vld [vmem:[#allocation10] sm:$0xf]  ;;  %v6954_v2 = vld [vmem:[#allocation8 + $0x368] ss:$16 sps:$4 sm:$0xff]  }
 0x2e3   :  { %5072 = vmatprep.subr.bf16.mxu0 %v6902_v4  ;;  %v6959_v4 = vld [vmem:[#allocation8 + $0x34c] ss:$16 sps:$4 sm:$0xff]  }
 0x2e4   :  { %4965 = vmatprep.mubr.bf16.mxu1 %v7615_v5 }
 0x2e5   :  { %4966 = vmatmul.mubr.bf16.vlgmr.msra.gmra.mxu1 %v7617_v7 }
 0x2e6   :  { %5016 = vmatpush1.bf16.msra.mxu1 %v6891_v6  ;;  %5047 = vmatprep.mubr.bf16.mxu1 %v7558_v28  ;;  %v6917_v28 = vld [vmem:[#allocation8 + $0x26c] ss:$16 sps:$4 sm:$0xff]  }
 0x2e7   :  { %5017 = vmatprep.subr.bf16.mxu1 %v6899_v9  ;;  %5073 = vmatpush2.bf16.msra.mxu0 %v6900_v11  ;;  %v7026_v6 = vld [vmem:[#allocation11 + $0x30] ss:$8 sps:$4 sm:$0xff]   ;;  %v3513_v9 = vrot.slane %v7627_v1, %v7496_v55  ;;  %v7031_v11 = vld [vmem:[#allocation11 + $0x24] ss:$8 sps:$4 sm:$0xff]  }
 0x2e8   :  { %5074 = vmatprep.subr.bf16.mxu0 %v6908_v33  ;;  %v3517_v33 = vrot.slane %v7627_v1, %v7501_v62 }
 0x2ea   :  { %5018 = vmatpush1.bf16.msra.mxu1 %v6897_v12  ;;  %v6957_v12 = vld [vmem:[#allocation8 + $0x348] ss:$16 sps:$4 sm:$0xff]  }
 0x2eb   :  { %5019 = vmatprep.subr.bf16.mxu1 %v6905_v31  ;;  %5075 = vmatpush2.bf16.msra.mxu0 %v6906_v13  ;;  %v6962_v31 = vld [vmem:[#allocation8 + $0x32c] ss:$16 sps:$4 sm:$0xff]  }
 0x2ec   :  { %5076 = vmatprep.subr.bf16.mxu0 %v6914_v14  ;;  %v7029_v13 = vld [vmem:[#allocation11 + $0x20] ss:$8 sps:$4 sm:$0xff]  }
 0x2ee   :  { %5020 = vmatpush1.bf16.msra.mxu1 %v6903_v23  ;;  %v7034_v23 = vld [vmem:[#allocation11 + $0x14] ss:$8 sps:$4 sm:$0xff]  }
 0x2ef   :  { %5021 = vmatprep.subr.bf16.mxu1 %v6911_v57  ;;  %5077 = vmatpush2.bf16.msra.mxu0 %v6912_v29 }
 0x2f0   :  { %5078 = vmatprep.subr.bf16.mxu0 %v6920_v34 }
 0x2f2   :  { %5022 = vmatpush1.bf16.msra.mxu1 %v6909_v17  ;;  %v6960_v17 = vld [vmem:[#allocation8 + $0x328] ss:$16 sps:$4 sm:$0xff]  }
 0x2f3   :  { %5023 = vmatprep.subr.bf16.mxu1 %v6917_v28  ;;  %5079 = vmatpush2.bf16.msra.mxu0 %v6918_v50  ;;  %v6965_v50 = vld [vmem:[#allocation8 + $0x30c] ss:$16 sps:$4 sm:$0xff]  }
 0x2f4   :  { %5080 = vmatprep.subr.bf16.mxu0 %v6926_v59  ;;  %v7032_v59 = vld [vmem:[#allocation11 + $0x10] ss:$8 sps:$4 sm:$0xff]  }
 0x2f6   :  { %5024 = vmatpush1.bf16.msra.mxu1 %v6915_v22 }
 0x2f7   :  { %5025 = vmatprep.subr.bf16.mxu1 %v6923_v3  ;;  %5081 = vmatpush2.bf16.msra.mxu0 %v6924_v26  ;;  %v7622_v53 = vpop.f32.mrf.mxu0  ;;  %v7037_v3 = vld [vmem:[#allocation11 + $0x4] ss:$8 sps:$4 sm:$0xff]  }
 0x2f8   :  { %5082 = vmatprep.subr.bf16.mxu0 %v6932_v54  ;;  %v4845_v14 = vadd.f32 %v7622_v53, %v3513_v9  ;;  %v6963_v54 = vld [vmem:[#allocation8 + $0x308] ss:$16 sps:$4 sm:$0xff]  }
 0x2f9   :  { %v7624_v16 = vpop.f32.mrf.mxu0  ;;  %v7040_v53 = vld [vmem:[#allocation11 + $0xf4] ss:$8 sps:$4 sm:$0xff]  }
 0x2fa   :  { %5026 = vmatpush1.bf16.msra.mxu1 %v6921_v8  ;;  %v4847_v29 = vadd.f32 %v7624_v16, %v3517_v33  ;;  %v7038_v16 = vld [vmem:[#allocation11 + $0xf0] ss:$8 sps:$4 sm:$0xff]   ;;  %v6993_v9 = vld [vmem:[#allocation8 + $0x7c8] ss:$16 sps:$4 sm:$0xff]  }
 0x2fb   :  { %5027 = vmatprep.subr.bf16.mxu1 %v6929_v10  ;;  %5083 = vmatpush2.bf16.msra.mxu0 %v6930_v27  ;;  %v4848_v37 = vpop.f32.mrf.mxu0  ;;  %v6968_v10 = vld [vmem:[#allocation8 + $0x6ec] ss:$16 sps:$4 sm:$0xff]  }
 0x2fc   :  { %5084 = vmatprep.subr.bf16.mxu0 %v6938_v47  ;;  %v7035_v27 = vld [vmem:[#allocation11] ss:$8 sps:$4 sm:$0xff]   ;;  %v6966_v47 = vld [vmem:[#allocation8 + $0x6e8] ss:$16 sps:$4 sm:$0xff]  }
 0x2fd   :  { %v4849_v40 = vpop.f32.mrf.mxu0  ;;  %v6974_v37 = vld [vmem:[#allocation8 + $0x6ac] ss:$16 sps:$4 sm:$0xff]  }
 0x2fe   :  { %5028 = vmatpush1.bf16.msra.mxu1 %v6927_v51  ;;  %v6971_v51 = vld [vmem:[#allocation8 + $0x6cc] ss:$16 sps:$4 sm:$0xff]   ;;  %v6972_v40 = vld [vmem:[#allocation8 + $0x6a8] ss:$16 sps:$4 sm:$0xff]  }
 0x2ff   :  { %5029 = vmatprep.subr.bf16.mxu1 %v6935_v32  ;;  %5085 = vmatpush2.bf16.msra.mxu0 %v6936_v35  ;;  %v7043_v32 = vld [vmem:[#allocation11 + $0xe4] ss:$8 sps:$4 sm:$0xff]  }
 0x300   :  { %5086 = vmatprep.subr.bf16.mxu0 %v6944_v38  ;;  %v6969_v35 = vld [vmem:[#allocation8 + $0x6c8] ss:$16 sps:$4 sm:$0xff]   ;;  %v7041_v38 = vld [vmem:[#allocation11 + $0xe0] ss:$8 sps:$4 sm:$0xff]  }
 0x302   :  { %5030 = vmatpush1.bf16.msra.mxu1 %v6933_v39  ;;  %v7046_v39 = vld [vmem:[#allocation11 + $0xd4] ss:$8 sps:$4 sm:$0xff]  }
 0x303   :  { %5031 = vmatprep.subr.bf16.mxu1 %v6941_v25  ;;  %5087 = vmatpush2.bf16.msra.mxu0 %v6942_v21  ;;  %v6977_v25 = vld [vmem:[#allocation8 + $0x68c] ss:$16 sps:$4 sm:$0xff]  }
 0x304   :  { %5546 = vmatprep.subr.bf16.mxu0 %v7016_v42  ;;  %v7044_v21 = vld [vmem:[#allocation11 + $0xd0] ss:$8 sps:$4 sm:$0xff]   ;;  %v7049_v42 = vld [vmem:[#allocation11 + $0xc4] ss:$8 sps:$4 sm:$0xff]  }
 0x306   :  { %5032 = vmatpush2.bf16.msra.mxu1 %v6939_v43  ;;  %5089 = vmatmul.mubr.bf16.vlgmr.msra.gmra.mxu0 %v7598_v24  ;;  %v7023_v24 = vld [vmem:[#allocation11 + $0x40] ss:$8 sps:$4 sm:$0xff]  }
 0x307   :  { %5033 = vmatprep.subr.bf16.mxu1 %v6947_v45  ;;  %5547 = vmatpush1.bf16.msra.mxu0 %v7014_v46  ;;  %v6980_v43 = vld [vmem:[#allocation8 + $0x66c] ss:$16 sps:$4 sm:$0xff]   ;;  %v7052_v45 = vld [vmem:[#allocation11 + $0xb4] ss:$8 sps:$4 sm:$0xff]  }
 0x308   :  { %5548 = vmatprep.subr.bf16.mxu0 %v7019_v30  ;;  %v6978_v46 = vld [vmem:[#allocation8 + $0x668] ss:$16 sps:$4 sm:$0xff]   ;;  %v6983_v30 = vld [vmem:[#allocation8 + $0x64c] ss:$16 sps:$4 sm:$0xff]  }
 0x30a   :  { %5034 = vmatpush2.bf16.msra.mxu1 %v6945_v58  ;;  %v7050_v58 = vld [vmem:[#allocation11 + $0xb0] ss:$8 sps:$4 sm:$0xff]  }
 0x30b   :  { %5035 = vmatprep.subr.bf16.mxu1 %v6950_v48  ;;  %5549 = vmatpush1.bf16.msra.mxu0 %v7017_v49  ;;  %v7055_v48 = vld [vmem:[#allocation11 + $0xa4] ss:$8 sps:$4 sm:$0xff]  }
 0x30c   :  { %5550 = vmatprep.subr.bf16.mxu0 %v7022_v52  ;;  %v6981_v49 = vld [vmem:[#allocation8 + $0x648] ss:$16 sps:$4 sm:$0xff]   ;;  %v6986_v52 = vld [vmem:[#allocation8 + $0x62c] ss:$16 sps:$4 sm:$0xff]  }
 0x30e   :  { %5036 = vmatpush2.bf16.msra.mxu1 %v6948_v41  ;;  %v7053_v41 = vld [vmem:[#allocation11 + $0xa0] ss:$8 sps:$4 sm:$0xff]  }
 0x30f   :  { %5037 = vmatprep.subr.bf16.mxu1 %v6953_v56  ;;  %5551 = vmatpush1.bf16.msra.mxu0 %v7020_v60  ;;  %v7058_v56 = vld [vmem:[#allocation11 + $0x94] ss:$8 sps:$4 sm:$0xff]  }
 0x310   :  { %5552 = vmatprep.subr.bf16.mxu0 %v7025_v61  ;;  %v6984_v60 = vld [vmem:[#allocation8 + $0x628] ss:$16 sps:$4 sm:$0xff]   ;;  %v6989_v61 = vld [vmem:[#allocation8 + $0x60c] ss:$16 sps:$4 sm:$0xff]  }
 0x312   :  { %5038 = vmatpush2.bf16.msra.mxu1 %v6951_v18  ;;  %v7056_v18 = vld [vmem:[#allocation11 + $0x90] ss:$8 sps:$4 sm:$0xff]  }
 0x313   :  { %5039 = vmatprep.subr.bf16.mxu1 %v6956_v63  ;;  %5553 = vmatpush1.bf16.msra.mxu0 %v7023_v24  ;;  %v7061_v63 = vld [vmem:[#allocation11 + $0x84] ss:$8 sps:$4 sm:$0xff]  }
 0x314   :  { %5554 = vmatprep.subr.bf16.mxu0 %v7028_v0  ;;  %v6987_v24 = vld [vmem:[#allocation8 + $0x608] ss:$16 sps:$4 sm:$0xff]   ;;  %v6992_v0 = vld [vmem:[#allocation8 + $0x7ec] ss:$16 sps:$4 sm:$0xff]  }
 0x316   :  { %5040 = vmatpush2.bf16.msra.mxu1 %v6954_v2  ;;  %v7059_v2 = vld [vmem:[#allocation11 + $0x80] ss:$8 sps:$4 sm:$0xff]  }
 0x317   :  { %5041 = vmatprep.subr.bf16.mxu1 %v6959_v4  ;;  %5555 = vmatpush1.bf16.msra.mxu0 %v7026_v6  ;;  %v6990_v4 = vld [vmem:[#allocation8 + $0x7e8] ss:$16 sps:$4 sm:$0xff]   ;;  %v6995_v6 = vld [vmem:[#allocation8 + $0x7cc] ss:$16 sps:$4 sm:$0xff]  }
 0x318   :  { %5556 = vmatprep.subr.bf16.mxu0 %v7031_v11 }
 0x319   :  { %v4885_v57 = vpop.f32.mrf.mxu1 }
 0x31a   :  { %v7635_v34 = vadd.f32 %v4885_v57, %v4845_v14  ;;  %5042 = vmatpush2.bf16.msra.mxu1 %v6957_v12  ;;  %v6998_v12 = vld [vmem:[#allocation8 + $0x7ac] ss:$16 sps:$4 sm:$0xff]   ;;  %v6996_v14 = vld [vmem:[#allocation8 + $0x7a8] ss:$16 sps:$4 sm:$0xff]  }
 0x31b   :  { %v4887_v28 = vpop.f32.mrf.mxu1  ;;  %5043 = vmatprep.subr.bf16.mxu1 %v6962_v31  ;;  %5557 = vmatpush1.bf16.msra.mxu0 %v7029_v13  ;;  %v7001_v57 = vld [vmem:[#allocation8 + $0x78c] ss:$16 sps:$4 sm:$0xff]  }
 0x31c   :  { %v7637_v22 = vadd.f32 %v4887_v28, %v4847_v29  ;;  %5558 = vmatprep.subr.bf16.mxu0 %v7034_v23  ;;  %v7004_v28 = vld [vmem:[#allocation8 + $0x76c] ss:$16 sps:$4 sm:$0xff]  }
 0x31d   :  { %v4889_v26 = vpop.f32.mrf.mxu1 }
 0x31e   :  { %5044 = vmatpush2.bf16.msra.mxu1 %v6960_v17  ;;  %v6999_v17 = vld [vmem:[#allocation8 + $0x788] ss:$16 sps:$4 sm:$0xff]   ;;  %v7013_v26 = vld [vmem:[#allocation8 + $0x70c] ss:$16 sps:$4 sm:$0xff]  }
 0x31f   :  { %v4890_v8 = vpop.f32.mrf.mxu1  ;;  %5045 = vmatprep.subr.bf16.mxu1 %v6965_v50  ;;  %5559 = vmatpush1.bf16.msra.mxu0 %v7032_v59  ;;  %v7002_v50 = vld [vmem:[#allocation8 + $0x768] ss:$16 sps:$4 sm:$0xff]  }
 0x320   :  { %5560 = vmatprep.subr.bf16.mxu0 %v7037_v3  ;;  %v7005_v59 = vld [vmem:[#allocation8 + $0x748] ss:$16 sps:$4 sm:$0xff]   ;;  %v7010_v3 = vld [vmem:[#allocation8 + $0x72c] ss:$16 sps:$4 sm:$0xff]  }
 0x321   :  { %v7062_v8 = vld [vmem:[#allocation11 + $0x170] ss:$8 sps:$4 sm:$0xff]  }
 0x322   :  { %5046 = vmatpush2.bf16.msra.mxu1 %v6963_v54  ;;  %v7011_v54 = vld [vmem:[#allocation8 + $0x708] ss:$16 sps:$4 sm:$0xff]  }
 0x323   :  { %5097 = vmatprep.subr.bf16.mxu1 %v6968_v10  ;;  %5561 = vmatpush1.bf16.msra.mxu0 %v7035_v27  ;;  %v7064_v10 = vld [vmem:[#allocation11 + $0x174] ss:$8 sps:$4 sm:$0xff]   ;;  %v7067_v27 = vld [vmem:[#allocation11 + $0x164] ss:$8 sps:$4 sm:$0xff]  }
 0x324   :  { %5562 = vmatprep.subr.bf16.mxu0 %v7040_v53  ;;  %v7065_v53 = vld [vmem:[#allocation11 + $0x160] ss:$8 sps:$4 sm:$0xff]  }
 0x325   :  { %5048 = vmatmul.mubr.bf16.vlgmr.msra.gmra.mxu1 %v7581_v15  ;;  %v6975_v15 = vld [vmem:[#allocation8 + $0x688] ss:$16 sps:$4 sm:$0xff]  }
 0x326   :  { %5098 = vmatpush1.bf16.msra.mxu1 %v6966_v47  ;;  %5129 = vmatprep.mubr.bf16.mxu1 %v7615_v5  ;;  %v7047_v5 = vld [vmem:[#allocation11 + $0xc0] ss:$8 sps:$4 sm:$0xff]   ;;  %v7070_v47 = vld [vmem:[#allocation11 + $0x154] ss:$8 sps:$4 sm:$0xff]  }
 0x327   :  { %5099 = vmatprep.subr.bf16.mxu1 %v6971_v51  ;;  %5563 = vmatpush2.bf16.msra.mxu0 %v7038_v16  ;;  %v7068_v51 = vld [vmem:[#allocation11 + $0x150] ss:$8 sps:$4 sm:$0xff]   ;;  %v7073_v16 = vld [vmem:[#allocation11 + $0x144] ss:$8 sps:$4 sm:$0xff]  }
 0x328   :  { %5564 = vmatprep.subr.bf16.mxu0 %v7043_v32  ;;  %v7071_v32 = vld [vmem:[#allocation11 + $0x140] ss:$8 sps:$4 sm:$0xff]  }
 0x32a   :  { %5100 = vmatpush1.bf16.msra.mxu1 %v6969_v35  ;;  %v7076_v35 = vld [vmem:[#allocation11 + $0x134] ss:$8 sps:$4 sm:$0xff]  }
 0x32b   :  { %5101 = vmatprep.subr.bf16.mxu1 %v6974_v37  ;;  %5565 = vmatpush2.bf16.msra.mxu0 %v7041_v38  ;;  %v7074_v37 = vld [vmem:[#allocation11 + $0x130] ss:$8 sps:$4 sm:$0xff]   ;;  %v7077_v38 = vld [vmem:[#allocation11 + $0x120] ss:$8 sps:$4 sm:$0xff]  }
 0x32c   :  { %5566 = vmatprep.subr.bf16.mxu0 %v7046_v39  ;;  %v7082_v39 = vld [vmem:[#allocation11 + $0x114] ss:$8 sps:$4 sm:$0xff]  }
 0x32e   :  { %5102 = vmatpush1.bf16.msra.mxu1 %v6972_v40  ;;  %v7080_v40 = vld [vmem:[#allocation11 + $0x110] ss:$8 sps:$4 sm:$0xff]  }
 0x32f   :  { %5103 = vmatprep.subr.bf16.mxu1 %v6977_v25  ;;  %5567 = vmatpush2.bf16.msra.mxu0 %v7044_v21  ;;  %v7085_v25 = vld [vmem:[#allocation11 + $0x104] ss:$8 sps:$4 sm:$0xff]  }
 0x330   :  { %5568 = vmatprep.subr.bf16.mxu0 %v7049_v42  ;;  %v7083_v42 = vld [vmem:[#allocation11 + $0x100] ss:$8 sps:$4 sm:$0xff]  }
 0x332   :  { %5104 = vmatpush1.bf16.msra.mxu1 %v6975_v15  ;;  %v7088_v15 = vld [vmem:[#allocation11 + $0x1f4] ss:$8 sps:$4 sm:$0xff]  }
 0x333   :  { %5105 = vmatprep.subr.bf16.mxu1 %v6980_v43  ;;  %5569 = vmatpush2.bf16.msra.mxu0 %v7047_v5 }
 0x334   :  { %5570 = vmatprep.subr.bf16.mxu0 %v7052_v45  ;;  %v7086_v45 = vld [vmem:[#allocation11 + $0x1f0] ss:$8 sps:$4 sm:$0xff]  }
 0x336   :  { %5106 = vmatpush1.bf16.msra.mxu1 %v6978_v46  ;;  %v7091_v46 = vld [vmem:[#allocation11 + $0x1e4] ss:$8 sps:$4 sm:$0xff]  }
 0x337   :  { %5107 = vmatprep.subr.bf16.mxu1 %v6983_v30  ;;  %5571 = vmatpush2.bf16.msra.mxu0 %v7050_v58  ;;  %v7089_v58 = vld [vmem:[#allocation11 + $0x1e0] ss:$8 sps:$4 sm:$0xff]  }
 0x338   :  { %5572 = vmatprep.subr.bf16.mxu0 %v7055_v48  ;;  %v7094_v48 = vld [vmem:[#allocation11 + $0x1d4] ss:$8 sps:$4 sm:$0xff]  }
 0x33a   :  { %5108 = vmatpush1.bf16.msra.mxu1 %v6981_v49  ;;  %v7092_v49 = vld [vmem:[#allocation11 + $0x1d0] ss:$8 sps:$4 sm:$0xff]  }
 0x33b   :  { %5109 = vmatprep.subr.bf16.mxu1 %v6986_v52  ;;  %5573 = vmatpush2.bf16.msra.mxu0 %v7053_v41  ;;  %v7097_v52 = vld [vmem:[#allocation11 + $0x1c4] ss:$8 sps:$4 sm:$0xff]   ;;  %v7095_v41 = vld [vmem:[#allocation11 + $0x1c0] ss:$8 sps:$4 sm:$0xff]  }
 0x33c   :  { %5574 = vmatprep.subr.bf16.mxu0 %v7058_v56  ;;  %v7100_v56 = vld [vmem:[#allocation11 + $0x1b4] ss:$8 sps:$4 sm:$0xff]  }
 0x33e   :  { %5110 = vmatpush1.bf16.msra.mxu1 %v6984_v60  ;;  %v7098_v60 = vld [vmem:[#allocation11 + $0x1b0] ss:$8 sps:$4 sm:$0xff]  }
 0x33f   :  { %5111 = vmatprep.subr.bf16.mxu1 %v6989_v61  ;;  %5575 = vmatpush2.bf16.msra.mxu0 %v7056_v18  ;;  %v7103_v61 = vld [vmem:[#allocation11 + $0x1a4] ss:$8 sps:$4 sm:$0xff]   ;;  %v7101_v18 = vld [vmem:[#allocation11 + $0x1a0] ss:$8 sps:$4 sm:$0xff]  }
 0x340   :  { %5576 = vmatprep.subr.bf16.mxu0 %v7061_v63 }
 0x342   :  { %5112 = vmatpush1.bf16.msra.mxu1 %v6987_v24 }
 0x343   :  { %5113 = vmatprep.subr.bf16.mxu1 %v6992_v0  ;;  %5577 = vmatpush2.bf16.msra.mxu0 %v7059_v2  ;;  %v7106_v2 = vld [vmem:[#allocation11 + $0x194] ss:$8 sps:$4 sm:$0xff]  }
 0x345   :  { %v4926_v11 = vpop.f32.mrf.mxu0 }
 0x346   :  { %5114 = vmatpush2.bf16.msra.mxu1 %v6990_v4  ;;  %v7642_v33 = vadd.f32 %v4926_v11, %v7635_v34  ;;  %v7007_v34 = vld [vmem:[#allocation8 + $0x74c] ss:$16 sps:$4 sm:$0xff]  }
 0x347   :  { %5115 = vmatprep.subr.bf16.mxu1 %v6995_v6  ;;  %v4928_v31 = vpop.f32.mrf.mxu0 }
 0x348   :  { %v7645_v13 = vadd.f32 %v4928_v31, %v7637_v22  ;;  %v7008_v22 = vld [vmem:[#allocation8 + $0x728] ss:$16 sps:$4 sm:$0xff]  }
 0x349   :  { %v4930_v23 = vpop.f32.mrf.mxu0 }
 0x34a   :  { %5116 = vmatpush2.bf16.msra.mxu1 %v6993_v9  ;;  %v7104_v9 = vld [vmem:[#allocation11 + $0x190] ss:$8 sps:$4 sm:$0xff]   ;;  %v7109_v23 = vld [vmem:[#allocation11 + $0x184] ss:$8 sps:$4 sm:$0xff]  }
 0x34b   :  { %5117 = vmatprep.subr.bf16.mxu1 %v6998_v12  ;;  %v4931_v29 = vpop.f32.mrf.mxu0 }
 0x34c   :  { %v7107_v29 = vld [vmem:[#allocation11 + $0x180] ss:$8 sps:$4 sm:$0xff]  }
 0x34e   :  { %5118 = vmatpush2.bf16.msra.mxu1 %v6996_v14 }
 0x34f   :  { %5119 = vmatprep.subr.bf16.mxu1 %v7001_v57 }
 0x352   :  { %5120 = vmatpush2.bf16.msra.mxu1 %v6999_v17 }
 0x353   :  { %5121 = vmatprep.subr.bf16.mxu1 %v7004_v28 }
 0x356   :  { %5122 = vmatpush2.bf16.msra.mxu1 %v7002_v50 }
 0x357   :  { %5123 = vmatprep.subr.bf16.mxu1 %v7007_v34 }
 0x35a   :  { %5124 = vmatpush2.bf16.msra.mxu1 %v7005_v59  ;;  %v3521_v59 = vrot.slane %v7627_v1, %v554_v20  ;;  %v7113_v20 = vld [vmem:[#allocation14 + $0x30] sm:$0xff]  }
 0x35b   :  { %5125 = vmatprep.subr.bf16.mxu1 %v7010_v3  ;;  %v3525_v3 = vrot.slane %v7627_v1, %v558_v19  ;;  %v7115_v19 = vld [vmem:[#allocation14 + $0x28] sm:$0xff]   ;;  %v7116_v1 = vld [vmem:[#allocation14 + $0x60] sm:$0xff]  }
 0x35e   :  { %5126 = vmatpush2.bf16.msra.mxu1 %v7008_v22 }
 0x35f   :  { %5127 = vmatprep.subr.bf16.mxu1 %v7013_v26 }
 0x362   :  { %5128 = vmatpush2.bf16.msra.mxu1 %v7011_v54 }
 0x363   :  { %5587 = vmatprep.subr.bf16.mxu1 %v7064_v10 }
 0x365   :  { %5130 = vmatmul.mubr.bf16.vlgmr.msra.gmra.mxu1 %v7617_v7  ;;  %v7079_v7 = vld [vmem:[#allocation11 + $0x124] ss:$8 sps:$4 sm:$0xff]  }
 0x366   :  { %5588 = vmatpush1.bf16.msra.mxu1 %v7062_v8 }
 0x367   :  { %5589 = vmatprep.subr.bf16.mxu1 %v7067_v27 }
 0x36a   :  { %5590 = vmatpush1.bf16.msra.mxu1 %v7065_v53 }
 0x36b   :  { %5591 = vmatprep.subr.bf16.mxu1 %v7070_v47 }
 0x36e   :  { %5592 = vmatpush1.bf16.msra.mxu1 %v7068_v51 }
 0x36f   :  { %5593 = vmatprep.subr.bf16.mxu1 %v7073_v16 }
 0x372   :  { %5594 = vmatpush1.bf16.msra.mxu1 %v7071_v32  ;;  %v7110_v32 = vld [vmem:[#allocation14 + $0x78] sm:$0xff]  }
 0x373   :  { %5595 = vmatprep.subr.bf16.mxu1 %v7076_v35  ;;  %v7111_v35 = vld [vmem:[#allocation14 + $0x38] sm:$0xff]   ;;  %6582 = vmatprep.subr.bf16.mxu0 %v7110_v32 }
 0x376   :  { %5596 = vmatpush1.bf16.msra.mxu1 %v7074_v37  ;;  %v7112_v37 = vld [vmem:[#allocation14 + $0x70] sm:$0xff]  }
 0x377   :  { %5597 = vmatprep.subr.bf16.mxu1 %v7079_v7  ;;  %v7117_v7 = vld [vmem:[#allocation14 + $0x20] sm:$0xff]  }
 0x37a   :  { %5598 = vmatpush1.bf16.msra.mxu1 %v7077_v38  ;;  %v7118_v38 = vld [vmem:[#allocation14 + $0x58] sm:$0xff]  }
 0x37b   :  { %5599 = vmatprep.subr.bf16.mxu1 %v7082_v39  ;;  %v7119_v39 = vld [vmem:[#allocation14 + $0x18] sm:$0xff]  }
 0x37e   :  { %5600 = vmatpush1.bf16.msra.mxu1 %v7080_v40 }
 0x37f   :  { %5601 = vmatprep.subr.bf16.mxu1 %v7085_v25 }
 0x382   :  { %5602 = vmatpush1.bf16.msra.mxu1 %v7083_v42 }
 0x383   :  { %5603 = vmatprep.subr.bf16.mxu1 %v7088_v15 }
 0x385   :  { %v5008_v21 = vpop.f32.mrf.mxu0 }
 0x386   :  { %5604 = vmatpush2.bf16.msra.mxu1 %v7086_v45  ;;  %v5009_v22 = vadd.f32 %v5008_v21, %v3521_v59 }
 0x387   :  { %v5010_v43 = vpop.f32.mrf.mxu0  ;;  %5605 = vmatprep.subr.bf16.mxu1 %v7091_v46 }
 0x388   :  { %v5011_v54 = vadd.f32 %v5010_v43, %v3525_v3  ;;  %v6565_v3 = vld [vmem:[#allocation16] ss:$0 sm:$0xff] }
 0x389   :  { %v5012_v5 = vpop.f32.mrf.mxu0 }
 0x38a   :  { %5606 = vmatpush2.bf16.msra.mxu1 %v7089_v58 }
 0x38b   :  { %v5013_v30 = vpop.f32.mrf.mxu0  ;;  %5607 = vmatprep.subr.bf16.mxu1 %v7094_v48 }
 0x38e   :  { %5608 = vmatpush2.bf16.msra.mxu1 %v7092_v49  ;;  %v7120_v49 = vld [vmem:[#allocation14 + $0x50] sm:$0xff]  }
 0x38f   :  { %5609 = vmatprep.subr.bf16.mxu1 %v7097_v52  ;;  %v7121_v52 = vld [vmem:[#allocation14 + $0x10] sm:$0xff]  }
 0x392   :  { %5610 = vmatpush2.bf16.msra.mxu1 %v7095_v41 }
 0x393   :  { %5611 = vmatprep.subr.bf16.mxu1 %v7100_v56 }
 0x396   :  { %5612 = vmatpush2.bf16.msra.mxu1 %v7098_v60  ;;  %v7122_v60 = vld [vmem:[#allocation14 + $0x48] sm:$0xff]  }
 0x397   :  { %5613 = vmatprep.subr.bf16.mxu1 %v7103_v61  ;;  %v7123_v61 = vld [vmem:[#allocation14 + $0x8] sm:$0xff]  }
 0x39a   :  { %5614 = vmatpush2.bf16.msra.mxu1 %v7101_v18 }
 0x39b   :  { %5615 = vmatprep.subr.bf16.mxu1 %v7106_v2  ;;  %v5214_v2 = vld [vmem:[#allocation13] sm:$0x3] }
 0x39e   :  { %5616 = vmatpush2.bf16.msra.mxu1 %v7104_v9 }
 0x39f   :  { %5617 = vmatprep.subr.bf16.mxu1 %v7109_v23 }
 0x3a2   :  { %5618 = vmatpush2.bf16.msra.mxu1 %v7107_v29 }
 0x3a5   :  { %v4967_v63 = vpop.f32.mrf.mxu1 }
 0x3a6   :  { %v4968_v24 = vadd.f32 %v4967_v63, %v7642_v33 }
 0x3a7   :  { %v4969_v0 = vpop.f32.mrf.mxu1 }
 0x3a8   :  { %v5138_v4 = vmul.f32 0.2, %v4968_v24  ;;  %v4970_v6 = vadd.f32 %v4969_v0, %v7645_v13  ;;  %v7125_v0 = vld [vmem:[#allocation14] sm:$0xff]  }
 0x3a9   :  { %v4971_v11 = vpop.f32.mrf.mxu1 }
 0x3aa   :  { %v5139_v12 = vmul.f32 0.2, %v4970_v6  ;;  %v5142_v31 = vmax.f32 %v4968_v24, %v5138_v4  ;;  %v7124_v24 = vld [vmem:[#allocation14 + $0x40] sm:$0xff]   ;;  %v5219_v4 = vrot.slane %v5214_v2, %v7496_v55  ;;  %v5810_v55 = vand.u32 127, %v544_v36 }
 0x3ab   :  { %v4972_v14 = vpop.f32.mrf.mxu1 }
 0x3ac   :  { %v5143_v57 = vmax.f32 %v4970_v6, %v5139_v12  ;;  %v5146_v33 = vpack.c.bf16 %v5142_v31, %v5142_v31  ;;  %v5223_v6 = vrot.slane %v5214_v2, %v7501_v62  ;;  %vm5811_vm1 = vcmp.lt.s32.totalorder %v5810_v55, 10 }
 0x3ae   :  { %v5147_v17 = vpack.c.bf16 %v5143_v57, %v5143_v57 }
 0x3b0   :  { %5578 = vmatprep.mubr.bf16.mxu0 %v5147_v17 }
 0x3b1   :  { %5579 = vmatmul.mubr.bf16.vlgmr.msra.gmra.mxu0 %v5146_v33 }
 0x3b2   :  { %6583 = vmatpush3.bf16.msra.mxu0 %v7111_v35 }
 0x3b3   :  { %6584 = vmatprep.subr.bf16.mxu0 %v7112_v37 }
 0x3b6   :  { %6585 = vmatpush3.bf16.msra.mxu0 %v7113_v20 }
 0x3b7   :  { %6586 = vmatprep.subr.bf16.mxu0 %v7114_v44 }
 0x3ba   :  { %6587 = vmatpush3.bf16.msra.mxu0 %v7115_v19 }
 0x3bb   :  { %6588 = vmatprep.subr.bf16.mxu0 %v7116_v1 }
 0x3be   :  { %6589 = vmatpush3.bf16.msra.mxu0 %v7117_v7 }
 0x3bf   :  { %6590 = vmatprep.subr.bf16.mxu0 %v7118_v38 }
 0x3c2   :  { %6591 = vmatpush3.bf16.msra.mxu0 %v7119_v39 }
 0x3c3   :  { %6592 = vmatprep.subr.bf16.mxu0 %v7120_v49 }
 0x3c6   :  { %v5090_v28 = vpop.f32.mrf.mxu0  ;;  %6593 = vmatpush3.bf16.msra.mxu0 %v7121_v52 }
 0x3c7   :  { %6594 = vmatprep.subr.bf16.mxu0 %v7122_v60 }
 0x3c8   :  { %v5092_v50 = vpop.f32.mrf.mxu0 }
 0x3ca   :  { %v5094_v34 = vpop.f32.mrf.mxu0  ;;  %6595 = vmatpush3.bf16.msra.mxu0 %v7123_v61 }
 0x3cb   :  { %6596 = vmatprep.subr.bf16.mxu0 %v7124_v24 }
 0x3cc   :  { %v5095_v13 = vpop.f32.mrf.mxu0 }
 0x3ce   :  { %6597 = vmatpush3.bf16.msra.mxu0 %v7125_v0 }
 0x3e5   :  { %v5049_v26 = vpop.f32.mrf.mxu1 }
 0x3e6   :  { %v5050_v8 = vadd.f32 %v5049_v26, %v5009_v22 }
 0x3e7   :  { %v5051_v10 = vpop.f32.mrf.mxu1 }
 0x3e8   :  { %v5052_v27 = vadd.f32 %v5051_v10, %v5011_v54  ;;  %v5091_v53 = vadd.f32 %v5090_v28, %v5050_v8 }
 0x3e9   :  { %v5053_v47 = vpop.f32.mrf.mxu1 }
 0x3ea   :  { %v5093_v51 = vadd.f32 %v5092_v50, %v5052_v27 }
 0x3eb   :  { %v5054_v16 = vpop.f32.mrf.mxu1 }
 0x425   :  { %v5131_v40 = vpop.f32.mrf.mxu1 }
 0x426   :  { %v5132_v25 = vadd.f32 %v5131_v40, %v5091_v53 }
 0x427   :  { %v5133_v21 = vpop.f32.mrf.mxu1 }
 0x428   :  { %v5140_v42 = vmul.f32 0.2, %v5132_v25  ;;  %v5134_v15 = vadd.f32 %v5133_v21, %v5093_v51 }
 0x429   :  { %v5135_v43 = vpop.f32.mrf.mxu1 }
 0x42a   :  { %v5141_v5 = vmul.f32 0.2, %v5134_v15  ;;  %v5144_v45 = vmax.f32 %v5132_v25, %v5140_v42 }
 0x42b   :  { %v5136_v46 = vpop.f32.mrf.mxu1 }
 0x42c   :  { %v5145_v30 = vmax.f32 %v5134_v15, %v5141_v5  ;;  %v5148_v48 = vpack.c.bf16 %v5144_v45, %v5144_v45 }
 0x42e   :  { %v5149_v58 = vpack.c.bf16 %v5145_v30, %v5145_v30 }
 0x430   :  { %5619 = vmatprep.mubr.bf16.mxu1 %v5149_v58 }
 0x431   :  { %5620 = vmatmul.mubr.bf16.vlgmr.msra.gmra.mxu1 %v5148_v48 }
 0x471   :  { %v5580_v41 = vpop.f32.mrf.mxu0 }
 0x472   :  { %v5581_v9 = vadd.f32 %v5580_v41, %v5219_v4 }
 0x473   :  { %v5582_v56 = vpop.f32.mrf.mxu0 }
 0x474   :  { %v5583_v12 = vadd.f32 %v5582_v56, %v5223_v6 }
 0x475   :  { %v5584_v18 = vpop.f32.mrf.mxu0 }
 0x477   :  { %v5585_v63 = vpop.f32.mrf.mxu0 }
 0x4f1   :  { %v5621_v11 = vpop.f32.mrf.mxu1 }
 0x4f2   :  { %v5622_v31 = vadd.f32 %v5621_v11, %v5581_v9 }
 0x4f3   :  { %v5623_v14 = vpop.f32.mrf.mxu1 }
 0x4f4   :  { %v5628_v23 = vmul.f32 0.2, %v5622_v31  ;;  %v5624_v57 = vadd.f32 %v5623_v14, %v5583_v12 }
 0x4f5   :  { %v5625_v29 = vpop.f32.mrf.mxu1 }
 0x4f6   :  { %v5629_v17 = vmul.f32 0.2, %v5624_v57  ;;  %v5630_v33 = vmax.f32 %v5622_v31, %v5628_v23 }
 0x4f7   :  { %v5626_v28 = vpop.f32.mrf.mxu1 }
 0x4f8   :  { %v5631_v50 = vmax.f32 %v5624_v57, %v5629_v17  ;;  %v5632_v13 = vpack.c.bf16 %v5630_v33, %v5630_v33 }
 0x4fa   :  { %v5633_v34 = vpack.c.bf16 %v5631_v50, %v5631_v50 }
 0x4fc   :  { %5801 = vmatprep.mubr.bf16.mxu0 %v5633_v34 }
 0x4fd   :  { %5802 = vmatmul.mubr.bf16.vlgmr.msra.gmra.mxu0 %v5632_v13 }
 0x5bd   :  { %v6598_v59 = vpop.f32.mrf.mxu0 }
 0x5bf   :  { %v6599_v62 = vpop.f32.mrf.mxu0 }
 0x5c0   :  { %v6600_v22 = vadd.f32 %v6599_v62, %v6598_v59 }
 0x5c1   :  { %v6601_v26 = vpop.f32.mrf.mxu0 }
 0x5c2   :  { %v5804_v54 = vadd.f32 %v6600_v22, %v6565_v3 }
 0x5c3   :  { %v6602_v8 = vpop.f32.mrf.mxu0 }
 0x5c4   :  { %v5812_v10 = vsel %vm5811_vm1, %v5804_v54, -inf }
 0x5c5   :  { %5813 = vmax.xlane.f32.xlu0 %v5812_v10 }
 0x64e   :  { %v5814_v27 = vpop.xlane.xlu0 %5813 }
 0x64f   :  { %v5815_v53 = vsub.f32 %v5812_v10, %v5814_v27 }
 0x651   :  { %v5816_v47 = vmul.f32 1.442695, %v5815_v53 }
 0x653   :  { %7126 = vpow2.f32 %v5816_v47 }
 0x660   :  { %v7127_v51 = vpop.eup %7126 }
 0x661   :  { %5818 = vadd.xlane.f32.xlu0 %v7127_v51 }
 0x6ea   :  { %v5819_v16 = vpop.xlane.xlu0 %5818 }
 0x6eb   :  { %7128 = vrcp.f32 %v5819_v16 }
 0x6f8   :  { %v7129_v36 = vpop.eup %7128 }
 0x6f9   :  { %v5821_v32 = vmul.f32 %v7129_v36, %v7127_v51 }
 0x6fb   :  { %5822 = vst [vmem:[#allocation17] sm:$0xff] %v5821_v32 }
 0x6fc   :  { %7324 = shalt.err (!%p7321_p7)
}
 0x6fd   :  { %5832 = dma.vmem_to_hbm [thread:$0]  %s5830_s8, 128, %s7671_s9, [#allocation4]  }
 0x6fe   :  { %7343 = dma.done.wait [#allocation4], 128  }
 0x6ff   :  { %7344 = vsyncadd [#allocation4], 4294967168 }
 0x700   :  { %5836 = vsyncpa [#allocation3], 1 }
 0x701   :  { %5837 = vsyncpa [#allocation6], 1 }
 0x702   :  { %5838 = vsyncpa [#allocation9], 1 }
 0x703   :  { %5839 = vsyncpa [#allocation12], 1 }
 0x704   :  { %5840 = vsyncpa [#allocation15], 1 }
 0x705   :  { %5841 = vsyncpa [#allocation4], 1 }

// kernel: tpu_custom_call.1
= control target key start
LH: loop header
LB: loop body
LE: loop exit
PB: predicated region body
PF: predicated region fallthrough
CT: control target
= control target key end

     0   :  { %14 = vsyncpa [#allocation3], 0  ;;  %s7662_s0 = inlined_call_operand.hbm [shape: bf16[8,784], index: 0, kind: input, shape index: {}]   ;;  %s7663_s1 = inlined_call_operand.hbm [shape: bf16[784,1024], index: 1, kind: input, shape index: {}]   ;;  %s7664_s2 = inlined_call_operand.hbm [shape: f32[1,1024], index: 2, kind: input, shape index: {}]   ;;  %s7665_s3 = inlined_call_operand.hbm [shape: bf16[1024,512], index: 3, kind: input, shape index: {}]   ;;  %s7666_s4 = inlined_call_operand.hbm [shape: f32[1,512], index: 4, kind: input, shape index: {}]   ;;  %s7667_s5 = inlined_call_operand.hbm [shape: bf16[512,256], index: 5, kind: input, shape index: {}]   ;;  %s7668_s6 = inlined_call_operand.hbm [shape: f32[1,256], index: 6, kind: input, shape index: {}]   ;;  %s7669_s7 = inlined_call_operand.hbm [shape: bf16[256,128], index: 7, kind: input, shape index: {}]   ;;  %s7670_s8 = inlined_call_operand.hbm [shape: f32[1,128], index: 8, kind: input, shape index: {}]   ;;  %s7671_s9 = inlined_call_operand.hbm [shape: f32[8,128], index: 9, kind: output, shape index: {}]  }
   0x1   :  { %15 = vsyncpa [#allocation6], 0 }
   0x2   :  { %16 = vsyncpa [#allocation9], 0 }
   0x3   :  { %17 = vsyncpa [#allocation12], 0 }
   0x4   :  { %18 = vsyncpa [#allocation15], 0 }
   0x5   :  { %19 = vsyncpa [#allocation4], 0  ;;  %s7345_s30 = smov [#allocation5]  }
   0x6   :  { %s35_s10 = sshll.u32 %s7345_s30, 4  ;;  %s36_s10 = int_to_ptr.vmem [resolvable:$true] %s35_s10 }
   0x7   :  { %s7141_s11 = scalar_lea.vmem %s36_s10, 50176  ;;  %p7146_p1 = scmp.lt.s32.totalorder %s36_s10, %s36_s10 }
   0x8   :  { %p7142_p0 = scmp.ne.s32.totalorder %s36_s10, %s7141_s11  ;;  %p7147_p2 = scmp.lt.s32.totalorder %s7141_s11, %s7141_s11 }
   0xa   :  { %p7148_p3 = por %p7147_p2, %p7146_p1 }
   0xc   :  { %p7149_p4 = pnand %p7148_p3, %p7142_p0 }
   0xe   :  { %7152 = shalt.err (!%p7149_p4)
}
   0xf   :  { %s7346_s12 = smov 512   ;;  %s7347_s13 = smov 32  }
  0x10   :  { %41 = dma.hbm_to_vmem [thread:$0]  %s7663_s1, 50176, %s36_s10, [#allocation6], %s7346_s12, %s7346_s12, %s7347_s13  }
  0x11   :  { %s7348_s16 = smov [#allocation8]  }
  0x12   :  { %s57_s17 = sshll.u32 %s7348_s16, 4  ;;  %s58_s17 = int_to_ptr.vmem [resolvable:$true] %s57_s17 }
  0x13   :  { %s7161_s18 = scalar_lea.vmem %s58_s17, 32768  ;;  %p7166_p6 = scmp.lt.s32.totalorder %s58_s17, %s58_s17 }
  0x14   :  { %p7162_p5 = scmp.ne.s32.totalorder %s58_s17, %s7161_s18  ;;  %p7167_p7 = scmp.lt.s32.totalorder %s7161_s18, %s7161_s18 }
  0x16   :  { %p7168_p8 = por %p7167_p7, %p7166_p6 }
  0x18   :  { %p7169_p9 = pnand %p7168_p8, %p7162_p5 }
  0x1a   :  { %7172 = shalt.err (!%p7169_p9)
}
  0x1b   :  { %s7349_s19 = smov 256   ;;  %s7350_s20 = smov 16  }
  0x1c   :  { %63 = dma.hbm_to_vmem [thread:$0]  %s7665_s3, 32768, %s58_s17, [#allocation9], %s7349_s19, %s7349_s19, %s7350_s20  }
  0x1d   :  { %s7351_s23 = smov [#allocation11]  }
  0x1e   :  { %s79_s24 = sshll.u32 %s7351_s23, 4  ;;  %s80_s24 = int_to_ptr.vmem [resolvable:$true] %s79_s24 }
  0x1f   :  { %s7181_s1 = scalar_lea.vmem %s80_s24, 8192  ;;  %p7186_p11 = scmp.lt.s32.totalorder %s80_s24, %s80_s24 }
  0x20   :  { %p7182_p10 = scmp.ne.s32.totalorder %s80_s24, %s7181_s1  ;;  %p7187_p12 = scmp.lt.s32.totalorder %s7181_s1, %s7181_s1 }
  0x22   :  { %p7188_p13 = por %p7187_p12, %p7186_p11 }
  0x24   :  { %p7189_p0 = pnand %p7188_p13, %p7182_p10 }
  0x26   :  { %7192 = shalt.err (!%p7189_p0)
}
  0x27   :  { %s7352_s25 = smov 128   ;;  %s7353_s26 = smov 8  }
  0x28   :  { %85 = dma.hbm_to_vmem [thread:$0]  %s7667_s5, 8192, %s80_s24, [#allocation12], %s7352_s25, %s7352_s25, %s7353_s26  }
  0x29   :  { %s7354_s29 = smov [#allocation14]  }
  0x2a   :  { %s101_s30 = sshll.u32 %s7354_s29, 4  ;;  %s102_s30 = int_to_ptr.vmem [resolvable:$true] %s101_s30 }
  0x2b   :  { %s7201_s3 = scalar_lea.vmem %s102_s30, 2048  ;;  %p7206_p2 = scmp.lt.s32.totalorder %s102_s30, %s102_s30 }
  0x2c   :  { %p7202_p1 = scmp.ne.s32.totalorder %s102_s30, %s7201_s3  ;;  %p7207_p3 = scmp.lt.s32.totalorder %s7201_s3, %s7201_s3 }
  0x2e   :  { %p7208_p4 = por %p7207_p3, %p7206_p2 }
  0x30   :  { %p7209_p5 = pnand %p7208_p4, %p7202_p1 }
  0x32   :  { %7212 = shalt.err (!%p7209_p5)
}
  0x33   :  { %s7355_s10 = smov 64   ;;  %s7356_s11 = smov 4  }
  0x34   :  { %107 = dma.hbm_to_vmem [thread:$0]  %s7669_s7, 2048, %s102_s30, [#allocation15], %s7355_s10, %s7355_s10, %s7356_s11  }
  0x35   :  { %s7357_s14 = smov [#allocation2]   ;;  %s7358_s16 = smov [#allocation7]  }
  0x36   :  { %s26_s15 = sshll.u32 %s7357_s14, 4  ;;  %s48_s5 = sshll.u32 %s7358_s16, 4  ;;  %s27_s15 = int_to_ptr.vmem [resolvable:$true] %s26_s15  ;;  %s49_s5 = int_to_ptr.vmem [resolvable:$true] %s48_s5 }
  0x37   :  { %s7221_s17 = scalar_lea.vmem %s27_s15, 448  ;;  %p7226_p7 = scmp.lt.s32.totalorder %s27_s15, %s27_s15 }
  0x38   :  { %p7222_p6 = scmp.ne.s32.totalorder %s27_s15, %s7221_s17  ;;  %p7227_p8 = scmp.lt.s32.totalorder %s7221_s17, %s7221_s17 }
  0x3a   :  { %p7228_p9 = por %p7227_p8, %p7226_p7 }
  0x3c   :  { %p7229_p10 = pnand %p7228_p9, %p7222_p6 }
  0x3e   :  { %7232 = shalt.err (!%p7229_p10)
}
  0x3f   :  { %29 = dma.hbm_to_vmem [thread:$0]  %s7662_s0, 448, %s27_s15, [#allocation3]  }
  0x40   :  { %s7241_s20 = scalar_lea.vmem %s49_s5, 128  ;;  %p7246_p12 = scmp.lt.s32.totalorder %s49_s5, %s49_s5 }
  0x41   :  { %p7242_p11 = scmp.ne.s32.totalorder %s49_s5, %s7241_s20  ;;  %p7247_p13 = scmp.lt.s32.totalorder %s7241_s20, %s7241_s20 }
  0x43   :  { %p7248_p0 = por %p7247_p13, %p7246_p12 }
  0x45   :  { %p7249_p1 = pnand %p7248_p0, %p7242_p11 }
  0x47   :  { %7252 = shalt.err (!%p7249_p1)
}
  0x48   :  { %51 = dma.hbm_to_vmem [thread:$0]  %s7664_s2, 128, %s49_s5, [#allocation6]  }
  0x49   :  { %s7359_s22 = smov [#allocation10]   ;;  %s7360_s24 = smov [#allocation13]  }
  0x4a   :  { %s70_s23 = sshll.u32 %s7359_s22, 4  ;;  %s92_s1 = sshll.u32 %s7360_s24, 4  ;;  %s71_s23 = int_to_ptr.vmem [resolvable:$true] %s70_s23  ;;  %s93_s1 = int_to_ptr.vmem [resolvable:$true] %s92_s1 }
  0x4b   :  { %s7261_s25 = scalar_lea.vmem %s71_s23, 64  ;;  %p7266_p3 = scmp.lt.s32.totalorder %s71_s23, %s71_s23 }
  0x4c   :  { %p7262_p2 = scmp.ne.s32.totalorder %s71_s23, %s7261_s25  ;;  %p7267_p4 = scmp.lt.s32.totalorder %s7261_s25, %s7261_s25 }
  0x4e   :  { %p7268_p5 = por %p7267_p4, %p7266_p3 }
  0x50   :  { %p7269_p6 = pnand %p7268_p5, %p7262_p2 }
  0x52   :  { %7272 = shalt.err (!%p7269_p6)
}
  0x53   :  { %73 = dma.hbm_to_vmem [thread:$0]  %s7666_s4, 64, %s71_s23, [#allocation9]  }
  0x54   :  { %s7281_s27 = scalar_lea.vmem %s93_s1, 32  ;;  %p7286_p8 = scmp.lt.s32.totalorder %s93_s1, %s93_s1 }
  0x55   :  { %p7282_p7 = scmp.ne.s32.totalorder %s93_s1, %s7281_s27  ;;  %p7287_p9 = scmp.lt.s32.totalorder %s7281_s27, %s7281_s27 }
  0x57   :  { %p7288_p10 = por %p7287_p9, %p7286_p8 }
  0x59   :  { %p7289_p11 = pnand %p7288_p10, %p7282_p7 }
  0x5b   :  { %7292 = shalt.err (!%p7289_p11)
}
  0x5c   :  { %95 = dma.hbm_to_vmem [thread:$0]  %s7668_s6, 32, %s93_s1, [#allocation12]  }
  0x5d   :  { %s7361_s29 = smov [#allocation16]  }
  0x5e   :  { %s114_s30 = sshll.u32 %s7361_s29, 4  ;;  %s115_s30 = int_to_ptr.vmem [resolvable:$true] %s114_s30 }
  0x5f   :  { %s7301_s3 = scalar_lea.vmem %s115_s30, 16  ;;  %s7305_s10 = scalar_lea.vmem %s115_s30, 32 }
  0x60   :  { %p7302_p12 = scmp.ne.s32.totalorder %s115_s30, %s7301_s3  ;;  %p7306_p13 = scmp.lt.s32.totalorder %s115_s30, %s115_s30 }
  0x61   :  { %p7307_p0 = scmp.lt.s32.totalorder %s7305_s10, %s7301_s3 }
  0x63   :  { %p7308_p1 = por %p7307_p0, %p7306_p13 }
  0x65   :  { %p7309_p2 = pnand %p7308_p1, %p7302_p12 }
  0x67   :  { %7312 = shalt.err (!%p7309_p2)
}
  0x68   :  { %117 = dma.hbm_to_vmem [thread:$0]  %s7670_s8, 16, %s115_s30, [#allocation15]  }
  0x69   :  { %7333 = dma.done.wait [#allocation3], 448  }
  0x6a   :  { %7334 = vsyncadd [#allocation3], 4294966848 }
  0x6b   :  { %7335 = dma.done.wait [#allocation6], 50304  }
  0x6c   :  { %7336 = vsyncadd [#allocation6], 4294916992 }
  0x6d   :  { %7337 = dma.done.wait [#allocation9], 32832  }
  0x6e   :  { %7338 = vsyncadd [#allocation9], 4294934464 }
  0x6f   :  { %7339 = dma.done.wait [#allocation12], 8224  }
  0x70   :  { %7340 = vsyncadd [#allocation12], 4294959072 }
  0x71   :  { %7341 = dma.done.wait [#allocation15], 2064  }
  0x72   :  { %7342 = vsyncadd [#allocation15], 4294965232  ;;  %v206_v0 = vld [vmem:[#allocation5 + $0x1c0] sm:$0xff]  ;;  %v7443_v54 = vld [vmem:[#allocation2 + $0x8] sm:$0xff]  ;;  %vm2568_vm0 = vcmask 130048   ;;  %s7363_s6 = smov [#allocation17]  }
  0x73   :  { %v210_v1 = vld [vmem:[#allocation5 + $0x1e0] sm:$0xff]  ;;  %v7451_v59 = vcombine.high %v7443_v54, %v7443_v54  ;;  %s5829_s8 = sshll.u32 %s7363_s6, 4  ;;  %s5830_s8 = int_to_ptr.vmem [resolvable:$true] %s5829_s8 }
  0x74   :  { %v334_v2 = vld [vmem:[#allocation5 + $0x5c0] sm:$0xff]  ;;  %v5906_v3 = vcombine.high %v206_v0, %v210_v1  ;;  %v5905_v5 = vcombine.low %v206_v0, %v210_v1  ;;  %s7313_s12 = scalar_lea.vmem %s5830_s8, 128  ;;  %p7318_p4 = scmp.lt.s32.totalorder %s5830_s8, %s5830_s8 }
  0x75   :  { %v338_v4 = vld [vmem:[#allocation5 + $0x5e0] sm:$0xff]  ;;  %2645 = vmatprep.mubr.bf16.mxu1 %v7451_v59  ;;  %p7314_p3 = scmp.ne.s32.totalorder %s5830_s8, %s7313_s12  ;;  %p7319_p5 = scmp.lt.s32.totalorder %s7313_s12, %s7313_s12 }
  0x76   :  { %v198_v6 = vld [vmem:[#allocation5 + $0x180] sm:$0xff]  ;;  %v6034_v8 = vcombine.high %v334_v2, %v338_v4  ;;  %v6033_v9 = vcombine.low %v334_v2, %v338_v4  ;;  %2572 = vmatprep.subr.bf16.mxu0 %v5906_v3 }
  0x77   :  { %v202_v7 = vld [vmem:[#allocation5 + $0x1a0] sm:$0xff]  ;;  %2573 = vmatpush1.bf16.msra.mxu0 %v5905_v5  ;;  %p7320_p6 = por %p7319_p5, %p7318_p4 }
  0x78   :  { %v5898_v10 = vcombine.high %v198_v6, %v202_v7  ;;  %v326_v11 = vld [vmem:[#allocation5 + $0x580] sm:$0xff]  ;;  %2613 = vmatprep.subr.bf16.mxu1 %v6034_v8  ;;  %v5897_v18 = vcombine.low %v198_v6, %v202_v7 }
  0x79   :  { %v330_v12 = vld [vmem:[#allocation5 + $0x5a0] sm:$0xff]  ;;  %2614 = vmatpush1.bf16.msra.mxu1 %v6033_v9  ;;  %p7321_p7 = pnand %p7320_p6, %p7314_p3 }
  0x7a   :  { %v190_v13 = vld [vmem:[#allocation5 + $0x140] sm:$0xff]  ;;  %v6026_v14 = vcombine.high %v326_v11, %v330_v12  ;;  %2574 = vmatprep.subr.bf16.mxu0 %v5898_v10  ;;  %v6025_v19 = vcombine.low %v326_v11, %v330_v12 }
  0x7b   :  { %v194_v15 = vld [vmem:[#allocation5 + $0x160] sm:$0xff]  ;;  %2575 = vmatpush1.bf16.msra.mxu0 %v5897_v18 }
  0x7c   :  { %v318_v16 = vld [vmem:[#allocation5 + $0x540] sm:$0xff]  ;;  %v5890_v20 = vcombine.high %v190_v13, %v194_v15  ;;  %2615 = vmatprep.subr.bf16.mxu1 %v6026_v14  ;;  %v5889_v26 = vcombine.low %v190_v13, %v194_v15 }
  0x7d   :  { %v322_v17 = vld [vmem:[#allocation5 + $0x560] sm:$0xff]  ;;  %2616 = vmatpush1.bf16.msra.mxu1 %v6025_v19 }
  0x7e   :  { %v6018_v21 = vcombine.high %v318_v16, %v322_v17  ;;  %v182_v22 = vld [vmem:[#allocation5 + $0x100] sm:$0xff]  ;;  %2576 = vmatprep.subr.bf16.mxu0 %v5890_v20  ;;  %v6017_v27 = vcombine.low %v318_v16, %v322_v17 }
  0x7f   :  { %v186_v23 = vld [vmem:[#allocation5 + $0x120] sm:$0xff]  ;;  %2577 = vmatpush1.bf16.msra.mxu0 %v5889_v26 }
  0x80   :  { %v310_v24 = vld [vmem:[#allocation5 + $0x500] sm:$0xff]  ;;  %v5882_v28 = vcombine.high %v182_v22, %v186_v23  ;;  %2617 = vmatprep.subr.bf16.mxu1 %v6018_v21  ;;  %v5881_v34 = vcombine.low %v182_v22, %v186_v23 }
  0x81   :  { %v314_v25 = vld [vmem:[#allocation5 + $0x520] sm:$0xff]  ;;  %2618 = vmatpush1.bf16.msra.mxu1 %v6017_v27 }
  0x82   :  { %v6010_v29 = vcombine.high %v310_v24, %v314_v25  ;;  %v174_v30 = vld [vmem:[#allocation5 + $0xc0] sm:$0xff]  ;;  %2578 = vmatprep.subr.bf16.mxu0 %v5882_v28  ;;  %v6009_v35 = vcombine.low %v310_v24, %v314_v25 }
  0x83   :  { %v178_v31 = vld [vmem:[#allocation5 + $0xe0] sm:$0xff]  ;;  %2579 = vmatpush1.bf16.msra.mxu0 %v5881_v34 }
  0x84   :  { %v302_v32 = vld [vmem:[#allocation5 + $0x4c0] sm:$0xff]  ;;  %v5874_v36 = vcombine.high %v174_v30, %v178_v31  ;;  %2619 = vmatprep.subr.bf16.mxu1 %v6010_v29  ;;  %v5873_v42 = vcombine.low %v174_v30, %v178_v31 }
  0x85   :  { %v306_v33 = vld [vmem:[#allocation5 + $0x4e0] sm:$0xff]  ;;  %2620 = vmatpush1.bf16.msra.mxu1 %v6009_v35 }
  0x86   :  { %v6002_v37 = vcombine.high %v302_v32, %v306_v33  ;;  %v166_v38 = vld [vmem:[#allocation5 + $0x80] sm:$0xff]  ;;  %2580 = vmatprep.subr.bf16.mxu0 %v5874_v36  ;;  %v6001_v43 = vcombine.low %v302_v32, %v306_v33 }
  0x87   :  { %v170_v39 = vld [vmem:[#allocation5 + $0xa0] sm:$0xff]  ;;  %2581 = vmatpush1.bf16.msra.mxu0 %v5873_v42 }
  0x88   :  { %v294_v40 = vld [vmem:[#allocation5 + $0x480] sm:$0xff]  ;;  %v5866_v44 = vcombine.high %v166_v38, %v170_v39  ;;  %2621 = vmatprep.subr.bf16.mxu1 %v6002_v37  ;;  %v5865_v50 = vcombine.low %v166_v38, %v170_v39 }
  0x89   :  { %v298_v41 = vld [vmem:[#allocation5 + $0x4a0] sm:$0xff]  ;;  %2622 = vmatpush1.bf16.msra.mxu1 %v6001_v43 }
  0x8a   :  { %v5994_v45 = vcombine.high %v294_v40, %v298_v41  ;;  %v158_v46 = vld [vmem:[#allocation5 + $0x40] sm:$0xff]  ;;  %2582 = vmatprep.subr.bf16.mxu0 %v5866_v44  ;;  %v5993_v51 = vcombine.low %v294_v40, %v298_v41 }
  0x8b   :  { %v162_v47 = vld [vmem:[#allocation5 + $0x60] sm:$0xff]  ;;  %2583 = vmatpush1.bf16.msra.mxu0 %v5865_v50 }
  0x8c   :  { %v286_v48 = vld [vmem:[#allocation5 + $0x440] sm:$0xff]  ;;  %v5858_v52 = vcombine.high %v158_v46, %v162_v47  ;;  %2623 = vmatprep.subr.bf16.mxu1 %v5994_v45  ;;  %v5857_v62 = vcombine.low %v158_v46, %v162_v47 }
  0x8d   :  { %v290_v49 = vld [vmem:[#allocation5 + $0x460] sm:$0xff]  ;;  %2624 = vmatpush1.bf16.msra.mxu1 %v5993_v51 }
  0x8e   :  { %v7441_v53 = vld [vmem:[#allocation2] sm:$0xff]  ;;  %v5986_v55 = vcombine.high %v286_v48, %v290_v49  ;;  %2584 = vmatprep.subr.bf16.mxu0 %v5858_v52  ;;  %v5985_v63 = vcombine.low %v286_v48, %v290_v49 }
  0x8f   :  { %v150_v56 = vld [vmem:[#allocation5] sm:$0xff]  ;;  %v7447_v58 = vcombine.high %v7441_v53, %v7441_v53  ;;  %2585 = vmatpush1.bf16.msra.mxu0 %v5857_v62 }
  0x90   :  { %v154_v57 = vld [vmem:[#allocation5 + $0x20] sm:$0xff]  ;;  %2625 = vmatprep.subr.bf16.mxu1 %v5986_v55 }
  0x91   :  { %v278_v60 = vld [vmem:[#allocation5 + $0x400] sm:$0xff]  ;;  %2604 = vmatprep.mubr.bf16.mxu0 %v7447_v58  ;;  %v5850_v0 = vcombine.high %v150_v56, %v154_v57  ;;  %v5849_v6 = vcombine.low %v150_v56, %v154_v57  ;;  %2626 = vmatpush1.bf16.msra.mxu1 %v5985_v63 }
  0x92   :  { %v282_v61 = vld [vmem:[#allocation5 + $0x420] sm:$0xff] }
  0x93   :  { %v5978_v1 = vcombine.high %v278_v60, %v282_v61  ;;  %v270_v2 = vld [vmem:[#allocation5 + $0x3c0] sm:$0xff]  ;;  %2586 = vmatprep.subr.bf16.mxu0 %v5850_v0  ;;  %v5977_v7 = vcombine.low %v278_v60, %v282_v61 }
  0x94   :  { %v274_v3 = vld [vmem:[#allocation5 + $0x3e0] sm:$0xff]  ;;  %2587 = vmatpush1.bf16.msra.mxu0 %v5849_v6 }
  0x95   :  { %v398_v4 = vld [vmem:[#allocation5 + $0x7c0] sm:$0xff]  ;;  %v5970_v8 = vcombine.high %v270_v2, %v274_v3  ;;  %2627 = vmatprep.subr.bf16.mxu1 %v5978_v1  ;;  %v5969_v14 = vcombine.low %v270_v2, %v274_v3 }
  0x96   :  { %v402_v5 = vld [vmem:[#allocation5 + $0x7e0] sm:$0xff]  ;;  %2628 = vmatpush1.bf16.msra.mxu1 %v5977_v7 }
  0x97   :  { %v6098_v9 = vcombine.high %v398_v4, %v402_v5  ;;  %v262_v10 = vld [vmem:[#allocation5 + $0x380] sm:$0xff]  ;;  %2588 = vmatprep.subr.bf16.mxu0 %v5970_v8  ;;  %v6097_v15 = vcombine.low %v398_v4, %v402_v5 }
  0x98   :  { %v266_v11 = vld [vmem:[#allocation5 + $0x3a0] sm:$0xff]  ;;  %2589 = vmatpush2.bf16.msra.mxu0 %v5969_v14 }
  0x99   :  { %v390_v12 = vld [vmem:[#allocation5 + $0x780] sm:$0xff]  ;;  %v5962_v16 = vcombine.high %v262_v10, %v266_v11  ;;  %2629 = vmatprep.subr.bf16.mxu1 %v6098_v9  ;;  %v5961_v22 = vcombine.low %v262_v10, %v266_v11 }
  0x9a   :  { %v394_v13 = vld [vmem:[#allocation5 + $0x7a0] sm:$0xff]  ;;  %2630 = vmatpush2.bf16.msra.mxu1 %v6097_v15 }
  0x9b   :  { %v6090_v17 = vcombine.high %v390_v12, %v394_v13  ;;  %v254_v18 = vld [vmem:[#allocation5 + $0x340] sm:$0xff]  ;;  %2590 = vmatprep.subr.bf16.mxu0 %v5962_v16  ;;  %v6089_v23 = vcombine.low %v390_v12, %v394_v13  ;;  %v7457_v16 = vcombine.low %v7441_v53, %v7441_v53 }
  0x9c   :  { %v258_v19 = vld [vmem:[#allocation5 + $0x360] sm:$0xff]  ;;  %2591 = vmatpush2.bf16.msra.mxu0 %v5961_v22 }
  0x9d   :  { %v382_v20 = vld [vmem:[#allocation5 + $0x740] sm:$0xff]  ;;  %v5954_v24 = vcombine.high %v254_v18, %v258_v19  ;;  %2631 = vmatprep.subr.bf16.mxu1 %v6090_v17  ;;  %v5953_v30 = vcombine.low %v254_v18, %v258_v19  ;;  %v207_v17 = vld [vmem:[#allocation5 + $0x1c8] sm:$0xff]  ;;  %v7461_v19 = vcombine.low %v7443_v54, %v7443_v54 }
  0x9e   :  { %v386_v21 = vld [vmem:[#allocation5 + $0x760] sm:$0xff]  ;;  %2632 = vmatpush2.bf16.msra.mxu1 %v6089_v23  ;;  %v211_v18 = vld [vmem:[#allocation5 + $0x1e8] sm:$0xff] }
  0x9f   :  { %v6082_v25 = vcombine.high %v382_v20, %v386_v21  ;;  %v246_v26 = vld [vmem:[#allocation5 + $0x300] sm:$0xff]  ;;  %2592 = vmatprep.subr.bf16.mxu0 %v5954_v24  ;;  %v6081_v31 = vcombine.low %v382_v20, %v386_v21  ;;  %v7463_v21 = vld [vmem:[#allocation2 + $0x10] sm:$0xff]  ;;  %v5908_v24 = vcombine.high %v207_v17, %v211_v18 }
  0xa0   :  { %v250_v27 = vld [vmem:[#allocation5 + $0x320] sm:$0xff]  ;;  %2593 = vmatpush2.bf16.msra.mxu0 %v5953_v30  ;;  %v7468_v53 = vcombine.high %v7463_v21, %v7463_v21  ;;  %v7362_v30 = vmov 0  }
  0xa1   :  { %v374_v28 = vld [vmem:[#allocation5 + $0x700] sm:$0xff]  ;;  %v5946_v32 = vcombine.high %v246_v26, %v250_v27  ;;  %2633 = vmatprep.subr.bf16.mxu1 %v6082_v25  ;;  %v5945_v38 = vcombine.low %v246_v26, %v250_v27 }
  0xa2   :  { %v378_v29 = vld [vmem:[#allocation5 + $0x720] sm:$0xff]  ;;  %2634 = vmatpush2.bf16.msra.mxu1 %v6081_v31  ;;  %v6627_v31 = vld [vmem:[#allocation2 + $0x18] ss:$0 sps:$4 sm:$0xff]  }
  0xa3   :  { %v6074_v33 = vcombine.high %v374_v28, %v378_v29  ;;  %v238_v34 = vld [vmem:[#allocation5 + $0x2c0] sm:$0xff]  ;;  %2594 = vmatprep.subr.bf16.mxu0 %v5946_v32  ;;  %v6073_v39 = vcombine.low %v374_v28, %v378_v29  ;;  %v199_v28 = vld [vmem:[#allocation5 + $0x188] sm:$0xff] }
  0xa4   :  { %v242_v35 = vld [vmem:[#allocation5 + $0x2e0] sm:$0xff]  ;;  %2595 = vmatpush2.bf16.msra.mxu0 %v5945_v38  ;;  %v203_v29 = vld [vmem:[#allocation5 + $0x1a8] sm:$0xff] }
  0xa5   :  { %v366_v36 = vld [vmem:[#allocation5 + $0x6c0] sm:$0xff]  ;;  %v5938_v40 = vcombine.high %v238_v34, %v242_v35  ;;  %2635 = vmatprep.subr.bf16.mxu1 %v6074_v33  ;;  %v5937_v46 = vcombine.low %v238_v34, %v242_v35  ;;  %v5907_v35 = vcombine.low %v207_v17, %v211_v18  ;;  %v195_v38 = vld [vmem:[#allocation5 + $0x168] sm:$0xff] }
  0xa6   :  { %v370_v37 = vld [vmem:[#allocation5 + $0x6e0] sm:$0xff]  ;;  %2636 = vmatpush2.bf16.msra.mxu1 %v6073_v39  ;;  %v5900_v39 = vcombine.high %v199_v28, %v203_v29 }
  0xa7   :  { %v6066_v41 = vcombine.high %v366_v36, %v370_v37  ;;  %v230_v42 = vld [vmem:[#allocation5 + $0x280] sm:$0xff]  ;;  %2596 = vmatprep.subr.bf16.mxu0 %v5938_v40  ;;  %v6065_v47 = vcombine.low %v366_v36, %v370_v37  ;;  %v191_v37 = vld [vmem:[#allocation5 + $0x148] sm:$0xff] }
  0xa8   :  { %v234_v43 = vld [vmem:[#allocation5 + $0x2a0] sm:$0xff]  ;;  %2597 = vmatpush2.bf16.msra.mxu0 %v5937_v46  ;;  %v187_v46 = vld [vmem:[#allocation5 + $0x128] sm:$0xff] }
  0xa9   :  { %v358_v44 = vld [vmem:[#allocation5 + $0x680] sm:$0xff]  ;;  %v5930_v48 = vcombine.high %v230_v42, %v234_v43  ;;  %2637 = vmatprep.subr.bf16.mxu1 %v6066_v41  ;;  %v5929_v56 = vcombine.low %v230_v42, %v234_v43  ;;  %v5899_v43 = vcombine.low %v199_v28, %v203_v29 }
  0xaa   :  { %v362_v45 = vld [vmem:[#allocation5 + $0x6a0] sm:$0xff]  ;;  %2638 = vmatpush2.bf16.msra.mxu1 %v6065_v47 }
  0xab   :  { %v6058_v49 = vcombine.high %v358_v44, %v362_v45  ;;  %v222_v50 = vld [vmem:[#allocation5 + $0x240] sm:$0xff]  ;;  %2598 = vmatprep.subr.bf16.mxu0 %v5930_v48  ;;  %v6057_v57 = vcombine.low %v358_v44, %v362_v45  ;;  %v183_v45 = vld [vmem:[#allocation5 + $0x108] sm:$0xff] }
  0xac   :  { %v226_v51 = vld [vmem:[#allocation5 + $0x260] sm:$0xff]  ;;  %2599 = vmatpush2.bf16.msra.mxu0 %v5929_v56 }
  0xad   :  { %v350_v52 = vld [vmem:[#allocation5 + $0x640] sm:$0xff]  ;;  %v5922_v60 = vcombine.high %v222_v50, %v226_v51  ;;  %2639 = vmatprep.subr.bf16.mxu1 %v6058_v49  ;;  %v5921_v2 = vcombine.low %v222_v50, %v226_v51  ;;  %v5892_v49 = vcombine.high %v191_v37, %v195_v38 }
  0xae   :  { %v354_v55 = vld [vmem:[#allocation5 + $0x660] sm:$0xff]  ;;  %2640 = vmatpush2.bf16.msra.mxu1 %v6057_v57  ;;  %v5884_v57 = vcombine.high %v183_v45, %v187_v46 }
  0xaf   :  { %v6050_v61 = vcombine.high %v350_v52, %v354_v55  ;;  %v214_v62 = vld [vmem:[#allocation5 + $0x200] sm:$0xff]  ;;  %2600 = vmatprep.subr.bf16.mxu0 %v5922_v60  ;;  %v6049_v3 = vcombine.low %v350_v52, %v354_v55  ;;  %v5891_v55 = vcombine.low %v191_v37, %v195_v38  ;;  %v175_v60 = vld [vmem:[#allocation5 + $0xc8] sm:$0xff] }
  0xb0   :  { %v218_v63 = vld [vmem:[#allocation5 + $0x220] sm:$0xff]  ;;  %2601 = vmatpush2.bf16.msra.mxu0 %v5921_v2 }
  0xb1   :  { %v342_v0 = vld [vmem:[#allocation5 + $0x600] sm:$0xff]  ;;  %v5914_v4 = vcombine.high %v214_v62, %v218_v63  ;;  %2641 = vmatprep.subr.bf16.mxu1 %v6050_v61  ;;  %v5913_v10 = vcombine.low %v214_v62, %v218_v63  ;;  %v179_v61 = vld [vmem:[#allocation5 + $0xe8] sm:$0xff]  ;;  %v5883_v63 = vcombine.low %v183_v45, %v187_v46 }
  0xb2   :  { %v346_v1 = vld [vmem:[#allocation5 + $0x620] sm:$0xff]  ;;  %2642 = vmatpush2.bf16.msra.mxu1 %v6049_v3  ;;  %v5876_v3 = vcombine.high %v175_v60, %v179_v61 }
  0xb3   :  { %v6042_v5 = vcombine.high %v342_v0, %v346_v1  ;;  %v462_v6 = vld [vmem:[#allocation5 + $0x9c0] sm:$0xff]  ;;  %2602 = vmatprep.subr.bf16.mxu0 %v5914_v4  ;;  %v6041_v11 = vcombine.low %v342_v0, %v346_v1  ;;  %v167_v4 = vld [vmem:[#allocation5 + $0x88] sm:$0xff] }
  0xb4   :  { %v466_v7 = vld [vmem:[#allocation5 + $0x9e0] sm:$0xff]  ;;  %2603 = vmatpush2.bf16.msra.mxu0 %v5913_v10 }
  0xb5   :  { %v534_v8 = vld [vmem:[#allocation5 + $0xc00] sm:$0xff]  ;;  %v6162_v12 = vcombine.high %v462_v6, %v466_v7  ;;  %2643 = vmatprep.subr.bf16.mxu1 %v6042_v5  ;;  %v6161_v20 = vcombine.low %v462_v6, %v466_v7  ;;  %v171_v5 = vld [vmem:[#allocation5 + $0xa8] sm:$0xff]  ;;  %v5875_v7 = vcombine.low %v175_v60, %v179_v61 }
  0xb6   :  { %v538_v9 = vld [vmem:[#allocation5 + $0xc20] sm:$0xff]  ;;  %2644 = vmatpush2.bf16.msra.mxu1 %v6041_v11  ;;  %v5868_v11 = vcombine.high %v167_v4, %v171_v5  ;;  %v251_v60 = vld [vmem:[#allocation5 + $0x328] sm:$0xff] }
  0xb7   :  { %v6234_v13 = vcombine.high %v534_v8, %v538_v9  ;;  %v454_v14 = vld [vmem:[#allocation5 + $0x980] sm:$0xff]  ;;  %2654 = vmatprep.subr.bf16.mxu0 %v6162_v12  ;;  %v6233_v22 = vcombine.low %v534_v8, %v538_v9  ;;  %2605 = vmatmul.mubr.bf16.vlgmr.msra.gmra.mxu0 %v7457_v16  ;;  %v159_v12 = vld [vmem:[#allocation5 + $0x48] sm:$0xff] }
  0xb8   :  { %v458_v15 = vld [vmem:[#allocation5 + $0x9a0] sm:$0xff]  ;;  %2655 = vmatpush1.bf16.msra.mxu0 %v6161_v20  ;;  %2686 = vmatprep.mubr.bf16.mxu0 %v7468_v53 }
  0xb9   :  { %v6154_v23 = vcombine.high %v454_v14, %v458_v15  ;;  %2709 = vmatprep.subr.bf16.mxu1 %v6234_v13  ;;  %v446_v25 = vld [vmem:[#allocation5 + $0x940] sm:$0xff]  ;;  %2646 = vmatmul.mubr.bf16.vlgmr.msra.gmra.mxu1 %v7461_v19  ;;  %v6153_v54 = vcombine.low %v454_v14, %v458_v15  ;;  %v163_v13 = vld [vmem:[#allocation5 + $0x68] sm:$0xff]  ;;  %v5867_v15 = vcombine.low %v167_v4, %v171_v5 }
  0xba   :  { %v450_v26 = vld [vmem:[#allocation5 + $0x960] sm:$0xff]  ;;  %2710 = vmatpush1.bf16.msra.mxu1 %v6233_v22  ;;  %2727 = vmatprep.mubr.bf16.mxu1 %v7362_v30  ;;  %v5860_v22 = vcombine.high %v159_v12, %v163_v13  ;;  %v243_v4 = vld [vmem:[#allocation5 + $0x2e8] sm:$0xff] }
  0xbb   :  { %2656 = vmatprep.subr.bf16.mxu0 %v6154_v23  ;;  %v6146_v27 = vcombine.high %v446_v25, %v450_v26  ;;  %2736 = vmatprep.subr.bf16.mxu1 %v5908_v24  ;;  %v438_v32 = vld [vmem:[#allocation5 + $0x900] sm:$0xff]  ;;  %v6145_v34 = vcombine.low %v446_v25, %v450_v26  ;;  %v151_v23 = vld [vmem:[#allocation5 + $0x8] sm:$0xff]  ;;  %v5859_v26 = vcombine.low %v159_v12, %v163_v13 }
  0xbc   :  { %v442_v33 = vld [vmem:[#allocation5 + $0x920] sm:$0xff]  ;;  %2657 = vmatpush1.bf16.msra.mxu0 %v6153_v54  ;;  %v155_v24 = vld [vmem:[#allocation5 + $0x28] sm:$0xff] }
  0xbd   :  { %2658 = vmatprep.subr.bf16.mxu0 %v6146_v27  ;;  %v6138_v36 = vcombine.high %v438_v32, %v442_v33  ;;  %v430_v40 = vld [vmem:[#allocation5 + $0x8c0] sm:$0xff]  ;;  %v6137_v42 = vcombine.low %v438_v32, %v442_v33  ;;  %v5852_v29 = vcombine.high %v151_v23, %v155_v24  ;;  %v275_v32 = vld [vmem:[#allocation5 + $0x3e8] sm:$0xff] }
  0xbe   :  { %v434_v41 = vld [vmem:[#allocation5 + $0x8e0] sm:$0xff]  ;;  %v235_v12 = vld [vmem:[#allocation5 + $0x2a8] sm:$0xff] }
  0xbf   :  { %v6130_v44 = vcombine.high %v430_v40, %v434_v41  ;;  %v422_v47 = vld [vmem:[#allocation5 + $0x880] sm:$0xff]  ;;  %v6129_v50 = vcombine.low %v430_v40, %v434_v41  ;;  %v267_v40 = vld [vmem:[#allocation5 + $0x3a8] sm:$0xff] }
  0xc0   :  { %2659 = vmatpush1.bf16.msra.mxu0 %v6145_v34  ;;  %v426_v48 = vld [vmem:[#allocation5 + $0x8a0] sm:$0xff]  ;;  %v5851_v34 = vcombine.low %v151_v23, %v155_v24  ;;  %v227_v23 = vld [vmem:[#allocation5 + $0x268] sm:$0xff] }
  0xc1   :  { %6241 = vmatmul.mubr.msk.bf16.vlgmr.msra.gmra.mxu1 %vm2568_vm0, %v6627_v31  ;;  %2660 = vmatprep.subr.bf16.mxu0 %v6138_v36  ;;  %v414_v51 = vld [vmem:[#allocation5 + $0x840] sm:$0xff]  ;;  %v6122_v56 = vcombine.high %v422_v47, %v426_v48  ;;  %v6121_v62 = vcombine.low %v422_v47, %v426_v48  ;;  %v271_v31 = vld [vmem:[#allocation5 + $0x3c8] sm:$0xff] }
  0xc2   :  { %2737 = vmatpush1.bf16.msra.mxu1 %v5907_v35  ;;  %2768 = vmatprep.mubr.bf16.mxu1 %v7447_v58  ;;  %v418_v52 = vld [vmem:[#allocation5 + $0x860] sm:$0xff]  ;;  %v5972_v38 = vcombine.high %v271_v31, %v275_v32  ;;  %v255_v47 = vld [vmem:[#allocation5 + $0x348] sm:$0xff] }
  0xc3   :  { %2738 = vmatprep.subr.bf16.mxu1 %v5900_v39  ;;  %v6114_v0 = vcombine.high %v414_v51, %v418_v52  ;;  %v406_v1 = vld [vmem:[#allocation5 + $0x800] sm:$0xff]  ;;  %v6113_v6 = vcombine.low %v414_v51, %v418_v52  ;;  %v263_v39 = vld [vmem:[#allocation5 + $0x388] sm:$0xff] }
  0xc4   :  { %2661 = vmatpush1.bf16.msra.mxu0 %v6137_v42  ;;  %v410_v2 = vld [vmem:[#allocation5 + $0x820] sm:$0xff]  ;;  %v5971_v42 = vcombine.low %v271_v31, %v275_v32  ;;  %v5964_v46 = vcombine.high %v263_v39, %v267_v40  ;;  %v259_v48 = vld [vmem:[#allocation5 + $0x368] sm:$0xff] }
  0xc5   :  { %2662 = vmatprep.subr.bf16.mxu0 %v6130_v44  ;;  %v6106_v8 = vcombine.high %v406_v1, %v410_v2  ;;  %v526_v9 = vld [vmem:[#allocation5 + $0xbc0] sm:$0xff]  ;;  %v6105_v14 = vcombine.low %v406_v1, %v410_v2  ;;  %v215_v31 = vld [vmem:[#allocation5 + $0x208] sm:$0xff] }
  0xc6   :  { %2739 = vmatpush1.bf16.msra.mxu1 %v5899_v43  ;;  %v530_v10 = vld [vmem:[#allocation5 + $0xbe0] sm:$0xff]  ;;  %v219_v32 = vld [vmem:[#allocation5 + $0x228] sm:$0xff] }
  0xc7   :  { %2740 = vmatprep.subr.bf16.mxu1 %v5892_v49  ;;  %v6226_v17 = vcombine.high %v526_v9, %v530_v10  ;;  %v518_v18 = vld [vmem:[#allocation5 + $0xb80] sm:$0xff]  ;;  %v6225_v25 = vcombine.low %v526_v9, %v530_v10 }
  0xc8   :  { %2663 = vmatpush1.bf16.msra.mxu0 %v6129_v50  ;;  %v522_v20 = vld [vmem:[#allocation5 + $0xba0] sm:$0xff]  ;;  %v5963_v50 = vcombine.low %v263_v39, %v267_v40  ;;  %v463_v39 = vld [vmem:[#allocation5 + $0x9c8] sm:$0xff] }
  0xc9   :  { %2664 = vmatprep.subr.bf16.mxu0 %v6122_v56  ;;  %v6218_v54 = vcombine.high %v518_v18, %v522_v20  ;;  %v510_v27 = vld [vmem:[#allocation5 + $0xb40] sm:$0xff]  ;;  %v6217_v33 = vcombine.low %v518_v18, %v522_v20  ;;  %v5956_v56 = vcombine.high %v255_v47, %v259_v48  ;;  %v339_v18 = vld [vmem:[#allocation5 + $0x5e8] sm:$0xff] }
  0xca   :  { %2741 = vmatpush1.bf16.msra.mxu1 %v5891_v55  ;;  %v514_v28 = vld [vmem:[#allocation5 + $0xb60] sm:$0xff]  ;;  %v467_v40 = vld [vmem:[#allocation5 + $0x9e8] sm:$0xff] }
  0xcb   :  { %2742 = vmatprep.subr.bf16.mxu1 %v5884_v57  ;;  %v6210_v35 = vcombine.high %v510_v27, %v514_v28  ;;  %v502_v36 = vld [vmem:[#allocation5 + $0xb00] sm:$0xff]  ;;  %v6209_v41 = vcombine.low %v510_v27, %v514_v28  ;;  %v247_v57 = vld [vmem:[#allocation5 + $0x308] sm:$0xff] }
  0xcc   :  { %2665 = vmatpush1.bf16.msra.mxu0 %v6121_v62  ;;  %v506_v37 = vld [vmem:[#allocation5 + $0xb20] sm:$0xff]  ;;  %v5955_v62 = vcombine.low %v255_v47, %v259_v48  ;;  %v5948_v2 = vcombine.high %v247_v57, %v251_v60  ;;  %v331_v27 = vld [vmem:[#allocation5 + $0x5a8] sm:$0xff] }
  0xcd   :  { %2666 = vmatprep.subr.bf16.mxu0 %v6114_v0  ;;  %v6202_v43 = vcombine.high %v502_v36, %v506_v37  ;;  %v494_v44 = vld [vmem:[#allocation5 + $0xac0] sm:$0xff]  ;;  %v6201_v49 = vcombine.low %v502_v36, %v506_v37  ;;  %v319_v36 = vld [vmem:[#allocation5 + $0x548] sm:$0xff] }
  0xce   :  { %2743 = vmatpush1.bf16.msra.mxu1 %v5883_v63  ;;  %v498_v45 = vld [vmem:[#allocation5 + $0xae0] sm:$0xff]  ;;  %v323_v37 = vld [vmem:[#allocation5 + $0x568] sm:$0xff] }
  0xcf   :  { %2744 = vmatprep.subr.bf16.mxu1 %v5876_v3  ;;  %v6194_v51 = vcombine.high %v494_v44, %v498_v45  ;;  %v486_v52 = vld [vmem:[#allocation5 + $0xa80] sm:$0xff]  ;;  %v6193_v61 = vcombine.low %v494_v44, %v498_v45  ;;  %v239_v3 = vld [vmem:[#allocation5 + $0x2c8] sm:$0xff]  ;;  %v6164_v45 = vcombine.high %v463_v39, %v467_v40  ;;  %v6019_v48 = vcombine.low %v319_v36, %v323_v37 }
  0xd0   :  { %2667 = vmatpush1.bf16.msra.mxu0 %v6113_v6  ;;  %v490_v55 = vld [vmem:[#allocation5 + $0xaa0] sm:$0xff]  ;;  %v5947_v6 = vcombine.low %v247_v57, %v251_v60  ;;  %v5940_v10 = vcombine.high %v239_v3, %v243_v4  ;;  %v315_v44 = vld [vmem:[#allocation5 + $0x528] sm:$0xff] }
  0xd1   :  { %2668 = vmatprep.subr.bf16.mxu0 %v6106_v8  ;;  %v6186_v63 = vcombine.high %v486_v52, %v490_v55  ;;  %v478_v0 = vld [vmem:[#allocation5 + $0xa40] sm:$0xff]  ;;  %v6185_v5 = vcombine.low %v486_v52, %v490_v55  ;;  %v459_v47 = vld [vmem:[#allocation5 + $0x9a8] sm:$0xff] }
  0xd2   :  { %2745 = vmatpush1.bf16.msra.mxu1 %v5875_v7  ;;  %v482_v1 = vld [vmem:[#allocation5 + $0xa60] sm:$0xff]  ;;  %v307_v52 = vld [vmem:[#allocation5 + $0x4e8] sm:$0xff] }
  0xd3   :  { %2746 = vmatprep.subr.bf16.mxu1 %v5868_v11  ;;  %v6178_v7 = vcombine.high %v478_v0, %v482_v1  ;;  %v470_v8 = vld [vmem:[#allocation5 + $0xa00] sm:$0xff]  ;;  %v231_v11 = vld [vmem:[#allocation5 + $0x288] sm:$0xff]  ;;  %v6177_v13 = vcombine.low %v478_v0, %v482_v1 }
  0xd4   :  { %2669 = vmatpush1.bf16.msra.mxu0 %v6105_v14  ;;  %v474_v9 = vld [vmem:[#allocation5 + $0xa20] sm:$0xff]  ;;  %v5939_v14 = vcombine.low %v239_v3, %v243_v4  ;;  %v5932_v20 = vcombine.high %v231_v11, %v235_v12  ;;  %v451_v57 = vld [vmem:[#allocation5 + $0x968] sm:$0xff] }
  0xd5   :  { %2670 = vmatprep.subr.bf16.mxu0 %v6226_v17  ;;  %v335_v17 = vld [vmem:[#allocation5 + $0x5c8] sm:$0xff]  ;;  %v6169_v24 = vcombine.low %v470_v8, %v474_v9 }
  0xd6   :  { %2747 = vmatpush1.bf16.msra.mxu1 %v5867_v15  ;;  %v6170_v15 = vcombine.high %v470_v8, %v474_v9  ;;  %v299_v0 = vld [vmem:[#allocation5 + $0x4a8] sm:$0xff] }
  0xd7   :  { %2748 = vmatprep.subr.bf16.mxu1 %v5860_v22  ;;  %v223_v22 = vld [vmem:[#allocation5 + $0x248] sm:$0xff] }
  0xd8   :  { %2671 = vmatpush2.bf16.msra.mxu0 %v6225_v25  ;;  %v5931_v25 = vcombine.low %v231_v11, %v235_v12  ;;  %v5924_v28 = vcombine.high %v223_v22, %v227_v23  ;;  %v443_v3 = vld [vmem:[#allocation5 + $0x928] sm:$0xff] }
  0xd9   :  { %2672 = vmatprep.subr.bf16.mxu0 %v6218_v54  ;;  %v327_v54 = vld [vmem:[#allocation5 + $0x588] sm:$0xff] }
  0xda   :  { %2749 = vmatpush1.bf16.msra.mxu1 %v5859_v26  ;;  %v6036_v26 = vcombine.high %v335_v17, %v339_v18  ;;  %v435_v11 = vld [vmem:[#allocation5 + $0x8e8] sm:$0xff] }
  0xdb   :  { %2750 = vmatprep.subr.bf16.mxu1 %v5852_v29  ;;  %v7477_v29 = vcombine.low %v7463_v21, %v7463_v21  ;;  %v5915_v21 = vcombine.low %v215_v31, %v219_v32 }
  0xdc   :  { %2673 = vmatpush2.bf16.msra.mxu0 %v6217_v33  ;;  %v6035_v33 = vcombine.low %v335_v17, %v339_v18  ;;  %v427_v17 = vld [vmem:[#allocation5 + $0x8a8] sm:$0xff] }
  0xdd   :  { %2674 = vmatprep.subr.bf16.mxu0 %v6210_v35  ;;  %v6028_v35 = vcombine.high %v327_v54, %v331_v27  ;;  %v279_v18 = vld [vmem:[#allocation5 + $0x408] sm:$0xff] }
  0xde   :  { %2751 = vmatpush1.bf16.msra.mxu1 %v5851_v34  ;;  %v5923_v34 = vcombine.low %v223_v22, %v227_v23 }
  0xdf   :  { %2752 = vmatprep.subr.bf16.mxu1 %v5972_v38  ;;  %v5916_v38 = vcombine.high %v215_v31, %v219_v32 }
  0xe0   :  { %2675 = vmatpush2.bf16.msra.mxu0 %v6209_v41  ;;  %v6027_v41 = vcombine.low %v327_v54, %v331_v27  ;;  %v415_v27 = vld [vmem:[#allocation5 + $0x848] sm:$0xff] }
  0xe1   :  { %2676 = vmatprep.subr.bf16.mxu0 %v6202_v43  ;;  %v311_v43 = vld [vmem:[#allocation5 + $0x508] sm:$0xff] }
  0xe2   :  { %2753 = vmatpush2.bf16.msra.mxu1 %v5971_v42  ;;  %v6020_v42 = vcombine.high %v319_v36, %v323_v37  ;;  %v6011_v60 = vcombine.low %v311_v43, %v315_v44  ;;  %v411_v36 = vld [vmem:[#allocation5 + $0x828] sm:$0xff] }
  0xe3   :  { %2754 = vmatprep.subr.bf16.mxu1 %v5964_v46  ;;  %v455_v46 = vld [vmem:[#allocation5 + $0x988] sm:$0xff] }
  0xe4   :  { %2677 = vmatpush2.bf16.msra.mxu0 %v6201_v49  ;;  %v6163_v49 = vcombine.low %v463_v39, %v467_v40  ;;  %v6156_v55 = vcombine.high %v455_v46, %v459_v47  ;;  %v391_v37 = vld [vmem:[#allocation5 + $0x788] sm:$0xff] }
  0xe5   :  { %2678 = vmatprep.subr.bf16.mxu0 %v6194_v51  ;;  %v303_v51 = vld [vmem:[#allocation5 + $0x4c8] sm:$0xff] }
  0xe6   :  { %2755 = vmatpush2.bf16.msra.mxu1 %v5963_v50  ;;  %v6012_v50 = vcombine.high %v311_v43, %v315_v44  ;;  %v6003_v4 = vcombine.low %v303_v51, %v307_v52  ;;  %v531_v43 = vld [vmem:[#allocation5 + $0xbe8] sm:$0xff] }
  0xe7   :  { %2756 = vmatprep.subr.bf16.mxu1 %v5956_v56  ;;  %v447_v56 = vld [vmem:[#allocation5 + $0x948] sm:$0xff] }
  0xe8   :  { %2679 = vmatpush2.bf16.msra.mxu0 %v6193_v61  ;;  %v6155_v61 = vcombine.low %v455_v46, %v459_v47  ;;  %v6148_v1 = vcombine.high %v447_v56, %v451_v57  ;;  %v383_v44 = vld [vmem:[#allocation5 + $0x748] sm:$0xff] }
  0xe9   :  { %2680 = vmatprep.subr.bf16.mxu0 %v6186_v63  ;;  %v295_v63 = vld [vmem:[#allocation5 + $0x488] sm:$0xff] }
  0xea   :  { %2757 = vmatpush2.bf16.msra.mxu1 %v5955_v62  ;;  %v6004_v62 = vcombine.high %v303_v51, %v307_v52  ;;  %v5996_v8 = vcombine.high %v295_v63, %v299_v0  ;;  %v5995_v12 = vcombine.low %v295_v63, %v299_v0  ;;  %v523_v51 = vld [vmem:[#allocation5 + $0xba8] sm:$0xff] }
  0xeb   :  { %2758 = vmatprep.subr.bf16.mxu1 %v5948_v2  ;;  %v439_v2 = vld [vmem:[#allocation5 + $0x908] sm:$0xff] }
  0xec   :  { %2681 = vmatpush2.bf16.msra.mxu0 %v6185_v5  ;;  %v287_v5 = vld [vmem:[#allocation5 + $0x448] sm:$0xff]  ;;  %v6140_v9 = vcombine.high %v439_v2, %v443_v3 }
  0xed   :  { %2682 = vmatprep.subr.bf16.mxu0 %v6178_v7  ;;  %v6147_v7 = vcombine.low %v447_v56, %v451_v57  ;;  %v375_v52 = vld [vmem:[#allocation5 + $0x708] sm:$0xff] }
  0xee   :  { %2759 = vmatpush2.bf16.msra.mxu1 %v5947_v6  ;;  %v291_v6 = vld [vmem:[#allocation5 + $0x468] sm:$0xff] }
  0xef   :  { %2760 = vmatprep.subr.bf16.mxu1 %v5940_v10  ;;  %v431_v10 = vld [vmem:[#allocation5 + $0x8c8] sm:$0xff]  ;;  %v5987_v23 = vcombine.low %v287_v5, %v291_v6 }
  0xf0   :  { %2683 = vmatpush2.bf16.msra.mxu0 %v6177_v13  ;;  %v6139_v13 = vcombine.low %v439_v2, %v443_v3  ;;  %v6132_v22 = vcombine.high %v431_v10, %v435_v11  ;;  %v515_v63 = vld [vmem:[#allocation5 + $0xb68] sm:$0xff] }
  0xf1   :  { %2684 = vmatprep.subr.bf16.mxu0 %v6170_v15  ;;  %v423_v15 = vld [vmem:[#allocation5 + $0x888] sm:$0xff] }
  0xf2   :  { %2761 = vmatpush2.bf16.msra.mxu1 %v5939_v14  ;;  %v5988_v14 = vcombine.high %v287_v5, %v291_v6  ;;  %v6124_v31 = vcombine.high %v423_v15, %v427_v17  ;;  %v367_v0 = vld [vmem:[#allocation5 + $0x6c8] sm:$0xff] }
  0xf3   :  { %2762 = vmatprep.subr.bf16.mxu1 %v5932_v20  ;;  %v283_v20 = vld [vmem:[#allocation5 + $0x428] sm:$0xff] }
  0xf4   :  { %2685 = vmatpush2.bf16.msra.mxu0 %v6169_v24  ;;  %v399_v24 = vld [vmem:[#allocation5 + $0x7c8] sm:$0xff]  ;;  %v5980_v54 = vcombine.high %v279_v18, %v283_v20  ;;  %v5979_v32 = vcombine.low %v279_v18, %v283_v20 }
  0xf5   :  { %2777 = vmatprep.subr.bf16.mxu0 %v6036_v26  ;;  %v6131_v26 = vcombine.low %v431_v10, %v435_v11  ;;  %v503_v6 = vld [vmem:[#allocation5 + $0xb08] sm:$0xff] }
  0xf6   :  { %2763 = vmatpush2.bf16.msra.mxu1 %v5931_v25  ;;  %v403_v25 = vld [vmem:[#allocation5 + $0x7e8] sm:$0xff] }
  0xf7   :  { %2764 = vmatprep.subr.bf16.mxu1 %v5924_v28  ;;  %2687 = vmatmul.mubr.bf16.vlgmr.msra.gmra.mxu0 %v7477_v29  ;;  %v419_v28 = vld [vmem:[#allocation5 + $0x868] sm:$0xff]  ;;  %v6099_v40 = vcombine.low %v399_v24, %v403_v25 }
  0xf8   :  { %2778 = vmatpush1.bf16.msra.mxu0 %v6035_v33  ;;  %2809 = vmatprep.mubr.bf16.mxu0 %v7451_v59  ;;  %v6123_v33 = vcombine.low %v423_v15, %v427_v17  ;;  %v6116_v39 = vcombine.high %v415_v27, %v419_v28  ;;  %v499_v15 = vld [vmem:[#allocation5 + $0xae8] sm:$0xff] }
  0xf9   :  { %2779 = vmatprep.subr.bf16.mxu0 %v6028_v35  ;;  %v407_v35 = vld [vmem:[#allocation5 + $0x808] sm:$0xff] }
  0xfa   :  { %2765 = vmatpush2.bf16.msra.mxu1 %v5923_v34  ;;  %v6100_v34 = vcombine.high %v399_v24, %v403_v25  ;;  %v6108_v46 = vcombine.high %v407_v35, %v411_v36  ;;  %v351_v17 = vld [vmem:[#allocation5 + $0x648] sm:$0xff] }
  0xfb   :  { %2766 = vmatprep.subr.bf16.mxu1 %v5916_v38  ;;  %v395_v38 = vld [vmem:[#allocation5 + $0x7a8] sm:$0xff] }
  0xfc   :  { %2780 = vmatpush1.bf16.msra.mxu0 %v6027_v41  ;;  %v6115_v41 = vcombine.low %v415_v27, %v419_v28  ;;  %v6091_v47 = vcombine.low %v391_v37, %v395_v38  ;;  %v355_v18 = vld [vmem:[#allocation5 + $0x668] sm:$0xff] }
  0xfd   :  { %2781 = vmatprep.subr.bf16.mxu0 %v6020_v42  ;;  %v527_v42 = vld [vmem:[#allocation5 + $0xbc8] sm:$0xff]  ;;  %v6052_v24 = vcombine.high %v351_v17, %v355_v18 }
  0xfe   :  { %2767 = vmatpush2.bf16.msra.mxu1 %v5915_v21  ;;  %v6092_v21 = vcombine.high %v391_v37, %v395_v38  ;;  %v6228_v56 = vcombine.high %v527_v42, %v531_v43  ;;  %v487_v25 = vld [vmem:[#allocation5 + $0xa88] sm:$0xff]  ;;  %v212_v37 = vld [vmem:[#allocation5 + $0x1f0] sm:$0xff] }
  0xff   :  { %2818 = vmatprep.subr.bf16.mxu1 %v6164_v45  ;;  %v387_v45 = vld [vmem:[#allocation5 + $0x768] sm:$0xff] }
 0x100   :  { %2782 = vmatpush1.bf16.msra.mxu0 %v6019_v48  ;;  %v6107_v48 = vcombine.low %v407_v35, %v411_v36  ;;  %v6083_v57 = vcombine.low %v383_v44, %v387_v45  ;;  %v347_v27 = vld [vmem:[#allocation5 + $0x628] sm:$0xff]  ;;  %v208_v36 = vld [vmem:[#allocation5 + $0x1d0] sm:$0xff] }
 0x101   :  { %2769 = vmatmul.mubr.bf16.vlgmr.msra.gmra.mxu1 %v7457_v16  ;;  %2783 = vmatprep.subr.bf16.mxu0 %v6012_v50  ;;  %v519_v50 = vld [vmem:[#allocation5 + $0xb88] sm:$0xff] }
 0x102   :  { %2819 = vmatpush1.bf16.msra.mxu1 %v6163_v49  ;;  %2850 = vmatprep.mubr.bf16.mxu1 %v7468_v53  ;;  %v6084_v49 = vcombine.high %v383_v44, %v387_v45  ;;  %v6220_v2 = vcombine.high %v519_v50, %v523_v51  ;;  %v483_v35 = vld [vmem:[#allocation5 + $0xa68] sm:$0xff]  ;;  %v204_v44 = vld [vmem:[#allocation5 + $0x1b0] sm:$0xff] }
 0x103   :  { %2820 = vmatprep.subr.bf16.mxu1 %v6156_v55  ;;  %v379_v55 = vld [vmem:[#allocation5 + $0x728] sm:$0xff] }
 0x104   :  { %2784 = vmatpush1.bf16.msra.mxu0 %v6011_v60  ;;  %v6227_v60 = vcombine.low %v527_v42, %v531_v43  ;;  %v6075_v3 = vcombine.low %v375_v52, %v379_v55  ;;  %v475_v42 = vld [vmem:[#allocation5 + $0xa28] sm:$0xff]  ;;  %v200_v43 = vld [vmem:[#allocation5 + $0x190] sm:$0xff] }
 0x105   :  { %2785 = vmatprep.subr.bf16.mxu0 %v6004_v62  ;;  %v511_v62 = vld [vmem:[#allocation5 + $0xb48] sm:$0xff] }
 0x106   :  { %2821 = vmatpush1.bf16.msra.mxu1 %v6155_v61  ;;  %v6076_v61 = vcombine.high %v375_v52, %v379_v55  ;;  %v6212_v10 = vcombine.high %v511_v62, %v515_v63  ;;  %v539_v52 = vld [vmem:[#allocation5 + $0xc28] sm:$0xff] }
 0x107   :  { %2822 = vmatprep.subr.bf16.mxu1 %v6148_v1  ;;  %v371_v1 = vld [vmem:[#allocation5 + $0x6e8] sm:$0xff] }
 0x108   :  { %2786 = vmatpush1.bf16.msra.mxu0 %v6003_v4  ;;  %v6219_v4 = vcombine.low %v519_v50, %v523_v51  ;;  %v6068_v5 = vcombine.high %v367_v0, %v371_v1  ;;  %v6067_v11 = vcombine.low %v367_v0, %v371_v1  ;;  %v5902_v50 = vcombine.high %v200_v43, %v204_v44  ;;  %v535_v51 = vld [vmem:[#allocation5 + $0xc08] sm:$0xff]  ;;  %v340_v0 = vld [vmem:[#allocation5 + $0x5f0] sm:$0xff] }
 0x109   :  { %2787 = vmatprep.subr.bf16.mxu0 %v5996_v8  ;;  %v359_v8 = vld [vmem:[#allocation5 + $0x688] sm:$0xff]  ;;  %v6236_v1 = vcombine.high %v535_v51, %v539_v52 }
 0x10a   :  { %2823 = vmatpush1.bf16.msra.mxu1 %v6147_v7  ;;  %v507_v7 = vld [vmem:[#allocation5 + $0xb28] sm:$0xff] }
 0x10b   :  { %2824 = vmatprep.subr.bf16.mxu1 %v6140_v9  ;;  %v363_v9 = vld [vmem:[#allocation5 + $0x6a8] sm:$0xff]  ;;  %v6204_v20 = vcombine.high %v503_v6, %v507_v7 }
 0x10c   :  { %2788 = vmatpush1.bf16.msra.mxu0 %v5995_v12  ;;  %v6211_v12 = vcombine.low %v511_v62, %v515_v63  ;;  %v336_v63 = vld [vmem:[#allocation5 + $0x5d0] sm:$0xff] }
 0x10d   :  { %2789 = vmatprep.subr.bf16.mxu0 %v5988_v14  ;;  %v495_v14 = vld [vmem:[#allocation5 + $0xac8] sm:$0xff] }
 0x10e   :  { %2825 = vmatpush1.bf16.msra.mxu1 %v6139_v13  ;;  %v6060_v13 = vcombine.high %v359_v8, %v363_v9  ;;  %v6196_v28 = vcombine.high %v495_v14, %v499_v15 }
 0x10f   :  { %2826 = vmatprep.subr.bf16.mxu1 %v6132_v22  ;;  %v6059_v22 = vcombine.low %v359_v8, %v363_v9 }
 0x110   :  { %2790 = vmatpush1.bf16.msra.mxu0 %v5987_v23  ;;  %v6203_v23 = vcombine.low %v503_v6, %v507_v7  ;;  %v180_v6 = vld [vmem:[#allocation5 + $0xf0] sm:$0xff]  ;;  %v6038_v7 = vcombine.high %v336_v63, %v340_v0 }
 0x111   :  { %2791 = vmatprep.subr.bf16.mxu0 %v5980_v54  ;;  %v343_v54 = vld [vmem:[#allocation5 + $0x608] sm:$0xff] }
 0x112   :  { %2827 = vmatpush1.bf16.msra.mxu1 %v6131_v26  ;;  %v491_v26 = vld [vmem:[#allocation5 + $0xaa8] sm:$0xff] }
 0x113   :  { %2828 = vmatprep.subr.bf16.mxu1 %v6124_v31  ;;  %v6051_v31 = vcombine.low %v351_v17, %v355_v18  ;;  %v6188_v38 = vcombine.high %v487_v25, %v491_v26  ;;  %v320_v18 = vld [vmem:[#allocation5 + $0x550] sm:$0xff] }
 0x114   :  { %2792 = vmatpush1.bf16.msra.mxu0 %v5979_v32  ;;  %v6195_v32 = vcombine.low %v495_v14, %v499_v15  ;;  %v6037_v15 = vcombine.low %v336_v63, %v340_v0 }
 0x115   :  { %2793 = vmatprep.subr.bf16.mxu0 %v6100_v34  ;;  %v479_v34 = vld [vmem:[#allocation5 + $0xa48] sm:$0xff] }
 0x116   :  { %2829 = vmatpush1.bf16.msra.mxu1 %v6123_v33  ;;  %v6044_v33 = vcombine.high %v343_v54, %v347_v27  ;;  %v6180_v45 = vcombine.high %v479_v34, %v483_v35 }
 0x117   :  { %2830 = vmatprep.subr.bf16.mxu1 %v6116_v39  ;;  %v6043_v39 = vcombine.low %v343_v54, %v347_v27 }
 0x118   :  { %2794 = vmatpush2.bf16.msra.mxu0 %v6099_v40  ;;  %v6187_v40 = vcombine.low %v487_v25, %v491_v26  ;;  %v7487_v25 = vld [vmem:[#allocation2 + $0x18] ss:$0 sps:$4 sm:$0xff]  }
 0x119   :  { %2795 = vmatprep.subr.bf16.mxu0 %v6092_v21  ;;  %v471_v21 = vld [vmem:[#allocation5 + $0xa08] sm:$0xff] }
 0x11a   :  { %2831 = vmatpush1.bf16.msra.mxu1 %v6115_v41  ;;  %v5910_v41 = vcombine.high %v208_v36, %v212_v37  ;;  %v6172_v55 = vcombine.high %v471_v21, %v475_v42 }
 0x11b   :  { %2832 = vmatprep.subr.bf16.mxu1 %v6108_v46  ;;  %v5909_v46 = vcombine.low %v208_v36, %v212_v37 }
 0x11c   :  { %2796 = vmatpush2.bf16.msra.mxu0 %v6091_v47  ;;  %v192_v47 = vld [vmem:[#allocation5 + $0x150] sm:$0xff] }
 0x11d   :  { %2797 = vmatprep.subr.bf16.mxu0 %v6084_v49  ;;  %v6179_v49 = vcombine.low %v479_v34, %v483_v35 }
 0x11e   :  { %2833 = vmatpush1.bf16.msra.mxu1 %v6107_v48  ;;  %v196_v48 = vld [vmem:[#allocation5 + $0x170] sm:$0xff] }
 0x11f   :  { %2834 = vmatprep.subr.bf16.mxu1 %v6228_v56  ;;  %v5901_v56 = vcombine.low %v200_v43, %v204_v44  ;;  %v5894_v62 = vcombine.high %v192_v47, %v196_v48 }
 0x120   :  { %2798 = vmatpush2.bf16.msra.mxu0 %v6083_v57  ;;  %v184_v57 = vld [vmem:[#allocation5 + $0x110] sm:$0xff] }
 0x121   :  { %2799 = vmatprep.subr.bf16.mxu0 %v6076_v61  ;;  %v6171_v61 = vcombine.low %v471_v21, %v475_v42 }
 0x122   :  { %2835 = vmatpush2.bf16.msra.mxu1 %v6227_v60  ;;  %v188_v60 = vld [vmem:[#allocation5 + $0x130] sm:$0xff] }
 0x123   :  { %2836 = vmatprep.subr.bf16.mxu1 %v6220_v2  ;;  %v5893_v2 = vcombine.low %v192_v47, %v196_v48  ;;  %v5885_v8 = vcombine.low %v184_v57, %v188_v60  ;;  %v264_v47 = vld [vmem:[#allocation5 + $0x390] sm:$0xff] }
 0x124   :  { %2800 = vmatpush2.bf16.msra.mxu0 %v6075_v3  ;;  %v6235_v3 = vcombine.low %v535_v51, %v539_v52  ;;  %v268_v48 = vld [vmem:[#allocation5 + $0x3b0] sm:$0xff] }
 0x125   :  { %2801 = vmatprep.subr.bf16.mxu0 %v6068_v5  ;;  %v176_v5 = vld [vmem:[#allocation5 + $0xd0] sm:$0xff]  ;;  %v5966_v52 = vcombine.high %v264_v47, %v268_v48 }
 0x126   :  { %2837 = vmatpush2.bf16.msra.mxu1 %v6219_v4  ;;  %v5886_v4 = vcombine.high %v184_v57, %v188_v60  ;;  %v5878_v9 = vcombine.high %v176_v5, %v180_v6  ;;  %v5877_v14 = vcombine.low %v176_v5, %v180_v6  ;;  %v256_v57 = vld [vmem:[#allocation5 + $0x350] sm:$0xff] }
 0x127   :  { %2838 = vmatprep.subr.bf16.mxu1 %v6212_v10  ;;  %v328_v10 = vld [vmem:[#allocation5 + $0x590] sm:$0xff] }
 0x128   :  { %2802 = vmatpush2.bf16.msra.mxu0 %v6067_v11  ;;  %v332_v11 = vld [vmem:[#allocation5 + $0x5b0] sm:$0xff] }
 0x129   :  { %2803 = vmatprep.subr.bf16.mxu0 %v6060_v13  ;;  %v172_v13 = vld [vmem:[#allocation5 + $0xb0] sm:$0xff]  ;;  %v6029_v54 = vcombine.low %v328_v10, %v332_v11 }
 0x12a   :  { %2839 = vmatpush2.bf16.msra.mxu1 %v6211_v12  ;;  %v168_v12 = vld [vmem:[#allocation5 + $0x90] sm:$0xff] }
 0x12b   :  { %2840 = vmatprep.subr.bf16.mxu1 %v6204_v20  ;;  %v5870_v17 = vcombine.high %v168_v12, %v172_v13  ;;  %v324_v20 = vld [vmem:[#allocation5 + $0x570] sm:$0xff]  ;;  %v5869_v26 = vcombine.low %v168_v12, %v172_v13 }
 0x12c   :  { %2804 = vmatpush2.bf16.msra.mxu0 %v6059_v22  ;;  %v160_v22 = vld [vmem:[#allocation5 + $0x50] sm:$0xff]  ;;  %v6022_v34 = vcombine.high %v320_v18, %v324_v20  ;;  %v6021_v36 = vcombine.low %v320_v18, %v324_v20 }
 0x12d   :  { %2805 = vmatprep.subr.bf16.mxu0 %v6052_v24  ;;  %v6030_v24 = vcombine.high %v328_v10, %v332_v11  ;;  %v260_v60 = vld [vmem:[#allocation5 + $0x370] sm:$0xff] }
 0x12e   :  { %2841 = vmatpush2.bf16.msra.mxu1 %v6203_v23  ;;  %v164_v23 = vld [vmem:[#allocation5 + $0x70] sm:$0xff]  ;;  %v5958_v0 = vcombine.high %v256_v57, %v260_v60  ;;  %v5957_v6 = vcombine.low %v256_v57, %v260_v60  ;;  %v7498_v57 = vld [vmem:[#allocation7] sm:$0xff] }
 0x12f   :  { %2842 = vmatprep.subr.bf16.mxu1 %v6196_v28  ;;  %v5862_v27 = vcombine.high %v160_v22, %v164_v23  ;;  %v312_v28 = vld [vmem:[#allocation5 + $0x510] sm:$0xff]  ;;  %v5861_v35 = vcombine.low %v160_v22, %v164_v23 }
 0x130   :  { %2806 = vmatpush2.bf16.msra.mxu0 %v6051_v31  ;;  %v316_v31 = vld [vmem:[#allocation5 + $0x530] sm:$0xff] }
 0x131   :  { %2807 = vmatprep.subr.bf16.mxu0 %v6044_v33  ;;  %v156_v33 = vld [vmem:[#allocation5 + $0x30] sm:$0xff]  ;;  %v6014_v21 = vcombine.high %v312_v28, %v316_v31  ;;  %v6013_v43 = vcombine.low %v312_v28, %v316_v31 }
 0x132   :  { %2843 = vmatpush2.bf16.msra.mxu1 %v6195_v32  ;;  %v152_v32 = vld [vmem:[#allocation5 + $0x10] sm:$0xff] }
 0x133   :  { %2844 = vmatprep.subr.bf16.mxu1 %v6188_v38  ;;  %v5854_v37 = vcombine.high %v152_v32, %v156_v33  ;;  %v304_v38 = vld [vmem:[#allocation5 + $0x4d0] sm:$0xff]  ;;  %v5853_v42 = vcombine.low %v152_v32, %v156_v33 }
 0x134   :  { %2808 = vmatpush2.bf16.msra.mxu0 %v6043_v39  ;;  %v308_v39 = vld [vmem:[#allocation5 + $0x4f0] sm:$0xff] }
 0x135   :  { %2900 = vmatprep.subr.bf16.mxu0 %v5910_v41  ;;  %v276_v41 = vld [vmem:[#allocation5 + $0x3f0] sm:$0xff]  ;;  %v6005_v51 = vcombine.low %v304_v38, %v308_v39 }
 0x136   :  { %2845 = vmatpush2.bf16.msra.mxu1 %v6187_v40  ;;  %v272_v40 = vld [vmem:[#allocation5 + $0x3d0] sm:$0xff] }
 0x137   :  { %2846 = vmatprep.subr.bf16.mxu1 %v6180_v45  ;;  %2810 = vmatmul.mubr.bf16.vlgmr.msra.gmra.mxu0 %v7461_v19  ;;  %v5974_v44 = vcombine.high %v272_v40, %v276_v41  ;;  %v296_v45 = vld [vmem:[#allocation5 + $0x490] sm:$0xff] }
 0x138   :  { %2901 = vmatpush1.bf16.msra.mxu0 %v5909_v46  ;;  %2932 = vmatprep.mubr.bf16.mxu0 %v7447_v58  ;;  %v300_v46 = vld [vmem:[#allocation5 + $0x4b0] sm:$0xff] }
 0x139   :  { %2902 = vmatprep.subr.bf16.mxu0 %v5902_v50  ;;  %v5973_v50 = vcombine.low %v272_v40, %v276_v41  ;;  %v5997_v63 = vcombine.low %v296_v45, %v300_v46  ;;  %v404_v10 = vld [vmem:[#allocation5 + $0x7f0] sm:$0xff] }
 0x13a   :  { %2847 = vmatpush2.bf16.msra.mxu1 %v6179_v49  ;;  %v6006_v49 = vcombine.high %v304_v38, %v308_v39  ;;  %v240_v11 = vld [vmem:[#allocation5 + $0x2d0] sm:$0xff] }
 0x13b   :  { %2848 = vmatprep.subr.bf16.mxu1 %v6172_v55  ;;  %v288_v55 = vld [vmem:[#allocation5 + $0x450] sm:$0xff] }
 0x13c   :  { %2903 = vmatpush1.bf16.msra.mxu0 %v5901_v56  ;;  %v292_v56 = vld [vmem:[#allocation5 + $0x470] sm:$0xff] }
 0x13d   :  { %2904 = vmatprep.subr.bf16.mxu0 %v5894_v62  ;;  %v5965_v62 = vcombine.low %v264_v47, %v268_v48  ;;  %v5990_v5 = vcombine.high %v288_v55, %v292_v56  ;;  %v244_v12 = vld [vmem:[#allocation5 + $0x2f0] sm:$0xff] }
 0x13e   :  { %2849 = vmatpush2.bf16.msra.mxu1 %v6171_v61  ;;  %v5998_v61 = vcombine.high %v296_v45, %v300_v46  ;;  %v232_v18 = vld [vmem:[#allocation5 + $0x290] sm:$0xff] }
 0x13f   :  { %2873 = vmatprep.subr.bf16.mxu1 %v6236_v1  ;;  %v280_v1 = vld [vmem:[#allocation5 + $0x410] sm:$0xff] }
 0x140   :  { %2905 = vmatpush1.bf16.msra.mxu0 %v5893_v2  ;;  %v284_v2 = vld [vmem:[#allocation5 + $0x430] sm:$0xff] }
 0x141   :  { %2851 = vmatmul.mubr.bf16.vlgmr.msra.gmra.mxu1 %v7477_v29  ;;  %2906 = vmatprep.subr.bf16.mxu0 %v5886_v4  ;;  %v252_v4 = vld [vmem:[#allocation5 + $0x330] sm:$0xff]  ;;  %v5982_v13 = vcombine.high %v280_v1, %v284_v2 }
 0x142   :  { %2874 = vmatpush1.bf16.msra.mxu1 %v6235_v3  ;;  %2891 = vmatprep.mubr.bf16.mxu1 %v7362_v30  ;;  %v248_v3 = vld [vmem:[#allocation5 + $0x310] sm:$0xff] }
 0x143   :  { %2941 = vmatprep.subr.bf16.mxu1 %v6038_v7  ;;  %v5989_v7 = vcombine.low %v288_v55, %v292_v56  ;;  %v236_v20 = vld [vmem:[#allocation5 + $0x2b0] sm:$0xff] }
 0x144   :  { %2907 = vmatpush1.bf16.msra.mxu0 %v5885_v8  ;;  %v5950_v8 = vcombine.high %v248_v3, %v252_v4  ;;  %v392_v23 = vld [vmem:[#allocation5 + $0x790] sm:$0xff] }
 0x145   :  { %2908 = vmatprep.subr.bf16.mxu0 %v5878_v9  ;;  %v400_v9 = vld [vmem:[#allocation5 + $0x7d0] sm:$0xff] }
 0x146   :  { %v6102_v22 = vcombine.high %v400_v9, %v404_v10  ;;  %v224_v31 = vld [vmem:[#allocation5 + $0x250] sm:$0xff] }
 0x147   :  { %v228_v32 = vld [vmem:[#allocation5 + $0x270] sm:$0xff] }
 0x148   :  { %2909 = vmatpush1.bf16.msra.mxu0 %v5877_v14  ;;  %v5949_v14 = vcombine.low %v248_v3, %v252_v4  ;;  %v384_v33 = vld [vmem:[#allocation5 + $0x750] sm:$0xff]  ;;  %v5926_v38 = vcombine.high %v224_v31, %v228_v32 }
 0x149   :  { %6242 = vmatmul.mubr.msk.bf16.vlgmr.msra.gmra.mxu1 %vm2568_vm0, %v7487_v25  ;;  %2910 = vmatprep.subr.bf16.mxu0 %v5870_v17  ;;  %v5942_v17 = vcombine.high %v240_v11, %v244_v12  ;;  %v216_v40 = vld [vmem:[#allocation5 + $0x210] sm:$0xff] }
 0x14a   :  { %2942 = vmatpush1.bf16.msra.mxu1 %v6037_v15  ;;  %2973 = vmatprep.mubr.bf16.mxu1 %v7451_v59  ;;  %v5981_v15 = vcombine.low %v280_v1, %v284_v2  ;;  %v220_v41 = vld [vmem:[#allocation5 + $0x230] sm:$0xff] }
 0x14b   :  { %2943 = vmatprep.subr.bf16.mxu1 %v6030_v24  ;;  %v396_v24 = vld [vmem:[#allocation5 + $0x7b0] sm:$0xff]  ;;  %v5918_v46 = vcombine.high %v216_v40, %v220_v41 }
 0x14c   :  { %2911 = vmatpush1.bf16.msra.mxu0 %v5869_v26  ;;  %v5941_v26 = vcombine.low %v240_v11, %v244_v12  ;;  %v6094_v28 = vcombine.high %v392_v23, %v396_v24  ;;  %v464_v48 = vld [vmem:[#allocation5 + $0x9d0] sm:$0xff] }
 0x14d   :  { %2912 = vmatprep.subr.bf16.mxu0 %v5862_v27  ;;  %v5934_v27 = vcombine.high %v232_v18, %v236_v20  ;;  %v360_v1 = vld [vmem:[#allocation5 + $0x690] sm:$0xff] }
 0x14e   :  { %2944 = vmatpush1.bf16.msra.mxu1 %v6029_v54  ;;  %v6101_v54 = vcombine.low %v400_v9, %v404_v10  ;;  %v364_v2 = vld [vmem:[#allocation5 + $0x6b0] sm:$0xff] }
 0x14f   :  { %2945 = vmatprep.subr.bf16.mxu1 %v6022_v34  ;;  %v388_v34 = vld [vmem:[#allocation5 + $0x770] sm:$0xff] }
 0x150   :  { %2913 = vmatpush1.bf16.msra.mxu0 %v5861_v35  ;;  %v5933_v35 = vcombine.low %v232_v18, %v236_v20  ;;  %v6086_v39 = vcombine.high %v384_v33, %v388_v34  ;;  %v6085_v45 = vcombine.low %v384_v33, %v388_v34  ;;  %v448_v9 = vld [vmem:[#allocation5 + $0x950] sm:$0xff]  ;;  %v6061_v20 = vcombine.low %v360_v1, %v364_v2 }
 0x151   :  { %2914 = vmatprep.subr.bf16.mxu0 %v5854_v37  ;;  %v6093_v37 = vcombine.low %v392_v23, %v396_v24  ;;  %v452_v10 = vld [vmem:[#allocation5 + $0x970] sm:$0xff] }
 0x152   :  { %2946 = vmatpush1.bf16.msra.mxu1 %v6021_v36  ;;  %v544_v36 = vlaneseq  ;;  %v352_v12 = vld [vmem:[#allocation5 + $0x650] sm:$0xff] }
 0x153   :  { %2947 = vmatprep.subr.bf16.mxu1 %v6014_v21  ;;  %v376_v21 = vld [vmem:[#allocation5 + $0x710] sm:$0xff] }
 0x154   :  { %2915 = vmatpush1.bf16.msra.mxu0 %v5853_v42  ;;  %v380_v42 = vld [vmem:[#allocation5 + $0x730] sm:$0xff] }
 0x155   :  { %2916 = vmatprep.subr.bf16.mxu0 %v5974_v44  ;;  %v7493_v44 = vshrl.u32 %v544_v36, 7  ;;  %v6078_v47 = vcombine.high %v376_v21, %v380_v42  ;;  %v6077_v56 = vcombine.low %v376_v21, %v380_v42  ;;  %v432_v42 = vld [vmem:[#allocation5 + $0x8d0] sm:$0xff] }
 0x156   :  { %2948 = vmatpush1.bf16.msra.mxu1 %v6013_v43  ;;  %v5925_v43 = vcombine.low %v224_v31, %v228_v32  ;;  %v344_v31 = vld [vmem:[#allocation5 + $0x610] sm:$0xff] }
 0x157   :  { %2949 = vmatprep.subr.bf16.mxu1 %v6006_v49  ;;  %v468_v49 = vld [vmem:[#allocation5 + $0x9f0] sm:$0xff]  ;;  %v7496_v55 = vsub.s32 0, %v7493_v44 }
 0x158   :  { %2917 = vmatpush2.bf16.msra.mxu0 %v5973_v50  ;;  %v368_v50 = vld [vmem:[#allocation5 + $0x6d0] sm:$0xff]  ;;  %v6166_v60 = vcombine.high %v464_v48, %v468_v49  ;;  %v6165_v4 = vcombine.low %v464_v48, %v468_v49 }
 0x159   :  { %2918 = vmatprep.subr.bf16.mxu0 %v5966_v52  ;;  %v5917_v52 = vcombine.low %v216_v40, %v220_v41  ;;  %v547_v3 = vrot.slane %v7498_v57, %v7496_v55  ;;  %v348_v32 = vld [vmem:[#allocation5 + $0x630] sm:$0xff] }
 0x15a   :  { %2950 = vmatpush1.bf16.msra.mxu1 %v6005_v51  ;;  %v372_v51 = vld [vmem:[#allocation5 + $0x6f0] sm:$0xff]  ;;  %v6046_v21 = vcombine.high %v344_v31, %v348_v32  ;;  %v6045_v49 = vcombine.low %v344_v31, %v348_v32 }
 0x15b   :  { %2951 = vmatprep.subr.bf16.mxu1 %v5998_v61  ;;  %v6070_v61 = vcombine.high %v368_v50, %v372_v51  ;;  %v520_v32 = vld [vmem:[#allocation5 + $0xb90] sm:$0xff] }
 0x15c   :  { %2919 = vmatpush2.bf16.msra.mxu0 %v5965_v62  ;;  %v7501_v62 = vsub.s32 1, %v7493_v44 }
 0x15d   :  { %2920 = vmatprep.subr.bf16.mxu0 %v5958_v0  ;;  %v460_v0 = vld [vmem:[#allocation5 + $0x9b0] sm:$0xff] }
 0x15e   :  { %2952 = vmatpush1.bf16.msra.mxu1 %v5997_v63  ;;  %v456_v63 = vld [vmem:[#allocation5 + $0x990] sm:$0xff] }
 0x15f   :  { %2953 = vmatprep.subr.bf16.mxu1 %v5990_v5  ;;  %v6069_v5 = vcombine.low %v368_v50, %v372_v51 }
 0x160   :  { %2921 = vmatpush2.bf16.msra.mxu0 %v5957_v6  ;;  %v6158_v6 = vcombine.high %v456_v63, %v460_v0 }
 0x161   :  { %2922 = vmatprep.subr.bf16.mxu0 %v5950_v8  ;;  %v6062_v8 = vcombine.high %v360_v1, %v364_v2 }
 0x162   :  { %2954 = vmatpush1.bf16.msra.mxu1 %v5989_v7  ;;  %v551_v7 = vrot.slane %v7498_v57, %v7501_v62 }
 0x163   :  { %2955 = vmatprep.subr.bf16.mxu1 %v5982_v13  ;;  %v356_v13 = vld [vmem:[#allocation5 + $0x670] sm:$0xff] }
 0x164   :  { %2923 = vmatpush2.bf16.msra.mxu0 %v5949_v14 }
 0x165   :  { %2924 = vmatprep.subr.bf16.mxu0 %v5942_v17  ;;  %v6157_v17 = vcombine.low %v456_v63, %v460_v0  ;;  %v213_v63 = vld [vmem:[#allocation5 + $0x1f8] sm:$0xff] }
 0x166   :  { %2956 = vmatpush1.bf16.msra.mxu1 %v5981_v15 }
 0x167   :  { %2957 = vmatprep.subr.bf16.mxu1 %v6102_v22  ;;  %v6150_v22 = vcombine.high %v448_v9, %v452_v10 }
 0x168   :  { %2925 = vmatpush2.bf16.msra.mxu0 %v5941_v26 }
 0x169   :  { %2926 = vmatprep.subr.bf16.mxu0 %v5934_v27  ;;  %v440_v27 = vld [vmem:[#allocation5 + $0x910] sm:$0xff] }
 0x16a   :  { %2958 = vmatpush2.bf16.msra.mxu1 %v6101_v54  ;;  %v6054_v54 = vcombine.high %v352_v12, %v356_v13 }
 0x16b   :  { %2959 = vmatprep.subr.bf16.mxu1 %v6094_v28  ;;  %v444_v28 = vld [vmem:[#allocation5 + $0x930] sm:$0xff] }
 0x16c   :  { %2927 = vmatpush2.bf16.msra.mxu0 %v5933_v35  ;;  %v6141_v48 = vcombine.low %v440_v27, %v444_v28 }
 0x16d   :  { %2928 = vmatprep.subr.bf16.mxu0 %v5926_v38  ;;  %v6053_v38 = vcombine.low %v352_v12, %v356_v13  ;;  %v201_v12 = vld [vmem:[#allocation5 + $0x198] sm:$0xff] }
 0x16e   :  { %2960 = vmatpush2.bf16.msra.mxu1 %v6093_v37  ;;  %v6149_v37 = vcombine.low %v448_v9, %v452_v10  ;;  %v408_v10 = vld [vmem:[#allocation5 + $0x810] sm:$0xff]  ;;  %v205_v13 = vld [vmem:[#allocation5 + $0x1b8] sm:$0xff] }
 0x16f   :  { %2961 = vmatprep.subr.bf16.mxu1 %v6086_v39  ;;  %v6142_v39 = vcombine.high %v440_v27, %v444_v28  ;;  %v5903_v27 = vcombine.low %v201_v12, %v205_v13 }
 0x170   :  { %2929 = vmatpush2.bf16.msra.mxu0 %v5925_v43  ;;  %v436_v43 = vld [vmem:[#allocation5 + $0x8f0] sm:$0xff] }
 0x171   :  { %2930 = vmatprep.subr.bf16.mxu0 %v5918_v46  ;;  %v540_v46 = vld [vmem:[#allocation5 + $0xc30] sm:$0xff]  ;;  %v6134_v50 = vcombine.high %v432_v42, %v436_v43  ;;  %v6133_v1 = vcombine.low %v432_v42, %v436_v43  ;;  %v177_v42 = vld [vmem:[#allocation5 + $0xd8] sm:$0xff] }
 0x172   :  { %2962 = vmatpush2.bf16.msra.mxu1 %v6085_v45  ;;  %v536_v45 = vld [vmem:[#allocation5 + $0xc10] sm:$0xff]  ;;  %v181_v43 = vld [vmem:[#allocation5 + $0xf8] sm:$0xff] }
 0x173   :  { %2963 = vmatprep.subr.bf16.mxu1 %v6078_v47  ;;  %v6237_v2 = vcombine.low %v536_v45, %v540_v46 }
 0x174   :  { %2931 = vmatpush2.bf16.msra.mxu0 %v5917_v52  ;;  %v6238_v52 = vcombine.high %v536_v45, %v540_v46 }
 0x175   :  { %2982 = vmatprep.subr.bf16.mxu0 %v6166_v60  ;;  %v428_v60 = vld [vmem:[#allocation5 + $0x8b0] sm:$0xff] }
 0x176   :  { %2964 = vmatpush2.bf16.msra.mxu1 %v6077_v56  ;;  %v424_v56 = vld [vmem:[#allocation5 + $0x890] sm:$0xff] }
 0x177   :  { %2965 = vmatprep.subr.bf16.mxu1 %v6070_v61  ;;  %v2606_v11 = vpop.f32.mrf.mxu0  ;;  %2933 = vmatmul.mubr.bf16.vlgmr.msra.gmra.mxu0 %v7457_v16  ;;  %v209_v61 = vld [vmem:[#allocation5 + $0x1d8] sm:$0xff] }
 0x178   :  { %v2607_v14 = vadd.f32 %v2606_v11, %v547_v3  ;;  %2983 = vmatpush1.bf16.msra.mxu0 %v6165_v4  ;;  %3014 = vmatprep.mubr.bf16.mxu0 %v7468_v53  ;;  %v6126_v3 = vcombine.high %v424_v56, %v428_v60  ;;  %v412_v11 = vld [vmem:[#allocation5 + $0x830] sm:$0xff] }
 0x179   :  { %v2647_v15 = vpop.f32.mrf.mxu1  ;;  %v2608_v18 = vpop.f32.mrf.mxu0  ;;  %2984 = vmatprep.subr.bf16.mxu0 %v6158_v6  ;;  %v416_v6 = vld [vmem:[#allocation5 + $0x850] sm:$0xff] }
 0x17a   :  { %2966 = vmatpush2.bf16.msra.mxu1 %v6069_v5  ;;  %v7509_v23 = vadd.f32 %v2647_v15, %v2607_v14  ;;  %v2609_v24 = vadd.f32 %v2608_v18, %v551_v7  ;;  %v5912_v5 = vcombine.high %v209_v61, %v213_v63  ;;  %v420_v7 = vld [vmem:[#allocation5 + $0x870] sm:$0xff]  ;;  %v5911_v15 = vcombine.low %v209_v61, %v213_v63 }
 0x17b   :  { %v2649_v26 = vpop.f32.mrf.mxu1  ;;  %2967 = vmatprep.subr.bf16.mxu1 %v6062_v8  ;;  %v2610_v33 = vpop.f32.mrf.mxu0  ;;  %v6125_v8 = vcombine.low %v424_v56, %v428_v60  ;;  %v6118_v9 = vcombine.high %v416_v6, %v420_v7  ;;  %v6117_v14 = vcombine.low %v416_v6, %v420_v7  ;;  %v5904_v18 = vcombine.high %v201_v12, %v205_v13  ;;  %v173_v56 = vld [vmem:[#allocation5 + $0xb8] sm:$0xff] }
 0x17c   :  { %v7511_v34 = vadd.f32 %v2649_v26, %v2609_v24  ;;  %2985 = vmatpush1.bf16.msra.mxu0 %v6157_v17  ;;  %v6110_v17 = vcombine.high %v408_v10, %v412_v11  ;;  %v193_v24 = vld [vmem:[#allocation5 + $0x158] sm:$0xff]  ;;  %v524_v33 = vld [vmem:[#allocation5 + $0xbb0] sm:$0xff]  ;;  %v5879_v61 = vcombine.low %v177_v42, %v181_v43 }
 0x17d   :  { %v2651_v35 = vpop.f32.mrf.mxu1  ;;  %2986 = vmatprep.subr.bf16.mxu0 %v6150_v22  ;;  %v2611_v40 = vpop.f32.mrf.mxu0  ;;  %v532_v22 = vld [vmem:[#allocation5 + $0xbf0] sm:$0xff]  ;;  %v197_v26 = vld [vmem:[#allocation5 + $0x178] sm:$0xff]  ;;  %v6221_v45 = vcombine.low %v520_v32, %v524_v33 }
 0x17e   :  { %2968 = vmatpush2.bf16.msra.mxu1 %v6061_v20  ;;  %v528_v20 = vld [vmem:[#allocation5 + $0xbd0] sm:$0xff]  ;;  %v5896_v31 = vcombine.high %v193_v24, %v197_v26  ;;  %v185_v35 = vld [vmem:[#allocation5 + $0x118] sm:$0xff] }
 0x17f   :  { %v2652_v41 = vpop.f32.mrf.mxu1  ;;  %2969 = vmatprep.subr.bf16.mxu1 %v6054_v54  ;;  %v6109_v54 = vcombine.low %v408_v10, %v412_v11  ;;  %v6230_v28 = vcombine.high %v528_v20, %v532_v22  ;;  %v492_v10 = vld [vmem:[#allocation5 + $0xab0] sm:$0xff]  ;;  %v153_v11 = vld [vmem:[#allocation5 + $0x18] sm:$0xff] }
 0x180   :  { %2987 = vmatpush1.bf16.msra.mxu0 %v6149_v37  ;;  %v189_v37 = vld [vmem:[#allocation5 + $0x138] sm:$0xff]  ;;  %v512_v41 = vld [vmem:[#allocation5 + $0xb50] sm:$0xff] }
 0x181   :  { %v7513_v47 = vpop.f32.mrf.mxu1  ;;  %2988 = vmatprep.subr.bf16.mxu0 %v6142_v39  ;;  %v5895_v39 = vcombine.low %v193_v24, %v197_v26  ;;  %v5888_v40 = vcombine.high %v185_v35, %v189_v37  ;;  %v5887_v46 = vcombine.low %v185_v35, %v189_v37  ;;  %v157_v12 = vld [vmem:[#allocation5 + $0x38] sm:$0xff] }
 0x182   :  { %2970 = vmatpush2.bf16.msra.mxu1 %v6053_v38  ;;  %v6229_v38 = vcombine.low %v528_v20, %v532_v22  ;;  %v484_v20 = vld [vmem:[#allocation5 + $0xa70] sm:$0xff]  ;;  %v273_v22 = vld [vmem:[#allocation5 + $0x3d8] sm:$0xff] }
 0x183   :  { %v7515_v51 = vpop.f32.mrf.mxu1  ;;  %2971 = vmatprep.subr.bf16.mxu1 %v6046_v21  ;;  %v516_v21 = vld [vmem:[#allocation5 + $0xb70] sm:$0xff]  ;;  %v277_v24 = vld [vmem:[#allocation5 + $0x3f8] sm:$0xff] }
 0x184   :  { %2989 = vmatpush1.bf16.msra.mxu0 %v6141_v48  ;;  %v5880_v48 = vcombine.high %v177_v42, %v181_v43  ;;  %v6213_v60 = vcombine.low %v512_v41, %v516_v21  ;;  %v269_v35 = vld [vmem:[#allocation5 + $0x3b8] sm:$0xff] }
 0x185   :  { %v2733_v0 = vpop.f32.mrf.mxu1  ;;  %2990 = vmatprep.subr.bf16.mxu0 %v6134_v50  ;;  %v508_v50 = vld [vmem:[#allocation5 + $0xb30] sm:$0xff]  ;;  %v261_v42 = vld [vmem:[#allocation5 + $0x378] sm:$0xff] }
 0x186   :  { %2972 = vmatpush2.bf16.msra.mxu1 %v6045_v49  ;;  %v504_v49 = vld [vmem:[#allocation5 + $0xb10] sm:$0xff] }
 0x187   :  { %v2734_v4 = vpop.f32.mrf.mxu1  ;;  %3037 = vmatprep.subr.bf16.mxu1 %v6238_v52  ;;  %v169_v52 = vld [vmem:[#allocation5 + $0x98] sm:$0xff]  ;;  %v6206_v63 = vcombine.high %v504_v49, %v508_v50 }
 0x188   :  { %2991 = vmatpush1.bf16.msra.mxu0 %v6133_v1  ;;  %v5872_v0 = vcombine.high %v169_v52, %v173_v56  ;;  %v496_v1 = vld [vmem:[#allocation5 + $0xad0] sm:$0xff]  ;;  %v165_v4 = vld [vmem:[#allocation5 + $0x78] sm:$0xff]  ;;  %v5871_v6 = vcombine.low %v169_v52, %v173_v56 }
 0x189   :  { %2974 = vmatmul.mubr.bf16.vlgmr.msra.gmra.mxu1 %v7461_v19  ;;  %2992 = vmatprep.subr.bf16.mxu0 %v6126_v3  ;;  %v161_v3 = vld [vmem:[#allocation5 + $0x58] sm:$0xff] }
 0x18a   :  { %3038 = vmatpush1.bf16.msra.mxu1 %v6237_v2  ;;  %3055 = vmatprep.mubr.bf16.mxu1 %v7362_v30  ;;  %v500_v2 = vld [vmem:[#allocation5 + $0xaf0] sm:$0xff]  ;;  %v253_v52 = vld [vmem:[#allocation5 + $0x338] sm:$0xff] }
 0x18b   :  { %3064 = vmatprep.subr.bf16.mxu1 %v5912_v5  ;;  %v6205_v5 = vcombine.low %v504_v49, %v508_v50  ;;  %v6198_v7 = vcombine.high %v496_v1, %v500_v2  ;;  %v6197_v13 = vcombine.low %v496_v1, %v500_v2  ;;  %v333_v49 = vld [vmem:[#allocation5 + $0x5b8] sm:$0xff] }
 0x18c   :  { %2993 = vmatpush1.bf16.msra.mxu0 %v6125_v8  ;;  %v5864_v8 = vcombine.high %v161_v3, %v165_v4  ;;  %v249_v50 = vld [vmem:[#allocation5 + $0x318] sm:$0xff] }
 0x18d   :  { %2994 = vmatprep.subr.bf16.mxu0 %v6118_v9  ;;  %v488_v9 = vld [vmem:[#allocation5 + $0xa90] sm:$0xff]  ;;  %v325_v1 = vld [vmem:[#allocation5 + $0x578] sm:$0xff] }
 0x18e   :  { %v6189_v26 = vcombine.low %v488_v9, %v492_v10 }
 0x190   :  { %2995 = vmatpush1.bf16.msra.mxu0 %v6117_v14  ;;  %v5863_v14 = vcombine.low %v161_v3, %v165_v4  ;;  %v241_v3 = vld [vmem:[#allocation5 + $0x2d8] sm:$0xff] }
 0x191   :  { %6243 = vmatmul.mubr.msk.bf16.vlgmr.msra.gmra.mxu1 %vm2568_vm0, %v7487_v25  ;;  %2996 = vmatprep.subr.bf16.mxu0 %v6110_v17  ;;  %v6222_v25 = vcombine.high %v520_v32, %v524_v33  ;;  %v5856_v17 = vcombine.high %v153_v11, %v157_v12  ;;  %v476_v32 = vld [vmem:[#allocation5 + $0xa30] sm:$0xff]  ;;  %v265_v33 = vld [vmem:[#allocation5 + $0x398] sm:$0xff] }
 0x192   :  { %3065 = vmatpush1.bf16.msra.mxu1 %v5911_v15  ;;  %3096 = vmatprep.mubr.bf16.mxu1 %v7447_v58  ;;  %v6214_v58 = vcombine.high %v512_v41, %v516_v21  ;;  %v6190_v15 = vcombine.high %v488_v9, %v492_v10  ;;  %v341_v41 = vld [vmem:[#allocation5 + $0x5f8] sm:$0xff] }
 0x193   :  { %3066 = vmatprep.subr.bf16.mxu1 %v5904_v18  ;;  %v480_v18 = vld [vmem:[#allocation5 + $0xa50] sm:$0xff]  ;;  %v257_v21 = vld [vmem:[#allocation5 + $0x358] sm:$0xff] }
 0x194   :  { %2997 = vmatpush1.bf16.msra.mxu0 %v6109_v54  ;;  %v5855_v54 = vcombine.low %v153_v11, %v157_v12  ;;  %v6181_v37 = vcombine.low %v480_v18, %v484_v20  ;;  %v245_v4 = vld [vmem:[#allocation5 + $0x2f8] sm:$0xff] }
 0x195   :  { %2998 = vmatprep.subr.bf16.mxu0 %v6230_v28  ;;  %v5976_v28 = vcombine.high %v273_v22, %v277_v24  ;;  %v5944_v12 = vcombine.high %v241_v3, %v245_v4 }
 0x196   :  { %3067 = vmatpush1.bf16.msra.mxu1 %v5903_v27  ;;  %v6182_v27 = vcombine.high %v480_v18, %v484_v20  ;;  %v5943_v20 = vcombine.low %v241_v3, %v245_v4 }
 0x197   :  { %3068 = vmatprep.subr.bf16.mxu1 %v5896_v31  ;;  %v472_v31 = vld [vmem:[#allocation5 + $0xa10] sm:$0xff] }
 0x198   :  { %2999 = vmatpush2.bf16.msra.mxu0 %v6229_v38  ;;  %v5975_v38 = vcombine.low %v273_v22, %v277_v24  ;;  %v6173_v43 = vcombine.low %v472_v31, %v476_v32 }
 0x199   :  { %3000 = vmatprep.subr.bf16.mxu0 %v6222_v25  ;;  %v5968_v25 = vcombine.high %v265_v33, %v269_v35 }
 0x19a   :  { %3069 = vmatpush1.bf16.msra.mxu1 %v5895_v39  ;;  %v6174_v39 = vcombine.high %v472_v31, %v476_v32 }
 0x19b   :  { %3070 = vmatprep.subr.bf16.mxu1 %v5888_v40  ;;  %v337_v40 = vld [vmem:[#allocation5 + $0x5d8] sm:$0xff] }
 0x19c   :  { %3001 = vmatpush2.bf16.msra.mxu0 %v6221_v45  ;;  %v5967_v45 = vcombine.low %v265_v33, %v269_v35  ;;  %v6039_v56 = vcombine.low %v337_v40, %v341_v41 }
 0x19d   :  { %3002 = vmatprep.subr.bf16.mxu0 %v6214_v58  ;;  %v5960_v58 = vcombine.high %v257_v21, %v261_v42 }
 0x19e   :  { %3071 = vmatpush1.bf16.msra.mxu1 %v5887_v46  ;;  %v6040_v46 = vcombine.high %v337_v40, %v341_v41 }
 0x19f   :  { %3072 = vmatprep.subr.bf16.mxu1 %v5880_v48  ;;  %v329_v48 = vld [vmem:[#allocation5 + $0x598] sm:$0xff] }
 0x1a0   :  { %3003 = vmatpush2.bf16.msra.mxu0 %v6213_v60  ;;  %v5959_v60 = vcombine.low %v257_v21, %v261_v42 }
 0x1a1   :  { %3004 = vmatprep.subr.bf16.mxu0 %v6206_v63  ;;  %v5952_v63 = vcombine.high %v249_v50, %v253_v52 }
 0x1a2   :  { %3073 = vmatpush1.bf16.msra.mxu1 %v5879_v61  ;;  %v6032_v61 = vcombine.high %v329_v48, %v333_v49 }
 0x1a3   :  { %3074 = vmatprep.subr.bf16.mxu1 %v5872_v0  ;;  %v321_v0 = vld [vmem:[#allocation5 + $0x558] sm:$0xff] }
 0x1a4   :  { %3005 = vmatpush2.bf16.msra.mxu0 %v6205_v5  ;;  %v6024_v9 = vcombine.high %v321_v0, %v325_v1 }
 0x1a5   :  { %3006 = vmatprep.subr.bf16.mxu0 %v6198_v7  ;;  %v5951_v7 = vcombine.low %v249_v50, %v253_v52 }
 0x1a6   :  { %3075 = vmatpush1.bf16.msra.mxu1 %v5871_v6  ;;  %v6031_v6 = vcombine.low %v329_v48, %v333_v49  ;;  %v465_v48 = vld [vmem:[#allocation5 + $0x9d8] sm:$0xff] }
 0x1a7   :  { %3076 = vmatprep.subr.bf16.mxu1 %v5864_v8  ;;  %v469_v49 = vld [vmem:[#allocation5 + $0x9f8] sm:$0xff] }
 0x1a8   :  { %3007 = vmatpush2.bf16.msra.mxu0 %v6197_v13  ;;  %v313_v13 = vld [vmem:[#allocation5 + $0x518] sm:$0xff]  ;;  %v6167_v3 = vcombine.low %v465_v48, %v469_v49 }
 0x1a9   :  { %3008 = vmatprep.subr.bf16.mxu0 %v6190_v15  ;;  %v233_v15 = vld [vmem:[#allocation5 + $0x298] sm:$0xff] }
 0x1aa   :  { %3077 = vmatpush1.bf16.msra.mxu1 %v5863_v14  ;;  %v317_v14 = vld [vmem:[#allocation5 + $0x538] sm:$0xff] }
 0x1ab   :  { %3078 = vmatprep.subr.bf16.mxu1 %v5856_v17  ;;  %v6016_v22 = vcombine.high %v313_v13, %v317_v14  ;;  %v6015_v31 = vcombine.low %v313_v13, %v317_v14 }
 0x1ac   :  { %3009 = vmatpush2.bf16.msra.mxu0 %v6189_v26  ;;  %v305_v26 = vld [vmem:[#allocation5 + $0x4d8] sm:$0xff] }
 0x1ad   :  { %3010 = vmatprep.subr.bf16.mxu0 %v6182_v27  ;;  %v229_v27 = vld [vmem:[#allocation5 + $0x278] sm:$0xff] }
 0x1ae   :  { %3079 = vmatpush1.bf16.msra.mxu1 %v5855_v54  ;;  %v225_v54 = vld [vmem:[#allocation5 + $0x258] sm:$0xff] }
 0x1af   :  { %3080 = vmatprep.subr.bf16.mxu1 %v5976_v28  ;;  %v5928_v35 = vcombine.high %v225_v54, %v229_v27  ;;  %v5927_v21 = vcombine.low %v225_v54, %v229_v27  ;;  %v437_v54 = vld [vmem:[#allocation5 + $0x8f8] sm:$0xff] }
 0x1b0   :  { %3011 = vmatpush2.bf16.msra.mxu0 %v6181_v37  ;;  %v297_v37 = vld [vmem:[#allocation5 + $0x498] sm:$0xff] }
 0x1b1   :  { %3012 = vmatprep.subr.bf16.mxu0 %v6174_v39  ;;  %v217_v39 = vld [vmem:[#allocation5 + $0x218] sm:$0xff] }
 0x1b2   :  { %3081 = vmatpush2.bf16.msra.mxu1 %v5975_v38  ;;  %v301_v38 = vld [vmem:[#allocation5 + $0x4b8] sm:$0xff] }
 0x1b3   :  { %3082 = vmatprep.subr.bf16.mxu1 %v5968_v25  ;;  %v221_v25 = vld [vmem:[#allocation5 + $0x238] sm:$0xff]  ;;  %v6000_v42 = vcombine.high %v297_v37, %v301_v38  ;;  %v5999_v50 = vcombine.low %v297_v37, %v301_v38 }
 0x1b4   :  { %3013 = vmatpush2.bf16.msra.mxu0 %v6173_v43  ;;  %v5919_v52 = vcombine.low %v217_v39, %v221_v25  ;;  %v425_v37 = vld [vmem:[#allocation5 + $0x898] sm:$0xff] }
 0x1b5   :  { %3105 = vmatprep.subr.bf16.mxu0 %v6040_v46  ;;  %v289_v46 = vld [vmem:[#allocation5 + $0x458] sm:$0xff] }
 0x1b6   :  { %3083 = vmatpush2.bf16.msra.mxu1 %v5967_v45  ;;  %v5920_v45 = vcombine.high %v217_v39, %v221_v25  ;;  %v429_v38 = vld [vmem:[#allocation5 + $0x8b8] sm:$0xff] }
 0x1b7   :  { %3084 = vmatprep.subr.bf16.mxu1 %v5960_v58  ;;  %v2688_v2 = vpop.f32.mrf.mxu0  ;;  %3015 = vmatmul.mubr.bf16.vlgmr.msra.gmra.mxu0 %v7477_v29  ;;  %v293_v58 = vld [vmem:[#allocation5 + $0x478] sm:$0xff] }
 0x1b8   :  { %v2689_v5 = vadd.f32 %v2688_v2, %v7509_v23  ;;  %3106 = vmatpush1.bf16.msra.mxu0 %v6039_v56  ;;  %3137 = vmatprep.mubr.bf16.mxu0 %v7451_v59  ;;  %v237_v23 = vld [vmem:[#allocation5 + $0x2b8] sm:$0xff]  ;;  %v6023_v59 = vcombine.low %v321_v0, %v325_v1  ;;  %v5992_v56 = vcombine.high %v289_v46, %v293_v58 }
 0x1b9   :  { %v2690_v8 = vpop.f32.mrf.mxu0  ;;  %3107 = vmatprep.subr.bf16.mxu0 %v6032_v61  ;;  %v5936_v24 = vcombine.high %v233_v15, %v237_v23  ;;  %v281_v61 = vld [vmem:[#allocation5 + $0x418] sm:$0xff]  ;;  %v5991_v2 = vcombine.low %v289_v46, %v293_v58  ;;  %v6127_v58 = vcombine.low %v425_v37, %v429_v38 }
 0x1ba   :  { %3085 = vmatpush2.bf16.msra.mxu1 %v5959_v60  ;;  %v7526_v10 = vadd.f32 %v7513_v47, %v2689_v5  ;;  %v2691_v11 = vadd.f32 %v2690_v8, %v7511_v34  ;;  %v309_v34 = vld [vmem:[#allocation5 + $0x4f8] sm:$0xff]  ;;  %v6168_v60 = vcombine.high %v465_v48, %v469_v49 }
 0x1bb   :  { %3086 = vmatprep.subr.bf16.mxu1 %v5952_v63  ;;  %v2692_v17 = vpop.f32.mrf.mxu0  ;;  %v6008_v32 = vcombine.high %v305_v26, %v309_v34  ;;  %v6007_v41 = vcombine.low %v305_v26, %v309_v34  ;;  %v285_v63 = vld [vmem:[#allocation5 + $0x438] sm:$0xff] }
 0x1bc   :  { %v7530_v18 = vadd.f32 %v7515_v51, %v2691_v11  ;;  %3108 = vmatpush1.bf16.msra.mxu0 %v6031_v6  ;;  %v5935_v51 = vcombine.low %v233_v15, %v237_v23  ;;  %v457_v0 = vld [vmem:[#allocation5 + $0x998] sm:$0xff]  ;;  %v5984_v4 = vcombine.high %v281_v61, %v285_v63  ;;  %v5983_v11 = vcombine.low %v281_v61, %v285_v63 }
 0x1bd   :  { %3109 = vmatprep.subr.bf16.mxu0 %v6024_v9  ;;  %v2693_v47 = vpop.f32.mrf.mxu0  ;;  %v461_v1 = vld [vmem:[#allocation5 + $0x9b8] sm:$0xff] }
 0x1be   :  { %3087 = vmatpush2.bf16.msra.mxu1 %v5951_v7  ;;  %v6160_v5 = vcombine.high %v457_v0, %v461_v1  ;;  %v401_v6 = vld [vmem:[#allocation5 + $0x7d8] sm:$0xff] }
 0x1bf   :  { %3088 = vmatprep.subr.bf16.mxu1 %v5944_v12  ;;  %v405_v7 = vld [vmem:[#allocation5 + $0x7f8] sm:$0xff]  ;;  %v6159_v12 = vcombine.low %v457_v0, %v461_v1 }
 0x1c0   :  { %3110 = vmatpush1.bf16.msra.mxu0 %v6023_v59  ;;  %v449_v8 = vld [vmem:[#allocation5 + $0x958] sm:$0xff]  ;;  %v6104_v13 = vcombine.high %v401_v6, %v405_v7 }
 0x1c1   :  { %v7532_v28 = vpop.f32.mrf.mxu1  ;;  %3111 = vmatprep.subr.bf16.mxu0 %v6016_v22  ;;  %v453_v9 = vld [vmem:[#allocation5 + $0x978] sm:$0xff] }
 0x1c2   :  { %3089 = vmatpush2.bf16.msra.mxu1 %v5943_v20  ;;  %v6152_v14 = vcombine.high %v449_v8, %v453_v9  ;;  %v393_v15 = vld [vmem:[#allocation5 + $0x798] sm:$0xff]  ;;  %v6103_v20 = vcombine.low %v401_v6, %v405_v7  ;;  %v6151_v22 = vcombine.low %v449_v8, %v453_v9 }
 0x1c3   :  { %v7534_v33 = vpop.f32.mrf.mxu1  ;;  %3090 = vmatprep.subr.bf16.mxu1 %v5936_v24  ;;  %v397_v23 = vld [vmem:[#allocation5 + $0x7b8] sm:$0xff] }
 0x1c4   :  { %3112 = vmatpush1.bf16.msra.mxu0 %v6015_v31  ;;  %v441_v17 = vld [vmem:[#allocation5 + $0x918] sm:$0xff]  ;;  %v6095_v27 = vcombine.low %v393_v15, %v397_v23 }
 0x1c5   :  { %v2774_v40 = vpop.f32.mrf.mxu1  ;;  %3113 = vmatprep.subr.bf16.mxu0 %v6008_v32  ;;  %v445_v59 = vld [vmem:[#allocation5 + $0x938] sm:$0xff] }
 0x1c6   :  { %3091 = vmatpush2.bf16.msra.mxu1 %v5935_v51  ;;  %v6144_v47 = vcombine.high %v441_v17, %v445_v59  ;;  %v385_v24 = vld [vmem:[#allocation5 + $0x758] sm:$0xff]  ;;  %v6143_v31 = vcombine.low %v441_v17, %v445_v59  ;;  %v3229_v59 = vmul.f32 0.2, %v7530_v18 }
 0x1c7   :  { %v2775_v43 = vpop.f32.mrf.mxu1  ;;  %3092 = vmatprep.subr.bf16.mxu1 %v5928_v35  ;;  %v389_v26 = vld [vmem:[#allocation5 + $0x778] sm:$0xff] }
 0x1c8   :  { %3114 = vmatpush1.bf16.msra.mxu0 %v6007_v41  ;;  %v433_v34 = vld [vmem:[#allocation5 + $0x8d8] sm:$0xff]  ;;  %v6087_v39 = vcombine.low %v385_v24, %v389_v26  ;;  %v6128_v41 = vcombine.high %v425_v37, %v429_v38 }
 0x1c9   :  { %3115 = vmatprep.subr.bf16.mxu0 %v6000_v42  ;;  %v6136_v51 = vcombine.high %v433_v34, %v437_v54  ;;  %v377_v32 = vld [vmem:[#allocation5 + $0x718] sm:$0xff]  ;;  %v6135_v25 = vcombine.low %v433_v34, %v437_v54 }
 0x1ca   :  { %3093 = vmatpush2.bf16.msra.mxu1 %v5927_v21  ;;  %v381_v35 = vld [vmem:[#allocation5 + $0x738] sm:$0xff] }
 0x1cb   :  { %3094 = vmatprep.subr.bf16.mxu1 %v5920_v45  ;;  %v6080_v40 = vcombine.high %v377_v32, %v381_v35  ;;  %v369_v21 = vld [vmem:[#allocation5 + $0x6d8] sm:$0xff]  ;;  %v6079_v46 = vcombine.low %v377_v32, %v381_v35 }
 0x1cc   :  { %3116 = vmatpush1.bf16.msra.mxu0 %v5999_v50  ;;  %v373_v42 = vld [vmem:[#allocation5 + $0x6f8] sm:$0xff] }
 0x1cd   :  { %3117 = vmatprep.subr.bf16.mxu0 %v5992_v56  ;;  %v417_v43 = vld [vmem:[#allocation5 + $0x858] sm:$0xff]  ;;  %v6072_v48 = vcombine.high %v369_v21, %v373_v42  ;;  %v6071_v61 = vcombine.low %v369_v21, %v373_v42 }
 0x1ce   :  { %3095 = vmatpush2.bf16.msra.mxu1 %v5919_v52  ;;  %v421_v45 = vld [vmem:[#allocation5 + $0x878] sm:$0xff] }
 0x1cf   :  { %3146 = vmatprep.subr.bf16.mxu1 %v6168_v60  ;;  %v6120_v49 = vcombine.high %v417_v43, %v421_v45  ;;  %v361_v50 = vld [vmem:[#allocation5 + $0x698] sm:$0xff]  ;;  %v6119_v63 = vcombine.low %v417_v43, %v421_v45 }
 0x1d0   :  { %3118 = vmatpush1.bf16.msra.mxu0 %v5991_v2  ;;  %v365_v52 = vld [vmem:[#allocation5 + $0x6b8] sm:$0xff] }
 0x1d1   :  { %3097 = vmatmul.mubr.bf16.vlgmr.msra.gmra.mxu1 %v7457_v16  ;;  %3119 = vmatprep.subr.bf16.mxu0 %v5984_v4  ;;  %v6096_v16 = vcombine.high %v393_v15, %v397_v23  ;;  %v409_v56 = vld [vmem:[#allocation5 + $0x818] sm:$0xff]  ;;  %v6064_v0 = vcombine.high %v361_v50, %v365_v52  ;;  %v6063_v6 = vcombine.low %v361_v50, %v365_v52 }
 0x1d2   :  { %3147 = vmatpush1.bf16.msra.mxu1 %v6167_v3  ;;  %3178 = vmatprep.mubr.bf16.mxu1 %v7468_v53  ;;  %v6088_v53 = vcombine.high %v385_v24, %v389_v26  ;;  %v413_v60 = vld [vmem:[#allocation5 + $0x838] sm:$0xff] }
 0x1d3   :  { %3148 = vmatprep.subr.bf16.mxu1 %v6160_v5  ;;  %v6112_v1 = vcombine.high %v409_v56, %v413_v60  ;;  %v353_v2 = vld [vmem:[#allocation5 + $0x658] sm:$0xff]  ;;  %v6111_v7 = vcombine.low %v409_v56, %v413_v60 }
 0x1d4   :  { %3120 = vmatpush1.bf16.msra.mxu0 %v5983_v11  ;;  %v357_v3 = vld [vmem:[#allocation5 + $0x678] sm:$0xff] }
 0x1d5   :  { %3121 = vmatprep.subr.bf16.mxu0 %v6104_v13  ;;  %v529_v4 = vld [vmem:[#allocation5 + $0xbd8] sm:$0xff]  ;;  %v6056_v8 = vcombine.high %v353_v2, %v357_v3  ;;  %v6055_v15 = vcombine.low %v353_v2, %v357_v3 }
 0x1d6   :  { %3149 = vmatpush1.bf16.msra.mxu1 %v6159_v12  ;;  %v533_v5 = vld [vmem:[#allocation5 + $0xbf8] sm:$0xff] }
 0x1d7   :  { %3150 = vmatprep.subr.bf16.mxu1 %v6152_v14  ;;  %v6232_v9 = vcombine.high %v529_v4, %v533_v5  ;;  %v345_v11 = vld [vmem:[#allocation5 + $0x618] sm:$0xff]  ;;  %v6231_v23 = vcombine.low %v529_v4, %v533_v5 }
 0x1d8   :  { %3122 = vmatpush2.bf16.msra.mxu0 %v6103_v20  ;;  %v349_v12 = vld [vmem:[#allocation5 + $0x638] sm:$0xff]  ;;  %v554_v20 = vsub.s32 2, %v7493_v44 }
 0x1d9   :  { %3123 = vmatprep.subr.bf16.mxu0 %v6096_v16  ;;  %v521_v13 = vld [vmem:[#allocation5 + $0xb98] sm:$0xff]  ;;  %v6048_v17 = vcombine.high %v345_v11, %v349_v12  ;;  %v6047_v24 = vcombine.low %v345_v11, %v349_v12 }
 0x1da   :  { %3151 = vmatpush1.bf16.msra.mxu1 %v6151_v22  ;;  %v525_v14 = vld [vmem:[#allocation5 + $0xbb8] sm:$0xff]  ;;  %v555_v54 = vrot.slane %v7498_v57, %v554_v20 }
 0x1db   :  { %3152 = vmatprep.subr.bf16.mxu1 %v6144_v47  ;;  %v6224_v22 = vcombine.high %v521_v13, %v525_v14  ;;  %v513_v16 = vld [vmem:[#allocation5 + $0xb58] sm:$0xff]  ;;  %v6223_v26 = vcombine.low %v521_v13, %v525_v14 }
 0x1dc   :  { %3124 = vmatpush2.bf16.msra.mxu0 %v6095_v27  ;;  %v517_v47 = vld [vmem:[#allocation5 + $0xb78] sm:$0xff]  ;;  %v2771_v38 = vadd.f32 %v7532_v28, %v555_v54 }
 0x1dd   :  { %3125 = vmatprep.subr.bf16.mxu0 %v6088_v53  ;;  %v6632_v34 = vld [vmem:[#allocation8 + $0xe4] ss:$16 sps:$4 sm:$0xff]   ;;  %v6216_v27 = vcombine.high %v513_v16, %v517_v47  ;;  %v6630_v32 = vld [vmem:[#allocation8 + $0xe0] ss:$16 sps:$4 sm:$0xff]   ;;  %v6215_v35 = vcombine.low %v513_v16, %v517_v47 }
 0x1de   :  { %3153 = vmatpush1.bf16.msra.mxu1 %v6143_v31  ;;  %v3237_v31 = vmax.f32 %v7530_v18, %v3229_v59  ;;  %v505_v53 = vld [vmem:[#allocation5 + $0xb18] sm:$0xff] }
 0x1df   :  { %3154 = vmatprep.subr.bf16.mxu1 %v6136_v51  ;;  %v509_v51 = vld [vmem:[#allocation5 + $0xb38] sm:$0xff] }
 0x1e0   :  { %3126 = vmatpush2.bf16.msra.mxu0 %v6087_v39  ;;  %v6635_v37 = vld [vmem:[#allocation8 + $0xc4] ss:$16 sps:$4 sm:$0xff]   ;;  %v6208_v39 = vcombine.high %v505_v53, %v509_v51  ;;  %v6633_v42 = vld [vmem:[#allocation8 + $0xc0] ss:$16 sps:$4 sm:$0xff]   ;;  %v6207_v43 = vcombine.low %v505_v53, %v509_v51 }
 0x1e1   :  { %3127 = vmatprep.subr.bf16.mxu0 %v6080_v40  ;;  %v501_v21 = vld [vmem:[#allocation5 + $0xaf8] sm:$0xff] }
 0x1e2   :  { %3155 = vmatpush1.bf16.msra.mxu1 %v6135_v25  ;;  %v7545_v25 = vpack.c.bf16 %v3237_v31, %v3237_v31  ;;  %v6636_v50 = vld [vmem:[#allocation8 + $0xa0] ss:$16 sps:$4 sm:$0xff]   ;;  %v6641_v56 = vld [vmem:[#allocation8 + $0x84] ss:$16 sps:$4 sm:$0xff]  }
 0x1e3   :  { %3156 = vmatprep.subr.bf16.mxu1 %v6128_v41  ;;  %v497_v41 = vld [vmem:[#allocation5 + $0xad8] sm:$0xff] }
 0x1e4   :  { %3128 = vmatpush2.bf16.msra.mxu0 %v6079_v46  ;;  %v6638_v46 = vld [vmem:[#allocation8 + $0xa4] ss:$16 sps:$4 sm:$0xff]   ;;  %v6200_v28 = vcombine.high %v497_v41, %v501_v21  ;;  %v6199_v52 = vcombine.low %v497_v41, %v501_v21  ;;  %v6639_v2 = vld [vmem:[#allocation8 + $0x80] ss:$16 sps:$4 sm:$0xff]  }
 0x1e5   :  { %3129 = vmatprep.subr.bf16.mxu0 %v6072_v48  ;;  %v493_v48 = vld [vmem:[#allocation5 + $0xab8] sm:$0xff] }
 0x1e6   :  { %3157 = vmatpush1.bf16.msra.mxu1 %v6127_v58  ;;  %v489_v58 = vld [vmem:[#allocation5 + $0xa98] sm:$0xff] }
 0x1e7   :  { %3158 = vmatprep.subr.bf16.mxu1 %v6120_v49  ;;  %v6191_v5 = vcombine.low %v489_v58, %v493_v48  ;;  %v477_v11 = vld [vmem:[#allocation5 + $0xa38] sm:$0xff] }
 0x1e8   :  { %3130 = vmatpush2.bf16.msra.mxu0 %v6071_v61  ;;  %v6192_v61 = vcombine.high %v489_v58, %v493_v48  ;;  %v6642_v13 = vld [vmem:[#allocation8 + $0x60] ss:$16 sps:$4 sm:$0xff]   ;;  %v6659_v21 = vld [vmem:[#allocation8 + $0x1e4] ss:$16 sps:$4 sm:$0xff]  }
 0x1e9   :  { %3131 = vmatprep.subr.bf16.mxu0 %v6064_v0  ;;  %v485_v0 = vld [vmem:[#allocation5 + $0xa78] sm:$0xff] }
 0x1ea   :  { %3159 = vmatpush1.bf16.msra.mxu1 %v6119_v63  ;;  %v481_v63 = vld [vmem:[#allocation5 + $0xa58] sm:$0xff] }
 0x1eb   :  { %3160 = vmatprep.subr.bf16.mxu1 %v6112_v1  ;;  %v541_v16 = vld [vmem:[#allocation5 + $0xc38] sm:$0xff] }
 0x1ec   :  { %3132 = vmatpush2.bf16.msra.mxu0 %v6063_v6  ;;  %v6644_v6 = vld [vmem:[#allocation8 + $0x64] ss:$16 sps:$4 sm:$0xff]   ;;  %v6651_v41 = vld [vmem:[#allocation8] ss:$16 sps:$4 sm:$0xff]  }
 0x1ed   :  { %3133 = vmatprep.subr.bf16.mxu0 %v6056_v8  ;;  %v6184_v8 = vcombine.high %v481_v63, %v485_v0  ;;  %v7131_v58 = vld [vmem:[#allocation2 + $0x18] ss:$0 sps:$4 sm:$0xff]  }
 0x1ee   :  { %3161 = vmatpush1.bf16.msra.mxu1 %v6111_v7  ;;  %v6671_v48 = vld [vmem:[#allocation8 + $0x1a4] ss:$16 sps:$4 sm:$0xff]  }
 0x1ef   :  { %3162 = vmatprep.subr.bf16.mxu1 %v6232_v9  ;;  %v473_v9 = vld [vmem:[#allocation5 + $0xa18] sm:$0xff] }
 0x1f0   :  { %3134 = vmatpush2.bf16.msra.mxu0 %v6055_v15  ;;  %v6183_v15 = vcombine.low %v481_v63, %v485_v0  ;;  %v6175_v54 = vcombine.low %v473_v9, %v477_v11  ;;  %v6672_v63 = vld [vmem:[#allocation8 + $0x280] ss:$16 sps:$4 sm:$0xff]   ;;  %v6683_v0 = vld [vmem:[#allocation8 + $0x164] ss:$16 sps:$4 sm:$0xff]  }
 0x1f1   :  { %3135 = vmatprep.subr.bf16.mxu0 %v6048_v17  ;;  %v6176_v17 = vcombine.high %v473_v9, %v477_v11  ;;  %v6692_v9 = vld [vmem:[#allocation8 + $0x224] ss:$16 sps:$4 sm:$0xff]   ;;  %v6693_v11 = vld [vmem:[#allocation8 + $0x120] ss:$16 sps:$4 sm:$0xff]  }
 0x1f2   :  { %3163 = vmatpush2.bf16.msra.mxu1 %v6231_v23  ;;  %v6647_v23 = vld [vmem:[#allocation8 + $0x44] ss:$16 sps:$4 sm:$0xff]  }
 0x1f3   :  { %3164 = vmatprep.subr.bf16.mxu1 %v6224_v22  ;;  %v537_v22 = vld [vmem:[#allocation5 + $0xc18] sm:$0xff] }
 0x1f4   :  { %3136 = vmatpush2.bf16.msra.mxu0 %v6047_v24  ;;  %v6645_v24 = vld [vmem:[#allocation8 + $0x40] ss:$16 sps:$4 sm:$0xff]   ;;  %v6240_v31 = vcombine.high %v537_v22, %v541_v16 }
 0x1f5   :  { %4810 = vmatprep.subr.bf16.mxu0 %v6632_v34 }
 0x1f6   :  { %3165 = vmatpush2.bf16.msra.mxu1 %v6223_v26 }
 0x1f7   :  { %3166 = vmatprep.subr.bf16.mxu1 %v6216_v27  ;;  %v2811_v40 = vpop.f32.mrf.mxu0  ;;  %3138 = vmatmul.mubr.bf16.vlgmr.msra.gmra.mxu0 %v7461_v19  ;;  %v558_v19 = vsub.s32 3, %v7493_v44 }
 0x1f8   :  { %v2812_v18 = vadd.f32 %v2811_v40, %v2771_v38  ;;  %4811 = vmatpush1.bf16.msra.mxu0 %v6630_v32  ;;  %4842 = vmatprep.mubr.bf16.mxu0 %v7545_v25  ;;  %v6648_v32 = vld [vmem:[#allocation8 + $0x20] ss:$16 sps:$4 sm:$0xff]   ;;  %v6653_v38 = vld [vmem:[#allocation8 + $0x4] ss:$16 sps:$4 sm:$0xff]  }
 0x1f9   :  { %v2813_v45 = vpop.f32.mrf.mxu0  ;;  %4812 = vmatprep.subr.bf16.mxu0 %v6635_v37  ;;  %v559_v3 = vrot.slane %v7498_v57, %v558_v19 }
 0x1fa   :  { %3167 = vmatpush2.bf16.msra.mxu1 %v6215_v35  ;;  %v6239_v35 = vcombine.low %v537_v22, %v541_v16  ;;  %v6704_v22 = vld [vmem:[#allocation8 + $0x3e4] ss:$16 sps:$4 sm:$0xff]   ;;  %v6717_v16 = vld [vmem:[#allocation8 + $0x4e0] ss:$16 sps:$4 sm:$0xff]  }
 0x1fb   :  { %3168 = vmatprep.subr.bf16.mxu1 %v6208_v39  ;;  %v2815_v49 = vpop.f32.mrf.mxu0  ;;  %v2773_v14 = vadd.f32 %v7534_v33, %v559_v3  ;;  %v6650_v33 = vld [vmem:[#allocation8 + $0x24] ss:$16 sps:$4 sm:$0xff]   ;;  %v6678_v3 = vld [vmem:[#allocation8 + $0x260] ss:$16 sps:$4 sm:$0xff]  }
 0x1fc   :  { %4813 = vmatpush1.bf16.msra.mxu0 %v6633_v42  ;;  %v6656_v39 = vld [vmem:[#allocation8 + $0x2e4] ss:$16 sps:$4 sm:$0xff]   ;;  %v6657_v42 = vld [vmem:[#allocation8 + $0x1e0] ss:$16 sps:$4 sm:$0xff]  }
 0x1fd   :  { %4814 = vmatprep.subr.bf16.mxu0 %v6638_v46  ;;  %v2816_v60 = vpop.f32.mrf.mxu0  ;;  %v2814_v59 = vadd.f32 %v2813_v45, %v2773_v14  ;;  %v6662_v45 = vld [vmem:[#allocation8 + $0x2c4] ss:$16 sps:$4 sm:$0xff]  }
 0x1fe   :  { %3169 = vmatpush2.bf16.msra.mxu1 %v6207_v43  ;;  %v6654_v43 = vld [vmem:[#allocation8 + $0x2e0] ss:$16 sps:$4 sm:$0xff]   ;;  %v6665_v46 = vld [vmem:[#allocation8 + $0x1c4] ss:$16 sps:$4 sm:$0xff]  }
 0x1ff   :  { %3170 = vmatprep.subr.bf16.mxu1 %v6200_v28  ;;  %v6668_v49 = vld [vmem:[#allocation8 + $0x2a4] ss:$16 sps:$4 sm:$0xff]  }
 0x200   :  { %4815 = vmatpush1.bf16.msra.mxu0 %v6636_v50  ;;  %v6669_v50 = vld [vmem:[#allocation8 + $0x1a0] ss:$16 sps:$4 sm:$0xff]   ;;  %v6674_v60 = vld [vmem:[#allocation8 + $0x284] ss:$16 sps:$4 sm:$0xff]  }
 0x201   :  { %v2852_v1 = vpop.f32.mrf.mxu1  ;;  %4816 = vmatprep.subr.bf16.mxu0 %v6641_v56  ;;  %v6677_v56 = vld [vmem:[#allocation8 + $0x184] ss:$16 sps:$4 sm:$0xff]  }
 0x202   :  { %3171 = vmatpush2.bf16.msra.mxu1 %v6199_v52  ;;  %v2853_v4 = vadd.f32 %v2852_v1, %v2812_v18  ;;  %v6666_v52 = vld [vmem:[#allocation8 + $0x2a0] ss:$16 sps:$4 sm:$0xff]   ;;  %v6680_v1 = vld [vmem:[#allocation8 + $0x264] ss:$16 sps:$4 sm:$0xff]  }
 0x203   :  { %v2854_v7 = vpop.f32.mrf.mxu1  ;;  %3172 = vmatprep.subr.bf16.mxu1 %v6192_v61  ;;  %v6675_v61 = vld [vmem:[#allocation8 + $0x180] ss:$16 sps:$4 sm:$0xff]   ;;  %v6701_v14 = vld [vmem:[#allocation8 + $0x104] ss:$16 sps:$4 sm:$0xff]  }
 0x204   :  { %4817 = vmatpush1.bf16.msra.mxu0 %v6639_v2  ;;  %v2855_v26 = vadd.f32 %v2854_v7, %v2814_v59  ;;  %v6681_v2 = vld [vmem:[#allocation8 + $0x160] ss:$16 sps:$4 sm:$0xff]   ;;  %v6719_v59 = vld [vmem:[#allocation8 + $0x4e4] ss:$16 sps:$4 sm:$0xff]  }
 0x205   :  { %v2856_v12 = vpop.f32.mrf.mxu1  ;;  %4818 = vmatprep.subr.bf16.mxu0 %v6644_v6  ;;  %v6687_v6 = vld [vmem:[#allocation8 + $0x140] ss:$16 sps:$4 sm:$0xff]  }
 0x206   :  { %3173 = vmatpush2.bf16.msra.mxu1 %v6191_v5  ;;  %v6686_v5 = vld [vmem:[#allocation8 + $0x244] ss:$16 sps:$4 sm:$0xff]   ;;  %v6684_v7 = vld [vmem:[#allocation8 + $0x240] ss:$16 sps:$4 sm:$0xff]   ;;  %v3228_v12 = vmul.f32 0.2, %v7526_v10 }
 0x207   :  { %v2857_v57 = vpop.f32.mrf.mxu1  ;;  %3174 = vmatprep.subr.bf16.mxu1 %v6184_v8  ;;  %v6695_v8 = vld [vmem:[#allocation8 + $0x124] ss:$16 sps:$4 sm:$0xff]  }
 0x208   :  { %4819 = vmatpush1.bf16.msra.mxu0 %v6642_v13  ;;  %v6690_v13 = vld [vmem:[#allocation8 + $0x220] ss:$16 sps:$4 sm:$0xff]   ;;  %v3236_v57 = vmax.f32 %v7526_v10, %v3228_v12 }
 0x209   :  { %v2893_v47 = vpop.f32.mrf.mxu1  ;;  %4820 = vmatprep.subr.bf16.mxu0 %v6647_v23  ;;  %v6699_v23 = vld [vmem:[#allocation8 + $0x100] ss:$16 sps:$4 sm:$0xff]  }
 0x20a   :  { %3175 = vmatpush2.bf16.msra.mxu1 %v6183_v15  ;;  %v7554_v34 = vadd.f32 %v2893_v47, %v2853_v4  ;;  %v6689_v4 = vld [vmem:[#allocation8 + $0x144] ss:$16 sps:$4 sm:$0xff]   ;;  %v7564_v47 = vpack.c.bf16 %v3236_v57, %v3236_v57  ;;  %v6723_v10 = vld [vmem:[#allocation8 + $0x4c0] ss:$16 sps:$4 sm:$0xff]  }
 0x20b   :  { %v2895_v27 = vpop.f32.mrf.mxu1  ;;  %3176 = vmatprep.subr.bf16.mxu1 %v6176_v17  ;;  %v6698_v15 = vld [vmem:[#allocation8 + $0x204] ss:$16 sps:$4 sm:$0xff]   ;;  %v6696_v17 = vld [vmem:[#allocation8 + $0x200] ss:$16 sps:$4 sm:$0xff]  }
 0x20c   :  { %v2896_v53 = vadd.f32 %v2895_v27, %v2855_v26  ;;  %4821 = vmatpush1.bf16.msra.mxu0 %v6645_v24  ;;  %v6702_v24 = vld [vmem:[#allocation8 + $0x3e0] ss:$16 sps:$4 sm:$0xff]   ;;  %v6725_v26 = vld [vmem:[#allocation8 + $0x4c4] ss:$16 sps:$4 sm:$0xff]  }
 0x20d   :  { %v2897_v51 = vpop.f32.mrf.mxu1  ;;  %4822 = vmatprep.subr.bf16.mxu0 %v6650_v33  ;;  %v6705_v27 = vld [vmem:[#allocation8 + $0x3c0] ss:$16 sps:$4 sm:$0xff]   ;;  %v6803_v57 = vld [vmem:[#allocation8 + $0x6c4] ss:$16 sps:$4 sm:$0xff]  }
 0x20e   :  { %3177 = vmatpush2.bf16.msra.mxu1 %v6175_v54  ;;  %v3231_v40 = vmul.f32 0.2, %v2896_v53  ;;  %v6707_v54 = vld [vmem:[#allocation8 + $0x3c4] ss:$16 sps:$4 sm:$0xff]   ;;  %v6750_v12 = vld [vmem:[#allocation8 + $0x5e0] ss:$16 sps:$4 sm:$0xff]  }
 0x20f   :  { %v2898_v37 = vpop.f32.mrf.mxu1  ;;  %3201 = vmatprep.subr.bf16.mxu1 %v6240_v31  ;;  %v6710_v51 = vld [vmem:[#allocation8 + $0x3a4] ss:$16 sps:$4 sm:$0xff]  }
 0x210   :  { %4823 = vmatpush1.bf16.msra.mxu0 %v6648_v32  ;;  %v3239_v18 = vmax.f32 %v2896_v53, %v3231_v40  ;;  %v6731_v53 = vld [vmem:[#allocation8 + $0x4a4] ss:$16 sps:$4 sm:$0xff]   ;;  %v6708_v37 = vld [vmem:[#allocation8 + $0x3a0] ss:$16 sps:$4 sm:$0xff]  }
 0x211   :  { %3179 = vmatmul.mubr.bf16.vlgmr.msra.gmra.mxu1 %v7477_v29  ;;  %4824 = vmatprep.subr.bf16.mxu0 %v6653_v38  ;;  %v6663_v29 = vld [vmem:[#allocation8 + $0x1c0] ss:$16 sps:$4 sm:$0xff]   ;;  %v6737_v38 = vld [vmem:[#allocation8 + $0x484] ss:$16 sps:$4 sm:$0xff]  }
 0x212   :  { %3202 = vmatpush1.bf16.msra.mxu1 %v6239_v35  ;;  %3219 = vmatprep.mubr.bf16.mxu1 %v7362_v30  ;;  %v7558_v28 = vpack.c.bf16 %v3239_v18, %v3239_v18  ;;  %v6660_v30 = vld [vmem:[#allocation8 + $0x2c0] ss:$16 sps:$4 sm:$0xff]   ;;  %v6713_v40 = vld [vmem:[#allocation8 + $0x384] ss:$16 sps:$4 sm:$0xff]  }
 0x213   :  { %4851 = vmatprep.subr.bf16.mxu1 %v6656_v39  ;;  %v6729_v35 = vld [vmem:[#allocation8 + $0x4a0] ss:$16 sps:$4 sm:$0xff]   ;;  %v6740_v18 = vld [vmem:[#allocation8 + $0x464] ss:$16 sps:$4 sm:$0xff]  }
 0x214   :  { %4825 = vmatpush1.bf16.msra.mxu0 %v6651_v41  ;;  %v6735_v41 = vld [vmem:[#allocation8 + $0x480] ss:$16 sps:$4 sm:$0xff]  }
 0x215   :  { %4826 = vmatprep.subr.bf16.mxu0 %v6659_v21  ;;  %v6711_v21 = vld [vmem:[#allocation8 + $0x380] ss:$16 sps:$4 sm:$0xff]  }
 0x218   :  { %4827 = vmatpush2.bf16.msra.mxu0 %v6657_v42  ;;  %v6716_v42 = vld [vmem:[#allocation8 + $0x364] ss:$16 sps:$4 sm:$0xff]  }
 0x219   :  { %6244 = vmatmul.mubr.msk.bf16.vlgmr.msra.gmra.mxu1 %vm2568_vm0, %v7131_v58  ;;  %4828 = vmatprep.subr.bf16.mxu0 %v6665_v46  ;;  %v6743_v46 = vld [vmem:[#allocation8 + $0x444] ss:$16 sps:$4 sm:$0xff]  }
 0x21a   :  { %4852 = vmatpush1.bf16.msra.mxu1 %v6654_v43  ;;  %4883 = vmatprep.mubr.bf16.mxu1 %v7558_v28  ;;  %v6738_v43 = vld [vmem:[#allocation8 + $0x460] ss:$16 sps:$4 sm:$0xff]   ;;  %v6722_v58 = vld [vmem:[#allocation8 + $0x344] ss:$16 sps:$4 sm:$0xff]  }
 0x21b   :  { %4853 = vmatprep.subr.bf16.mxu1 %v6662_v45  ;;  %v6714_v45 = vld [vmem:[#allocation8 + $0x360] ss:$16 sps:$4 sm:$0xff]  }
 0x21c   :  { %4829 = vmatpush2.bf16.msra.mxu0 %v6663_v29 }
 0x21d   :  { %4830 = vmatprep.subr.bf16.mxu0 %v6671_v48  ;;  %v6720_v48 = vld [vmem:[#allocation8 + $0x340] ss:$16 sps:$4 sm:$0xff]  }
 0x21e   :  { %4854 = vmatpush1.bf16.msra.mxu1 %v6660_v30  ;;  %v6741_v30 = vld [vmem:[#allocation8 + $0x440] ss:$16 sps:$4 sm:$0xff]  }
 0x21f   :  { %4855 = vmatprep.subr.bf16.mxu1 %v6668_v49  ;;  %v6746_v49 = vld [vmem:[#allocation8 + $0x424] ss:$16 sps:$4 sm:$0xff]  }
 0x220   :  { %4831 = vmatpush2.bf16.msra.mxu0 %v6669_v50 }
 0x221   :  { %4832 = vmatprep.subr.bf16.mxu0 %v6677_v56 }
 0x222   :  { %4856 = vmatpush1.bf16.msra.mxu1 %v6666_v52  ;;  %v6728_v52 = vld [vmem:[#allocation8 + $0x324] ss:$16 sps:$4 sm:$0xff]  }
 0x223   :  { %4857 = vmatprep.subr.bf16.mxu1 %v6674_v60  ;;  %v6744_v60 = vld [vmem:[#allocation8 + $0x420] ss:$16 sps:$4 sm:$0xff]  }
 0x224   :  { %4833 = vmatpush2.bf16.msra.mxu0 %v6675_v61  ;;  %v6726_v61 = vld [vmem:[#allocation8 + $0x320] ss:$16 sps:$4 sm:$0xff]  }
 0x225   :  { %4834 = vmatprep.subr.bf16.mxu0 %v6683_v0  ;;  %v3230_v0 = vmul.f32 0.2, %v7554_v34 }
 0x226   :  { %4858 = vmatpush1.bf16.msra.mxu1 %v6672_v63  ;;  %v6749_v63 = vld [vmem:[#allocation8 + $0x404] ss:$16 sps:$4 sm:$0xff]  }
 0x227   :  { %4859 = vmatprep.subr.bf16.mxu1 %v6680_v1 }
 0x228   :  { %4835 = vmatpush2.bf16.msra.mxu0 %v6681_v2  ;;  %v6734_v2 = vld [vmem:[#allocation8 + $0x304] ss:$16 sps:$4 sm:$0xff]  }
 0x229   :  { %4836 = vmatprep.subr.bf16.mxu0 %v6689_v4  ;;  %v6747_v4 = vld [vmem:[#allocation8 + $0x400] ss:$16 sps:$4 sm:$0xff]  }
 0x22a   :  { %4860 = vmatpush1.bf16.msra.mxu1 %v6678_v3 }
 0x22b   :  { %4861 = vmatprep.subr.bf16.mxu1 %v6686_v5  ;;  %v6732_v5 = vld [vmem:[#allocation8 + $0x300] ss:$16 sps:$4 sm:$0xff]  }
 0x22c   :  { %4837 = vmatpush2.bf16.msra.mxu0 %v6687_v6  ;;  %v6752_v6 = vld [vmem:[#allocation8 + $0x5e4] ss:$16 sps:$4 sm:$0xff]  }
 0x22d   :  { %4838 = vmatprep.subr.bf16.mxu0 %v6695_v8 }
 0x22e   :  { %4862 = vmatpush1.bf16.msra.mxu1 %v6684_v7  ;;  %v3238_v7 = vmax.f32 %v7554_v34, %v3230_v0  ;;  %v6753_v34 = vld [vmem:[#allocation8 + $0x5c0] ss:$16 sps:$4 sm:$0xff]  }
 0x22f   :  { %4863 = vmatprep.subr.bf16.mxu1 %v6692_v9  ;;  %v6797_v9 = vld [vmem:[#allocation8 + $0x6e4] ss:$16 sps:$4 sm:$0xff]  }
 0x230   :  { %4839 = vmatpush2.bf16.msra.mxu0 %v6693_v11 }
 0x231   :  { %4840 = vmatprep.subr.bf16.mxu0 %v6701_v14  ;;  %v6795_v14 = vld [vmem:[#allocation8 + $0x6e0] ss:$16 sps:$4 sm:$0xff]  }
 0x232   :  { %4864 = vmatpush1.bf16.msra.mxu1 %v6690_v13  ;;  %v6755_v13 = vld [vmem:[#allocation8 + $0x5c4] ss:$16 sps:$4 sm:$0xff]  }
 0x233   :  { %4865 = vmatprep.subr.bf16.mxu1 %v6698_v15  ;;  %v7581_v15 = vpack.c.bf16 %v3238_v7, %v3238_v7 }
 0x234   :  { %4841 = vmatpush2.bf16.msra.mxu0 %v6699_v23 }
 0x235   :  { %4892 = vmatprep.subr.bf16.mxu0 %v6719_v59  ;;  %v6801_v59 = vld [vmem:[#allocation8 + $0x6c0] ss:$16 sps:$4 sm:$0xff]  }
 0x236   :  { %4866 = vmatpush1.bf16.msra.mxu1 %v6696_v17  ;;  %v6758_v17 = vld [vmem:[#allocation8 + $0x5a4] ss:$16 sps:$4 sm:$0xff]  }
 0x237   :  { %4867 = vmatprep.subr.bf16.mxu1 %v6704_v22  ;;  %4843 = vmatmul.mubr.bf16.vlgmr.msra.gmra.mxu0 %v7564_v47  ;;  %v7567_v33 = vpop.f32.mrf.mxu0  ;;  %v6809_v22 = vld [vmem:[#allocation8 + $0x6a4] ss:$16 sps:$4 sm:$0xff]  }
 0x238   :  { %4893 = vmatpush1.bf16.msra.mxu0 %v6717_v16  ;;  %v6756_v16 = vld [vmem:[#allocation8 + $0x5a0] ss:$16 sps:$4 sm:$0xff]  }
 0x239   :  { %v7569_v31 = vpop.f32.mrf.mxu0  ;;  %4894 = vmatprep.subr.bf16.mxu0 %v6725_v26  ;;  %v6807_v26 = vld [vmem:[#allocation8 + $0x6a0] ss:$16 sps:$4 sm:$0xff]  }
 0x23a   :  { %4868 = vmatpush2.bf16.msra.mxu1 %v6702_v24  ;;  %v6761_v24 = vld [vmem:[#allocation8 + $0x584] ss:$16 sps:$4 sm:$0xff]  }
 0x23b   :  { %4869 = vmatprep.subr.bf16.mxu1 %v6707_v54  ;;  %v2938_v32 = vpop.f32.mrf.mxu0  ;;  %v6815_v54 = vld [vmem:[#allocation8 + $0x684] ss:$16 sps:$4 sm:$0xff]  }
 0x23c   :  { %4895 = vmatpush1.bf16.msra.mxu0 %v6723_v10  ;;  %v6759_v10 = vld [vmem:[#allocation8 + $0x580] ss:$16 sps:$4 sm:$0xff]  }
 0x23d   :  { %4896 = vmatprep.subr.bf16.mxu0 %v6731_v53  ;;  %v2939_v39 = vpop.f32.mrf.mxu0  ;;  %v6813_v53 = vld [vmem:[#allocation8 + $0x680] ss:$16 sps:$4 sm:$0xff]  }
 0x23e   :  { %4870 = vmatpush2.bf16.msra.mxu1 %v6705_v27  ;;  %v6764_v27 = vld [vmem:[#allocation8 + $0x564] ss:$16 sps:$4 sm:$0xff]   ;;  %v6762_v32 = vld [vmem:[#allocation8 + $0x560] ss:$16 sps:$4 sm:$0xff]  }
 0x23f   :  { %4871 = vmatprep.subr.bf16.mxu1 %v6710_v51  ;;  %v6821_v51 = vld [vmem:[#allocation8 + $0x664] ss:$16 sps:$4 sm:$0xff]   ;;  %v6765_v39 = vld [vmem:[#allocation8 + $0x540] ss:$16 sps:$4 sm:$0xff]  }
 0x240   :  { %4897 = vmatpush1.bf16.msra.mxu0 %v6729_v35  ;;  %v6767_v35 = vld [vmem:[#allocation8 + $0x544] ss:$16 sps:$4 sm:$0xff]  }
 0x241   :  { %4898 = vmatprep.subr.bf16.mxu0 %v6737_v38  ;;  %v6827_v38 = vld [vmem:[#allocation8 + $0x644] ss:$16 sps:$4 sm:$0xff]  }
 0x242   :  { %4872 = vmatpush2.bf16.msra.mxu1 %v6708_v37  ;;  %v6819_v37 = vld [vmem:[#allocation8 + $0x660] ss:$16 sps:$4 sm:$0xff]  }
 0x243   :  { %4873 = vmatprep.subr.bf16.mxu1 %v6713_v40  ;;  %v6770_v40 = vld [vmem:[#allocation8 + $0x524] ss:$16 sps:$4 sm:$0xff]  }
 0x244   :  { %4899 = vmatpush1.bf16.msra.mxu0 %v6735_v41  ;;  %v6825_v41 = vld [vmem:[#allocation8 + $0x640] ss:$16 sps:$4 sm:$0xff]  }
 0x245   :  { %4900 = vmatprep.subr.bf16.mxu0 %v6740_v18  ;;  %v6833_v18 = vld [vmem:[#allocation8 + $0x624] ss:$16 sps:$4 sm:$0xff]  }
 0x246   :  { %4874 = vmatpush2.bf16.msra.mxu1 %v6711_v21  ;;  %v562_v21 = vsub.s32 4, %v7493_v44 }
 0x247   :  { %4875 = vmatprep.subr.bf16.mxu1 %v6716_v42  ;;  %v566_v42 = vsub.s32 5, %v7493_v44 }
 0x248   :  { %4901 = vmatpush1.bf16.msra.mxu0 %v6738_v43  ;;  %v6768_v43 = vld [vmem:[#allocation8 + $0x520] ss:$16 sps:$4 sm:$0xff]  }
 0x249   :  { %v7571_v29 = vpop.f32.mrf.mxu1  ;;  %4902 = vmatprep.subr.bf16.mxu0 %v6743_v46  ;;  %v6831_v46 = vld [vmem:[#allocation8 + $0x620] ss:$16 sps:$4 sm:$0xff]  }
 0x24a   :  { %4876 = vmatpush2.bf16.msra.mxu1 %v6714_v45  ;;  %v6773_v45 = vld [vmem:[#allocation8 + $0x504] ss:$16 sps:$4 sm:$0xff]  }
 0x24b   :  { %v7573_v50 = vpop.f32.mrf.mxu1  ;;  %4877 = vmatprep.subr.bf16.mxu1 %v6722_v58  ;;  %v7586_v58 = vld [vmem:[#allocation7] sm:$0xff] }
 0x24c   :  { %4903 = vmatpush1.bf16.msra.mxu0 %v6741_v30  ;;  %v563_v30 = vrot.slane %v7586_v58, %v562_v21  ;;  %v6885_v21 = vld [vmem:[#allocation8 + $0x700] ss:$16 sps:$4 sm:$0xff]  }
 0x24d   :  { %v2979_v56 = vpop.f32.mrf.mxu1  ;;  %4904 = vmatprep.subr.bf16.mxu0 %v6746_v49  ;;  %v567_v49 = vrot.slane %v7586_v58, %v566_v42  ;;  %v6786_v42 = vld [vmem:[#allocation8 + $0x68] ss:$16 sps:$4 sm:$0xff]  }
 0x24e   :  { %4878 = vmatpush2.bf16.msra.mxu1 %v6720_v48  ;;  %v6839_v48 = vld [vmem:[#allocation8 + $0x604] ss:$16 sps:$4 sm:$0xff]   ;;  %v6776_v56 = vld [vmem:[#allocation8 + $0xec] ss:$16 sps:$4 sm:$0xff]  }
 0x24f   :  { %v2980_v1 = vpop.f32.mrf.mxu1  ;;  %4879 = vmatprep.subr.bf16.mxu1 %v6728_v52  ;;  %v6771_v52 = vld [vmem:[#allocation8 + $0x500] ss:$16 sps:$4 sm:$0xff]   ;;  %v2937_v0 = vadd.f32 %v7569_v31, %v567_v49  ;;  %v6857_v31 = vld [vmem:[#allocation8 + $0x7a4] ss:$16 sps:$4 sm:$0xff]   ;;  %v6794_v49 = vld [vmem:[#allocation8 + $0x2c] ss:$16 sps:$4 sm:$0xff]  }
 0x250   :  { %4905 = vmatpush1.bf16.msra.mxu0 %v6744_v60  ;;  %v6837_v60 = vld [vmem:[#allocation8 + $0x600] ss:$16 sps:$4 sm:$0xff]  }
 0x251   :  { %v7576_v3 = vpop.f32.mrf.mxu1  ;;  %4906 = vmatprep.subr.bf16.mxu0 %v6749_v63  ;;  %v6845_v63 = vld [vmem:[#allocation8 + $0x7e4] ss:$16 sps:$4 sm:$0xff]   ;;  %v6843_v1 = vld [vmem:[#allocation8 + $0x7e0] ss:$16 sps:$4 sm:$0xff]  }
 0x252   :  { %4880 = vmatpush2.bf16.msra.mxu1 %v6726_v61  ;;  %v2935_v61 = vadd.f32 %v7567_v33, %v563_v30 }
 0x253   :  { %v7579_v8 = vpop.f32.mrf.mxu1  ;;  %4881 = vmatprep.subr.bf16.mxu1 %v6734_v2 }
 0x254   :  { %4907 = vmatpush1.bf16.msra.mxu0 %v6747_v4  ;;  %v2976_v2 = vadd.f32 %v7571_v29, %v2935_v61  ;;  %v6851_v4 = vld [vmem:[#allocation8 + $0x7c4] ss:$16 sps:$4 sm:$0xff]   ;;  %v6855_v29 = vld [vmem:[#allocation8 + $0x7a0] ss:$16 sps:$4 sm:$0xff]   ;;  %v6806_v61 = vld [vmem:[#allocation8 + $0x1ec] ss:$16 sps:$4 sm:$0xff]  }
 0x255   :  { %v3061_v11 = vpop.f32.mrf.mxu1  ;;  %4908 = vmatprep.subr.bf16.mxu0 %v6752_v6  ;;  %v2978_v6 = vadd.f32 %v7573_v50, %v2937_v0  ;;  %v6812_v0 = vld [vmem:[#allocation8 + $0x1cc] ss:$16 sps:$4 sm:$0xff]  }
 0x256   :  { %4882 = vmatpush2.bf16.msra.mxu1 %v6732_v5  ;;  %v6849_v11 = vld [vmem:[#allocation8 + $0x7c0] ss:$16 sps:$4 sm:$0xff]  }
 0x257   :  { %v3062_v23 = vpop.f32.mrf.mxu1  ;;  %4933 = vmatprep.subr.bf16.mxu1 %v6797_v9 }
 0x258   :  { %4909 = vmatpush2.bf16.msra.mxu0 %v6750_v12 }
 0x259   :  { %4884 = vmatmul.mubr.bf16.vlgmr.msra.gmra.mxu1 %v7581_v15  ;;  %4910 = vmatprep.subr.bf16.mxu0 %v6755_v13 }
 0x25a   :  { %4934 = vmatpush1.bf16.msra.mxu1 %v6795_v14 }
 0x25b   :  { %4935 = vmatprep.subr.bf16.mxu1 %v6803_v57 }
 0x25c   :  { %4911 = vmatpush2.bf16.msra.mxu0 %v6753_v34 }
 0x25d   :  { %4912 = vmatprep.subr.bf16.mxu0 %v6758_v17  ;;  %v6863_v17 = vld [vmem:[#allocation8 + $0x784] ss:$16 sps:$4 sm:$0xff]  }
 0x25e   :  { %4936 = vmatpush1.bf16.msra.mxu1 %v6801_v59 }
 0x25f   :  { %4937 = vmatprep.subr.bf16.mxu1 %v6809_v22  ;;  %v6861_v22 = vld [vmem:[#allocation8 + $0x780] ss:$16 sps:$4 sm:$0xff]  }
 0x260   :  { %4913 = vmatpush2.bf16.msra.mxu0 %v6756_v16 }
 0x261   :  { %4914 = vmatprep.subr.bf16.mxu0 %v6761_v24 }
 0x262   :  { %4938 = vmatpush1.bf16.msra.mxu1 %v6807_v26  ;;  %v6779_v26 = vld [vmem:[#allocation8 + $0xcc] ss:$16 sps:$4 sm:$0xff]  }
 0x263   :  { %4939 = vmatprep.subr.bf16.mxu1 %v6815_v54  ;;  %v6869_v54 = vld [vmem:[#allocation8 + $0x764] ss:$16 sps:$4 sm:$0xff]  }
 0x264   :  { %4915 = vmatpush2.bf16.msra.mxu0 %v6759_v10  ;;  %v6777_v10 = vld [vmem:[#allocation8 + $0xc8] ss:$16 sps:$4 sm:$0xff]  }
 0x265   :  { %4916 = vmatprep.subr.bf16.mxu0 %v6764_v27  ;;  %v6875_v27 = vld [vmem:[#allocation8 + $0x744] ss:$16 sps:$4 sm:$0xff]  }
 0x266   :  { %4940 = vmatpush1.bf16.msra.mxu1 %v6813_v53  ;;  %v6782_v53 = vld [vmem:[#allocation8 + $0xac] ss:$16 sps:$4 sm:$0xff]  }
 0x267   :  { %4941 = vmatprep.subr.bf16.mxu1 %v6821_v51  ;;  %v6873_v51 = vld [vmem:[#allocation8 + $0x740] ss:$16 sps:$4 sm:$0xff]  }
 0x268   :  { %4917 = vmatpush2.bf16.msra.mxu0 %v6762_v32  ;;  %v6780_v32 = vld [vmem:[#allocation8 + $0xa8] ss:$16 sps:$4 sm:$0xff]  }
 0x269   :  { %4918 = vmatprep.subr.bf16.mxu0 %v6767_v35  ;;  %v6881_v35 = vld [vmem:[#allocation8 + $0x724] ss:$16 sps:$4 sm:$0xff]  }
 0x26a   :  { %4942 = vmatpush1.bf16.msra.mxu1 %v6819_v37  ;;  %v6785_v37 = vld [vmem:[#allocation8 + $0x8c] ss:$16 sps:$4 sm:$0xff]  }
 0x26b   :  { %4943 = vmatprep.subr.bf16.mxu1 %v6827_v38  ;;  %v6879_v38 = vld [vmem:[#allocation8 + $0x720] ss:$16 sps:$4 sm:$0xff]  }
 0x26c   :  { %4919 = vmatpush2.bf16.msra.mxu0 %v6765_v39  ;;  %v6783_v39 = vld [vmem:[#allocation8 + $0x88] ss:$16 sps:$4 sm:$0xff]  }
 0x26d   :  { %4920 = vmatprep.subr.bf16.mxu0 %v6770_v40  ;;  %v6887_v40 = vld [vmem:[#allocation8 + $0x704] ss:$16 sps:$4 sm:$0xff]  }
 0x26e   :  { %4944 = vmatpush1.bf16.msra.mxu1 %v6825_v41 }
 0x26f   :  { %4945 = vmatprep.subr.bf16.mxu1 %v6833_v18 }
 0x270   :  { %4921 = vmatpush2.bf16.msra.mxu0 %v6768_v43  ;;  %v6893_v43 = vld [vmem:[#allocation8 + $0x2ec] ss:$16 sps:$4 sm:$0xff]  }
 0x271   :  { %4922 = vmatprep.subr.bf16.mxu0 %v6773_v45  ;;  %v6791_v45 = vld [vmem:[#allocation8 + $0x4c] ss:$16 sps:$4 sm:$0xff]  }
 0x272   :  { %4946 = vmatpush1.bf16.msra.mxu1 %v6831_v46 }
 0x273   :  { %4947 = vmatprep.subr.bf16.mxu1 %v6839_v48  ;;  %v6789_v48 = vld [vmem:[#allocation8 + $0x48] ss:$16 sps:$4 sm:$0xff]  }
 0x274   :  { %4923 = vmatpush2.bf16.msra.mxu0 %v6771_v52  ;;  %v6792_v52 = vld [vmem:[#allocation8 + $0x28] ss:$16 sps:$4 sm:$0xff]  }
 0x275   :  { %4974 = vmatprep.subr.bf16.mxu0 %v6776_v56  ;;  %v6800_v56 = vld [vmem:[#allocation8 + $0xc] ss:$16 sps:$4 sm:$0xff]  }
 0x276   :  { %4948 = vmatpush1.bf16.msra.mxu1 %v6837_v60  ;;  %v6798_v60 = vld [vmem:[#allocation8 + $0x8] ss:$16 sps:$4 sm:$0xff]  }
 0x277   :  { %4949 = vmatprep.subr.bf16.mxu1 %v6845_v63  ;;  %v3016_v5 = vpop.f32.mrf.mxu0  ;;  %v6804_v63 = vld [vmem:[#allocation8 + $0x1e8] ss:$16 sps:$4 sm:$0xff]  }
 0x278   :  { %v3017_v7 = vadd.f32 %v3016_v5, %v2976_v2  ;;  %v6818_v2 = vld [vmem:[#allocation8 + $0x1ac] ss:$16 sps:$4 sm:$0xff]  }
 0x279   :  { %v3018_v9 = vpop.f32.mrf.mxu0  ;;  %v6824_v5 = vld [vmem:[#allocation8 + $0x18c] ss:$16 sps:$4 sm:$0xff]  }
 0x27a   :  { %4950 = vmatpush2.bf16.msra.mxu1 %v6843_v1  ;;  %v3058_v33 = vadd.f32 %v7576_v3, %v3017_v7  ;;  %v3019_v12 = vadd.f32 %v3018_v9, %v2978_v6  ;;  %v6774_v3 = vld [vmem:[#allocation8 + $0xe8] ss:$16 sps:$4 sm:$0xff]   ;;  %v6830_v7 = vld [vmem:[#allocation8 + $0x16c] ss:$16 sps:$4 sm:$0xff]  }
 0x27b   :  { %4951 = vmatprep.subr.bf16.mxu1 %v6851_v4  ;;  %v3020_v13 = vpop.f32.mrf.mxu0  ;;  %v6810_v1 = vld [vmem:[#allocation8 + $0x1c8] ss:$16 sps:$4 sm:$0xff]  }
 0x27c   :  { %v3232_v14 = vmul.f32 0.2, %v3058_v33  ;;  %v3060_v23 = vadd.f32 %v7579_v8, %v3019_v12  ;;  %v6867_v8 = vld [vmem:[#allocation8 + $0x760] ss:$16 sps:$4 sm:$0xff]   ;;  %v6816_v4 = vld [vmem:[#allocation8 + $0x1a8] ss:$16 sps:$4 sm:$0xff]  }
 0x27d   :  { %v3021_v57 = vpop.f32.mrf.mxu0  ;;  %v6822_v6 = vld [vmem:[#allocation8 + $0x188] ss:$16 sps:$4 sm:$0xff]  }
 0x27e   :  { %4952 = vmatpush2.bf16.msra.mxu1 %v6849_v11  ;;  %v3233_v34 = vmul.f32 0.2, %v3060_v23  ;;  %v3240_v50 = vmax.f32 %v3058_v33, %v3232_v14  ;;  %v6828_v9 = vld [vmem:[#allocation8 + $0x168] ss:$16 sps:$4 sm:$0xff]   ;;  %v6836_v11 = vld [vmem:[#allocation8 + $0x14c] ss:$16 sps:$4 sm:$0xff]  }
 0x27f   :  { %4953 = vmatprep.subr.bf16.mxu1 %v6857_v31  ;;  %v6834_v33 = vld [vmem:[#allocation8 + $0x148] ss:$16 sps:$4 sm:$0xff]   ;;  %v6842_v31 = vld [vmem:[#allocation8 + $0x12c] ss:$16 sps:$4 sm:$0xff]  }
 0x280   :  { %v3241_v59 = vmax.f32 %v3060_v23, %v3233_v34  ;;  %v7598_v24 = vpack.c.bf16 %v3240_v50, %v3240_v50  ;;  %v6840_v14 = vld [vmem:[#allocation8 + $0x128] ss:$16 sps:$4 sm:$0xff]   ;;  %v6848_v23 = vld [vmem:[#allocation8 + $0x10c] ss:$16 sps:$4 sm:$0xff]  }
 0x281   :  { %v6846_v34 = vld [vmem:[#allocation8 + $0x108] ss:$16 sps:$4 sm:$0xff]  }
 0x282   :  { %4954 = vmatpush2.bf16.msra.mxu1 %v6855_v29  ;;  %v7596_v16 = vpack.c.bf16 %v3241_v59, %v3241_v59  ;;  %v6852_v50 = vld [vmem:[#allocation8 + $0x4e8] ss:$16 sps:$4 sm:$0xff]   ;;  %v6860_v59 = vld [vmem:[#allocation8 + $0x4cc] ss:$16 sps:$4 sm:$0xff]  }
 0x283   :  { %4955 = vmatprep.subr.bf16.mxu1 %v6863_v17  ;;  %v6854_v17 = vld [vmem:[#allocation8 + $0x4ec] ss:$16 sps:$4 sm:$0xff]  }
 0x284   :  { %4924 = vmatprep.mubr.bf16.mxu0 %v7596_v16 }
 0x285   :  { %4925 = vmatmul.mubr.bf16.vlgmr.msra.gmra.mxu0 %v7598_v24 }
 0x286   :  { %4956 = vmatpush2.bf16.msra.mxu1 %v6861_v22  ;;  %4975 = vmatpush1.bf16.msra.mxu0 %v6774_v3  ;;  %v6858_v22 = vld [vmem:[#allocation8 + $0x4c8] ss:$16 sps:$4 sm:$0xff]   ;;  %v6866_v3 = vld [vmem:[#allocation8 + $0x4ac] ss:$16 sps:$4 sm:$0xff]  }
 0x287   :  { %5006 = vmatprep.mubr.bf16.mxu0 %v7545_v25  ;;  %4976 = vmatprep.subr.bf16.mxu0 %v6779_v26  ;;  %v6788_v25 = vld [vmem:[#allocation8 + $0x6c] ss:$16 sps:$4 sm:$0xff]   ;;  %v6864_v26 = vld [vmem:[#allocation8 + $0x4a8] ss:$16 sps:$4 sm:$0xff]  }
 0x288   :  { %4957 = vmatprep.subr.bf16.mxu1 %v6869_v54  ;;  %v570_v54 = vsub.s32 6, %v7493_v44 }
 0x28a   :  { %4958 = vmatpush2.bf16.msra.mxu1 %v6867_v8  ;;  %4977 = vmatpush1.bf16.msra.mxu0 %v6777_v10  ;;  %v6872_v8 = vld [vmem:[#allocation8 + $0x48c] ss:$16 sps:$4 sm:$0xff]   ;;  %v574_v10 = vsub.s32 7, %v7493_v44 }
 0x28b   :  { %4959 = vmatprep.subr.bf16.mxu1 %v6875_v27  ;;  %4978 = vmatprep.subr.bf16.mxu0 %v6782_v53  ;;  %v6870_v27 = vld [vmem:[#allocation8 + $0x488] ss:$16 sps:$4 sm:$0xff]   ;;  %v571_v53 = vrot.slane %v7586_v58, %v570_v54  ;;  %v6932_v54 = vld [vmem:[#allocation8 + $0x54c] ss:$16 sps:$4 sm:$0xff]  }
 0x28c   :  { %v7114_v44 = vld [vmem:[#allocation14 + $0x68] sm:$0xff]  }
 0x28e   :  { %4960 = vmatpush2.bf16.msra.mxu1 %v6873_v51  ;;  %4979 = vmatpush1.bf16.msra.mxu0 %v6780_v32 }
 0x28f   :  { %4961 = vmatprep.subr.bf16.mxu1 %v6881_v35  ;;  %4980 = vmatprep.subr.bf16.mxu0 %v6785_v37  ;;  %v6876_v35 = vld [vmem:[#allocation8 + $0x468] ss:$16 sps:$4 sm:$0xff]  }
 0x291   :  { %v7603_v41 = vpop.f32.mrf.mxu1 }
 0x292   :  { %4962 = vmatpush2.bf16.msra.mxu1 %v6879_v38  ;;  %4981 = vmatpush1.bf16.msra.mxu0 %v6783_v39  ;;  %v3099_v37 = vadd.f32 %v7603_v41, %v571_v53  ;;  %v6884_v38 = vld [vmem:[#allocation8 + $0x44c] ss:$16 sps:$4 sm:$0xff]  }
 0x293   :  { %v7605_v18 = vpop.f32.mrf.mxu1  ;;  %4963 = vmatprep.subr.bf16.mxu1 %v6887_v40  ;;  %4982 = vmatprep.subr.bf16.mxu0 %v6788_v25 }
 0x295   :  { %v3102_v46 = vpop.f32.mrf.mxu1 }
 0x296   :  { %4964 = vmatpush2.bf16.msra.mxu1 %v6885_v21  ;;  %4983 = vmatpush1.bf16.msra.mxu0 %v6786_v42  ;;  %v6882_v42 = vld [vmem:[#allocation8 + $0x448] ss:$16 sps:$4 sm:$0xff]   ;;  %v6890_v46 = vld [vmem:[#allocation8 + $0x42c] ss:$16 sps:$4 sm:$0xff]  }
 0x297   :  { %v3103_v30 = vpop.f32.mrf.mxu1  ;;  %5015 = vmatprep.subr.bf16.mxu1 %v6893_v43  ;;  %4984 = vmatprep.subr.bf16.mxu0 %v6791_v45 }
 0x29a   :  { %4985 = vmatpush1.bf16.msra.mxu0 %v6789_v48 }
 0x29b   :  { %4986 = vmatprep.subr.bf16.mxu0 %v6794_v49 }
 0x29e   :  { %4987 = vmatpush1.bf16.msra.mxu0 %v6792_v52  ;;  %v6888_v52 = vld [vmem:[#allocation8 + $0x428] ss:$16 sps:$4 sm:$0xff]  }
 0x29f   :  { %4988 = vmatprep.subr.bf16.mxu0 %v6800_v56 }
 0x2a2   :  { %4989 = vmatpush1.bf16.msra.mxu0 %v6798_v60  ;;  %v6896_v60 = vld [vmem:[#allocation8 + $0x40c] ss:$16 sps:$4 sm:$0xff]  }
 0x2a3   :  { %4990 = vmatprep.subr.bf16.mxu0 %v6806_v61 }
 0x2a6   :  { %4991 = vmatpush2.bf16.msra.mxu0 %v6804_v63 }
 0x2a7   :  { %4992 = vmatprep.subr.bf16.mxu0 %v6812_v0 }
 0x2aa   :  { %4993 = vmatpush2.bf16.msra.mxu0 %v6810_v1  ;;  %v6894_v1 = vld [vmem:[#allocation8 + $0x408] ss:$16 sps:$4 sm:$0xff]  }
 0x2ab   :  { %4994 = vmatprep.subr.bf16.mxu0 %v6818_v2 }
 0x2ae   :  { %4995 = vmatpush2.bf16.msra.mxu0 %v6816_v4  ;;  %v6902_v4 = vld [vmem:[#allocation8 + $0x5ec] ss:$16 sps:$4 sm:$0xff]  }
 0x2af   :  { %4996 = vmatprep.subr.bf16.mxu0 %v6824_v5 }
 0x2b2   :  { %4997 = vmatpush2.bf16.msra.mxu0 %v6822_v6  ;;  %v6891_v6 = vld [vmem:[#allocation8 + $0x2e8] ss:$16 sps:$4 sm:$0xff]  }
 0x2b3   :  { %4998 = vmatprep.subr.bf16.mxu0 %v6830_v7 }
 0x2b6   :  { %4999 = vmatpush2.bf16.msra.mxu0 %v6828_v9  ;;  %v6899_v9 = vld [vmem:[#allocation8 + $0x2cc] ss:$16 sps:$4 sm:$0xff]  }
 0x2b7   :  { %v3139_v12 = vpop.f32.mrf.mxu0  ;;  %5000 = vmatprep.subr.bf16.mxu0 %v6836_v11  ;;  %v6900_v11 = vld [vmem:[#allocation8 + $0x5e8] ss:$16 sps:$4 sm:$0xff]  }
 0x2b8   :  { %v3140_v25 = vadd.f32 %v3139_v12, %v3099_v37  ;;  %v6897_v12 = vld [vmem:[#allocation8 + $0x2c8] ss:$16 sps:$4 sm:$0xff]  }
 0x2b9   :  { %v3141_v13 = vpop.f32.mrf.mxu0 }
 0x2ba   :  { %5001 = vmatpush2.bf16.msra.mxu0 %v6834_v33  ;;  %v6908_v33 = vld [vmem:[#allocation8 + $0x5cc] ss:$16 sps:$4 sm:$0xff]  }
 0x2bb   :  { %5002 = vmatprep.subr.bf16.mxu0 %v6842_v31  ;;  %v3143_v57 = vpop.f32.mrf.mxu0  ;;  %v6905_v31 = vld [vmem:[#allocation8 + $0x2ac] ss:$16 sps:$4 sm:$0xff]  }
 0x2bc   :  { %v6911_v57 = vld [vmem:[#allocation8 + $0x28c] ss:$16 sps:$4 sm:$0xff]  }
 0x2bd   :  { %v3144_v29 = vpop.f32.mrf.mxu0 }
 0x2be   :  { %5003 = vmatpush2.bf16.msra.mxu0 %v6840_v14  ;;  %v6914_v14 = vld [vmem:[#allocation8 + $0x5ac] ss:$16 sps:$4 sm:$0xff]   ;;  %v6912_v29 = vld [vmem:[#allocation8 + $0x5a8] ss:$16 sps:$4 sm:$0xff]  }
 0x2bf   :  { %5004 = vmatprep.subr.bf16.mxu0 %v6848_v23  ;;  %v6903_v23 = vld [vmem:[#allocation8 + $0x2a8] ss:$16 sps:$4 sm:$0xff]  }
 0x2c2   :  { %5005 = vmatpush2.bf16.msra.mxu0 %v6846_v34  ;;  %v6920_v34 = vld [vmem:[#allocation8 + $0x58c] ss:$16 sps:$4 sm:$0xff]  }
 0x2c3   :  { %5056 = vmatprep.subr.bf16.mxu0 %v6854_v17  ;;  %v6909_v17 = vld [vmem:[#allocation8 + $0x288] ss:$16 sps:$4 sm:$0xff]  }
 0x2c5   :  { %5007 = vmatmul.mubr.bf16.vlgmr.msra.gmra.mxu0 %v7564_v47  ;;  %v6878_v47 = vld [vmem:[#allocation8 + $0x46c] ss:$16 sps:$4 sm:$0xff]  }
 0x2c6   :  { %5057 = vmatpush1.bf16.msra.mxu0 %v6852_v50  ;;  %5088 = vmatprep.mubr.bf16.mxu0 %v7596_v16  ;;  %v575_v16 = vrot.slane %v7586_v58, %v574_v10  ;;  %v6918_v50 = vld [vmem:[#allocation8 + $0x588] ss:$16 sps:$4 sm:$0xff]   ;;  %v6929_v10 = vld [vmem:[#allocation8 + $0x22c] ss:$16 sps:$4 sm:$0xff]  }
 0x2c7   :  { %5058 = vmatprep.subr.bf16.mxu0 %v6860_v59  ;;  %v6926_v59 = vld [vmem:[#allocation8 + $0x56c] ss:$16 sps:$4 sm:$0xff]  }
 0x2c8   :  { %v3101_v40 = vadd.f32 %v7605_v18, %v575_v16 }
 0x2ca   :  { %5059 = vmatpush1.bf16.msra.mxu0 %v6858_v22  ;;  %v3142_v43 = vadd.f32 %v3141_v13, %v3101_v40  ;;  %v6906_v13 = vld [vmem:[#allocation8 + $0x5c8] ss:$16 sps:$4 sm:$0xff]  }
 0x2cb   :  { %5060 = vmatprep.subr.bf16.mxu0 %v6866_v3  ;;  %v6915_v22 = vld [vmem:[#allocation8 + $0x268] ss:$16 sps:$4 sm:$0xff]   ;;  %v6923_v3 = vld [vmem:[#allocation8 + $0x24c] ss:$16 sps:$4 sm:$0xff]  }
 0x2ce   :  { %5061 = vmatpush1.bf16.msra.mxu0 %v6864_v26  ;;  %v6924_v26 = vld [vmem:[#allocation8 + $0x568] ss:$16 sps:$4 sm:$0xff]  }
 0x2cf   :  { %5062 = vmatprep.subr.bf16.mxu0 %v6872_v8  ;;  %v6921_v8 = vld [vmem:[#allocation8 + $0x248] ss:$16 sps:$4 sm:$0xff]  }
 0x2d1   :  { %v3180_v51 = vpop.f32.mrf.mxu1 }
 0x2d2   :  { %5063 = vmatpush1.bf16.msra.mxu0 %v6870_v27  ;;  %v3181_v45 = vadd.f32 %v3180_v51, %v3140_v25  ;;  %v6930_v27 = vld [vmem:[#allocation8 + $0x548] ss:$16 sps:$4 sm:$0xff]   ;;  %v6941_v25 = vld [vmem:[#allocation8 + $0x3ec] ss:$16 sps:$4 sm:$0xff]  }
 0x2d3   :  { %v3182_v32 = vpop.f32.mrf.mxu1  ;;  %5064 = vmatprep.subr.bf16.mxu0 %v6878_v47  ;;  %v6938_v47 = vld [vmem:[#allocation8 + $0x52c] ss:$16 sps:$4 sm:$0xff]   ;;  %v6927_v51 = vld [vmem:[#allocation8 + $0x228] ss:$16 sps:$4 sm:$0xff]  }
 0x2d4   :  { %v3183_v58 = vadd.f32 %v3182_v32, %v3142_v43  ;;  %v6935_v32 = vld [vmem:[#allocation8 + $0x20c] ss:$16 sps:$4 sm:$0xff]   ;;  %v6939_v43 = vld [vmem:[#allocation8 + $0x3e8] ss:$16 sps:$4 sm:$0xff]  }
 0x2d5   :  { %v3184_v39 = vpop.f32.mrf.mxu1 }
 0x2d6   :  { %5065 = vmatpush1.bf16.msra.mxu0 %v6876_v35  ;;  %v6936_v35 = vld [vmem:[#allocation8 + $0x528] ss:$16 sps:$4 sm:$0xff]  }
 0x2d7   :  { %v3185_v21 = vpop.f32.mrf.mxu1  ;;  %5066 = vmatprep.subr.bf16.mxu0 %v6884_v38  ;;  %v6944_v38 = vld [vmem:[#allocation8 + $0x50c] ss:$16 sps:$4 sm:$0xff]   ;;  %v6933_v39 = vld [vmem:[#allocation8 + $0x208] ss:$16 sps:$4 sm:$0xff]  }
 0x2d8   :  { %v6942_v21 = vld [vmem:[#allocation8 + $0x508] ss:$16 sps:$4 sm:$0xff]  }
 0x2d9   :  { %v3221_v30 = vpop.f32.mrf.mxu1 }
 0x2da   :  { %v3222_v48 = vadd.f32 %v3221_v30, %v3181_v45  ;;  %5067 = vmatpush1.bf16.msra.mxu0 %v6882_v42  ;;  %v7016_v42 = vld [vmem:[#allocation11 + $0x74] ss:$8 sps:$4 sm:$0xff]   ;;  %v6947_v45 = vld [vmem:[#allocation8 + $0x3cc] ss:$16 sps:$4 sm:$0xff]   ;;  %v7019_v30 = vld [vmem:[#allocation11 + $0x64] ss:$8 sps:$4 sm:$0xff]  }
 0x2db   :  { %v3223_v49 = vpop.f32.mrf.mxu1  ;;  %5068 = vmatprep.subr.bf16.mxu0 %v6890_v46  ;;  %v7014_v46 = vld [vmem:[#allocation11 + $0x70] ss:$8 sps:$4 sm:$0xff]  }
 0x2dc   :  { %v3234_v41 = vmul.f32 0.2, %v3222_v48  ;;  %v3224_v56 = vadd.f32 %v3223_v49, %v3183_v58  ;;  %v6945_v58 = vld [vmem:[#allocation8 + $0x3c8] ss:$16 sps:$4 sm:$0xff]   ;;  %v7017_v49 = vld [vmem:[#allocation11 + $0x60] ss:$8 sps:$4 sm:$0xff]  }
 0x2dd   :  { %v3225_v61 = vpop.f32.mrf.mxu1 }
 0x2de   :  { %v3235_v18 = vmul.f32 0.2, %v3224_v56  ;;  %v3242_v63 = vmax.f32 %v3222_v48, %v3234_v41  ;;  %5069 = vmatpush1.bf16.msra.mxu0 %v6888_v52  ;;  %v6950_v48 = vld [vmem:[#allocation8 + $0x3ac] ss:$16 sps:$4 sm:$0xff]   ;;  %v7022_v52 = vld [vmem:[#allocation11 + $0x54] ss:$8 sps:$4 sm:$0xff]  }
 0x2df   :  { %v3226_v0 = vpop.f32.mrf.mxu1  ;;  %5070 = vmatprep.subr.bf16.mxu0 %v6896_v60  ;;  %v6948_v41 = vld [vmem:[#allocation8 + $0x3a8] ss:$16 sps:$4 sm:$0xff]   ;;  %v7020_v60 = vld [vmem:[#allocation11 + $0x50] ss:$8 sps:$4 sm:$0xff]  }
 0x2e0   :  { %v3243_v2 = vmax.f32 %v3224_v56, %v3235_v18  ;;  %v7617_v7 = vpack.c.bf16 %v3242_v63, %v3242_v63  ;;  %v6953_v56 = vld [vmem:[#allocation8 + $0x38c] ss:$16 sps:$4 sm:$0xff]   ;;  %v7025_v61 = vld [vmem:[#allocation11 + $0x44] ss:$8 sps:$4 sm:$0xff]   ;;  %v7028_v0 = vld [vmem:[#allocation11 + $0x34] ss:$8 sps:$4 sm:$0xff]  }
 0x2e1   :  { %v6951_v18 = vld [vmem:[#allocation8 + $0x388] ss:$16 sps:$4 sm:$0xff]   ;;  %v6956_v63 = vld [vmem:[#allocation8 + $0x36c] ss:$16 sps:$4 sm:$0xff]  }
 0x2e2   :  { %v7615_v5 = vpack.c.bf16 %v3243_v2, %v3243_v2  ;;  %5071 = vmatpush1.bf16.msra.mxu0 %v6894_v1  ;;  %v7627_v1 = vld [vmem:[#allocation10] sm:$0xf]  ;;  %v6954_v2 = vld [vmem:[#allocation8 + $0x368] ss:$16 sps:$4 sm:$0xff]  }
 0x2e3   :  { %5072 = vmatprep.subr.bf16.mxu0 %v6902_v4  ;;  %v6959_v4 = vld [vmem:[#allocation8 + $0x34c] ss:$16 sps:$4 sm:$0xff]  }
 0x2e4   :  { %4965 = vmatprep.mubr.bf16.mxu1 %v7615_v5 }
 0x2e5   :  { %4966 = vmatmul.mubr.bf16.vlgmr.msra.gmra.mxu1 %v7617_v7 }
 0x2e6   :  { %5016 = vmatpush1.bf16.msra.mxu1 %v6891_v6  ;;  %5047 = vmatprep.mubr.bf16.mxu1 %v7558_v28  ;;  %v6917_v28 = vld [vmem:[#allocation8 + $0x26c] ss:$16 sps:$4 sm:$0xff]  }
 0x2e7   :  { %5017 = vmatprep.subr.bf16.mxu1 %v6899_v9  ;;  %5073 = vmatpush2.bf16.msra.mxu0 %v6900_v11  ;;  %v7026_v6 = vld [vmem:[#allocation11 + $0x30] ss:$8 sps:$4 sm:$0xff]   ;;  %v3513_v9 = vrot.slane %v7627_v1, %v7496_v55  ;;  %v7031_v11 = vld [vmem:[#allocation11 + $0x24] ss:$8 sps:$4 sm:$0xff]  }
 0x2e8   :  { %5074 = vmatprep.subr.bf16.mxu0 %v6908_v33  ;;  %v3517_v33 = vrot.slane %v7627_v1, %v7501_v62 }
 0x2ea   :  { %5018 = vmatpush1.bf16.msra.mxu1 %v6897_v12  ;;  %v6957_v12 = vld [vmem:[#allocation8 + $0x348] ss:$16 sps:$4 sm:$0xff]  }
 0x2eb   :  { %5019 = vmatprep.subr.bf16.mxu1 %v6905_v31  ;;  %5075 = vmatpush2.bf16.msra.mxu0 %v6906_v13  ;;  %v6962_v31 = vld [vmem:[#allocation8 + $0x32c] ss:$16 sps:$4 sm:$0xff]  }
 0x2ec   :  { %5076 = vmatprep.subr.bf16.mxu0 %v6914_v14  ;;  %v7029_v13 = vld [vmem:[#allocation11 + $0x20] ss:$8 sps:$4 sm:$0xff]  }
 0x2ee   :  { %5020 = vmatpush1.bf16.msra.mxu1 %v6903_v23  ;;  %v7034_v23 = vld [vmem:[#allocation11 + $0x14] ss:$8 sps:$4 sm:$0xff]  }
 0x2ef   :  { %5021 = vmatprep.subr.bf16.mxu1 %v6911_v57  ;;  %5077 = vmatpush2.bf16.msra.mxu0 %v6912_v29 }
 0x2f0   :  { %5078 = vmatprep.subr.bf16.mxu0 %v6920_v34 }
 0x2f2   :  { %5022 = vmatpush1.bf16.msra.mxu1 %v6909_v17  ;;  %v6960_v17 = vld [vmem:[#allocation8 + $0x328] ss:$16 sps:$4 sm:$0xff]  }
 0x2f3   :  { %5023 = vmatprep.subr.bf16.mxu1 %v6917_v28  ;;  %5079 = vmatpush2.bf16.msra.mxu0 %v6918_v50  ;;  %v6965_v50 = vld [vmem:[#allocation8 + $0x30c] ss:$16 sps:$4 sm:$0xff]  }
 0x2f4   :  { %5080 = vmatprep.subr.bf16.mxu0 %v6926_v59  ;;  %v7032_v59 = vld [vmem:[#allocation11 + $0x10] ss:$8 sps:$4 sm:$0xff]  }
 0x2f6   :  { %5024 = vmatpush1.bf16.msra.mxu1 %v6915_v22 }
 0x2f7   :  { %5025 = vmatprep.subr.bf16.mxu1 %v6923_v3  ;;  %5081 = vmatpush2.bf16.msra.mxu0 %v6924_v26  ;;  %v7622_v53 = vpop.f32.mrf.mxu0  ;;  %v7037_v3 = vld [vmem:[#allocation11 + $0x4] ss:$8 sps:$4 sm:$0xff]  }
 0x2f8   :  { %5082 = vmatprep.subr.bf16.mxu0 %v6932_v54  ;;  %v4845_v14 = vadd.f32 %v7622_v53, %v3513_v9  ;;  %v6963_v54 = vld [vmem:[#allocation8 + $0x308] ss:$16 sps:$4 sm:$0xff]  }
 0x2f9   :  { %v7624_v16 = vpop.f32.mrf.mxu0  ;;  %v7040_v53 = vld [vmem:[#allocation11 + $0xf4] ss:$8 sps:$4 sm:$0xff]  }
 0x2fa   :  { %5026 = vmatpush1.bf16.msra.mxu1 %v6921_v8  ;;  %v4847_v29 = vadd.f32 %v7624_v16, %v3517_v33  ;;  %v7038_v16 = vld [vmem:[#allocation11 + $0xf0] ss:$8 sps:$4 sm:$0xff]   ;;  %v6993_v9 = vld [vmem:[#allocation8 + $0x7c8] ss:$16 sps:$4 sm:$0xff]  }
 0x2fb   :  { %5027 = vmatprep.subr.bf16.mxu1 %v6929_v10  ;;  %5083 = vmatpush2.bf16.msra.mxu0 %v6930_v27  ;;  %v4848_v37 = vpop.f32.mrf.mxu0  ;;  %v6968_v10 = vld [vmem:[#allocation8 + $0x6ec] ss:$16 sps:$4 sm:$0xff]  }
 0x2fc   :  { %5084 = vmatprep.subr.bf16.mxu0 %v6938_v47  ;;  %v7035_v27 = vld [vmem:[#allocation11] ss:$8 sps:$4 sm:$0xff]   ;;  %v6966_v47 = vld [vmem:[#allocation8 + $0x6e8] ss:$16 sps:$4 sm:$0xff]  }
 0x2fd   :  { %v4849_v40 = vpop.f32.mrf.mxu0  ;;  %v6974_v37 = vld [vmem:[#allocation8 + $0x6ac] ss:$16 sps:$4 sm:$0xff]  }
 0x2fe   :  { %5028 = vmatpush1.bf16.msra.mxu1 %v6927_v51  ;;  %v6971_v51 = vld [vmem:[#allocation8 + $0x6cc] ss:$16 sps:$4 sm:$0xff]   ;;  %v6972_v40 = vld [vmem:[#allocation8 + $0x6a8] ss:$16 sps:$4 sm:$0xff]  }
 0x2ff   :  { %5029 = vmatprep.subr.bf16.mxu1 %v6935_v32  ;;  %5085 = vmatpush2.bf16.msra.mxu0 %v6936_v35  ;;  %v7043_v32 = vld [vmem:[#allocation11 + $0xe4] ss:$8 sps:$4 sm:$0xff]  }
 0x300   :  { %5086 = vmatprep.subr.bf16.mxu0 %v6944_v38  ;;  %v6969_v35 = vld [vmem:[#allocation8 + $0x6c8] ss:$16 sps:$4 sm:$0xff]   ;;  %v7041_v38 = vld [vmem:[#allocation11 + $0xe0] ss:$8 sps:$4 sm:$0xff]  }
 0x302   :  { %5030 = vmatpush1.bf16.msra.mxu1 %v6933_v39  ;;  %v7046_v39 = vld [vmem:[#allocation11 + $0xd4] ss:$8 sps:$4 sm:$0xff]  }
 0x303   :  { %5031 = vmatprep.subr.bf16.mxu1 %v6941_v25  ;;  %5087 = vmatpush2.bf16.msra.mxu0 %v6942_v21  ;;  %v6977_v25 = vld [vmem:[#allocation8 + $0x68c] ss:$16 sps:$4 sm:$0xff]  }
 0x304   :  { %5546 = vmatprep.subr.bf16.mxu0 %v7016_v42  ;;  %v7044_v21 = vld [vmem:[#allocation11 + $0xd0] ss:$8 sps:$4 sm:$0xff]   ;;  %v7049_v42 = vld [vmem:[#allocation11 + $0xc4] ss:$8 sps:$4 sm:$0xff]  }
 0x306   :  { %5032 = vmatpush2.bf16.msra.mxu1 %v6939_v43  ;;  %5089 = vmatmul.mubr.bf16.vlgmr.msra.gmra.mxu0 %v7598_v24  ;;  %v7023_v24 = vld [vmem:[#allocation11 + $0x40] ss:$8 sps:$4 sm:$0xff]  }
 0x307   :  { %5033 = vmatprep.subr.bf16.mxu1 %v6947_v45  ;;  %5547 = vmatpush1.bf16.msra.mxu0 %v7014_v46  ;;  %v6980_v43 = vld [vmem:[#allocation8 + $0x66c] ss:$16 sps:$4 sm:$0xff]   ;;  %v7052_v45 = vld [vmem:[#allocation11 + $0xb4] ss:$8 sps:$4 sm:$0xff]  }
 0x308   :  { %5548 = vmatprep.subr.bf16.mxu0 %v7019_v30  ;;  %v6978_v46 = vld [vmem:[#allocation8 + $0x668] ss:$16 sps:$4 sm:$0xff]   ;;  %v6983_v30 = vld [vmem:[#allocation8 + $0x64c] ss:$16 sps:$4 sm:$0xff]  }
 0x30a   :  { %5034 = vmatpush2.bf16.msra.mxu1 %v6945_v58  ;;  %v7050_v58 = vld [vmem:[#allocation11 + $0xb0] ss:$8 sps:$4 sm:$0xff]  }
 0x30b   :  { %5035 = vmatprep.subr.bf16.mxu1 %v6950_v48  ;;  %5549 = vmatpush1.bf16.msra.mxu0 %v7017_v49  ;;  %v7055_v48 = vld [vmem:[#allocation11 + $0xa4] ss:$8 sps:$4 sm:$0xff]  }
 0x30c   :  { %5550 = vmatprep.subr.bf16.mxu0 %v7022_v52  ;;  %v6981_v49 = vld [vmem:[#allocation8 + $0x648] ss:$16 sps:$4 sm:$0xff]   ;;  %v6986_v52 = vld [vmem:[#allocation8 + $0x62c] ss:$16 sps:$4 sm:$0xff]  }
 0x30e   :  { %5036 = vmatpush2.bf16.msra.mxu1 %v6948_v41  ;;  %v7053_v41 = vld [vmem:[#allocation11 + $0xa0] ss:$8 sps:$4 sm:$0xff]  }
 0x30f   :  { %5037 = vmatprep.subr.bf16.mxu1 %v6953_v56  ;;  %5551 = vmatpush1.bf16.msra.mxu0 %v7020_v60  ;;  %v7058_v56 = vld [vmem:[#allocation11 + $0x94] ss:$8 sps:$4 sm:$0xff]  }
 0x310   :  { %5552 = vmatprep.subr.bf16.mxu0 %v7025_v61  ;;  %v6984_v60 = vld [vmem:[#allocation8 + $0x628] ss:$16 sps:$4 sm:$0xff]   ;;  %v6989_v61 = vld [vmem:[#allocation8 + $0x60c] ss:$16 sps:$4 sm:$0xff]  }
 0x312   :  { %5038 = vmatpush2.bf16.msra.mxu1 %v6951_v18  ;;  %v7056_v18 = vld [vmem:[#allocation11 + $0x90] ss:$8 sps:$4 sm:$0xff]  }
 0x313   :  { %5039 = vmatprep.subr.bf16.mxu1 %v6956_v63  ;;  %5553 = vmatpush1.bf16.msra.mxu0 %v7023_v24  ;;  %v7061_v63 = vld [vmem:[#allocation11 + $0x84] ss:$8 sps:$4 sm:$0xff]  }
 0x314   :  { %5554 = vmatprep.subr.bf16.mxu0 %v7028_v0  ;;  %v6987_v24 = vld [vmem:[#allocation8 + $0x608] ss:$16 sps:$4 sm:$0xff]   ;;  %v6992_v0 = vld [vmem:[#allocation8 + $0x7ec] ss:$16 sps:$4 sm:$0xff]  }
 0x316   :  { %5040 = vmatpush2.bf16.msra.mxu1 %v6954_v2  ;;  %v7059_v2 = vld [vmem:[#allocation11 + $0x80] ss:$8 sps:$4 sm:$0xff]  }
 0x317   :  { %5041 = vmatprep.subr.bf16.mxu1 %v6959_v4  ;;  %5555 = vmatpush1.bf16.msra.mxu0 %v7026_v6  ;;  %v6990_v4 = vld [vmem:[#allocation8 + $0x7e8] ss:$16 sps:$4 sm:$0xff]   ;;  %v6995_v6 = vld [vmem:[#allocation8 + $0x7cc] ss:$16 sps:$4 sm:$0xff]  }
 0x318   :  { %5556 = vmatprep.subr.bf16.mxu0 %v7031_v11 }
 0x319   :  { %v4885_v57 = vpop.f32.mrf.mxu1 }
 0x31a   :  { %v7635_v34 = vadd.f32 %v4885_v57, %v4845_v14  ;;  %5042 = vmatpush2.bf16.msra.mxu1 %v6957_v12  ;;  %v6998_v12 = vld [vmem:[#allocation8 + $0x7ac] ss:$16 sps:$4 sm:$0xff]   ;;  %v6996_v14 = vld [vmem:[#allocation8 + $0x7a8] ss:$16 sps:$4 sm:$0xff]  }
 0x31b   :  { %v4887_v28 = vpop.f32.mrf.mxu1  ;;  %5043 = vmatprep.subr.bf16.mxu1 %v6962_v31  ;;  %5557 = vmatpush1.bf16.msra.mxu0 %v7029_v13  ;;  %v7001_v57 = vld [vmem:[#allocation8 + $0x78c] ss:$16 sps:$4 sm:$0xff]  }
 0x31c   :  { %v7637_v22 = vadd.f32 %v4887_v28, %v4847_v29  ;;  %5558 = vmatprep.subr.bf16.mxu0 %v7034_v23  ;;  %v7004_v28 = vld [vmem:[#allocation8 + $0x76c] ss:$16 sps:$4 sm:$0xff]  }
 0x31d   :  { %v4889_v26 = vpop.f32.mrf.mxu1 }
 0x31e   :  { %5044 = vmatpush2.bf16.msra.mxu1 %v6960_v17  ;;  %v6999_v17 = vld [vmem:[#allocation8 + $0x788] ss:$16 sps:$4 sm:$0xff]   ;;  %v7013_v26 = vld [vmem:[#allocation8 + $0x70c] ss:$16 sps:$4 sm:$0xff]  }
 0x31f   :  { %v4890_v8 = vpop.f32.mrf.mxu1  ;;  %5045 = vmatprep.subr.bf16.mxu1 %v6965_v50  ;;  %5559 = vmatpush1.bf16.msra.mxu0 %v7032_v59  ;;  %v7002_v50 = vld [vmem:[#allocation8 + $0x768] ss:$16 sps:$4 sm:$0xff]  }
 0x320   :  { %5560 = vmatprep.subr.bf16.mxu0 %v7037_v3  ;;  %v7005_v59 = vld [vmem:[#allocation8 + $0x748] ss:$16 sps:$4 sm:$0xff]   ;;  %v7010_v3 = vld [vmem:[#allocation8 + $0x72c] ss:$16 sps:$4 sm:$0xff]  }
 0x321   :  { %v7062_v8 = vld [vmem:[#allocation11 + $0x170] ss:$8 sps:$4 sm:$0xff]  }
 0x322   :  { %5046 = vmatpush2.bf16.msra.mxu1 %v6963_v54  ;;  %v7011_v54 = vld [vmem:[#allocation8 + $0x708] ss:$16 sps:$4 sm:$0xff]  }
 0x323   :  { %5097 = vmatprep.subr.bf16.mxu1 %v6968_v10  ;;  %5561 = vmatpush1.bf16.msra.mxu0 %v7035_v27  ;;  %v7064_v10 = vld [vmem:[#allocation11 + $0x174] ss:$8 sps:$4 sm:$0xff]   ;;  %v7067_v27 = vld [vmem:[#allocation11 + $0x164] ss:$8 sps:$4 sm:$0xff]  }
 0x324   :  { %5562 = vmatprep.subr.bf16.mxu0 %v7040_v53  ;;  %v7065_v53 = vld [vmem:[#allocation11 + $0x160] ss:$8 sps:$4 sm:$0xff]  }
 0x325   :  { %5048 = vmatmul.mubr.bf16.vlgmr.msra.gmra.mxu1 %v7581_v15  ;;  %v6975_v15 = vld [vmem:[#allocation8 + $0x688] ss:$16 sps:$4 sm:$0xff]  }
 0x326   :  { %5098 = vmatpush1.bf16.msra.mxu1 %v6966_v47  ;;  %5129 = vmatprep.mubr.bf16.mxu1 %v7615_v5  ;;  %v7047_v5 = vld [vmem:[#allocation11 + $0xc0] ss:$8 sps:$4 sm:$0xff]   ;;  %v7070_v47 = vld [vmem:[#allocation11 + $0x154] ss:$8 sps:$4 sm:$0xff]  }
 0x327   :  { %5099 = vmatprep.subr.bf16.mxu1 %v6971_v51  ;;  %5563 = vmatpush2.bf16.msra.mxu0 %v7038_v16  ;;  %v7068_v51 = vld [vmem:[#allocation11 + $0x150] ss:$8 sps:$4 sm:$0xff]   ;;  %v7073_v16 = vld [vmem:[#allocation11 + $0x144] ss:$8 sps:$4 sm:$0xff]  }
 0x328   :  { %5564 = vmatprep.subr.bf16.mxu0 %v7043_v32  ;;  %v7071_v32 = vld [vmem:[#allocation11 + $0x140] ss:$8 sps:$4 sm:$0xff]  }
 0x32a   :  { %5100 = vmatpush1.bf16.msra.mxu1 %v6969_v35  ;;  %v7076_v35 = vld [vmem:[#allocation11 + $0x134] ss:$8 sps:$4 sm:$0xff]  }
 0x32b   :  { %5101 = vmatprep.subr.bf16.mxu1 %v6974_v37  ;;  %5565 = vmatpush2.bf16.msra.mxu0 %v7041_v38  ;;  %v7074_v37 = vld [vmem:[#allocation11 + $0x130] ss:$8 sps:$4 sm:$0xff]   ;;  %v7077_v38 = vld [vmem:[#allocation11 + $0x120] ss:$8 sps:$4 sm:$0xff]  }
 0x32c   :  { %5566 = vmatprep.subr.bf16.mxu0 %v7046_v39  ;;  %v7082_v39 = vld [vmem:[#allocation11 + $0x114] ss:$8 sps:$4 sm:$0xff]  }
 0x32e   :  { %5102 = vmatpush1.bf16.msra.mxu1 %v6972_v40  ;;  %v7080_v40 = vld [vmem:[#allocation11 + $0x110] ss:$8 sps:$4 sm:$0xff]  }
 0x32f   :  { %5103 = vmatprep.subr.bf16.mxu1 %v6977_v25  ;;  %5567 = vmatpush2.bf16.msra.mxu0 %v7044_v21  ;;  %v7085_v25 = vld [vmem:[#allocation11 + $0x104] ss:$8 sps:$4 sm:$0xff]  }
 0x330   :  { %5568 = vmatprep.subr.bf16.mxu0 %v7049_v42  ;;  %v7083_v42 = vld [vmem:[#allocation11 + $0x100] ss:$8 sps:$4 sm:$0xff]  }
 0x332   :  { %5104 = vmatpush1.bf16.msra.mxu1 %v6975_v15  ;;  %v7088_v15 = vld [vmem:[#allocation11 + $0x1f4] ss:$8 sps:$4 sm:$0xff]  }
 0x333   :  { %5105 = vmatprep.subr.bf16.mxu1 %v6980_v43  ;;  %5569 = vmatpush2.bf16.msra.mxu0 %v7047_v5 }
 0x334   :  { %5570 = vmatprep.subr.bf16.mxu0 %v7052_v45  ;;  %v7086_v45 = vld [vmem:[#allocation11 + $0x1f0] ss:$8 sps:$4 sm:$0xff]  }
 0x336   :  { %5106 = vmatpush1.bf16.msra.mxu1 %v6978_v46  ;;  %v7091_v46 = vld [vmem:[#allocation11 + $0x1e4] ss:$8 sps:$4 sm:$0xff]  }
 0x337   :  { %5107 = vmatprep.subr.bf16.mxu1 %v6983_v30  ;;  %5571 = vmatpush2.bf16.msra.mxu0 %v7050_v58  ;;  %v7089_v58 = vld [vmem:[#allocation11 + $0x1e0] ss:$8 sps:$4 sm:$0xff]  }
 0x338   :  { %5572 = vmatprep.subr.bf16.mxu0 %v7055_v48  ;;  %v7094_v48 = vld [vmem:[#allocation11 + $0x1d4] ss:$8 sps:$4 sm:$0xff]  }
 0x33a   :  { %5108 = vmatpush1.bf16.msra.mxu1 %v6981_v49  ;;  %v7092_v49 = vld [vmem:[#allocation11 + $0x1d0] ss:$8 sps:$4 sm:$0xff]  }
 0x33b   :  { %5109 = vmatprep.subr.bf16.mxu1 %v6986_v52  ;;  %5573 = vmatpush2.bf16.msra.mxu0 %v7053_v41  ;;  %v7097_v52 = vld [vmem:[#allocation11 + $0x1c4] ss:$8 sps:$4 sm:$0xff]   ;;  %v7095_v41 = vld [vmem:[#allocation11 + $0x1c0] ss:$8 sps:$4 sm:$0xff]  }
 0x33c   :  { %5574 = vmatprep.subr.bf16.mxu0 %v7058_v56  ;;  %v7100_v56 = vld [vmem:[#allocation11 + $0x1b4] ss:$8 sps:$4 sm:$0xff]  }
 0x33e   :  { %5110 = vmatpush1.bf16.msra.mxu1 %v6984_v60  ;;  %v7098_v60 = vld [vmem:[#allocation11 + $0x1b0] ss:$8 sps:$4 sm:$0xff]  }
 0x33f   :  { %5111 = vmatprep.subr.bf16.mxu1 %v6989_v61  ;;  %5575 = vmatpush2.bf16.msra.mxu0 %v7056_v18  ;;  %v7103_v61 = vld [vmem:[#allocation11 + $0x1a4] ss:$8 sps:$4 sm:$0xff]   ;;  %v7101_v18 = vld [vmem:[#allocation11 + $0x1a0] ss:$8 sps:$4 sm:$0xff]  }
 0x340   :  { %5576 = vmatprep.subr.bf16.mxu0 %v7061_v63 }
 0x342   :  { %5112 = vmatpush1.bf16.msra.mxu1 %v6987_v24 }
 0x343   :  { %5113 = vmatprep.subr.bf16.mxu1 %v6992_v0  ;;  %5577 = vmatpush2.bf16.msra.mxu0 %v7059_v2  ;;  %v7106_v2 = vld [vmem:[#allocation11 + $0x194] ss:$8 sps:$4 sm:$0xff]  }
 0x345   :  { %v4926_v11 = vpop.f32.mrf.mxu0 }
 0x346   :  { %5114 = vmatpush2.bf16.msra.mxu1 %v6990_v4  ;;  %v7642_v33 = vadd.f32 %v4926_v11, %v7635_v34  ;;  %v7007_v34 = vld [vmem:[#allocation8 + $0x74c] ss:$16 sps:$4 sm:$0xff]  }
 0x347   :  { %5115 = vmatprep.subr.bf16.mxu1 %v6995_v6  ;;  %v4928_v31 = vpop.f32.mrf.mxu0 }
 0x348   :  { %v7645_v13 = vadd.f32 %v4928_v31, %v7637_v22  ;;  %v7008_v22 = vld [vmem:[#allocation8 + $0x728] ss:$16 sps:$4 sm:$0xff]  }
 0x349   :  { %v4930_v23 = vpop.f32.mrf.mxu0 }
 0x34a   :  { %5116 = vmatpush2.bf16.msra.mxu1 %v6993_v9  ;;  %v7104_v9 = vld [vmem:[#allocation11 + $0x190] ss:$8 sps:$4 sm:$0xff]   ;;  %v7109_v23 = vld [vmem:[#allocation11 + $0x184] ss:$8 sps:$4 sm:$0xff]  }
 0x34b   :  { %5117 = vmatprep.subr.bf16.mxu1 %v6998_v12  ;;  %v4931_v29 = vpop.f32.mrf.mxu0 }
 0x34c   :  { %v7107_v29 = vld [vmem:[#allocation11 + $0x180] ss:$8 sps:$4 sm:$0xff]  }
 0x34e   :  { %5118 = vmatpush2.bf16.msra.mxu1 %v6996_v14 }
 0x34f   :  { %5119 = vmatprep.subr.bf16.mxu1 %v7001_v57 }
 0x352   :  { %5120 = vmatpush2.bf16.msra.mxu1 %v6999_v17 }
 0x353   :  { %5121 = vmatprep.subr.bf16.mxu1 %v7004_v28 }
 0x356   :  { %5122 = vmatpush2.bf16.msra.mxu1 %v7002_v50 }
 0x357   :  { %5123 = vmatprep.subr.bf16.mxu1 %v7007_v34 }
 0x35a   :  { %5124 = vmatpush2.bf16.msra.mxu1 %v7005_v59  ;;  %v3521_v59 = vrot.slane %v7627_v1, %v554_v20  ;;  %v7113_v20 = vld [vmem:[#allocation14 + $0x30] sm:$0xff]  }
 0x35b   :  { %5125 = vmatprep.subr.bf16.mxu1 %v7010_v3  ;;  %v3525_v3 = vrot.slane %v7627_v1, %v558_v19  ;;  %v7115_v19 = vld [vmem:[#allocation14 + $0x28] sm:$0xff]   ;;  %v7116_v1 = vld [vmem:[#allocation14 + $0x60] sm:$0xff]  }
 0x35e   :  { %5126 = vmatpush2.bf16.msra.mxu1 %v7008_v22 }
 0x35f   :  { %5127 = vmatprep.subr.bf16.mxu1 %v7013_v26 }
 0x362   :  { %5128 = vmatpush2.bf16.msra.mxu1 %v7011_v54 }
 0x363   :  { %5587 = vmatprep.subr.bf16.mxu1 %v7064_v10 }
 0x365   :  { %5130 = vmatmul.mubr.bf16.vlgmr.msra.gmra.mxu1 %v7617_v7  ;;  %v7079_v7 = vld [vmem:[#allocation11 + $0x124] ss:$8 sps:$4 sm:$0xff]  }
 0x366   :  { %5588 = vmatpush1.bf16.msra.mxu1 %v7062_v8 }
 0x367   :  { %5589 = vmatprep.subr.bf16.mxu1 %v7067_v27 }
 0x36a   :  { %5590 = vmatpush1.bf16.msra.mxu1 %v7065_v53 }
 0x36b   :  { %5591 = vmatprep.subr.bf16.mxu1 %v7070_v47 }
 0x36e   :  { %5592 = vmatpush1.bf16.msra.mxu1 %v7068_v51 }
 0x36f   :  { %5593 = vmatprep.subr.bf16.mxu1 %v7073_v16 }
 0x372   :  { %5594 = vmatpush1.bf16.msra.mxu1 %v7071_v32  ;;  %v7110_v32 = vld [vmem:[#allocation14 + $0x78] sm:$0xff]  }
 0x373   :  { %5595 = vmatprep.subr.bf16.mxu1 %v7076_v35  ;;  %v7111_v35 = vld [vmem:[#allocation14 + $0x38] sm:$0xff]   ;;  %6582 = vmatprep.subr.bf16.mxu0 %v7110_v32 }
 0x376   :  { %5596 = vmatpush1.bf16.msra.mxu1 %v7074_v37  ;;  %v7112_v37 = vld [vmem:[#allocation14 + $0x70] sm:$0xff]  }
 0x377   :  { %5597 = vmatprep.subr.bf16.mxu1 %v7079_v7  ;;  %v7117_v7 = vld [vmem:[#allocation14 + $0x20] sm:$0xff]  }
 0x37a   :  { %5598 = vmatpush1.bf16.msra.mxu1 %v7077_v38  ;;  %v7118_v38 = vld [vmem:[#allocation14 + $0x58] sm:$0xff]  }
 0x37b   :  { %5599 = vmatprep.subr.bf16.mxu1 %v7082_v39  ;;  %v7119_v39 = vld [vmem:[#allocation14 + $0x18] sm:$0xff]  }
 0x37e   :  { %5600 = vmatpush1.bf16.msra.mxu1 %v7080_v40 }
 0x37f   :  { %5601 = vmatprep.subr.bf16.mxu1 %v7085_v25 }
 0x382   :  { %5602 = vmatpush1.bf16.msra.mxu1 %v7083_v42 }
 0x383   :  { %5603 = vmatprep.subr.bf16.mxu1 %v7088_v15 }
 0x385   :  { %v5008_v21 = vpop.f32.mrf.mxu0 }
 0x386   :  { %5604 = vmatpush2.bf16.msra.mxu1 %v7086_v45  ;;  %v5009_v22 = vadd.f32 %v5008_v21, %v3521_v59 }
 0x387   :  { %v5010_v43 = vpop.f32.mrf.mxu0  ;;  %5605 = vmatprep.subr.bf16.mxu1 %v7091_v46 }
 0x388   :  { %v5011_v54 = vadd.f32 %v5010_v43, %v3525_v3  ;;  %v6565_v3 = vld [vmem:[#allocation16] ss:$0 sm:$0xff] }
 0x389   :  { %v5012_v5 = vpop.f32.mrf.mxu0 }
 0x38a   :  { %5606 = vmatpush2.bf16.msra.mxu1 %v7089_v58 }
 0x38b   :  { %v5013_v30 = vpop.f32.mrf.mxu0  ;;  %5607 = vmatprep.subr.bf16.mxu1 %v7094_v48 }
 0x38e   :  { %5608 = vmatpush2.bf16.msra.mxu1 %v7092_v49  ;;  %v7120_v49 = vld [vmem:[#allocation14 + $0x50] sm:$0xff]  }
 0x38f   :  { %5609 = vmatprep.subr.bf16.mxu1 %v7097_v52  ;;  %v7121_v52 = vld [vmem:[#allocation14 + $0x10] sm:$0xff]  }
 0x392   :  { %5610 = vmatpush2.bf16.msra.mxu1 %v7095_v41 }
 0x393   :  { %5611 = vmatprep.subr.bf16.mxu1 %v7100_v56 }
 0x396   :  { %5612 = vmatpush2.bf16.msra.mxu1 %v7098_v60  ;;  %v7122_v60 = vld [vmem:[#allocation14 + $0x48] sm:$0xff]  }
 0x397   :  { %5613 = vmatprep.subr.bf16.mxu1 %v7103_v61  ;;  %v7123_v61 = vld [vmem:[#allocation14 + $0x8] sm:$0xff]  }
 0x39a   :  { %5614 = vmatpush2.bf16.msra.mxu1 %v7101_v18 }
 0x39b   :  { %5615 = vmatprep.subr.bf16.mxu1 %v7106_v2  ;;  %v5214_v2 = vld [vmem:[#allocation13] sm:$0x3] }
 0x39e   :  { %5616 = vmatpush2.bf16.msra.mxu1 %v7104_v9 }
 0x39f   :  { %5617 = vmatprep.subr.bf16.mxu1 %v7109_v23 }
 0x3a2   :  { %5618 = vmatpush2.bf16.msra.mxu1 %v7107_v29 }
 0x3a5   :  { %v4967_v63 = vpop.f32.mrf.mxu1 }
 0x3a6   :  { %v4968_v24 = vadd.f32 %v4967_v63, %v7642_v33 }
 0x3a7   :  { %v4969_v0 = vpop.f32.mrf.mxu1 }
 0x3a8   :  { %v5138_v4 = vmul.f32 0.2, %v4968_v24  ;;  %v4970_v6 = vadd.f32 %v4969_v0, %v7645_v13  ;;  %v7125_v0 = vld [vmem:[#allocation14] sm:$0xff]  }
 0x3a9   :  { %v4971_v11 = vpop.f32.mrf.mxu1 }
 0x3aa   :  { %v5139_v12 = vmul.f32 0.2, %v4970_v6  ;;  %v5142_v31 = vmax.f32 %v4968_v24, %v5138_v4  ;;  %v7124_v24 = vld [vmem:[#allocation14 + $0x40] sm:$0xff]   ;;  %v5219_v4 = vrot.slane %v5214_v2, %v7496_v55  ;;  %v5810_v55 = vand.u32 127, %v544_v36 }
 0x3ab   :  { %v4972_v14 = vpop.f32.mrf.mxu1 }
 0x3ac   :  { %v5143_v57 = vmax.f32 %v4970_v6, %v5139_v12  ;;  %v5146_v33 = vpack.c.bf16 %v5142_v31, %v5142_v31  ;;  %v5223_v6 = vrot.slane %v5214_v2, %v7501_v62  ;;  %vm5811_vm1 = vcmp.lt.s32.totalorder %v5810_v55, 10 }
 0x3ae   :  { %v5147_v17 = vpack.c.bf16 %v5143_v57, %v5143_v57 }
 0x3b0   :  { %5578 = vmatprep.mubr.bf16.mxu0 %v5147_v17 }
 0x3b1   :  { %5579 = vmatmul.mubr.bf16.vlgmr.msra.gmra.mxu0 %v5146_v33 }
 0x3b2   :  { %6583 = vmatpush3.bf16.msra.mxu0 %v7111_v35 }
 0x3b3   :  { %6584 = vmatprep.subr.bf16.mxu0 %v7112_v37 }
 0x3b6   :  { %6585 = vmatpush3.bf16.msra.mxu0 %v7113_v20 }
 0x3b7   :  { %6586 = vmatprep.subr.bf16.mxu0 %v7114_v44 }
 0x3ba   :  { %6587 = vmatpush3.bf16.msra.mxu0 %v7115_v19 }
 0x3bb   :  { %6588 = vmatprep.subr.bf16.mxu0 %v7116_v1 }
 0x3be   :  { %6589 = vmatpush3.bf16.msra.mxu0 %v7117_v7 }
 0x3bf   :  { %6590 = vmatprep.subr.bf16.mxu0 %v7118_v38 }
 0x3c2   :  { %6591 = vmatpush3.bf16.msra.mxu0 %v7119_v39 }
 0x3c3   :  { %6592 = vmatprep.subr.bf16.mxu0 %v7120_v49 }
 0x3c6   :  { %v5090_v28 = vpop.f32.mrf.mxu0  ;;  %6593 = vmatpush3.bf16.msra.mxu0 %v7121_v52 }
 0x3c7   :  { %6594 = vmatprep.subr.bf16.mxu0 %v7122_v60 }
 0x3c8   :  { %v5092_v50 = vpop.f32.mrf.mxu0 }
 0x3ca   :  { %v5094_v34 = vpop.f32.mrf.mxu0  ;;  %6595 = vmatpush3.bf16.msra.mxu0 %v7123_v61 }
 0x3cb   :  { %6596 = vmatprep.subr.bf16.mxu0 %v7124_v24 }
 0x3cc   :  { %v5095_v13 = vpop.f32.mrf.mxu0 }
 0x3ce   :  { %6597 = vmatpush3.bf16.msra.mxu0 %v7125_v0 }
 0x3e5   :  { %v5049_v26 = vpop.f32.mrf.mxu1 }
 0x3e6   :  { %v5050_v8 = vadd.f32 %v5049_v26, %v5009_v22 }
 0x3e7   :  { %v5051_v10 = vpop.f32.mrf.mxu1 }
 0x3e8   :  { %v5052_v27 = vadd.f32 %v5051_v10, %v5011_v54  ;;  %v5091_v53 = vadd.f32 %v5090_v28, %v5050_v8 }
 0x3e9   :  { %v5053_v47 = vpop.f32.mrf.mxu1 }
 0x3ea   :  { %v5093_v51 = vadd.f32 %v5092_v50, %v5052_v27 }
 0x3eb   :  { %v5054_v16 = vpop.f32.mrf.mxu1 }
 0x425   :  { %v5131_v40 = vpop.f32.mrf.mxu1 }
 0x426   :  { %v5132_v25 = vadd.f32 %v5131_v40, %v5091_v53 }
 0x427   :  { %v5133_v21 = vpop.f32.mrf.mxu1 }
 0x428   :  { %v5140_v42 = vmul.f32 0.2, %v5132_v25  ;;  %v5134_v15 = vadd.f32 %v5133_v21, %v5093_v51 }
 0x429   :  { %v5135_v43 = vpop.f32.mrf.mxu1 }
 0x42a   :  { %v5141_v5 = vmul.f32 0.2, %v5134_v15  ;;  %v5144_v45 = vmax.f32 %v5132_v25, %v5140_v42 }
 0x42b   :  { %v5136_v46 = vpop.f32.mrf.mxu1 }
 0x42c   :  { %v5145_v30 = vmax.f32 %v5134_v15, %v5141_v5  ;;  %v5148_v48 = vpack.c.bf16 %v5144_v45, %v5144_v45 }
 0x42e   :  { %v5149_v58 = vpack.c.bf16 %v5145_v30, %v5145_v30 }
 0x430   :  { %5619 = vmatprep.mubr.bf16.mxu1 %v5149_v58 }
 0x431   :  { %5620 = vmatmul.mubr.bf16.vlgmr.msra.gmra.mxu1 %v5148_v48 }
 0x471   :  { %v5580_v41 = vpop.f32.mrf.mxu0 }
 0x472   :  { %v5581_v9 = vadd.f32 %v5580_v41, %v5219_v4 }
 0x473   :  { %v5582_v56 = vpop.f32.mrf.mxu0 }
 0x474   :  { %v5583_v12 = vadd.f32 %v5582_v56, %v5223_v6 }
 0x475   :  { %v5584_v18 = vpop.f32.mrf.mxu0 }
 0x477   :  { %v5585_v63 = vpop.f32.mrf.mxu0 }
 0x4f1   :  { %v5621_v11 = vpop.f32.mrf.mxu1 }
 0x4f2   :  { %v5622_v31 = vadd.f32 %v5621_v11, %v5581_v9 }
 0x4f3   :  { %v5623_v14 = vpop.f32.mrf.mxu1 }
 0x4f4   :  { %v5628_v23 = vmul.f32 0.2, %v5622_v31  ;;  %v5624_v57 = vadd.f32 %v5623_v14, %v5583_v12 }
 0x4f5   :  { %v5625_v29 = vpop.f32.mrf.mxu1 }
 0x4f6   :  { %v5629_v17 = vmul.f32 0.2, %v5624_v57  ;;  %v5630_v33 = vmax.f32 %v5622_v31, %v5628_v23 }
 0x4f7   :  { %v5626_v28 = vpop.f32.mrf.mxu1 }
 0x4f8   :  { %v5631_v50 = vmax.f32 %v5624_v57, %v5629_v17  ;;  %v5632_v13 = vpack.c.bf16 %v5630_v33, %v5630_v33 }
 0x4fa   :  { %v5633_v34 = vpack.c.bf16 %v5631_v50, %v5631_v50 }
 0x4fc   :  { %5801 = vmatprep.mubr.bf16.mxu0 %v5633_v34 }
 0x4fd   :  { %5802 = vmatmul.mubr.bf16.vlgmr.msra.gmra.mxu0 %v5632_v13 }
 0x5bd   :  { %v6598_v59 = vpop.f32.mrf.mxu0 }
 0x5bf   :  { %v6599_v62 = vpop.f32.mrf.mxu0 }
 0x5c0   :  { %v6600_v22 = vadd.f32 %v6599_v62, %v6598_v59 }
 0x5c1   :  { %v6601_v26 = vpop.f32.mrf.mxu0 }
 0x5c2   :  { %v5804_v54 = vadd.f32 %v6600_v22, %v6565_v3 }
 0x5c3   :  { %v6602_v8 = vpop.f32.mrf.mxu0 }
 0x5c4   :  { %v5812_v10 = vsel %vm5811_vm1, %v5804_v54, -inf }
 0x5c5   :  { %5813 = vmax.xlane.f32.xlu0 %v5812_v10 }
 0x64e   :  { %v5814_v27 = vpop.xlane.xlu0 %5813 }
 0x64f   :  { %v5815_v53 = vsub.f32 %v5812_v10, %v5814_v27 }
 0x651   :  { %v5816_v47 = vmul.f32 1.442695, %v5815_v53 }
 0x653   :  { %7126 = vpow2.f32 %v5816_v47 }
 0x660   :  { %v7127_v51 = vpop.eup %7126 }
 0x661   :  { %5818 = vadd.xlane.f32.xlu0 %v7127_v51 }
 0x6ea   :  { %v5819_v16 = vpop.xlane.xlu0 %5818 }
 0x6eb   :  { %7128 = vrcp.f32 %v5819_v16 }
 0x6f8   :  { %v7129_v36 = vpop.eup %7128 }
 0x6f9   :  { %v5821_v32 = vmul.f32 %v7129_v36, %v7127_v51 }
 0x6fb   :  { %5822 = vst [vmem:[#allocation17] sm:$0xff] %v5821_v32 }
 0x6fc   :  { %7324 = shalt.err (!%p7321_p7)
}
 0x6fd   :  { %5832 = dma.vmem_to_hbm [thread:$0]  %s5830_s8, 128, %s7671_s9, [#allocation4]  }
 0x6fe   :  { %7343 = dma.done.wait [#allocation4], 128  }
 0x6ff   :  { %7344 = vsyncadd [#allocation4], 4294967168 }
 0x700   :  { %5836 = vsyncpa [#allocation3], 1 }
 0x701   :  { %5837 = vsyncpa [#allocation6], 1 }
 0x702   :  { %5838 = vsyncpa [#allocation9], 1 }
 0x703   :  { %5839 = vsyncpa [#allocation12], 1 }
 0x704   :  { %5840 = vsyncpa [#allocation15], 1 }
 0x705   :  { %5841 = vsyncpa [#allocation4], 1 }

</bundles_post_ra>
